<compile_context>
chip_gen: v6e
topology: v6e:2x2x1
jax: 0.10.0
libtpu: 0.0.40
codegen_flags: <defaults>
</compile_context>

<pallas_src>
import functools
import math

import jax
import jax.numpy as jnp
from jax import lax
from jax.experimental import pallas as pl
from jax.experimental.pallas import tpu as pltpu


def _population_mlp_kernel(x_ref, w0t_ref, b0_ref, w1_ref, b1_ref, o_ref,
                           w1bd_ref, *, gb, hidden, action):
    """One grid step: evaluate `gb` genomes' 2-layer MLPs on the shared batch.

    x_ref   : (B, S)               shared observations (grid-resident)
    w0t_ref : (S, gb*H)            dense0 weights, pre-transposed (in, out)
    b0_ref  : (n_blocks, gb*H)     dense0 biases, f32 (grid-resident)
    w1_ref  : (gb, A, H)           dense1 weights, PyTorch (out, in)
    b1_ref  : (n_blocks, gb*A)     dense1 biases, f32 (grid-resident)
    o_ref   : (B, gb*A)            lane-dense f32 output slab
    w1bd_ref: (gb*A, gb*H) scratch block-diagonal dense1 weights
    """
    g0 = pl.program_id(0)

    # ---- layer 0: one stacked canonical (K,N) matmul for all gb genomes ----
    h = jnp.dot(x_ref[...], w0t_ref[...],
                preferred_element_type=jnp.float32,
                precision=lax.Precision.HIGHEST)                  # (B, gb*H) f32
    h = jnp.maximum(h + b0_ref[pl.ds(g0, 1), :], 0.0)             # f32 bias + ReLU

    # ---- layer 1: single block-diagonal MXU matmul ----
    # Zero unconditionally (NOT under pl.when(program_id==0)): with "parallel"
    # semantics the grid may be sharded across TensorCores and not every core
    # executes step 0.  Off-diagonal zeros persist; the diagonal is refreshed
    # with this step's genome weights via tile-aligned (A, H) vreg stores.
    w1bd_ref[...] = jnp.zeros_like(w1bd_ref)
    for g in range(gb):                                           # static unroll
        w1bd_ref[g * action:(g + 1) * action,
                 g * hidden:(g + 1) * hidden] = w1_ref[g]

    y = lax.dot_general(
        h.astype(w1bd_ref.dtype), w1bd_ref[...],
        dimension_numbers=(((1,), (1,)), ((), ())),               # (B,K) @ (N,K)^T
        preferred_element_type=jnp.float32,
        precision=lax.Precision.HIGHEST)                          # (B, gb*A) f32

    o_ref[...] = (y + b1_ref[pl.ds(g0, 1), :]).astype(o_ref.dtype)


def _choose_genome_block(population, state_obs, hidden, action, itemsize,
                         budget_bytes=20 << 20, prefer_min_blocks=2):
    """Largest genome block whose output width is a multiple of 128 lanes and
    whose double-buffered weights + block-diag scratch fit a conservative VMEM
    budget; prefer >=2 blocks so v7x's two TensorCores both get work."""
    base = 128 // math.gcd(128, action)
    if base > population or population % base != 0:
        return population  # fallback: single block (output = full array width)

    def est(gb):
        w0_blk = state_obs * gb * hidden * itemsize
        w1_blk = gb * action * hidden * itemsize
        scratch = (gb * action) * (gb * hidden) * itemsize
        return 2 * (w0_blk + w1_blk) + scratch

    cands = [g for g in range(base, population + 1, base)
             if population % g == 0 and est(g) <= budget_bytes]
    if not cands:
        return base
    multi = [g for g in cands if population // g >= prefer_min_blocks]
    return max(multi) if multi else max(cands)


def action_approximation_population(x, W0, b0, W1, b1, *,
                                    weight_dtype=jnp.bfloat16,
                                    genomes_per_block=None):
    """Evaluate a whole EA population of ActionApproximation nets in one call.

    Args:
      x : (B, S) float32 observations (shared across genomes)
      W0: (G, H, S) float32  per-genome dense0.weight, PyTorch (out, in)
      b0: (G, H)   float32
      W1: (G, A, H) float32  per-genome dense1.weight, PyTorch (out, in)
      b1: (G, A)   float32
      weight_dtype: dtype weights/activations are streamed in (bf16 halves the
        dominant HBM traffic; accumulation + epilogue stay f32).
    Returns:
      (G, B, A) float32 action values per genome.
    """
    B, S = x.shape
    G, H, _ = W0.shape
    A = W1.shape[1]

    itemsize = jnp.dtype(weight_dtype).itemsize
    gb = genomes_per_block or _choose_genome_block(G, S, H, A, itemsize)
    assert G % gb == 0, "population must be divisible by the genome block"
    n_blocks = G // gb

    # One-shot wrapper-side layout plumbing (cheap XLA ops, outside the kernel):
    #  * dense0 weights -> (S, G*H) so the layer-0 matmul is canonical (K,N).
    #  * biases stay f32 and are reshaped per-block so they can sit
    #    grid-resident in VMEM (no per-step tiny DMAs).
    w0t = jnp.transpose(W0.reshape(G * H, S).astype(weight_dtype))   # (S, G*H)
    w1c = W1.astype(weight_dtype)                                    # (G, A, H)
    b0_blocks = b0.reshape(n_blocks, gb * H).astype(jnp.float32)
    b1_blocks = b1.reshape(n_blocks, gb * A).astype(jnp.float32)
    x_c = x.astype(weight_dtype)

    kernel = functools.partial(_population_mlp_kernel,
                               gb=gb, hidden=H, action=A)

    out_flat = pl.pallas_call(
        kernel,
        out_shape=jax.ShapeDtypeStruct((B, G * A), jnp.float32),
        grid_spec=pltpu.PrefetchScalarGridSpec(
            num_scalar_prefetch=0,
            grid=(n_blocks,),
            in_specs=[
                pl.BlockSpec((B, S), lambda g: (0, 0)),               # x (resident)
                pl.BlockSpec((S, gb * H), lambda g: (0, g)),          # W0^T block
                pl.BlockSpec((n_blocks, gb * H), lambda g: (0, 0)),   # b0 (resident)
                pl.BlockSpec((gb, A, H), lambda g: (g, 0, 0)),        # W1 block
                pl.BlockSpec((n_blocks, gb * A), lambda g: (0, 0)),   # b1 (resident)
            ],
            out_specs=pl.BlockSpec((B, gb * A), lambda g: (0, g)),    # lane-dense
            scratch_shapes=[pltpu.VMEM((gb * A, gb * H), weight_dtype)],
        ),
        compiler_params=pltpu.CompilerParams(
            # Genome blocks are independent -> shard across v7x's 2 TCs.
            dimension_semantics=("parallel",),
            vmem_limit_bytes=48 * 1024 * 1024),
    )(x_c, w0t, b0_blocks, w1c, b1_blocks)

    # Cheap layout plumbing outside the kernel: (B, G*A) -> (G, B, A).
    return jnp.transpose(out_flat.reshape(B, G, A), (1, 0, 2))


def action_approximation(x, w0, b0, w1, b1, *, weight_dtype=jnp.float32):
    """Single-module forward, identical to the PyTorch module's forward.

    x: (B, S); w0: (H, S); b0: (H,); w1: (A, H); b1: (A,)  (PyTorch layouts)
    Returns (B, A).
    """
    out = action_approximation_population(
        x, w0[None], b0[None], w1[None], b1[None], weight_dtype=weight_dtype)
    return out[0]


def _reference_single(x, w0, b0, w1, b1):
    h = jnp.maximum(
        jnp.dot(x, w0.T, precision=lax.Precision.HIGHEST) + b0, 0.0)
    return jnp.dot(h, w1.T, precision=lax.Precision.HIGHEST) + b1


def _reference_population(x, W0, b0, W1, b1):
    return jax.vmap(
        lambda w0, bb0, w1, bb1: _reference_single(x, w0, bb0, w1, bb1)
    )(W0, b0, W1, b1)


if __name__ == "__main__":
    # Module hyper-parameters (small, consistent with the forward pass).
    state_obs, hidden, action = 16, 128, 8
    batch, population = 8, 64

    key = jax.random.PRNGKey(0)
    kx, kw, kb0, kb1 = jax.random.split(key, 4)

    # EA genomes: flat weight vector per genome, split/reshaped exactly like the
    # module's __init__ (dense0.weight first, then dense1.weight, row-major).
    n_flat = hidden * state_obs + action * hidden
    genomes = jax.random.normal(kw, (population, n_flat), dtype=jnp.float32) * 0.1
    W0 = genomes[:, : hidden * state_obs].reshape(population, hidden, state_obs)
    W1 = genomes[:, hidden * state_obs:].reshape(population, action, hidden)
    b0 = jax.random.normal(kb0, (population, hidden), dtype=jnp.float32) * 0.01
    b1 = jax.random.normal(kb1, (population, action), dtype=jnp.float32) * 0.01
    x = jax.random.normal(kx, (batch, state_obs), dtype=jnp.float32)

    ref_pop = _reference_population(x, W0, b0, W1, b1)

    # f32 path: matches the PyTorch module semantics.
    out_f32 = jax.block_until_ready(action_approximation_population(
        x, W0, b0, W1, b1, weight_dtype=jnp.float32))
    assert out_f32.shape == (population, batch, action)
    assert jnp.allclose(out_f32, ref_pop, atol=5e-3, rtol=5e-3), \
        "f32 population mismatch vs reference"

    # bf16 weight-streaming path (halves HBM weight traffic; f32 accumulation
    # and f32 epilogue) -> looser tolerance per bf16 rounding.
    out_bf16 = jax.block_until_ready(action_approximation_population(
        x, W0, b0, W1, b1, weight_dtype=jnp.bfloat16))
    assert out_bf16.shape == (population, batch, action)
    assert jnp.allclose(out_bf16, ref_pop, atol=5e-2, rtol=5e-2), \
        "bf16 population mismatch vs reference"

    # Single-module path: the G=1 special case of the population kernel.
    out_one = jax.block_until_ready(action_approximation(
        x, W0[3], b0[3], W1[3], b1[3]))
    ref_one = _reference_single(x, W0[3], b0[3], W1[3], b1[3])
    assert out_one.shape == (batch, action)
    assert jnp.allclose(out_one, ref_one, atol=5e-3, rtol=5e-3), \
        "single-genome mismatch vs reference"

    # TODO(synk): for very large populations, gb could additionally be tuned
    # per-chip (v5e HBM BW vs v7x 64 MiB VMEM) via pltpu.get_tpu_info().
    print("KERNEL_OK")
</pallas_src>

<mosaic_0001>
module attributes {stable_mosaic.version = 11 : i64} {
  func.func @_population_mlp_kernel(%arg0: i32, %arg1: memref<8x16xf32, #tpu.memory_space<vmem>>, %arg2: memref<16x4096xf32, #tpu.memory_space<vmem>>, %arg3: memref<2x4096xf32, #tpu.memory_space<vmem>>, %arg4: memref<32x8x128xf32, #tpu.memory_space<vmem>>, %arg5: memref<2x256xf32, #tpu.memory_space<vmem>>, %arg6: memref<8x256xf32, #tpu.memory_space<vmem>>, %arg7: memref<256x4096xf32, #tpu.memory_space<vmem>>) attributes {dimension_semantics = [#tpu.dimension_semantics<parallel>], iteration_bounds = array<i64: 2>, scalar_prefetch = 0 : i64, scratch_operands = 1 : i64, tpu.core_type = #tpu.core_type<tc>, window_params = [{pipeline_mode = #tpu.pipeline_mode<synchronous>, transform_indices = @transform_0, window_bounds = array<i64: 8, 16>}, {transform_indices = @transform_1, window_bounds = array<i64: 16, 4096>}, {pipeline_mode = #tpu.pipeline_mode<synchronous>, transform_indices = @transform_2, window_bounds = array<i64: 2, 4096>}, {transform_indices = @transform_3, window_bounds = array<i64: 32, 8, 128>}, {pipeline_mode = #tpu.pipeline_mode<synchronous>, transform_indices = @transform_4, window_bounds = array<i64: 2, 256>}, {transform_indices = @transform_5, window_bounds = array<i64: 8, 256>}]} {
    %c0 = arith.constant 0 : index
    %c0_0 = arith.constant 0 : index
    %0 = vector.load %arg1[%c0, %c0_0] : memref<8x16xf32, #tpu.memory_space<vmem>>, vector<8x16xf32>
    %c0_1 = arith.constant 0 : index
    %c0_2 = arith.constant 0 : index
    %1 = vector.load %arg2[%c0_1, %c0_2] : memref<16x4096xf32, #tpu.memory_space<vmem>>, vector<16x4096xf32>
    %cst = arith.constant dense<0.000000e+00> : vector<8x4096xf32>
    %2 = tpu.matmul %0, %1, %cst {dimension_numbers = #tpu.dot_dimension_numbers<[1], [0], [0], [1], [0, 0, 1, 1], [], []>, precision = #tpu.contract_precision<fp32>} : vector<8x16xf32>, vector<16x4096xf32>, vector<8x4096xf32> -> vector<8x4096xf32>
    %3 = arith.index_cast %arg0 : i32 to index
    %c0_3 = arith.constant 0 : index
    %4 = vector.load %arg3[%3, %c0_3] : memref<2x4096xf32, #tpu.memory_space<vmem>>, vector<1x4096xf32>
    %5 = vector.broadcast %4 : vector<1x4096xf32> to vector<8x4096xf32>
    %6 = arith.addf %2, %5 : vector<8x4096xf32>
    %cst_4 = arith.constant 0.000000e+00 : f32
    %7 = vector.broadcast %cst_4 : f32 to vector<8x4096xf32>
    %8 = arith.maximumf %6, %7 : vector<8x4096xf32>
    %cst_5 = arith.constant 0.000000e+00 : f32
    %9 = vector.broadcast %cst_5 : f32 to vector<256x4096xf32>
    %c0_6 = arith.constant 0 : index
    %c0_7 = arith.constant 0 : index
    %10 = vector.load %arg7[%c0_6, %c0_7] : memref<256x4096xf32, #tpu.memory_space<vmem>>, vector<256x4096xf32>
    tpu.vector_store %arg7[%c0_6, %c0_7], %9 {strides = array<i32>} : memref<256x4096xf32, #tpu.memory_space<vmem>>, vector<256x4096xf32>,
    %c0_8 = arith.constant 0 : index
    %c0_9 = arith.constant 0 : index
    %c0_10 = arith.constant 0 : index
    %11 = vector.load %arg4[%c0_8, %c0_9, %c0_10] : memref<32x8x128xf32, #tpu.memory_space<vmem>>, vector<1x8x128xf32>
    %12 = vector.shape_cast %11 : vector<1x8x128xf32> to vector<8x128xf32>
    %c0_11 = arith.constant 0 : index
    %c0_12 = arith.constant 0 : index
    %13 = vector.load %arg7[%c0_11, %c0_12] : memref<256x4096xf32, #tpu.memory_space<vmem>>, vector<8x128xf32>
    tpu.vector_store %arg7[%c0_11, %c0_12], %12 {strides = array<i32>} : memref<256x4096xf32, #tpu.memory_space<vmem>>, vector<8x128xf32>,
    %c1 = arith.constant 1 : index
    %c0_13 = arith.constant 0 : index
    %c0_14 = arith.constant 0 : index
    %14 = vector.load %arg4[%c1, %c0_13, %c0_14] : memref<32x8x128xf32, #tpu.memory_space<vmem>>, vector<1x8x128xf32>
    %15 = vector.shape_cast %14 : vector<1x8x128xf32> to vector<8x128xf32>
    %c8 = arith.constant 8 : index
    %c128 = arith.constant 128 : index
    %16 = vector.load %arg7[%c8, %c128] : memref<256x4096xf32, #tpu.memory_space<vmem>>, vector<8x128xf32>
    tpu.vector_store %arg7[%c8, %c128], %15 {strides = array<i32>} : memref<256x4096xf32, #tpu.memory_space<vmem>>, vector<8x128xf32>,
    %c2 = arith.constant 2 : index
    %c0_15 = arith.constant 0 : index
    %c0_16 = arith.constant 0 : index
    %17 = vector.load %arg4[%c2, %c0_15, %c0_16] : memref<32x8x128xf32, #tpu.memory_space<vmem>>, vector<1x8x128xf32>
    %18 = vector.shape_cast %17 : vector<1x8x128xf32> to vector<8x128xf32>
    %c16 = arith.constant 16 : index
    %c256 = arith.constant 256 : index
    %19 = vector.load %arg7[%c16, %c256] : memref<256x4096xf32, #tpu.memory_space<vmem>>, vector<8x128xf32>
    tpu.vector_store %arg7[%c16, %c256], %18 {strides = array<i32>} : memref<256x4096xf32, #tpu.memory_space<vmem>>, vector<8x128xf32>,
    %c3 = arith.constant 3 : index
    %c0_17 = arith.constant 0 : index
    %c0_18 = arith.constant 0 : index
    %20 = vector.load %arg4[%c3, %c0_17, %c0_18] : memref<32x8x128xf32, #tpu.memory_space<vmem>>, vector<1x8x128xf32>
    %21 = vector.shape_cast %20 : vector<1x8x128xf32> to vector<8x128xf32>
    %c24 = arith.constant 24 : index
    %c384 = arith.constant 384 : index
    %22 = vector.load %arg7[%c24, %c384] : memref<256x4096xf32, #tpu.memory_space<vmem>>, vector<8x128xf32>
    tpu.vector_store %arg7[%c24, %c384], %21 {strides = array<i32>} : memref<256x4096xf32, #tpu.memory_space<vmem>>, vector<8x128xf32>,
    %c4 = arith.constant 4 : index
    %c0_19 = arith.constant 0 : index
    %c0_20 = arith.constant 0 : index
    %23 = vector.load %arg4[%c4, %c0_19, %c0_20] : memref<32x8x128xf32, #tpu.memory_space<vmem>>, vector<1x8x128xf32>
    %24 = vector.shape_cast %23 : vector<1x8x128xf32> to vector<8x128xf32>
    %c32 = arith.constant 32 : index
    %c512 = arith.constant 512 : index
    %25 = vector.load %arg7[%c32, %c512] : memref<256x4096xf32, #tpu.memory_space<vmem>>, vector<8x128xf32>
    tpu.vector_store %arg7[%c32, %c512], %24 {strides = array<i32>} : memref<256x4096xf32, #tpu.memory_space<vmem>>, vector<8x128xf32>,
    %c5 = arith.constant 5 : index
    %c0_21 = arith.constant 0 : index
    %c0_22 = arith.constant 0 : index
    %26 = vector.load %arg4[%c5, %c0_21, %c0_22] : memref<32x8x128xf32, #tpu.memory_space<vmem>>, vector<1x8x128xf32>
    %27 = vector.shape_cast %26 : vector<1x8x128xf32> to vector<8x128xf32>
    %c40 = arith.constant 40 : index
    %c640 = arith.constant 640 : index
    %28 = vector.load %arg7[%c40, %c640] : memref<256x4096xf32, #tpu.memory_space<vmem>>, vector<8x128xf32>
    tpu.vector_store %arg7[%c40, %c640], %27 {strides = array<i32>} : memref<256x4096xf32, #tpu.memory_space<vmem>>, vector<8x128xf32>,
    %c6 = arith.constant 6 : index
    %c0_23 = arith.constant 0 : index
    %c0_24 = arith.constant 0 : index
    %29 = vector.load %arg4[%c6, %c0_23, %c0_24] : memref<32x8x128xf32, #tpu.memory_space<vmem>>, vector<1x8x128xf32>
    %30 = vector.shape_cast %29 : vector<1x8x128xf32> to vector<8x128xf32>
    %c48 = arith.constant 48 : index
    %c768 = arith.constant 768 : index
    %31 = vector.load %arg7[%c48, %c768] : memref<256x4096xf32, #tpu.memory_space<vmem>>, vector<8x128xf32>
    tpu.vector_store %arg7[%c48, %c768], %30 {strides = array<i32>} : memref<256x4096xf32, #tpu.memory_space<vmem>>, vector<8x128xf32>,
    %c7 = arith.constant 7 : index
    %c0_25 = arith.constant 0 : index
    %c0_26 = arith.constant 0 : index
    %32 = vector.load %arg4[%c7, %c0_25, %c0_26] : memref<32x8x128xf32, #tpu.memory_space<vmem>>, vector<1x8x128xf32>
    %33 = vector.shape_cast %32 : vector<1x8x128xf32> to vector<8x128xf32>
    %c56 = arith.constant 56 : index
    %c896 = arith.constant 896 : index
    %34 = vector.load %arg7[%c56, %c896] : memref<256x4096xf32, #tpu.memory_space<vmem>>, vector<8x128xf32>
    tpu.vector_store %arg7[%c56, %c896], %33 {strides = array<i32>} : memref<256x4096xf32, #tpu.memory_space<vmem>>, vector<8x128xf32>,
    %c8_27 = arith.constant 8 : index
    %c0_28 = arith.constant 0 : index
    %c0_29 = arith.constant 0 : index
    %35 = vector.load %arg4[%c8_27, %c0_28, %c0_29] : memref<32x8x128xf32, #tpu.memory_space<vmem>>, vector<1x8x128xf32>
    %36 = vector.shape_cast %35 : vector<1x8x128xf32> to vector<8x128xf32>
    %c64 = arith.constant 64 : index
    %c1024 = arith.constant 1024 : index
    %37 = vector.load %arg7[%c64, %c1024] : memref<256x4096xf32, #tpu.memory_space<vmem>>, vector<8x128xf32>
    tpu.vector_store %arg7[%c64, %c1024], %36 {strides = array<i32>} : memref<256x4096xf32, #tpu.memory_space<vmem>>, vector<8x128xf32>,
    %c9 = arith.constant 9 : index
    %c0_30 = arith.constant 0 : index
    %c0_31 = arith.constant 0 : index
    %38 = vector.load %arg4[%c9, %c0_30, %c0_31] : memref<32x8x128xf32, #tpu.memory_space<vmem>>, vector<1x8x128xf32>
    %39 = vector.shape_cast %38 : vector<1x8x128xf32> to vector<8x128xf32>
    %c72 = arith.constant 72 : index
    %c1152 = arith.constant 1152 : index
    %40 = vector.load %arg7[%c72, %c1152] : memref<256x4096xf32, #tpu.memory_space<vmem>>, vector<8x128xf32>
    tpu.vector_store %arg7[%c72, %c1152], %39 {strides = array<i32>} : memref<256x4096xf32, #tpu.memory_space<vmem>>, vector<8x128xf32>,
    %c10 = arith.constant 10 : index
    %c0_32 = arith.constant 0 : index
    %c0_33 = arith.constant 0 : index
    %41 = vector.load %arg4[%c10, %c0_32, %c0_33] : memref<32x8x128xf32, #tpu.memory_space<vmem>>, vector<1x8x128xf32>
    %42 = vector.shape_cast %41 : vector<1x8x128xf32> to vector<8x128xf32>
    %c80 = arith.constant 80 : index
    %c1280 = arith.constant 1280 : index
    %43 = vector.load %arg7[%c80, %c1280] : memref<256x4096xf32, #tpu.memory_space<vmem>>, vector<8x128xf32>
    tpu.vector_store %arg7[%c80, %c1280], %42 {strides = array<i32>} : memref<256x4096xf32, #tpu.memory_space<vmem>>, vector<8x128xf32>,
    %c11 = arith.constant 11 : index
    %c0_34 = arith.constant 0 : index
    %c0_35 = arith.constant 0 : index
    %44 = vector.load %arg4[%c11, %c0_34, %c0_35] : memref<32x8x128xf32, #tpu.memory_space<vmem>>, vector<1x8x128xf32>
    %45 = vector.shape_cast %44 : vector<1x8x128xf32> to vector<8x128xf32>
    %c88 = arith.constant 88 : index
    %c1408 = arith.constant 1408 : index
    %46 = vector.load %arg7[%c88, %c1408] : memref<256x4096xf32, #tpu.memory_space<vmem>>, vector<8x128xf32>
    tpu.vector_store %arg7[%c88, %c1408], %45 {strides = array<i32>} : memref<256x4096xf32, #tpu.memory_space<vmem>>, vector<8x128xf32>,
    %c12 = arith.constant 12 : index
    %c0_36 = arith.constant 0 : index
    %c0_37 = arith.constant 0 : index
    %47 = vector.load %arg4[%c12, %c0_36, %c0_37] : memref<32x8x128xf32, #tpu.memory_space<vmem>>, vector<1x8x128xf32>
    %48 = vector.shape_cast %47 : vector<1x8x128xf32> to vector<8x128xf32>
    %c96 = arith.constant 96 : index
    %c1536 = arith.constant 1536 : index
    %49 = vector.load %arg7[%c96, %c1536] : memref<256x4096xf32, #tpu.memory_space<vmem>>, vector<8x128xf32>
    tpu.vector_store %arg7[%c96, %c1536], %48 {strides = array<i32>} : memref<256x4096xf32, #tpu.memory_space<vmem>>, vector<8x128xf32>,
    %c13 = arith.constant 13 : index
    %c0_38 = arith.constant 0 : index
    %c0_39 = arith.constant 0 : index
    %50 = vector.load %arg4[%c13, %c0_38, %c0_39] : memref<32x8x128xf32, #tpu.memory_space<vmem>>, vector<1x8x128xf32>
    %51 = vector.shape_cast %50 : vector<1x8x128xf32> to vector<8x128xf32>
    %c104 = arith.constant 104 : index
    %c1664 = arith.constant 1664 : index
    %52 = vector.load %arg7[%c104, %c1664] : memref<256x4096xf32, #tpu.memory_space<vmem>>, vector<8x128xf32>
    tpu.vector_store %arg7[%c104, %c1664], %51 {strides = array<i32>} : memref<256x4096xf32, #tpu.memory_space<vmem>>, vector<8x128xf32>,
    %c14 = arith.constant 14 : index
    %c0_40 = arith.constant 0 : index
    %c0_41 = arith.constant 0 : index
    %53 = vector.load %arg4[%c14, %c0_40, %c0_41] : memref<32x8x128xf32, #tpu.memory_space<vmem>>, vector<1x8x128xf32>
    %54 = vector.shape_cast %53 : vector<1x8x128xf32> to vector<8x128xf32>
    %c112 = arith.constant 112 : index
    %c1792 = arith.constant 1792 : index
    %55 = vector.load %arg7[%c112, %c1792] : memref<256x4096xf32, #tpu.memory_space<vmem>>, vector<8x128xf32>
    tpu.vector_store %arg7[%c112, %c1792], %54 {strides = array<i32>} : memref<256x4096xf32, #tpu.memory_space<vmem>>, vector<8x128xf32>,
    %c15 = arith.constant 15 : index
    %c0_42 = arith.constant 0 : index
    %c0_43 = arith.constant 0 : index
    %56 = vector.load %arg4[%c15, %c0_42, %c0_43] : memref<32x8x128xf32, #tpu.memory_space<vmem>>, vector<1x8x128xf32>
    %57 = vector.shape_cast %56 : vector<1x8x128xf32> to vector<8x128xf32>
    %c120 = arith.constant 120 : index
    %c1920 = arith.constant 1920 : index
    %58 = vector.load %arg7[%c120, %c1920] : memref<256x4096xf32, #tpu.memory_space<vmem>>, vector<8x128xf32>
    tpu.vector_store %arg7[%c120, %c1920], %57 {strides = array<i32>} : memref<256x4096xf32, #tpu.memory_space<vmem>>, vector<8x128xf32>,
    %c16_44 = arith.constant 16 : index
    %c0_45 = arith.constant 0 : index
    %c0_46 = arith.constant 0 : index
    %59 = vector.load %arg4[%c16_44, %c0_45, %c0_46] : memref<32x8x128xf32, #tpu.memory_space<vmem>>, vector<1x8x128xf32>
    %60 = vector.shape_cast %59 : vector<1x8x128xf32> to vector<8x128xf32>
    %c128_47 = arith.constant 128 : index
    %c2048 = arith.constant 2048 : index
    %61 = vector.load %arg7[%c128_47, %c2048] : memref<256x4096xf32, #tpu.memory_space<vmem>>, vector<8x128xf32>
    tpu.vector_store %arg7[%c128_47, %c2048], %60 {strides = array<i32>} : memref<256x4096xf32, #tpu.memory_space<vmem>>, vector<8x128xf32>,
    %c17 = arith.constant 17 : index
    %c0_48 = arith.constant 0 : index
    %c0_49 = arith.constant 0 : index
    %62 = vector.load %arg4[%c17, %c0_48, %c0_49] : memref<32x8x128xf32, #tpu.memory_space<vmem>>, vector<1x8x128xf32>
    %63 = vector.shape_cast %62 : vector<1x8x128xf32> to vector<8x128xf32>
    %c136 = arith.constant 136 : index
    %c2176 = arith.constant 2176 : index
    %64 = vector.load %arg7[%c136, %c2176] : memref<256x4096xf32, #tpu.memory_space<vmem>>, vector<8x128xf32>
    tpu.vector_store %arg7[%c136, %c2176], %63 {strides = array<i32>} : memref<256x4096xf32, #tpu.memory_space<vmem>>, vector<8x128xf32>,
    %c18 = arith.constant 18 : index
    %c0_50 = arith.constant 0 : index
    %c0_51 = arith.constant 0 : index
    %65 = vector.load %arg4[%c18, %c0_50, %c0_51] : memref<32x8x128xf32, #tpu.memory_space<vmem>>, vector<1x8x128xf32>
    %66 = vector.shape_cast %65 : vector<1x8x128xf32> to vector<8x128xf32>
    %c144 = arith.constant 144 : index
    %c2304 = arith.constant 2304 : index
    %67 = vector.load %arg7[%c144, %c2304] : memref<256x4096xf32, #tpu.memory_space<vmem>>, vector<8x128xf32>
    tpu.vector_store %arg7[%c144, %c2304], %66 {strides = array<i32>} : memref<256x4096xf32, #tpu.memory_space<vmem>>, vector<8x128xf32>,
    %c19 = arith.constant 19 : index
    %c0_52 = arith.constant 0 : index
    %c0_53 = arith.constant 0 : index
    %68 = vector.load %arg4[%c19, %c0_52, %c0_53] : memref<32x8x128xf32, #tpu.memory_space<vmem>>, vector<1x8x128xf32>
    %69 = vector.shape_cast %68 : vector<1x8x128xf32> to vector<8x128xf32>
    %c152 = arith.constant 152 : index
    %c2432 = arith.constant 2432 : index
    %70 = vector.load %arg7[%c152, %c2432] : memref<256x4096xf32, #tpu.memory_space<vmem>>, vector<8x128xf32>
    tpu.vector_store %arg7[%c152, %c2432], %69 {strides = array<i32>} : memref<256x4096xf32, #tpu.memory_space<vmem>>, vector<8x128xf32>,
    %c20 = arith.constant 20 : index
    %c0_54 = arith.constant 0 : index
    %c0_55 = arith.constant 0 : index
    %71 = vector.load %arg4[%c20, %c0_54, %c0_55] : memref<32x8x128xf32, #tpu.memory_space<vmem>>, vector<1x8x128xf32>
    %72 = vector.shape_cast %71 : vector<1x8x128xf32> to vector<8x128xf32>
    %c160 = arith.constant 160 : index
    %c2560 = arith.constant 2560 : index
    %73 = vector.load %arg7[%c160, %c2560] : memref<256x4096xf32, #tpu.memory_space<vmem>>, vector<8x128xf32>
    tpu.vector_store %arg7[%c160, %c2560], %72 {strides = array<i32>} : memref<256x4096xf32, #tpu.memory_space<vmem>>, vector<8x128xf32>,
    %c21 = arith.constant 21 : index
    %c0_56 = arith.constant 0 : index
    %c0_57 = arith.constant 0 : index
    %74 = vector.load %arg4[%c21, %c0_56, %c0_57] : memref<32x8x128xf32, #tpu.memory_space<vmem>>, vector<1x8x128xf32>
    %75 = vector.shape_cast %74 : vector<1x8x128xf32> to vector<8x128xf32>
    %c168 = arith.constant 168 : index
    %c2688 = arith.constant 2688 : index
    %76 = vector.load %arg7[%c168, %c2688] : memref<256x4096xf32, #tpu.memory_space<vmem>>, vector<8x128xf32>
    tpu.vector_store %arg7[%c168, %c2688], %75 {strides = array<i32>} : memref<256x4096xf32, #tpu.memory_space<vmem>>, vector<8x128xf32>,
    %c22 = arith.constant 22 : index
    %c0_58 = arith.constant 0 : index
    %c0_59 = arith.constant 0 : index
    %77 = vector.load %arg4[%c22, %c0_58, %c0_59] : memref<32x8x128xf32, #tpu.memory_space<vmem>>, vector<1x8x128xf32>
    %78 = vector.shape_cast %77 : vector<1x8x128xf32> to vector<8x128xf32>
    %c176 = arith.constant 176 : index
    %c2816 = arith.constant 2816 : index
    %79 = vector.load %arg7[%c176, %c2816] : memref<256x4096xf32, #tpu.memory_space<vmem>>, vector<8x128xf32>
    tpu.vector_store %arg7[%c176, %c2816], %78 {strides = array<i32>} : memref<256x4096xf32, #tpu.memory_space<vmem>>, vector<8x128xf32>,
    %c23 = arith.constant 23 : index
    %c0_60 = arith.constant 0 : index
    %c0_61 = arith.constant 0 : index
    %80 = vector.load %arg4[%c23, %c0_60, %c0_61] : memref<32x8x128xf32, #tpu.memory_space<vmem>>, vector<1x8x128xf32>
    %81 = vector.shape_cast %80 : vector<1x8x128xf32> to vector<8x128xf32>
    %c184 = arith.constant 184 : index
    %c2944 = arith.constant 2944 : index
    %82 = vector.load %arg7[%c184, %c2944] : memref<256x4096xf32, #tpu.memory_space<vmem>>, vector<8x128xf32>
    tpu.vector_store %arg7[%c184, %c2944], %81 {strides = array<i32>} : memref<256x4096xf32, #tpu.memory_space<vmem>>, vector<8x128xf32>,
    %c24_62 = arith.constant 24 : index
    %c0_63 = arith.constant 0 : index
    %c0_64 = arith.constant 0 : index
    %83 = vector.load %arg4[%c24_62, %c0_63, %c0_64] : memref<32x8x128xf32, #tpu.memory_space<vmem>>, vector<1x8x128xf32>
    %84 = vector.shape_cast %83 : vector<1x8x128xf32> to vector<8x128xf32>
    %c192 = arith.constant 192 : index
    %c3072 = arith.constant 3072 : index
    %85 = vector.load %arg7[%c192, %c3072] : memref<256x4096xf32, #tpu.memory_space<vmem>>, vector<8x128xf32>
    tpu.vector_store %arg7[%c192, %c3072], %84 {strides = array<i32>} : memref<256x4096xf32, #tpu.memory_space<vmem>>, vector<8x128xf32>,
    %c25 = arith.constant 25 : index
    %c0_65 = arith.constant 0 : index
    %c0_66 = arith.constant 0 : index
    %86 = vector.load %arg4[%c25, %c0_65, %c0_66] : memref<32x8x128xf32, #tpu.memory_space<vmem>>, vector<1x8x128xf32>
    %87 = vector.shape_cast %86 : vector<1x8x128xf32> to vector<8x128xf32>
    %c200 = arith.constant 200 : index
    %c3200 = arith.constant 3200 : index
    %88 = vector.load %arg7[%c200, %c3200] : memref<256x4096xf32, #tpu.memory_space<vmem>>, vector<8x128xf32>
    tpu.vector_store %arg7[%c200, %c3200], %87 {strides = array<i32>} : memref<256x4096xf32, #tpu.memory_space<vmem>>, vector<8x128xf32>,
    %c26 = arith.constant 26 : index
    %c0_67 = arith.constant 0 : index
    %c0_68 = arith.constant 0 : index
    %89 = vector.load %arg4[%c26, %c0_67, %c0_68] : memref<32x8x128xf32, #tpu.memory_space<vmem>>, vector<1x8x128xf32>
    %90 = vector.shape_cast %89 : vector<1x8x128xf32> to vector<8x128xf32>
    %c208 = arith.constant 208 : index
    %c3328 = arith.constant 3328 : index
    %91 = vector.load %arg7[%c208, %c3328] : memref<256x4096xf32, #tpu.memory_space<vmem>>, vector<8x128xf32>
    tpu.vector_store %arg7[%c208, %c3328], %90 {strides = array<i32>} : memref<256x4096xf32, #tpu.memory_space<vmem>>, vector<8x128xf32>,
    %c27 = arith.constant 27 : index
    %c0_69 = arith.constant 0 : index
    %c0_70 = arith.constant 0 : index
    %92 = vector.load %arg4[%c27, %c0_69, %c0_70] : memref<32x8x128xf32, #tpu.memory_space<vmem>>, vector<1x8x128xf32>
    %93 = vector.shape_cast %92 : vector<1x8x128xf32> to vector<8x128xf32>
    %c216 = arith.constant 216 : index
    %c3456 = arith.constant 3456 : index
    %94 = vector.load %arg7[%c216, %c3456] : memref<256x4096xf32, #tpu.memory_space<vmem>>, vector<8x128xf32>
    tpu.vector_store %arg7[%c216, %c3456], %93 {strides = array<i32>} : memref<256x4096xf32, #tpu.memory_space<vmem>>, vector<8x128xf32>,
    %c28 = arith.constant 28 : index
    %c0_71 = arith.constant 0 : index
    %c0_72 = arith.constant 0 : index
    %95 = vector.load %arg4[%c28, %c0_71, %c0_72] : memref<32x8x128xf32, #tpu.memory_space<vmem>>, vector<1x8x128xf32>
    %96 = vector.shape_cast %95 : vector<1x8x128xf32> to vector<8x128xf32>
    %c224 = arith.constant 224 : index
    %c3584 = arith.constant 3584 : index
    %97 = vector.load %arg7[%c224, %c3584] : memref<256x4096xf32, #tpu.memory_space<vmem>>, vector<8x128xf32>
    tpu.vector_store %arg7[%c224, %c3584], %96 {strides = array<i32>} : memref<256x4096xf32, #tpu.memory_space<vmem>>, vector<8x128xf32>,
    %c29 = arith.constant 29 : index
    %c0_73 = arith.constant 0 : index
    %c0_74 = arith.constant 0 : index
    %98 = vector.load %arg4[%c29, %c0_73, %c0_74] : memref<32x8x128xf32, #tpu.memory_space<vmem>>, vector<1x8x128xf32>
    %99 = vector.shape_cast %98 : vector<1x8x128xf32> to vector<8x128xf32>
    %c232 = arith.constant 232 : index
    %c3712 = arith.constant 3712 : index
    %100 = vector.load %arg7[%c232, %c3712] : memref<256x4096xf32, #tpu.memory_space<vmem>>, vector<8x128xf32>
    tpu.vector_store %arg7[%c232, %c3712], %99 {strides = array<i32>} : memref<256x4096xf32, #tpu.memory_space<vmem>>, vector<8x128xf32>,
    %c30 = arith.constant 30 : index
    %c0_75 = arith.constant 0 : index
    %c0_76 = arith.constant 0 : index
    %101 = vector.load %arg4[%c30, %c0_75, %c0_76] : memref<32x8x128xf32, #tpu.memory_space<vmem>>, vector<1x8x128xf32>
    %102 = vector.shape_cast %101 : vector<1x8x128xf32> to vector<8x128xf32>
    %c240 = arith.constant 240 : index
    %c3840 = arith.constant 3840 : index
    %103 = vector.load %arg7[%c240, %c3840] : memref<256x4096xf32, #tpu.memory_space<vmem>>, vector<8x128xf32>
    tpu.vector_store %arg7[%c240, %c3840], %102 {strides = array<i32>} : memref<256x4096xf32, #tpu.memory_space<vmem>>, vector<8x128xf32>,
    %c31 = arith.constant 31 : index
    %c0_77 = arith.constant 0 : index
    %c0_78 = arith.constant 0 : index
    %104 = vector.load %arg4[%c31, %c0_77, %c0_78] : memref<32x8x128xf32, #tpu.memory_space<vmem>>, vector<1x8x128xf32>
    %105 = vector.shape_cast %104 : vector<1x8x128xf32> to vector<8x128xf32>
    %c248 = arith.constant 248 : index
    %c3968 = arith.constant 3968 : index
    %106 = vector.load %arg7[%c248, %c3968] : memref<256x4096xf32, #tpu.memory_space<vmem>>, vector<8x128xf32>
    tpu.vector_store %arg7[%c248, %c3968], %105 {strides = array<i32>} : memref<256x4096xf32, #tpu.memory_space<vmem>>, vector<8x128xf32>,
    %c0_79 = arith.constant 0 : index
    %c0_80 = arith.constant 0 : index
    %107 = vector.load %arg7[%c0_79, %c0_80] : memref<256x4096xf32, #tpu.memory_space<vmem>>, vector<256x4096xf32>
    %cst_81 = arith.constant dense<0.000000e+00> : vector<8x256xf32>
    %108 = tpu.matmul %8, %107, %cst_81 {dimension_numbers = #tpu.dot_dimension_numbers<[1], [1], [0], [0], [0, 0, 1, 0], [], []>, precision = #tpu.contract_precision<fp32>} : vector<8x4096xf32>, vector<256x4096xf32>, vector<8x256xf32> -> vector<8x256xf32>
    %109 = arith.index_cast %arg0 : i32 to index
    %c0_82 = arith.constant 0 : index
    %110 = vector.load %arg5[%109, %c0_82] : memref<2x256xf32, #tpu.memory_space<vmem>>, vector<1x256xf32>
    %111 = vector.broadcast %110 : vector<1x256xf32> to vector<8x256xf32>
    %112 = arith.addf %108, %111 : vector<8x256xf32>
    %c0_83 = arith.constant 0 : index
    %c0_84 = arith.constant 0 : index
    %113 = vector.load %arg6[%c0_83, %c0_84] : memref<8x256xf32, #tpu.memory_space<vmem>>, vector<8x256xf32>
    tpu.vector_store %arg6[%c0_83, %c0_84], %112 {strides = array<i32>} : memref<8x256xf32, #tpu.memory_space<vmem>>, vector<8x256xf32>,
    return
  }
  func.func @transform_0(%arg0: i32) -> (i32, i32) {
    %c0_i32 = arith.constant 0 : i32
    %c0_i32_0 = arith.constant 0 : i32
    %c0_i32_1 = arith.constant 0 : i32
    return %c0_i32, %c0_i32_0 : i32, i32
  }
  func.func @transform_1(%arg0: i32) -> (i32, i32) {
    %c0_i32 = arith.constant 0 : i32
    %c0_i32_0 = arith.constant 0 : i32
    return %c0_i32, %arg0 : i32, i32
  }
  func.func @transform_2(%arg0: i32) -> (i32, i32) {
    %c0_i32 = arith.constant 0 : i32
    %c0_i32_0 = arith.constant 0 : i32
    %c0_i32_1 = arith.constant 0 : i32
    return %c0_i32, %c0_i32_0 : i32, i32
  }
  func.func @transform_3(%arg0: i32) -> (i32, i32, i32) {
    %c0_i32 = arith.constant 0 : i32
    %c0_i32_0 = arith.constant 0 : i32
    %c0_i32_1 = arith.constant 0 : i32
    return %arg0, %c0_i32, %c0_i32_0 : i32, i32, i32
  }
  func.func @transform_4(%arg0: i32) -> (i32, i32) {
    %c0_i32 = arith.constant 0 : i32
    %c0_i32_0 = arith.constant 0 : i32
    %c0_i32_1 = arith.constant 0 : i32
    return %c0_i32, %c0_i32_0 : i32, i32
  }
  func.func @transform_5(%arg0: i32) -> (i32, i32) {
    %c0_i32 = arith.constant 0 : i32
    %c0_i32_0 = arith.constant 0 : i32
    return %c0_i32, %arg0 : i32, i32
  }
}

</mosaic_0001>

<bundles_post_ra>
// kernel: tpu_custom_call.1
= control target key start
LH: loop header
LB: loop body
LE: loop exit
PB: predicated region body
PF: predicated region fallthrough
CT: control target
= control target key end

     0   :  { %s36335_s0 = inlined_call_operand.hbm [shape: f32[8,16], index: 0, kind: input, shape index: {}]   ;;  %s36336_s1 = inlined_call_operand.hbm [shape: f32[16,8192], index: 1, kind: input, shape index: {}]   ;;  %s36337_s2 = inlined_call_operand.hbm [shape: f32[2,4096], index: 2, kind: input, shape index: {}]   ;;  %s36338_s3 = inlined_call_operand.hbm [shape: f32[64,8,128], index: 3, kind: input, shape index: {}]   ;;  %s36339_s4 = inlined_call_operand.vmem [shape: f32[2,256], index: 4, kind: input, shape index: {}]   ;;  %s36340_s5 = inlined_call_operand.hbm [shape: f32[8,512], index: 5, kind: output, shape index: {}]  }
   0x1   :  { %36374 = sst [smem:[#allocation110_spill]] %s36335_s0 }
   0x2   :  { %36375 = sst [smem:[#allocation111_spill]] %s36336_s1 }
   0x3   :  { %36376 = sst [smem:[#allocation112_spill]] %s36337_s2 }
   0x4   :  { %10 = vsyncpa [#allocation4], 0 }
   0x5   :  { %11 = vsyncpa [#allocation7], 0 }
   0x6   :  { %13 = vsyncpa [#allocation7 + $0x1], 0 }
   0x7   :  { %14 = vsyncpa [#allocation10], 0 }
   0x8   :  { %16 = vsyncpa [#allocation10 + $0x1], 0 }
   0x9   :  { %17 = vsyncpa [#allocation5], 0 }
   0xa   :  { %19 = vsyncpa [#allocation5 + $0x1], 0  ;;  %s31694_s18 = smov 0   ;;  %s31696_s19 = smov 0  }
   0xb   :  { %s31698_s20 = smov 0   ;;  %s31700_s21 = smov 0  }
   0xc LB: > { %s31715_s22 = sadd.s32 4294967295, %s31651_s21   ;;  %s31311_s23 = sadd.s32 4294967294, %s31651_s21   ;;  %s31651_s21 = sphi %s31700_s21, %s36632_s21   ;;  %s31647_s20 = sphi %s31698_s20, %s36631_s20   ;;  %s31643_s19 = sphi %s31696_s19, %s36630_s19   ;;  %s31639_s18 = sphi %s31694_s18, %s36629_s18  }
   0xd   : > { %s31719_s24 = sadd.s32 1, %s31651_s21   ;;  %s53_s25 = sadd.s32 1, %s31647_s20 }
   0xe   : > { %s50_s26 = ssub.s32 %s31651_s21, %s31719_s24  ;;  %p60_p0 = scmp.ne.s32.totalorder %s31647_s20, %s31643_s19 }
   0xf   : > { %p51_p1 = scmp.eq.s32.totalorder %s50_s26, 0  ;;  %p61_p2 = scmp.eq.s32.totalorder %s31651_s21, 0 }
  0x10   : > { %p66_p3 = scmp.ne.s32.totalorder %s31643_s19, %s31639_s18  ;;  %p36341_p4 = scmp.eq.s32.totalorder %s31715_s22, 0 }
  0x11   : > { %s31731_s27 = scalar_select %p51_p1, %s31647_s20, %s53_s25  }
  0x12   : > { %p31733_p5 = por %p61_p2, %p60_p0  ;;  %p31739_p6 = por %p36341_p4, %p66_p3 }
  0x13   : > { %p158_p7 = scmp.eq.s32.totalorder %s31715_s22, 1  ;;  %p164_p8 = scmp.eq.s32.totalorder %s31311_s23, 1 }
  0x14   : > { %s36378_s29 = scalar_select %p31739_p6, 1, 0 }
  0x15   : > { %p31312_p9 = scmp.ge.s32.totalorder %s31651_s21, 1  ;;  %p171_p10 = scmp.lt.s32.totalorder %s31651_s21, 3 }
  0x16   : > { %p31746_p11 = por %p158_p7, %p60_p0  ;;  %p31750_p12 = por %p164_p8, %p66_p3 }
  0x17   : > { %p31754_p13 = pnand %p31312_p9, %p171_p10  ;;  %s31653_s8 = smov [#allocation8]  }
  0x18   : > { %s36379_s30 = scalar_select %p31746_p11, 1, 0 }
  0x19   : > { %s36380_s6 = scalar_select %p31750_p12, 1, 0 }
  0x1a   : > { %p31399_p2 = pneg %p31754_p13  ;;  %s195_s9 = sshll.u32 %s31653_s8, 4  ;;  %s196_s9 = int_to_ptr.vmem [resolvable:$true] %s195_s9 }
  0x1b   : > { %p31419_p4 = scmp.lt.s32.totalorder %s31651_s21, 2  ;;  %p36382_p0 = scmp.eq.s32.totalorder %s31715_s22, 0 }
  0x1c   : > { %s31654_s12 = smov [#allocation3]   ;;  %s31478_s14 = scalar_lea.vmem %s196_s9, 1024 }
  0x1d   : > { %p31764_p7 = pnand %p31399_p2, %p36382_p0  ;;  %p31770_p3 = pnand %p31419_p4, %p31733_p5 }
  0x1e   : > { %s184_s13 = sshll.u32 %s31654_s12, 4  ;;  %p31479_p9 = scmp.ne.s32.totalorder %s196_s9, %s31478_s14  ;;  %s185_s13 = int_to_ptr.vmem [resolvable:$true] %s184_s13 }
  0x1f   : > { %p31469_p8 = pneg %p31764_p7  ;;  %p31486_p0 = scmp.lt.s32.totalorder %s196_s9, %s196_s9 }
  0x20   : > { %p31487_p1 = scmp.lt.s32.totalorder %s31478_s14, %s31478_s14 }
  0x21   : > { %p31481_p10 = pnand %p31479_p9, %p31469_p8 }
  0x22   : > { %p31488_p12 = por %p31487_p1, %p31486_p0 }
  0x23   : > { %p31482_p2 = pneg %p31481_p10 }
  0x25   : > { %p31489_p11 = pnand %p31488_p12, %p31482_p2 }
  0x27   : > { %31492 = shalt.err (!%p31489_p11)
}
  0x28   : > { %s36385_s2 = sld [smem:[#allocation112_spill]]  ;;  %s209_s17 = sand.u32 1, %s31651_s21  }
  0x29   : > { %s31504_s23 = scalar_lea.vmem %s185_s13, 128  ;;  %p31512_p10 = scmp.lt.s32.totalorder %s185_s13, %s185_s13 }
  0x2a   : > { %p31505_p4 = scmp.ne.s32.totalorder %s185_s13, %s31504_s23  ;;  %p31513_p6 = scmp.lt.s32.totalorder %s31504_s23, %s31504_s23 }
  0x2c   : > { %p31507_p5 = pnand %p31505_p4, %p31469_p8  ;;  %p31514_p1 = por %p31513_p6, %p31512_p10 }
  0x2e   : > { %31405 = dma.hbm_to_vmem [thread:$0]  (!%p31764_p7), %s36385_s2, 1024, %s196_s9, [#allocation7]  }
  0x2f   : > { %p31508_p9 = pneg %p31507_p5 }
  0x31   : > { %p31515_p12 = pnand %p31514_p1, %p31508_p9 }
  0x33   : > { %31518 = shalt.err (!%p31515_p12)
}
  0x34   : > { %s36386_s0 = sld [smem:[#allocation110_spill]]  ;;  %s31794_s28 = sand.u32 1, %s31647_s20  }
  0x35   : > { %s31316_s8 = sshll.u32 %s31794_s28, 9  ;;  %s36344_s9 = sshll.u32 %s31651_s21, 12 }
  0x36   : > { %s36387_s1 = sld [smem:[#allocation111_spill]]  ;;  %s213_s10 = scalar_lea.vmem [#allocation6], %s31316_s8 }
  0x37   : > { %s220_s16 = sshll.u32 %s213_s10, 4  ;;  %s31807_s23 = scalar_lea.sflag [#allocation7], %s209_s17  ;;  %s31805_s16 = int_to_ptr.vmem [resolvable:$true] %s220_s16 }
  0x38   : > { %p31521_p11 = pneg %p31770_p3 }
  0x3a   : > { %31402 = dma.hbm_to_vmem [thread:$0]  (!%p31764_p7), %s36386_s0, 128, %s185_s13, [#allocation4]  }
  0x3c   : > { %s31803_s15 = scalar_lea.hbm %s36387_s1, %s36344_s9  ;;  %s31524_s12 = scalar_lea.hbm %s36387_s1, 16384 }
  0x3d   : > { %s31519_s13 = scalar_lea.hbm %s31803_s15, 8192  ;;  %p31525_p2 = scmp.lt.s32.totalorder %s31803_s15, %s36387_s1 }
  0x3e   : > { %p31520_p6 = scmp.ne.s32.totalorder %s31803_s15, %s31519_s13  ;;  %p31526_p0 = scmp.lt.s32.totalorder %s31524_s12, %s31519_s13 }
  0x40   : > { %p31522_p7 = pnand %p31521_p11, %p31520_p6  ;;  %p31527_p4 = por %p31526_p0, %p31525_p2 }
  0x42   : > { %p31523_p8 = pneg %p31522_p7 }
  0x44   : > { %p31528_p5 = pnand %p31527_p4, %p31523_p8 }
  0x46   : > { %31531 = shalt.err (!%p31528_p5)
}
  0x47   : > { %s31532_s17 = scalar_lea.vmem %s31805_s16, 8192  ;;  %s31655_s8 = smov [#allocation6]  }
  0x48   : > { %p31533_p9 = scmp.ne.s32.totalorder %s31805_s16, %s31532_s17  ;;  %s31537_s10 = sshll.u32 %s31655_s8, 4  ;;  %s31538_s10 = int_to_ptr.vmem [resolvable:$false] %s31537_s10 }
  0x49   : > { %s31539_s25 = scalar_lea.vmem %s31538_s10, 16384  ;;  %p31540_p12 = scmp.lt.s32.totalorder %s31805_s16, %s31538_s10 }
  0x4a   : > { %p31535_p10 = pnand %p31533_p9, %p31521_p11  ;;  %p31541_p6 = scmp.lt.s32.totalorder %s31539_s25, %s31532_s17 }
  0x4c   : > { %p31536_p1 = pneg %p31535_p10  ;;  %p31542_p7 = por %p31541_p6, %p31540_p12 }
  0x4e   : > { %p31543_p2 = pnand %p31542_p7, %p31536_p1 }
  0x50   : > { %31546 = shalt.err (!%p31543_p2)
}
  0x51   : > { %s31656_s9 = smov 8192   ;;  %s31657_s13 = smov 4096  }
  0x52   : > { %s31658_s26 = smov 256   ;;  %s31319_s12 = sshll.u32 %s31794_s28, 8 }
  0x53   : > { %31409 = dma.hbm_to_vmem [thread:$0]  (!%p31770_p3), %s31803_s15, 8192, %s31805_s16, %s31807_s23, %s31656_s9, %s31657_s13, %s31658_s26  }
  0x54   : > { %s36388_s14 = sshll.u32 %s31651_s21, 12  ;;  %s234_s25 = scalar_lea.vmem [#allocation9], %s31319_s12 }
  0x55   : > { %s31840_s10 = scalar_lea.hbm %s36338_s3, %s36388_s14  ;;  %s241_s0 = sshll.u32 %s234_s25, 4  ;;  %s31842_s0 = int_to_ptr.vmem [resolvable:$true] %s241_s0 }
  0x56   : > { %s231_s1 = scalar_lea.sflag [#allocation10], %s31794_s28  ;;  %s31547_s2 = scalar_lea.hbm %s31840_s10, 4096 }
  0x57   : > { %p31548_p8 = scmp.ne.s32.totalorder %s31840_s10, %s31547_s2  ;;  %s31552_s23 = scalar_lea.hbm %s36338_s3, 8192 }
  0x58   : > { %p31553_p5 = scmp.lt.s32.totalorder %s31840_s10, %s36338_s3  ;;  %p31554_p9 = scmp.lt.s32.totalorder %s31552_s23, %s31547_s2 }
  0x59   : > { %p31550_p0 = pnand %p31548_p8, %p31521_p11 }
  0x5a   : > { %p31555_p10 = por %p31554_p9, %p31553_p5 }
  0x5b   : > { %p31551_p4 = pneg %p31550_p0 }
  0x5d   : > { %p31556_p1 = pnand %p31555_p10, %p31551_p4 }
  0x5f   : > { %31559 = shalt.err (!%p31556_p1)
}
  0x60   : > { %s31560_s26 = scalar_lea.vmem %s31842_s0, 4096  ;;  %s31659_s12 = smov [#allocation9]  }
  0x61   : > { %p31561_p12 = scmp.ne.s32.totalorder %s31842_s0, %s31560_s26  ;;  %s31565_s14 = sshll.u32 %s31659_s12, 4  ;;  %s31566_s14 = int_to_ptr.vmem [resolvable:$false] %s31565_s14 }
  0x62   : > { %s31567_s8 = scalar_lea.vmem %s31566_s14, 8192  ;;  %p31568_p2 = scmp.lt.s32.totalorder %s31842_s0, %s31566_s14 }
  0x63   : > { %p31563_p6 = pnand %p31561_p12, %p31521_p11  ;;  %p31569_p8 = scmp.lt.s32.totalorder %s31567_s8, %s31560_s26 }
  0x65   : > { %p31564_p7 = pneg %p31563_p6  ;;  %p31570_p0 = por %p31569_p8, %p31568_p2 }
  0x67   : > { %p31571_p5 = pnand %p31570_p0, %p31564_p7 }
  0x69   : > { %31574 = shalt.err (!%p31571_p5)
}
  0x6a   : > { %s31660_s2 = smov 128   ;;  %s31661_s17 = smov 8  }
  0x6b   : > { %31412 = dma.hbm_to_vmem [thread:$0]  (!%p31770_p3), %s31840_s10, 4096, %s31842_s0, %s231_s1, %s31660_s2, %s31660_s2, %s31661_s17  }
  0x6c   : > { %253 = sbr.rel (%p31754_p13) target bundleno = 2462 (0x99e), region = 40 }
  0x71   : > { %p36389_p11 = scmp.eq.s32.totalorder %s31715_s22, 0 }
  0x73   : > { %31618 = dma.done.wait (%p36389_p11), [#allocation4], 128   ;;  %p36390_p4 = pmov %p36389_p11 }
  0x74   : > { %s31876_s25 = sand.u32 1, %s31715_s22   ;;  %s31879_s15 = sand.u32 1, %s31643_s19  }
  0x75   : > { %31620 = vsyncadd (%p36390_p4), [#allocation4], 4294967168  ;;  %s31324_s11 = sshll.u32 %s31879_s15, 9  ;;  %s260_s0 = scalar_lea.sflag [#allocation7], %s31876_s25 }
  0x76   : > { %s31883_s1 = scalar_lea.vmem [#allocation6], %s31324_s11  ;;  %p36391_p13 = scmp.ne.s32.totalorder %s36378_s29, 0 }
  0x78   : > { %31622 = dma.done.wait (%p36391_p13), %s260_s0, 8192  }
  0x79   : > { %31624 = vsyncadd (%p36391_p13), %s260_s0, 4294959104  ;;  %p36392_p3 = pmov %p36390_p4 }
  0x7b   : > { %31626 = dma.done.wait (%p36392_p3), [#allocation7], 1024   ;;  %p36393_p9 = pmov %p36392_p3 }
  0x7c   : > { %s31326_s7 = sshll.u32 %s31879_s15, 8  ;;  %s273_s28 = scalar_lea.sflag [#allocation10], %s31879_s15 }
  0x7d   : > { %31628 = vsyncadd (%p36393_p9), [#allocation7], 4294966272  ;;  %s31895_s10 = scalar_lea.vmem [#allocation9], %s31326_s7 }
  0x7e   : > { %31630 = dma.done.wait (%p36391_p13), %s273_s28, 4096  }
  0x7f   : > { %31632 = vsyncadd (%p36391_p13), %s273_s28, 4294963200  ;;  %v36351_v0 = vmov 0.0   ;;  %vm564_vm0 = vcmask 130048   ;;  %v345_v1 = vld [vmem:[%s31883_s1 + $0x108] sm:$0xff]  ;;  %v344_v2 = vld [vmem:[%s31883_s1 + $0x100] sm:$0xff]  ;;  %s376_s29 = sshra.s32 %s31715_s22, 1 }
  0x80   : > { %636 = vmatprep.mubr.f32.mxu0 %v36351_v0  ;;  %732 = vmatprep.mubr.f32.mxu1 %v36351_v0  ;;  %v313_v3 = vld [vmem:[%s31883_s1 + $0x8] sm:$0xff]  ;;  %v31906_v4 = vand.u32 4294901760, %v345_v1  ;;  %v31908_v5 = vand.u32 4294901760, %v344_v2  ;;  %v312_v7 = vld [vmem:[%s31883_s1] sm:$0xff]  ;;  %v311_v8 = vld [vmem:[#allocation3] sm:$0xff]  ;;  %s32942_s16 = sshll.u32 %s376_s29, 6 }
  0x81   : > { %v31910_v6 = vand.u32 4294901760, %v313_v3  ;;  %v31913_v9 = vand.u32 4294901760, %v312_v7  ;;  %v566_v10 = vsel %vm564_vm0, %v311_v8, 0  ;;  %v347_v15 = vld [vmem:[%s31883_s1 + $0x118] sm:$0xff]  ;;  %v346_v21 = vld [vmem:[%s31883_s1 + $0x110] sm:$0xff]  ;;  %v349_v51 = vld [vmem:[%s31883_s1 + $0x128] sm:$0xff]  ;;  %s382_s23 = sadd.s32 %s32942_s16, %s31876_s25 }
  0x82   : > { %597 = vmatprep.subr.mxu0 %v31906_v4  ;;  %v677_v11 = vsub.f32 %v345_v1, %v31906_v4  ;;  %v31917_v12 = vand.u32 4294901760, %v566_v10  ;;  %v683_v13 = vsub.f32 %v344_v2, %v31908_v5  ;;  %v315_v22 = vld [vmem:[%s31883_s1 + $0x18] sm:$0xff]  ;;  %v31931_v24 = vand.u32 4294901760, %v347_v15  ;;  %v314_v32 = vld [vmem:[%s31883_s1 + $0x10] sm:$0xff]  ;;  %v348_v53 = vld [vmem:[%s31883_s1 + $0x120] sm:$0xff]  ;;  %s33001_s9 = scalar_lea.vmem [#allocation8], %s382_s23 }
  0x83   : > { %v689_v14 = vsub.f32 %v313_v3, %v31910_v6  ;;  %599 = vmatpush1.msra.mxu0 %v31908_v5  ;;  %v695_v16 = vsub.f32 %v312_v7, %v31913_v9  ;;  %v31936_v30 = vand.u32 4294901760, %v346_v21  ;;  %v31938_v31 = vand.u32 4294901760, %v315_v22  ;;  %v317_v55 = vld [vmem:[%s31883_s1 + $0x28] sm:$0xff]  ;;  %v316_v58 = vld [vmem:[%s31883_s1 + $0x20] sm:$0xff]  ;;  %s31383_s13 = sshll.u32 %s376_s29, 2  ;;  %s31327_s2 = sshll.u32 %s31879_s15, 4 }
  0x84   : > { %601 = vmatprep.subr.mxu0 %v31910_v6  ;;  %v678_v17 = vand.u32 4294901760, %v677_v11  ;;  %v31926_v18 = vsub.f32 %v566_v10, %v31917_v12  ;;  %v684_v19 = vand.u32 4294901760, %v683_v13  ;;  %v31946_v39 = vsub.f32 %v347_v15, %v31931_v24  ;;  %v351_v10 = vld [vmem:[%s31883_s1 + $0x138] sm:$0xff]  ;;  %s10601_s26 = sadd.s32 %s31383_s13, %s31876_s25  ;;  %s31384_s17 = sshll.u32 %s31715_s22, 8 }
  0x85   : > { %v690_v20 = vand.u32 4294901760, %v689_v14  ;;  %603 = vmatpush1.msra.mxu0 %v31913_v9  ;;  %v696_v23 = vand.u32 4294901760, %v695_v16  ;;  %v31948_v40 = vand.u32 4294901760, %v314_v32  ;;  %v31951_v41 = vsub.f32 %v346_v21, %v31936_v30  ;;  %s10602_s8 = scalar_lea.vmem %s36339_s4, %s10601_s26  ;;  %s307_s25 = scalar_lea.vmem [#allocation11], %s31327_s2 }
  0x86   : > { %v679_v25 = vsub.f32 %v677_v11, %v678_v17  ;;  %v31934_v26 = vand.u32 4294901760, %v31926_v18  ;;  %v685_v27 = vsub.f32 %v683_v13, %v684_v19  ;;  %770 = vmatprep.subr.mxu0 %v677_v11  ;;  %v31955_v42 = vsub.f32 %v315_v22, %v31938_v31  ;;  %s31176_s11 = sshll.u32 %s307_s25, 4  ;;  %s31174_s7 = scalar_lea.hbm %s36340_s5, %s31384_s17  ;;  %s31177_s11 = int_to_ptr.vmem [resolvable:$true] %s31176_s11 }
  0x87   : > { %v691_v28 = vsub.f32 %v689_v14, %v690_v20  ;;  %v697_v29 = vsub.f32 %v695_v16, %v696_v23  ;;  %v31958_v43 = vsub.f32 %v314_v32, %v31948_v40  ;;  %v1169_v44 = vand.u32 4294901760, %v31946_v39  ;;  %s31162_s28 = scalar_lea.sflag [#allocation5], %s31879_s15  ;;  %p36626_p1 = scmp.ne.s32.totalorder %s36379_s30, 0 }
  0x88   : > { %v680_v33 = vand.u32 4294901760, %v679_v25  ;;  %v640_v34 = vsub.f32 %v31926_v18, %v31934_v26  ;;  %v686_v35 = vand.u32 4294901760, %v685_v27  ;;  %v1175_v45 = vand.u32 4294901760, %v31951_v41  ;;  %s31663_s22 = smov [#allocation11]  }
  0x89   : > { %v692_v36 = vand.u32 4294901760, %v691_v28  ;;  %v698_v37 = vand.u32 4294901760, %v697_v29  ;;  %v1181_v46 = vand.u32 4294901760, %v31955_v42  ;;  %v1187_v47 = vand.u32 4294901760, %v31958_v43  ;;  %s31579_s29 = sshll.u32 %s31663_s22, 4  ;;  %s31580_s29 = int_to_ptr.vmem [resolvable:$false] %s31579_s29 }
  0x8a   : > { %681 = vmatprep.subr.mxu1 %v680_v33  ;;  %v31943_v38 = vand.u32 4294901760, %v640_v34  ;;  %v1170_v48 = vsub.f32 %v31946_v39, %v1169_v44  ;;  %v1176_v49 = vsub.f32 %v31951_v41, %v1175_v45  ;;  %v31993_v57 = vand.u32 4294901760, %v349_v51  ;;  %s31581_s16 = scalar_lea.vmem %s31580_s29, 512  ;;  %p31582_p7 = scmp.lt.s32.totalorder %s31177_s11, %s31580_s29 }
  0x8b   : > { %687 = vmatpush1.msra.mxu1 %v686_v35  ;;  %v1182_v50 = vsub.f32 %v31955_v42, %v1181_v46  ;;  %v1188_v52 = vsub.f32 %v31958_v43, %v1187_v47  ;;  %v31998_v60 = vand.u32 4294901760, %v348_v53  ;;  %v32002_v62 = vand.u32 4294901760, %v317_v55 }
  0x8c   : > { %642 = vmatmul.mubr.f32.vlgmr.msra.gmra.mxu0 %v31943_v38  ;;  %693 = vmatprep.subr.mxu1 %v692_v36  ;;  %v1171_v54 = vand.u32 4294901760, %v1170_v48  ;;  %v1177_v56 = vand.u32 4294901760, %v1176_v49  ;;  %v32005_v63 = vand.u32 4294901760, %v316_v58  ;;  %v32009_v1 = vsub.f32 %v349_v51, %v31993_v57  ;;  %v320_v48 = vld [vmem:[%s31883_s1 + $0x40] sm:$0xff] }
  0x8d   : > { %773 = vmatpush1.msra.mxu0 %v683_v13  ;;  %699 = vmatpush1.msra.mxu1 %v698_v37  ;;  %v1183_v59 = vand.u32 4294901760, %v1182_v50  ;;  %v1189_v61 = vand.u32 4294901760, %v1188_v52  ;;  %v32013_v2 = vsub.f32 %v348_v53, %v31998_v60  ;;  %v32017_v3 = vsub.f32 %v317_v55, %v32002_v62 }
  0x8e   : > { %776 = vmatprep.subr.mxu0 %v689_v14  ;;  %734 = vmatmul.mubr.f32.vlgmr.msra.gmra.mxu1 %v31917_v12  ;;  %v350_v14 = vld [vmem:[%s31883_s1 + $0x130] sm:$0xff]  ;;  %v32154_v53 = vand.u32 4294901760, %v320_v48 }
  0x8f   : > { %779 = vmatpush1.msra.mxu0 %v695_v16  ;;  %812 = vmatprep.mubr.f32.mxu0 %v36351_v0  ;;  %v1672_v7 = vand.u32 4294901760, %v32017_v3  ;;  %v32060_v16 = vand.u32 4294901760, %v351_v10  ;;  %v32070_v22 = vand.u32 4294901760, %v350_v14 }
  0x90   : > { %850 = vmatprep.subr.mxu1 %v31906_v4  ;;  %815 = vmatmul.mubr.f32.vlgmr.msra.gmra.mxu0 %v31926_v18 }
  0x91   : > { %852 = vmatpush1.msra.mxu1 %v31908_v5  ;;  %930 = vmatprep.subr.mxu0 %v678_v17  ;;  %v1673_v13 = vsub.f32 %v32017_v3, %v1672_v7  ;;  %v319_v17 = vld [vmem:[%s31883_s1 + $0x38] sm:$0xff]  ;;  %v32079_v27 = vsub.f32 %v351_v10, %v32060_v16  ;;  %v32086_v29 = vsub.f32 %v350_v14, %v32070_v22 }
  0x92   : > { %854 = vmatprep.subr.mxu1 %v31910_v6  ;;  %934 = vmatpush1.msra.mxu0 %v684_v19 }
  0x93   : > { %856 = vmatpush1.msra.mxu1 %v31913_v9  ;;  %889 = vmatprep.mubr.f32.mxu1 %v36351_v0  ;;  %v2157_v33 = vand.u32 4294901760, %v32086_v29 }
  0x94   : > { %938 = vmatprep.subr.mxu0 %v690_v20  ;;  %893 = vmatmul.mubr.f32.vlgmr.msra.gmra.mxu1 %v31934_v26  ;;  %v318_v20 = vld [vmem:[%s31883_s1 + $0x30] sm:$0xff] }
  0x95   : > { %942 = vmatpush1.msra.mxu0 %v696_v23  ;;  %975 = vmatprep.mubr.f32.mxu0 %v36351_v0  ;;  %v1674_v23 = vand.u32 4294901760, %v1673_v13  ;;  %v32081_v28 = vand.u32 4294901760, %v318_v20  ;;  %v2158_v37 = vsub.f32 %v32086_v29, %v2157_v33 }
  0x96   : > { %1012 = vmatprep.subr.mxu1 %v31906_v4  ;;  %977 = vmatmul.mubr.f32.vlgmr.msra.gmra.mxu0 %v31917_v12  ;;  %v32022_v4 = vsub.f32 %v316_v58, %v32005_v63 }
  0x97   : > { %1014 = vmatpush1.msra.mxu1 %v31908_v5  ;;  %1051 = vmatprep.mubr.f32.mxu1 %v36351_v0  ;;  %v1660_v5 = vand.u32 4294901760, %v32009_v1  ;;  %v32095_v32 = vsub.f32 %v318_v20, %v32081_v28 }
  0x98   : > { %1016 = vmatprep.subr.mxu1 %v31910_v6  ;;  %1088 = vmatprep.subr.mxu0 %v31931_v24  ;;  %v1666_v6 = vand.u32 4294901760, %v32013_v2  ;;  %v1678_v8 = vand.u32 4294901760, %v32022_v4 }
  0x99   : > { %1018 = vmatpush1.msra.mxu1 %v31913_v9  ;;  %1090 = vmatpush1.msra.mxu0 %v31936_v30  ;;  %v1661_v9 = vsub.f32 %v32009_v1, %v1660_v5  ;;  %v2169_v36 = vand.u32 4294901760, %v32095_v32 }
  0x9a   : > { %1053 = vmatmul.mubr.f32.vlgmr.msra.gmra.mxu1 %v31917_v12  ;;  %1172 = vmatprep.subr.mxu1 %v1171_v54  ;;  %v1667_v11 = vsub.f32 %v32013_v2, %v1666_v6  ;;  %v1679_v15 = vsub.f32 %v32022_v4, %v1678_v8 }
  0x9b   : > { %1178 = vmatpush1.msra.mxu1 %v1177_v56  ;;  %1092 = vmatprep.subr.mxu0 %v31938_v31  ;;  %v1662_v19 = vand.u32 4294901760, %v1661_v9  ;;  %v322_v9 = vld [vmem:[%s31883_s1 + $0x50] sm:$0xff] }
  0x9c   : > { %1184 = vmatprep.subr.mxu1 %v1183_v59  ;;  %1094 = vmatpush1.msra.mxu0 %v31948_v40  ;;  %v1668_v21 = vand.u32 4294901760, %v1667_v11  ;;  %v1680_v25 = vand.u32 4294901760, %v1679_v15  ;;  %v32230_v15 = vand.u32 4294901760, %v322_v9 }
  0x9d   : > { %1127 = vmatprep.mubr.f32.mxu0 %v36351_v0  ;;  %1190 = vmatpush1.msra.mxu1 %v1189_v61 }
  0x9e   : > { %1133 = vmatmul.mubr.f32.vlgmr.msra.gmra.mxu0 %v31943_v38  ;;  %1223 = vmatprep.mubr.f32.mxu1 %v36351_v0  ;;  %v32247_v20 = vsub.f32 %v322_v9, %v32230_v15 }
  0x9f   : > { %1261 = vmatprep.subr.mxu0 %v31946_v39  ;;  %1341 = vmatprep.subr.mxu1 %v31931_v24 }
  0xa0   : > { %1225 = vmatmul.mubr.f32.vlgmr.msra.gmra.mxu1 %v31917_v12  ;;  %1264 = vmatpush1.msra.mxu0 %v31951_v41 }
  0xa1   : > { %1343 = vmatpush1.msra.mxu1 %v31936_v30  ;;  %1267 = vmatprep.subr.mxu0 %v31955_v42  ;;  %v2170_v42 = vsub.f32 %v32095_v32, %v2169_v36 }
  0xa2   : > { %1345 = vmatprep.subr.mxu1 %v31938_v31  ;;  %1270 = vmatpush1.msra.mxu0 %v31958_v43  ;;  %v352_v43 = vld [vmem:[%s31883_s1 + $0x140] sm:$0xff] }
  0xa3   : > { %1303 = vmatprep.mubr.f32.mxu0 %v36351_v0  ;;  %1347 = vmatpush1.msra.mxu1 %v31948_v40  ;;  %v2171_v49 = vand.u32 4294901760, %v2170_v42  ;;  %v32142_v50 = vand.u32 4294901760, %v352_v43 }
  0xa4   : > { %1306 = vmatmul.mubr.f32.vlgmr.msra.gmra.mxu0 %v31926_v18  ;;  %1380 = vmatprep.mubr.f32.mxu1 %v36351_v0 }
  0xa5   : > { %1421 = vmatprep.subr.mxu0 %v1169_v44  ;;  %1503 = vmatprep.subr.mxu1 %v31931_v24  ;;  %v32074_v24 = vand.u32 4294901760, %v319_v17  ;;  %v2159_v44 = vand.u32 4294901760, %v2158_v37  ;;  %v32160_v54 = vsub.f32 %v352_v43, %v32142_v50 }
  0xa6   : > { %1384 = vmatmul.mubr.f32.vlgmr.msra.gmra.mxu1 %v31934_v26  ;;  %1425 = vmatpush1.msra.mxu0 %v1175_v45 }
  0xa7   : > { %1505 = vmatpush1.msra.mxu1 %v31936_v30  ;;  %1429 = vmatprep.subr.mxu0 %v1181_v46  ;;  %v32090_v30 = vsub.f32 %v319_v17, %v32074_v24  ;;  %v321_v46 = vld [vmem:[%s31883_s1 + $0x48] sm:$0xff]  ;;  %v2648_v58 = vand.u32 4294901760, %v32160_v54 }
  0xa8   : > { %1507 = vmatprep.subr.mxu1 %v31938_v31  ;;  %1433 = vmatpush1.msra.mxu0 %v1187_v47  ;;  %v2151_v31 = vand.u32 4294901760, %v32079_v27  ;;  %v32147_v51 = vand.u32 4294901760, %v321_v46 }
  0xa9   : > { %1466 = vmatprep.mubr.f32.mxu0 %v36351_v0  ;;  %1509 = vmatpush1.msra.mxu1 %v31948_v40  ;;  %v2163_v34 = vand.u32 4294901760, %v32090_v30  ;;  %v353_v40 = vld [vmem:[%s31883_s1 + $0x148] sm:$0xff] }
  0xaa   : > { %1468 = vmatmul.mubr.f32.vlgmr.msra.gmra.mxu0 %v31917_v12  ;;  %1542 = vmatprep.mubr.f32.mxu1 %v36351_v0  ;;  %v2152_v35 = vsub.f32 %v32079_v27, %v2151_v31  ;;  %v32134_v45 = vand.u32 4294901760, %v353_v40  ;;  %v32165_v55 = vsub.f32 %v321_v46, %v32147_v51 }
  0xab   : > { %1663 = vmatprep.subr.mxu1 %v1662_v19  ;;  %1544 = vmatmul.mubr.f32.vlgmr.msra.gmra.mxu1 %v31917_v12  ;;  %v2164_v39 = vsub.f32 %v32090_v30, %v2163_v34 }
  0xac   : > { %1669 = vmatpush1.msra.mxu1 %v1668_v21  ;;  %1579 = vmatprep.subr.mxu0 %v31993_v57  ;;  %v2153_v41 = vand.u32 4294901760, %v2152_v35  ;;  %v32152_v52 = vsub.f32 %v353_v40, %v32134_v45  ;;  %v2654_v59 = vand.u32 4294901760, %v32165_v55 }
  0xad   : > { %1675 = vmatprep.subr.mxu1 %v1674_v23  ;;  %1714 = vmatprep.mubr.f32.mxu1 %v36351_v0  ;;  %v2165_v47 = vand.u32 4294901760, %v2164_v39 }
  0xae   : > { %1681 = vmatpush1.msra.mxu1 %v1680_v25  ;;  %1581 = vmatpush1.msra.mxu0 %v31998_v60  ;;  %v2642_v56 = vand.u32 4294901760, %v32152_v52 }
  0xaf   : > { %1832 = vmatprep.subr.mxu1 %v31993_v57  ;;  %1716 = vmatmul.mubr.f32.vlgmr.msra.gmra.mxu1 %v31917_v12 }
  0xb0   : > { %1834 = vmatpush1.msra.mxu1 %v31998_v60  ;;  %1583 = vmatprep.subr.mxu0 %v32002_v62 }
  0xb1   : > { %1836 = vmatprep.subr.mxu1 %v32002_v62  ;;  %1585 = vmatpush1.msra.mxu0 %v32005_v63 }
  0xb2   : > { %1618 = vmatprep.mubr.f32.mxu0 %v36351_v0  ;;  %1838 = vmatpush1.msra.mxu1 %v32005_v63 }
  0xb3   : > { %1624 = vmatmul.mubr.f32.vlgmr.msra.gmra.mxu0 %v31943_v38  ;;  %1752 = vmatprep.subr.mxu0 %v32009_v1  ;;  %v355_v1 = vld [vmem:[%s31883_s1 + $0x158] sm:$0xff] }
  0xb4   : > { %1871 = vmatprep.mubr.f32.mxu1 %v36351_v0  ;;  %1994 = vmatprep.subr.mxu1 %v31993_v57  ;;  %v32171_v57 = vsub.f32 %v320_v48, %v32154_v53 }
  0xb5   : > { %1755 = vmatpush1.msra.mxu0 %v32013_v2  ;;  %1875 = vmatmul.mubr.f32.vlgmr.msra.gmra.mxu1 %v31934_v26 }
  0xb6   : > { %1996 = vmatpush1.msra.mxu1 %v31998_v60  ;;  %1758 = vmatprep.subr.mxu0 %v32017_v3  ;;  %v2643_v60 = vsub.f32 %v32152_v52, %v2642_v56  ;;  %v2660_v61 = vand.u32 4294901760, %v32171_v57 }
  0xb7   : > { %1998 = vmatprep.subr.mxu1 %v32002_v62  ;;  %1761 = vmatpush1.msra.mxu0 %v32022_v4  ;;  %v2649_v62 = vsub.f32 %v32160_v54, %v2648_v58  ;;  %v354_v4 = vld [vmem:[%s31883_s1 + $0x150] sm:$0xff] }
  0xb8   : > { %1794 = vmatprep.mubr.f32.mxu0 %v36351_v0  ;;  %2000 = vmatpush1.msra.mxu1 %v32005_v63  ;;  %v2655_v63 = vsub.f32 %v32165_v55, %v2654_v59  ;;  %v2644_v2 = vand.u32 4294901760, %v2643_v60  ;;  %v2661_v3 = vsub.f32 %v32171_v57, %v2660_v61  ;;  %v32218_v11 = vand.u32 4294901760, %v354_v4 }
  0xb9   : > { %1797 = vmatmul.mubr.f32.vlgmr.msra.gmra.mxu0 %v31926_v18  ;;  %1912 = vmatprep.subr.mxu0 %v1660_v5  ;;  %v2650_v5 = vand.u32 4294901760, %v2649_v62 }
  0xba   : > { %2033 = vmatprep.mubr.f32.mxu1 %v36351_v0  ;;  %2154 = vmatprep.subr.mxu1 %v2153_v41  ;;  %v2662_v10 = vand.u32 4294901760, %v2661_v3 }
  0xbb   : > { %1916 = vmatpush1.msra.mxu0 %v1666_v6  ;;  %2035 = vmatmul.mubr.f32.vlgmr.msra.gmra.mxu1 %v31917_v12  ;;  %v32210_v6 = vand.u32 4294901760, %v355_v1 }
  0xbc   : > { %2160 = vmatpush1.msra.mxu1 %v2159_v44  ;;  %1920 = vmatprep.subr.mxu0 %v1672_v7  ;;  %v323_v7 = vld [vmem:[%s31883_s1 + $0x58] sm:$0xff] }
  0xbd   : > { %2166 = vmatprep.subr.mxu1 %v2165_v47  ;;  %1924 = vmatpush1.msra.mxu0 %v1678_v8  ;;  %v2656_v8 = vand.u32 4294901760, %v2655_v63  ;;  %v32223_v13 = vand.u32 4294901760, %v323_v7  ;;  %v32228_v14 = vsub.f32 %v355_v1, %v32210_v6 }
  0xbe   : > { %1957 = vmatprep.mubr.f32.mxu0 %v36351_v0  ;;  %2172 = vmatpush1.msra.mxu1 %v2171_v49 }
  0xbf   : > { %1959 = vmatmul.mubr.f32.vlgmr.msra.gmra.mxu0 %v31917_v12  ;;  %2070 = vmatprep.subr.mxu0 %v32060_v16  ;;  %v32241_v17 = vsub.f32 %v323_v7, %v32223_v13  ;;  %v3133_v19 = vand.u32 4294901760, %v32228_v14 }
  0xc0   : > { %2205 = vmatprep.mubr.f32.mxu1 %v36351_v0  ;;  %2323 = vmatprep.subr.mxu1 %v32060_v16 }
  0xc1   : > { %2072 = vmatpush1.msra.mxu0 %v32070_v22  ;;  %2207 = vmatmul.mubr.f32.vlgmr.msra.gmra.mxu1 %v31917_v12  ;;  %v3134_v23 = vsub.f32 %v32228_v14, %v3133_v19 }
  0xc2   : > { %2325 = vmatpush1.msra.mxu1 %v32070_v22  ;;  %2074 = vmatprep.subr.mxu0 %v32074_v24 }
  0xc3   : > { %2327 = vmatprep.subr.mxu1 %v32074_v24  ;;  %2076 = vmatpush1.msra.mxu0 %v32081_v28 }
  0xc4   : > { %2109 = vmatprep.mubr.f32.mxu0 %v36351_v0  ;;  %2329 = vmatpush1.msra.mxu1 %v32081_v28 }
  0xc5   : > { %2115 = vmatmul.mubr.f32.vlgmr.msra.gmra.mxu0 %v31943_v38  ;;  %2243 = vmatprep.subr.mxu0 %v32079_v27 }
  0xc6   : > { %2362 = vmatprep.mubr.f32.mxu1 %v36351_v0  ;;  %2485 = vmatprep.subr.mxu1 %v32060_v16  ;;  %v32236_v16 = vsub.f32 %v354_v4, %v32218_v11 }
  0xc7   : > { %2246 = vmatpush1.msra.mxu0 %v32086_v29  ;;  %2366 = vmatmul.mubr.f32.vlgmr.msra.gmra.mxu1 %v31934_v26  ;;  %v3135_v29 = vand.u32 4294901760, %v3134_v23 }
  0xc8   : > { %2487 = vmatpush1.msra.mxu1 %v32070_v22  ;;  %2249 = vmatprep.subr.mxu0 %v32090_v30  ;;  %v3139_v21 = vand.u32 4294901760, %v32236_v16  ;;  %v3145_v22 = vand.u32 4294901760, %v32241_v17 }
  0xc9   : > { %2489 = vmatprep.subr.mxu1 %v32074_v24  ;;  %2252 = vmatpush1.msra.mxu0 %v32095_v32  ;;  %v3151_v24 = vand.u32 4294901760, %v32247_v20 }
  0xca   : > { %2285 = vmatprep.mubr.f32.mxu0 %v36351_v0  ;;  %2491 = vmatpush1.msra.mxu1 %v32081_v28  ;;  %v3140_v25 = vsub.f32 %v32236_v16, %v3139_v21  ;;  %v3146_v27 = vsub.f32 %v32241_v17, %v3145_v22  ;;  %v357_v28 = vld [vmem:[%s31883_s1 + $0x168] sm:$0xff] }
  0xcb   : > { %2288 = vmatmul.mubr.f32.vlgmr.msra.gmra.mxu0 %v31926_v18  ;;  %2403 = vmatprep.subr.mxu0 %v2151_v31  ;;  %v3152_v30 = vsub.f32 %v32247_v20, %v3151_v24  ;;  %v356_v31 = vld [vmem:[%s31883_s1 + $0x160] sm:$0xff] }
  0xcc   : > { %2524 = vmatprep.mubr.f32.mxu1 %v36351_v0  ;;  %2645 = vmatprep.subr.mxu1 %v2644_v2  ;;  %v3141_v32 = vand.u32 4294901760, %v3140_v25  ;;  %v3147_v35 = vand.u32 4294901760, %v3146_v27  ;;  %v32294_v39 = vand.u32 4294901760, %v356_v31 }
  0xcd   : > { %2407 = vmatpush1.msra.mxu0 %v2157_v33  ;;  %2526 = vmatmul.mubr.f32.vlgmr.msra.gmra.mxu1 %v31917_v12  ;;  %v32286_v33 = vand.u32 4294901760, %v357_v28  ;;  %v3153_v37 = vand.u32 4294901760, %v3152_v30 }
  0xce   : > { %2651 = vmatpush1.msra.mxu1 %v2650_v5  ;;  %2411 = vmatprep.subr.mxu0 %v2163_v34  ;;  %v325_v34 = vld [vmem:[%s31883_s1 + $0x68] sm:$0xff]  ;;  %v32312_v43 = vsub.f32 %v356_v31, %v32294_v39 }
  0xcf   : > { %2657 = vmatprep.subr.mxu1 %v2656_v8  ;;  %2415 = vmatpush1.msra.mxu0 %v2169_v36  ;;  %v324_v36 = vld [vmem:[%s31883_s1 + $0x60] sm:$0xff]  ;;  %v32299_v40 = vand.u32 4294901760, %v325_v34  ;;  %v32304_v41 = vsub.f32 %v357_v28, %v32286_v33 }
  0xd0   : > { %2448 = vmatprep.mubr.f32.mxu0 %v36351_v0  ;;  %2663 = vmatpush1.msra.mxu1 %v2662_v10  ;;  %v32306_v42 = vand.u32 4294901760, %v324_v36  ;;  %v3630_v47 = vand.u32 4294901760, %v32312_v43 }
  0xd1   : > { %2450 = vmatmul.mubr.f32.vlgmr.msra.gmra.mxu0 %v31917_v12  ;;  %2561 = vmatprep.subr.mxu0 %v32134_v45  ;;  %v32317_v44 = vsub.f32 %v325_v34, %v32299_v40 }
  0xd2   : > { %2696 = vmatprep.mubr.f32.mxu1 %v36351_v0  ;;  %2814 = vmatprep.subr.mxu1 %v32134_v45  ;;  %v32323_v46 = vsub.f32 %v324_v36, %v32306_v42 }
  0xd3   : > { %2563 = vmatpush1.msra.mxu0 %v32142_v50  ;;  %2698 = vmatmul.mubr.f32.vlgmr.msra.gmra.mxu1 %v31917_v12  ;;  %v3636_v48 = vand.u32 4294901760, %v32317_v44 }
  0xd4   : > { %2816 = vmatpush1.msra.mxu1 %v32142_v50  ;;  %2565 = vmatprep.subr.mxu0 %v32147_v51 }
  0xd5   : > { %2818 = vmatprep.subr.mxu1 %v32147_v51  ;;  %2567 = vmatpush1.msra.mxu0 %v32154_v53 }
  0xd6   : > { %2600 = vmatprep.mubr.f32.mxu0 %v36351_v0  ;;  %2820 = vmatpush1.msra.mxu1 %v32154_v53 }
  0xd7   : > { %2606 = vmatmul.mubr.f32.vlgmr.msra.gmra.mxu0 %v31943_v38  ;;  %2734 = vmatprep.subr.mxu0 %v32152_v52  ;;  %v3637_v52 = vsub.f32 %v32317_v44, %v3636_v48 }
  0xd8   : > { %2853 = vmatprep.mubr.f32.mxu1 %v36351_v0  ;;  %2976 = vmatprep.subr.mxu1 %v32134_v45  ;;  %v3624_v45 = vand.u32 4294901760, %v32304_v41 }
  0xd9   : > { %2737 = vmatpush1.msra.mxu0 %v32160_v54  ;;  %2857 = vmatmul.mubr.f32.vlgmr.msra.gmra.mxu1 %v31934_v26  ;;  %v3638_v60 = vand.u32 4294901760, %v3637_v52 }
  0xda   : > { %2978 = vmatpush1.msra.mxu1 %v32142_v50  ;;  %2740 = vmatprep.subr.mxu0 %v32165_v55  ;;  %v3625_v49 = vsub.f32 %v32304_v41, %v3624_v45  ;;  %v3642_v50 = vand.u32 4294901760, %v32323_v46 }
  0xdb   : > { %2980 = vmatprep.subr.mxu1 %v32147_v51  ;;  %2743 = vmatpush1.msra.mxu0 %v32171_v57  ;;  %v3631_v51 = vsub.f32 %v32312_v43, %v3630_v47 }
  0xdc   : > { %2776 = vmatprep.mubr.f32.mxu0 %v36351_v0  ;;  %2982 = vmatpush1.msra.mxu1 %v32154_v53  ;;  %v359_v53 = vld [vmem:[%s31883_s1 + $0x178] sm:$0xff]  ;;  %v3626_v54 = vand.u32 4294901760, %v3625_v49  ;;  %v3643_v55 = vsub.f32 %v32323_v46, %v3642_v50 }
  0xdd   : > { %2779 = vmatmul.mubr.f32.vlgmr.msra.gmra.mxu0 %v31926_v18  ;;  %2894 = vmatprep.subr.mxu0 %v2642_v56  ;;  %v358_v56 = vld [vmem:[%s31883_s1 + $0x170] sm:$0xff]  ;;  %v3632_v57 = vand.u32 4294901760, %v3631_v51 }
  0xde   : > { %3015 = vmatprep.mubr.f32.mxu1 %v36351_v0  ;;  %3136 = vmatprep.subr.mxu1 %v3135_v29  ;;  %v3644_v62 = vand.u32 4294901760, %v3643_v55  ;;  %v32370_v63 = vand.u32 4294901760, %v358_v56 }
  0xdf   : > { %2898 = vmatpush1.msra.mxu0 %v2648_v58  ;;  %3017 = vmatmul.mubr.f32.vlgmr.msra.gmra.mxu1 %v31917_v12  ;;  %v32362_v58 = vand.u32 4294901760, %v359_v53 }
  0xe0   : > { %3142 = vmatpush1.msra.mxu1 %v3141_v32  ;;  %2902 = vmatprep.subr.mxu0 %v2654_v59  ;;  %v327_v59 = vld [vmem:[%s31883_s1 + $0x78] sm:$0xff]  ;;  %v32388_v4 = vsub.f32 %v358_v56, %v32370_v63 }
  0xe1   : > { %3148 = vmatprep.subr.mxu1 %v3147_v35  ;;  %2906 = vmatpush1.msra.mxu0 %v2660_v61  ;;  %v326_v61 = vld [vmem:[%s31883_s1 + $0x70] sm:$0xff]  ;;  %v32375_v1 = vand.u32 4294901760, %v327_v59  ;;  %v32380_v2 = vsub.f32 %v359_v53, %v32362_v58 }
  0xe2   : > { %2939 = vmatprep.mubr.f32.mxu0 %v36351_v0  ;;  %3154 = vmatpush1.msra.mxu1 %v3153_v37  ;;  %v32382_v3 = vand.u32 4294901760, %v326_v61  ;;  %v4121_v8 = vand.u32 4294901760, %v32388_v4 }
  0xe3   : > { %2941 = vmatmul.mubr.f32.vlgmr.msra.gmra.mxu0 %v31917_v12  ;;  %3052 = vmatprep.subr.mxu0 %v32210_v6  ;;  %v32393_v5 = vsub.f32 %v327_v59, %v32375_v1 }
  0xe4   : > { %3187 = vmatprep.mubr.f32.mxu1 %v36351_v0  ;;  %3305 = vmatprep.subr.mxu1 %v32210_v6  ;;  %v32399_v7 = vsub.f32 %v326_v61, %v32382_v3 }
  0xe5   : > { %3054 = vmatpush1.msra.mxu0 %v32218_v11  ;;  %3189 = vmatmul.mubr.f32.vlgmr.msra.gmra.mxu1 %v31917_v12  ;;  %v4127_v9 = vand.u32 4294901760, %v32393_v5 }
  0xe6   : > { %3307 = vmatpush1.msra.mxu1 %v32218_v11  ;;  %3056 = vmatprep.subr.mxu0 %v32223_v13 }
  0xe7   : > { %3309 = vmatprep.subr.mxu1 %v32223_v13  ;;  %3058 = vmatpush1.msra.mxu0 %v32230_v15 }
  0xe8   : > { %3091 = vmatprep.mubr.f32.mxu0 %v36351_v0  ;;  %3311 = vmatpush1.msra.mxu1 %v32230_v15 }
  0xe9   : > { %3097 = vmatmul.mubr.f32.vlgmr.msra.gmra.mxu0 %v31943_v38  ;;  %3225 = vmatprep.subr.mxu0 %v32228_v14  ;;  %v4128_v14 = vsub.f32 %v32393_v5, %v4127_v9 }
  0xea   : > { %3344 = vmatprep.mubr.f32.mxu1 %v36351_v0  ;;  %3467 = vmatprep.subr.mxu1 %v32210_v6  ;;  %v4115_v6 = vand.u32 4294901760, %v32380_v2 }
  0xeb   : > { %3228 = vmatpush1.msra.mxu0 %v32236_v16  ;;  %3348 = vmatmul.mubr.f32.vlgmr.msra.gmra.mxu1 %v31934_v26  ;;  %v4129_v23 = vand.u32 4294901760, %v4128_v14 }
  0xec   : > { %3469 = vmatpush1.msra.mxu1 %v32218_v11  ;;  %3231 = vmatprep.subr.mxu0 %v32241_v17  ;;  %v4116_v10 = vsub.f32 %v32380_v2, %v4115_v6  ;;  %v4133_v11 = vand.u32 4294901760, %v32399_v7 }
  0xed   : > { %3471 = vmatprep.subr.mxu1 %v32223_v13  ;;  %3234 = vmatpush1.msra.mxu0 %v32247_v20  ;;  %v4122_v13 = vsub.f32 %v32388_v4, %v4121_v8 }
  0xee   : > { %3267 = vmatprep.mubr.f32.mxu0 %v36351_v0  ;;  %3473 = vmatpush1.msra.mxu1 %v32230_v15  ;;  %v361_v15 = vld [vmem:[%s31883_s1 + $0x188] sm:$0xff]  ;;  %v4117_v16 = vand.u32 4294901760, %v4116_v10  ;;  %v4134_v17 = vsub.f32 %v32399_v7, %v4133_v11 }
  0xef   : > { %3270 = vmatmul.mubr.f32.vlgmr.msra.gmra.mxu0 %v31926_v18  ;;  %3385 = vmatprep.subr.mxu0 %v3133_v19  ;;  %v360_v19 = vld [vmem:[%s31883_s1 + $0x180] sm:$0xff]  ;;  %v4123_v20 = vand.u32 4294901760, %v4122_v13 }
  0xf0   : > { %3506 = vmatprep.mubr.f32.mxu1 %v36351_v0  ;;  %3627 = vmatprep.subr.mxu1 %v3626_v54  ;;  %v4135_v25 = vand.u32 4294901760, %v4134_v17  ;;  %v32446_v27 = vand.u32 4294901760, %v360_v19 }
  0xf1   : > { %3389 = vmatpush1.msra.mxu0 %v3139_v21  ;;  %3508 = vmatmul.mubr.f32.vlgmr.msra.gmra.mxu1 %v31917_v12  ;;  %v32438_v21 = vand.u32 4294901760, %v361_v15 }
  0xf2   : > { %3633 = vmatpush1.msra.mxu1 %v3632_v57  ;;  %3393 = vmatprep.subr.mxu0 %v3145_v22  ;;  %v329_v22 = vld [vmem:[%s31883_s1 + $0x88] sm:$0xff]  ;;  %v32464_v31 = vsub.f32 %v360_v19, %v32446_v27 }
  0xf3   : > { %3639 = vmatprep.subr.mxu1 %v3638_v60  ;;  %3397 = vmatpush1.msra.mxu0 %v3151_v24  ;;  %v328_v24 = vld [vmem:[%s31883_s1 + $0x80] sm:$0xff]  ;;  %v32451_v28 = vand.u32 4294901760, %v329_v22  ;;  %v32456_v29 = vsub.f32 %v361_v15, %v32438_v21 }
  0xf4   : > { %3430 = vmatprep.mubr.f32.mxu0 %v36351_v0  ;;  %3645 = vmatpush1.msra.mxu1 %v3644_v62  ;;  %v32458_v30 = vand.u32 4294901760, %v328_v24  ;;  %v4612_v35 = vand.u32 4294901760, %v32464_v31 }
  0xf5   : > { %3432 = vmatmul.mubr.f32.vlgmr.msra.gmra.mxu0 %v31917_v12  ;;  %3543 = vmatprep.subr.mxu0 %v32286_v33  ;;  %v32469_v32 = vsub.f32 %v329_v22, %v32451_v28 }
  0xf6   : > { %3678 = vmatprep.mubr.f32.mxu1 %v36351_v0  ;;  %3796 = vmatprep.subr.mxu1 %v32286_v33  ;;  %v32475_v34 = vsub.f32 %v328_v24, %v32458_v30 }
  0xf7   : > { %3545 = vmatpush1.msra.mxu0 %v32294_v39  ;;  %3680 = vmatmul.mubr.f32.vlgmr.msra.gmra.mxu1 %v31917_v12  ;;  %v4618_v36 = vand.u32 4294901760, %v32469_v32 }
  0xf8   : > { %3798 = vmatpush1.msra.mxu1 %v32294_v39  ;;  %3547 = vmatprep.subr.mxu0 %v32299_v40 }
  0xf9   : > { %3800 = vmatprep.subr.mxu1 %v32299_v40  ;;  %3549 = vmatpush1.msra.mxu0 %v32306_v42 }
  0xfa   : > { %3582 = vmatprep.mubr.f32.mxu0 %v36351_v0  ;;  %3802 = vmatpush1.msra.mxu1 %v32306_v42 }
  0xfb   : > { %3588 = vmatmul.mubr.f32.vlgmr.msra.gmra.mxu0 %v31943_v38  ;;  %3716 = vmatprep.subr.mxu0 %v32304_v41  ;;  %v4619_v41 = vsub.f32 %v32469_v32, %v4618_v36 }
  0xfc   : > { %3835 = vmatprep.mubr.f32.mxu1 %v36351_v0  ;;  %3958 = vmatprep.subr.mxu1 %v32286_v33  ;;  %v4606_v33 = vand.u32 4294901760, %v32456_v29 }
  0xfd   : > { %3719 = vmatpush1.msra.mxu0 %v32312_v43  ;;  %3839 = vmatmul.mubr.f32.vlgmr.msra.gmra.mxu1 %v31934_v26  ;;  %v4620_v49 = vand.u32 4294901760, %v4619_v41 }
  0xfe   : > { %3960 = vmatpush1.msra.mxu1 %v32294_v39  ;;  %3722 = vmatprep.subr.mxu0 %v32317_v44  ;;  %v4607_v37 = vsub.f32 %v32456_v29, %v4606_v33  ;;  %v4624_v39 = vand.u32 4294901760, %v32475_v34 }
  0xff   : > { %3962 = vmatprep.subr.mxu1 %v32299_v40  ;;  %3725 = vmatpush1.msra.mxu0 %v32323_v46  ;;  %v4613_v40 = vsub.f32 %v32464_v31, %v4612_v35 }
 0x100   : > { %3758 = vmatprep.mubr.f32.mxu0 %v36351_v0  ;;  %3964 = vmatpush1.msra.mxu1 %v32306_v42  ;;  %v363_v42 = vld [vmem:[%s31883_s1 + $0x198] sm:$0xff]  ;;  %v4608_v43 = vand.u32 4294901760, %v4607_v37  ;;  %v4625_v44 = vsub.f32 %v32475_v34, %v4624_v39 }
 0x101   : > { %3761 = vmatmul.mubr.f32.vlgmr.msra.gmra.mxu0 %v31926_v18  ;;  %3876 = vmatprep.subr.mxu0 %v3624_v45  ;;  %v362_v45 = vld [vmem:[%s31883_s1 + $0x190] sm:$0xff]  ;;  %v4614_v46 = vand.u32 4294901760, %v4613_v40 }
 0x102   : > { %3997 = vmatprep.mubr.f32.mxu1 %v36351_v0  ;;  %4118 = vmatprep.subr.mxu1 %v4117_v16  ;;  %v4626_v51 = vand.u32 4294901760, %v4625_v44  ;;  %v32522_v52 = vand.u32 4294901760, %v362_v45 }
 0x103   : > { %3880 = vmatpush1.msra.mxu0 %v3630_v47  ;;  %3999 = vmatmul.mubr.f32.vlgmr.msra.gmra.mxu1 %v31917_v12  ;;  %v32514_v47 = vand.u32 4294901760, %v363_v42 }
 0x104   : > { %4124 = vmatpush1.msra.mxu1 %v4123_v20  ;;  %3884 = vmatprep.subr.mxu0 %v3636_v48  ;;  %v331_v48 = vld [vmem:[%s31883_s1 + $0x98] sm:$0xff]  ;;  %v32540_v56 = vsub.f32 %v362_v45, %v32522_v52 }
 0x105   : > { %4130 = vmatprep.subr.mxu1 %v4129_v23  ;;  %3888 = vmatpush1.msra.mxu0 %v3642_v50  ;;  %v330_v50 = vld [vmem:[%s31883_s1 + $0x90] sm:$0xff]  ;;  %v32527_v53 = vand.u32 4294901760, %v331_v48  ;;  %v32532_v54 = vsub.f32 %v363_v42, %v32514_v47 }
 0x106   : > { %3921 = vmatprep.mubr.f32.mxu0 %v36351_v0  ;;  %4136 = vmatpush1.msra.mxu1 %v4135_v25  ;;  %v32534_v55 = vand.u32 4294901760, %v330_v50  ;;  %v5103_v60 = vand.u32 4294901760, %v32540_v56 }
 0x107   : > { %3923 = vmatmul.mubr.f32.vlgmr.msra.gmra.mxu0 %v31917_v12  ;;  %4034 = vmatprep.subr.mxu0 %v32362_v58  ;;  %v32545_v57 = vsub.f32 %v331_v48, %v32527_v53 }
 0x108   : > { %4169 = vmatprep.mubr.f32.mxu1 %v36351_v0  ;;  %4287 = vmatprep.subr.mxu1 %v32362_v58  ;;  %v32551_v59 = vsub.f32 %v330_v50, %v32534_v55 }
 0x109   : > { %4036 = vmatpush1.msra.mxu0 %v32370_v63  ;;  %4171 = vmatmul.mubr.f32.vlgmr.msra.gmra.mxu1 %v31917_v12  ;;  %v5109_v61 = vand.u32 4294901760, %v32545_v57 }
 0x10a   : > { %4289 = vmatpush1.msra.mxu1 %v32370_v63  ;;  %4038 = vmatprep.subr.mxu0 %v32375_v1 }
 0x10b   : > { %4291 = vmatprep.subr.mxu1 %v32375_v1  ;;  %4040 = vmatpush1.msra.mxu0 %v32382_v3 }
 0x10c   : > { %4073 = vmatprep.mubr.f32.mxu0 %v36351_v0  ;;  %4293 = vmatpush1.msra.mxu1 %v32382_v3 }
 0x10d   : > { %4079 = vmatmul.mubr.f32.vlgmr.msra.gmra.mxu0 %v31943_v38  ;;  %4207 = vmatprep.subr.mxu0 %v32380_v2  ;;  %v5110_v2 = vsub.f32 %v32545_v57, %v5109_v61 }
 0x10e   : > { %4326 = vmatprep.mubr.f32.mxu1 %v36351_v0  ;;  %4449 = vmatprep.subr.mxu1 %v32362_v58  ;;  %v5097_v58 = vand.u32 4294901760, %v32532_v54 }
 0x10f   : > { %4210 = vmatpush1.msra.mxu0 %v32388_v4  ;;  %4330 = vmatmul.mubr.f32.vlgmr.msra.gmra.mxu1 %v31934_v26  ;;  %v5111_v10 = vand.u32 4294901760, %v5110_v2 }
 0x110   : > { %4451 = vmatpush1.msra.mxu1 %v32370_v63  ;;  %4213 = vmatprep.subr.mxu0 %v32393_v5  ;;  %v5098_v62 = vsub.f32 %v32532_v54, %v5097_v58  ;;  %v5115_v63 = vand.u32 4294901760, %v32551_v59 }
 0x111   : > { %4453 = vmatprep.subr.mxu1 %v32375_v1  ;;  %4216 = vmatpush1.msra.mxu0 %v32399_v7  ;;  %v5104_v1 = vsub.f32 %v32540_v56, %v5103_v60 }
 0x112   : > { %4249 = vmatprep.mubr.f32.mxu0 %v36351_v0  ;;  %4455 = vmatpush1.msra.mxu1 %v32382_v3  ;;  %v365_v3 = vld [vmem:[%s31883_s1 + $0x1a8] sm:$0xff]  ;;  %v5099_v4 = vand.u32 4294901760, %v5098_v62  ;;  %v5116_v5 = vsub.f32 %v32551_v59, %v5115_v63 }
 0x113   : > { %4252 = vmatmul.mubr.f32.vlgmr.msra.gmra.mxu0 %v31926_v18  ;;  %4367 = vmatprep.subr.mxu0 %v4115_v6  ;;  %v364_v6 = vld [vmem:[%s31883_s1 + $0x1a0] sm:$0xff]  ;;  %v5105_v7 = vand.u32 4294901760, %v5104_v1 }
 0x114   : > { %4488 = vmatprep.mubr.f32.mxu1 %v36351_v0  ;;  %4609 = vmatprep.subr.mxu1 %v4608_v43  ;;  %v5117_v13 = vand.u32 4294901760, %v5116_v5  ;;  %v32598_v14 = vand.u32 4294901760, %v364_v6 }
 0x115   : > { %4371 = vmatpush1.msra.mxu0 %v4121_v8  ;;  %4490 = vmatmul.mubr.f32.vlgmr.msra.gmra.mxu1 %v31917_v12  ;;  %v32590_v8 = vand.u32 4294901760, %v365_v3 }
 0x116   : > { %4615 = vmatpush1.msra.mxu1 %v4614_v46  ;;  %4375 = vmatprep.subr.mxu0 %v4127_v9  ;;  %v333_v9 = vld [vmem:[%s31883_s1 + $0xa8] sm:$0xff]  ;;  %v32616_v19 = vsub.f32 %v364_v6, %v32598_v14 }
 0x117   : > { %4621 = vmatprep.subr.mxu1 %v4620_v49  ;;  %4379 = vmatpush1.msra.mxu0 %v4133_v11  ;;  %v332_v11 = vld [vmem:[%s31883_s1 + $0xa0] sm:$0xff]  ;;  %v32603_v15 = vand.u32 4294901760, %v333_v9  ;;  %v32608_v16 = vsub.f32 %v365_v3, %v32590_v8 }
 0x118   : > { %4412 = vmatprep.mubr.f32.mxu0 %v36351_v0  ;;  %4627 = vmatpush1.msra.mxu1 %v4626_v51  ;;  %v32610_v17 = vand.u32 4294901760, %v332_v11  ;;  %v5594_v23 = vand.u32 4294901760, %v32616_v19 }
 0x119   : > { %4414 = vmatmul.mubr.f32.vlgmr.msra.gmra.mxu0 %v31917_v12  ;;  %4525 = vmatprep.subr.mxu0 %v32438_v21  ;;  %v32621_v20 = vsub.f32 %v333_v9, %v32603_v15 }
 0x11a   : > { %4660 = vmatprep.mubr.f32.mxu1 %v36351_v0  ;;  %4778 = vmatprep.subr.mxu1 %v32438_v21  ;;  %v32627_v22 = vsub.f32 %v332_v11, %v32610_v17 }
 0x11b   : > { %4527 = vmatpush1.msra.mxu0 %v32446_v27  ;;  %4662 = vmatmul.mubr.f32.vlgmr.msra.gmra.mxu1 %v31917_v12  ;;  %v5600_v24 = vand.u32 4294901760, %v32621_v20 }
 0x11c   : > { %4780 = vmatpush1.msra.mxu1 %v32446_v27  ;;  %4529 = vmatprep.subr.mxu0 %v32451_v28 }
 0x11d   : > { %4782 = vmatprep.subr.mxu1 %v32451_v28  ;;  %4531 = vmatpush1.msra.mxu0 %v32458_v30 }
 0x11e   : > { %4564 = vmatprep.mubr.f32.mxu0 %v36351_v0  ;;  %4784 = vmatpush1.msra.mxu1 %v32458_v30 }
 0x11f   : > { %4570 = vmatmul.mubr.f32.vlgmr.msra.gmra.mxu0 %v31943_v38  ;;  %4698 = vmatprep.subr.mxu0 %v32456_v29  ;;  %v5601_v29 = vsub.f32 %v32621_v20, %v5600_v24 }
 0x120   : > { %4817 = vmatprep.mubr.f32.mxu1 %v36351_v0  ;;  %4940 = vmatprep.subr.mxu1 %v32438_v21  ;;  %v5588_v21 = vand.u32 4294901760, %v32608_v16 }
 0x121   : > { %4701 = vmatpush1.msra.mxu0 %v32464_v31  ;;  %4821 = vmatmul.mubr.f32.vlgmr.msra.gmra.mxu1 %v31934_v26  ;;  %v5602_v37 = vand.u32 4294901760, %v5601_v29 }
 0x122   : > { %4942 = vmatpush1.msra.mxu1 %v32446_v27  ;;  %4704 = vmatprep.subr.mxu0 %v32469_v32  ;;  %v5589_v25 = vsub.f32 %v32608_v16, %v5588_v21  ;;  %v5606_v27 = vand.u32 4294901760, %v32627_v22 }
 0x123   : > { %4944 = vmatprep.subr.mxu1 %v32451_v28  ;;  %4707 = vmatpush1.msra.mxu0 %v32475_v34  ;;  %v5595_v28 = vsub.f32 %v32616_v19, %v5594_v23 }
 0x124   : > { %4740 = vmatprep.mubr.f32.mxu0 %v36351_v0  ;;  %4946 = vmatpush1.msra.mxu1 %v32458_v30  ;;  %v367_v30 = vld [vmem:[%s31883_s1 + $0x1b8] sm:$0xff]  ;;  %v5590_v31 = vand.u32 4294901760, %v5589_v25  ;;  %v5607_v32 = vsub.f32 %v32627_v22, %v5606_v27 }
 0x125   : > { %4743 = vmatmul.mubr.f32.vlgmr.msra.gmra.mxu0 %v31926_v18  ;;  %4858 = vmatprep.subr.mxu0 %v4606_v33  ;;  %v366_v33 = vld [vmem:[%s31883_s1 + $0x1b0] sm:$0xff]  ;;  %v5596_v34 = vand.u32 4294901760, %v5595_v28 }
 0x126   : > { %4979 = vmatprep.mubr.f32.mxu1 %v36351_v0  ;;  %5100 = vmatprep.subr.mxu1 %v5099_v4  ;;  %v5608_v40 = vand.u32 4294901760, %v5607_v32  ;;  %v32674_v41 = vand.u32 4294901760, %v366_v33 }
 0x127   : > { %4862 = vmatpush1.msra.mxu0 %v4612_v35  ;;  %4981 = vmatmul.mubr.f32.vlgmr.msra.gmra.mxu1 %v31917_v12  ;;  %v32666_v35 = vand.u32 4294901760, %v367_v30 }
 0x128   : > { %5106 = vmatpush1.msra.mxu1 %v5105_v7  ;;  %4866 = vmatprep.subr.mxu0 %v4618_v36  ;;  %v335_v36 = vld [vmem:[%s31883_s1 + $0xb8] sm:$0xff]  ;;  %v32692_v45 = vsub.f32 %v366_v33, %v32674_v41 }
 0x129   : > { %5112 = vmatprep.subr.mxu1 %v5111_v10  ;;  %4870 = vmatpush1.msra.mxu0 %v4624_v39  ;;  %v334_v39 = vld [vmem:[%s31883_s1 + $0xb0] sm:$0xff]  ;;  %v32679_v42 = vand.u32 4294901760, %v335_v36  ;;  %v32684_v43 = vsub.f32 %v367_v30, %v32666_v35 }
 0x12a   : > { %4903 = vmatprep.mubr.f32.mxu0 %v36351_v0  ;;  %5118 = vmatpush1.msra.mxu1 %v5117_v13  ;;  %v32686_v44 = vand.u32 4294901760, %v334_v39  ;;  %v6085_v49 = vand.u32 4294901760, %v32692_v45 }
 0x12b   : > { %4905 = vmatmul.mubr.f32.vlgmr.msra.gmra.mxu0 %v31917_v12  ;;  %5016 = vmatprep.subr.mxu0 %v32514_v47  ;;  %v32697_v46 = vsub.f32 %v335_v36, %v32679_v42 }
 0x12c   : > { %5151 = vmatprep.mubr.f32.mxu1 %v36351_v0  ;;  %5269 = vmatprep.subr.mxu1 %v32514_v47  ;;  %v32703_v48 = vsub.f32 %v334_v39, %v32686_v44 }
 0x12d   : > { %5018 = vmatpush1.msra.mxu0 %v32522_v52  ;;  %5153 = vmatmul.mubr.f32.vlgmr.msra.gmra.mxu1 %v31917_v12  ;;  %v6091_v50 = vand.u32 4294901760, %v32697_v46 }
 0x12e   : > { %5271 = vmatpush1.msra.mxu1 %v32522_v52  ;;  %5020 = vmatprep.subr.mxu0 %v32527_v53 }
 0x12f   : > { %5273 = vmatprep.subr.mxu1 %v32527_v53  ;;  %5022 = vmatpush1.msra.mxu0 %v32534_v55 }
 0x130   : > { %5055 = vmatprep.mubr.f32.mxu0 %v36351_v0  ;;  %5275 = vmatpush1.msra.mxu1 %v32534_v55 }
 0x131   : > { %5061 = vmatmul.mubr.f32.vlgmr.msra.gmra.mxu0 %v31943_v38  ;;  %5189 = vmatprep.subr.mxu0 %v32532_v54  ;;  %v6092_v54 = vsub.f32 %v32697_v46, %v6091_v50 }
 0x132   : > { %5308 = vmatprep.mubr.f32.mxu1 %v36351_v0  ;;  %5431 = vmatprep.subr.mxu1 %v32514_v47  ;;  %v6079_v47 = vand.u32 4294901760, %v32684_v43 }
 0x133   : > { %5192 = vmatpush1.msra.mxu0 %v32540_v56  ;;  %5312 = vmatmul.mubr.f32.vlgmr.msra.gmra.mxu1 %v31934_v26  ;;  %v6093_v62 = vand.u32 4294901760, %v6092_v54 }
 0x134   : > { %5433 = vmatpush1.msra.mxu1 %v32522_v52  ;;  %5195 = vmatprep.subr.mxu0 %v32545_v57  ;;  %v6080_v51 = vsub.f32 %v32684_v43, %v6079_v47  ;;  %v6097_v52 = vand.u32 4294901760, %v32703_v48 }
 0x135   : > { %5435 = vmatprep.subr.mxu1 %v32527_v53  ;;  %5198 = vmatpush1.msra.mxu0 %v32551_v59  ;;  %v6086_v53 = vsub.f32 %v32692_v45, %v6085_v49 }
 0x136   : > { %5231 = vmatprep.mubr.f32.mxu0 %v36351_v0  ;;  %5437 = vmatpush1.msra.mxu1 %v32534_v55  ;;  %v369_v55 = vld [vmem:[%s31883_s1 + $0x1c8] sm:$0xff]  ;;  %v6081_v56 = vand.u32 4294901760, %v6080_v51  ;;  %v6098_v57 = vsub.f32 %v32703_v48, %v6097_v52 }
 0x137   : > { %5234 = vmatmul.mubr.f32.vlgmr.msra.gmra.mxu0 %v31926_v18  ;;  %5349 = vmatprep.subr.mxu0 %v5097_v58  ;;  %v368_v58 = vld [vmem:[%s31883_s1 + $0x1c0] sm:$0xff]  ;;  %v6087_v59 = vand.u32 4294901760, %v6086_v53 }
 0x138   : > { %5470 = vmatprep.mubr.f32.mxu1 %v36351_v0  ;;  %5591 = vmatprep.subr.mxu1 %v5590_v31  ;;  %v6099_v1 = vand.u32 4294901760, %v6098_v57  ;;  %v32750_v2 = vand.u32 4294901760, %v368_v58  ;;  %v370_v31 = vld [vmem:[%s31883_s1 + $0x1d0] sm:$0xff] }
 0x139   : > { %5353 = vmatpush1.msra.mxu0 %v5103_v60  ;;  %5472 = vmatmul.mubr.f32.vlgmr.msra.gmra.mxu1 %v31917_v12  ;;  %v32742_v60 = vand.u32 4294901760, %v369_v55 }
 0x13a   : > { %5597 = vmatpush1.msra.mxu1 %v5596_v34  ;;  %5357 = vmatprep.subr.mxu0 %v5109_v61  ;;  %v337_v61 = vld [vmem:[%s31883_s1 + $0xc8] sm:$0xff]  ;;  %v32770_v7 = vsub.f32 %v368_v58, %v32750_v2  ;;  %v339_v34 = vld [vmem:[%s31883_s1 + $0xd8] sm:$0xff] }
 0x13b   : > { %5603 = vmatprep.subr.mxu1 %v5602_v37  ;;  %5361 = vmatpush1.msra.mxu0 %v5115_v63  ;;  %v336_v63 = vld [vmem:[%s31883_s1 + $0xc0] sm:$0xff]  ;;  %v32755_v3 = vand.u32 4294901760, %v337_v61  ;;  %v32760_v4 = vsub.f32 %v369_v55, %v32742_v60  ;;  %v338_v37 = vld [vmem:[%s31883_s1 + $0xd0] sm:$0xff] }
 0x13c   : > { %5394 = vmatprep.mubr.f32.mxu0 %v36351_v0  ;;  %5609 = vmatpush1.msra.mxu1 %v5608_v40  ;;  %v32762_v5 = vand.u32 4294901760, %v336_v63  ;;  %v32846_v40 = vand.u32 4294901760, %v370_v31 }
 0x13d   : > { %5396 = vmatmul.mubr.f32.vlgmr.msra.gmra.mxu0 %v31917_v12  ;;  %5507 = vmatprep.subr.mxu0 %v32590_v8  ;;  %v32779_v10 = vsub.f32 %v337_v61, %v32755_v3  ;;  %v6570_v11 = vand.u32 4294901760, %v32760_v4 }
 0x13e   : > { %5642 = vmatprep.mubr.f32.mxu1 %v36351_v0  ;;  %5760 = vmatprep.subr.mxu1 %v32590_v8  ;;  %v32785_v13 = vsub.f32 %v336_v63, %v32762_v5 }
 0x13f   : > { %5509 = vmatpush1.msra.mxu0 %v32598_v14  ;;  %5644 = vmatmul.mubr.f32.vlgmr.msra.gmra.mxu1 %v31917_v12 }
 0x140   : > { %5762 = vmatpush1.msra.mxu1 %v32598_v14  ;;  %5511 = vmatprep.subr.mxu0 %v32603_v15 }
 0x141   : > { %5764 = vmatprep.subr.mxu1 %v32603_v15  ;;  %5513 = vmatpush1.msra.mxu0 %v32610_v17 }
 0x142   : > { %5546 = vmatprep.mubr.f32.mxu0 %v36351_v0  ;;  %5766 = vmatpush1.msra.mxu1 %v32610_v17 }
 0x143   : > { %5552 = vmatmul.mubr.f32.vlgmr.msra.gmra.mxu0 %v31943_v38  ;;  %5680 = vmatprep.subr.mxu0 %v32608_v16  ;;  %v6576_v16 = vand.u32 4294901760, %v32770_v7 }
 0x144   : > { %5799 = vmatprep.mubr.f32.mxu1 %v36351_v0  ;;  %5922 = vmatprep.subr.mxu1 %v32590_v8 }
 0x145   : > { %5683 = vmatpush1.msra.mxu0 %v32616_v19  ;;  %5803 = vmatmul.mubr.f32.vlgmr.msra.gmra.mxu1 %v31934_v26  ;;  %v6571_v19 = vsub.f32 %v32760_v4, %v6570_v11 }
 0x146   : > { %5924 = vmatpush1.msra.mxu1 %v32598_v14  ;;  %5686 = vmatprep.subr.mxu0 %v32621_v20  ;;  %v6588_v20 = vand.u32 4294901760, %v32785_v13 }
 0x147   : > { %5926 = vmatprep.subr.mxu1 %v32603_v15  ;;  %5689 = vmatpush1.msra.mxu0 %v32627_v22  ;;  %v6572_v28 = vand.u32 4294901760, %v6571_v19 }
 0x148   : > { %5722 = vmatprep.mubr.f32.mxu0 %v36351_v0  ;;  %5928 = vmatpush1.msra.mxu1 %v32610_v17  ;;  %v6582_v17 = vand.u32 4294901760, %v32779_v10  ;;  %v6589_v29 = vsub.f32 %v32785_v13, %v6588_v20 }
 0x149   : > { %5725 = vmatmul.mubr.f32.vlgmr.msra.gmra.mxu0 %v31926_v18  ;;  %5840 = vmatprep.subr.mxu0 %v5588_v21 }
 0x14a   : > { %5961 = vmatprep.mubr.f32.mxu1 %v36351_v0  ;;  %6082 = vmatprep.subr.mxu1 %v6081_v56  ;;  %v6583_v25 = vsub.f32 %v32779_v10, %v6582_v17  ;;  %v6590_v39 = vand.u32 4294901760, %v6589_v29  ;;  %v341_v29 = vld [vmem:[%s31883_s1 + $0xe8] sm:$0xff] }
 0x14b   : > { %5844 = vmatpush1.msra.mxu0 %v5594_v23  ;;  %5963 = vmatmul.mubr.f32.vlgmr.msra.gmra.mxu1 %v31917_v12  ;;  %v6577_v23 = vsub.f32 %v32770_v7, %v6576_v16 }
 0x14c   : > { %6088 = vmatpush1.msra.mxu1 %v6087_v59  ;;  %5848 = vmatprep.subr.mxu0 %v5600_v24  ;;  %v32764_v6 = vpop.f32.mrf.mxu0  ;;  %v6584_v36 = vand.u32 4294901760, %v6583_v25  ;;  %v372_v25 = vld [vmem:[%s31883_s1 + $0x1e0] sm:$0xff] }
 0x14d   : > { %6094 = vmatprep.subr.mxu1 %v6093_v62  ;;  %5852 = vmatpush1.msra.mxu0 %v5606_v27  ;;  %v371_v27 = vld [vmem:[%s31883_s1 + $0x1d8] sm:$0xff]  ;;  %v6578_v32 = vand.u32 4294901760, %v6577_v23 }
 0x14e   : > { %5885 = vmatprep.mubr.f32.mxu0 %v36351_v0  ;;  %6100 = vmatpush1.msra.mxu1 %v6099_v1  ;;  %v32772_v8 = vpop.f32.mrf.mxu0  ;;  %v32774_v9 = vpop.f32.mrf.mxu1  ;;  %v32836_v33 = vand.u32 4294901760, %v371_v27  ;;  %v373_v1 = vld [vmem:[%s31883_s1 + $0x1e8] sm:$0xff] }
 0x14f   : > { %5887 = vmatmul.mubr.f32.vlgmr.msra.gmra.mxu0 %v31917_v12  ;;  %5998 = vmatprep.subr.mxu0 %v32666_v35 }
 0x150   : > { %6133 = vmatprep.mubr.f32.mxu1 %v36351_v0  ;;  %6251 = vmatprep.subr.mxu1 %v32666_v35  ;;  %v32787_v14 = vpop.f32.mrf.mxu0  ;;  %v32789_v15 = vpop.f32.mrf.mxu1 }
 0x151   : > { %6000 = vmatpush1.msra.mxu0 %v32674_v41  ;;  %6135 = vmatmul.mubr.f32.vlgmr.msra.gmra.mxu1 %v31917_v12 }
 0x152   : > { %6253 = vmatpush1.msra.mxu1 %v32674_v41  ;;  %6002 = vmatprep.subr.mxu0 %v32679_v42  ;;  %v32805_v21 = vpop.f32.mrf.mxu0 }
 0x153   : > { %6255 = vmatprep.subr.mxu1 %v32679_v42  ;;  %6004 = vmatpush1.msra.mxu0 %v32686_v44 }
 0x154   : > { %6037 = vmatprep.mubr.f32.mxu0 %v36351_v0  ;;  %6257 = vmatpush1.msra.mxu1 %v32686_v44  ;;  %v32807_v22 = vpop.f32.mrf.mxu1 }
 0x155   : > { %6043 = vmatmul.mubr.f32.vlgmr.msra.gmra.mxu0 %v31943_v38  ;;  %6171 = vmatprep.subr.mxu0 %v32684_v43  ;;  %v32858_v43 = vsub.f32 %v371_v27, %v32836_v33 }
 0x156   : > { %6290 = vmatprep.mubr.f32.mxu1 %v36351_v0  ;;  %6413 = vmatprep.subr.mxu1 %v32666_v35  ;;  %v32816_v24 = vpop.f32.mrf.mxu1  ;;  %v32829_v30 = vpop.f32.mrf.mxu0 }
 0x157   : > { %6174 = vmatpush1.msra.mxu0 %v32692_v45  ;;  %6294 = vmatmul.mubr.f32.vlgmr.msra.gmra.mxu1 %v31934_v26  ;;  %v32870_v45 = vsub.f32 %v370_v31, %v32846_v40  ;;  %v404_v31 = vlaneseq }
 0x158   : > { %6415 = vmatpush1.msra.mxu1 %v32674_v41  ;;  %6177 = vmatprep.subr.mxu0 %v32697_v46  ;;  %v32848_v41 = vpop.f32.mrf.mxu0 }
 0x159   : > { %6417 = vmatprep.subr.mxu1 %v32679_v42  ;;  %6180 = vmatpush1.msra.mxu0 %v32703_v48  ;;  %v32853_v42 = vand.u32 4294901760, %v339_v34  ;;  %v36349_v48 = vand.u32 4294901760, %v32858_v43  ;;  %v36348_v54 = vand.u32 4294901760, %v32870_v45 }
 0x15a   : > { %6213 = vmatprep.mubr.f32.mxu0 %v36351_v0  ;;  %6419 = vmatpush1.msra.mxu1 %v32686_v44  ;;  %v32839_v35 = vpop.f32.mrf.mxu1  ;;  %v32860_v44 = vand.u32 4294901760, %v338_v37 }
 0x15b   : > { %6216 = vmatmul.mubr.f32.vlgmr.msra.gmra.mxu0 %v31926_v18  ;;  %6331 = vmatprep.subr.mxu0 %v6079_v47  ;;  %v7062_v57 = vsub.f32 %v32858_v43, %v36349_v48  ;;  %v7068_v61 = vsub.f32 %v32870_v45, %v36348_v54  ;;  %v375_v54 = vld [vmem:[%s31883_s1 + $0x1f8] sm:$0xff] }
 0x15c   : > { %6452 = vmatprep.mubr.f32.mxu1 %v36351_v0  ;;  %6573 = vmatprep.subr.mxu1 %v6572_v28  ;;  %v32862_v47 = vpop.f32.mrf.mxu1  ;;  %v32937_v28 = vand.u32 4294901760, %v373_v1 }
 0x15d   : > { %6335 = vmatpush1.msra.mxu0 %v6085_v49  ;;  %6454 = vmatmul.mubr.f32.vlgmr.msra.gmra.mxu1 %v31917_v12  ;;  %v32877_v49 = vsub.f32 %v339_v34, %v32853_v42 }
 0x15e   : > { %6579 = vmatpush1.msra.mxu1 %v6578_v32  ;;  %6339 = vmatprep.subr.mxu0 %v6091_v50  ;;  %v32864_v51 = vpop.f32.mrf.mxu0  ;;  %v340_v32 = vld [vmem:[%s31883_s1 + $0xe0] sm:$0xff] }
 0x15f   : > { %6585 = vmatprep.subr.mxu1 %v6584_v36  ;;  %6343 = vmatpush1.msra.mxu0 %v6097_v52  ;;  %v32885_v52 = vsub.f32 %v338_v37, %v32860_v44  ;;  %v36347_v55 = vand.u32 4294901760, %v32877_v49  ;;  %v32953_v37 = vand.u32 4294901760, %v372_v25 }
 0x160   : > { %6376 = vmatprep.mubr.f32.mxu0 %v36351_v0  ;;  %6591 = vmatpush1.msra.mxu1 %v6590_v39  ;;  %v32872_v46 = vpop.f32.mrf.mxu1  ;;  %v32879_v50 = vpop.f32.mrf.mxu0  ;;  %v32958_v39 = vand.u32 4294901760, %v341_v29 }
 0x161   : > { %6378 = vmatmul.mubr.f32.vlgmr.msra.gmra.mxu0 %v31917_v12  ;;  %6489 = vmatprep.subr.mxu0 %v32742_v60  ;;  %v36345_v58 = vand.u32 4294901760, %v32885_v52  ;;  %v7074_v63 = vsub.f32 %v32877_v49, %v36347_v55 }
 0x162   : > { %6624 = vmatprep.mubr.f32.mxu1 %v36351_v0  ;;  %6742 = vmatprep.subr.mxu1 %v32742_v60  ;;  %v32887_v53 = vpop.f32.mrf.mxu1 }
 0x163   : > { %6491 = vmatpush1.msra.mxu0 %v32750_v2  ;;  %6626 = vmatmul.mubr.f32.vlgmr.msra.gmra.mxu1 %v31917_v12  ;;  %v7080_v23 = vsub.f32 %v32885_v52, %v36345_v58 }
 0x164   : > { %6744 = vmatpush1.msra.mxu1 %v32750_v2  ;;  %6493 = vmatprep.subr.mxu0 %v32755_v3  ;;  %v32897_v56 = vpop.f32.mrf.mxu0 }
 0x165   : > { %6746 = vmatprep.subr.mxu1 %v32755_v3  ;;  %6495 = vmatpush1.msra.mxu0 %v32762_v5  ;;  %v7081_v36 = vand.u32 4294901760, %v7080_v23 }
 0x166   : > { %6528 = vmatprep.mubr.f32.mxu0 %v36351_v0  ;;  %6748 = vmatpush1.msra.mxu1 %v32762_v5  ;;  %v32905_v59 = vpop.f32.mrf.mxu1  ;;  %v32923_v19 = vpop.f32.mrf.mxu0 }
 0x167   : > { %6534 = vmatmul.mubr.f32.vlgmr.msra.gmra.mxu0 %v31943_v38  ;;  %6662 = vmatprep.subr.mxu0 %v32760_v4 }
 0x168   : > { %6781 = vmatprep.mubr.f32.mxu1 %v36351_v0  ;;  %6904 = vmatprep.subr.mxu1 %v32742_v60  ;;  %v32914_v62 = vpop.f32.mrf.mxu1  ;;  %v7063_v60 = vand.u32 4294901760, %v7062_v57  ;;  %v32969_v57 = vand.u32 4294901760, %v340_v32 }
 0x169   : > { %6665 = vmatpush1.msra.mxu0 %v32770_v7  ;;  %6785 = vmatmul.mubr.f32.vlgmr.msra.gmra.mxu1 %v31934_v26 }
 0x16a   : > { %6906 = vmatpush1.msra.mxu1 %v32750_v2  ;;  %6668 = vmatprep.subr.mxu0 %v32779_v10  ;;  %v7069_v2 = vand.u32 4294901760, %v7068_v61  ;;  %v32948_v34 = vpop.f32.mrf.mxu0  ;;  %v32971_v61 = vshrl.u32 %v404_v31, 7  ;;  %v32981_v10 = vsub.f32 %v372_v25, %v32953_v37 }
 0x16b   : > { %6908 = vmatprep.subr.mxu1 %v32755_v3  ;;  %6671 = vmatpush1.msra.mxu0 %v32785_v13  ;;  %v32933_v27 = vpop.f32.mrf.mxu1  ;;  %v7075_v3 = vand.u32 4294901760, %v7074_v63 }
 0x16c   : > { %6704 = vmatprep.mubr.f32.mxu0 %v36351_v0  ;;  %6910 = vmatpush1.msra.mxu1 %v32762_v5  ;;  %v32975_v7 = vpop.f32.mrf.mxu0 }
 0x16d   : > { %6707 = vmatmul.mubr.f32.vlgmr.msra.gmra.mxu0 %v31926_v18  ;;  %6822 = vmatprep.subr.mxu0 %v6570_v11  ;;  %v32950_v5 = vpop.f32.mrf.mxu1  ;;  %v32967_v11 = vsub.f32 %v373_v1, %v32937_v28  ;;  %v32997_v1 = vsub.s32 1, %v32971_v61 }
 0x16e   : > { %6943 = vmatprep.mubr.f32.mxu1 %v36351_v0  ;;  %7064 = vmatprep.subr.mxu1 %v7063_v60  ;;  %v33004_v60 = vld [vmem:[%s33001_s9] ss:$2 sm:$0xff] }
 0x16f   : > { %6826 = vmatpush1.msra.mxu0 %v6576_v16  ;;  %6945 = vmatmul.mubr.f32.vlgmr.msra.gmra.mxu1 %v31917_v12  ;;  %v32962_v4 = vpop.f32.mrf.mxu1  ;;  %v36346_v13 = vand.u32 4294901760, %v32967_v11  ;;  %36396 = vst [vmem:[#allocation19_spill] sm:$0xff] %v32997_v1 }
 0x170   : > { %36394 = vst [vmem:[#allocation17_spill] sm:$0xff] %v32962_v4  ;;  %7070 = vmatpush1.msra.mxu1 %v7069_v2  ;;  %6830 = vmatprep.subr.mxu0 %v6582_v17  ;;  %v32986_v17 = vsub.f32 %v341_v29, %v32958_v39  ;;  %v36350_v2 = vand.u32 4294901760, %v32981_v10  ;;  %v36405_v4 = vand.u32 4294901760, %v32858_v43 }
 0x171   : > { %7076 = vmatprep.subr.mxu1 %v7075_v3  ;;  %6834 = vmatpush1.msra.mxu0 %v6588_v20  ;;  %v32977_v16 = vpop.f32.mrf.mxu1  ;;  %v32994_v20 = vsub.f32 %v340_v32, %v32969_v57  ;;  %v7553_v3 = vsub.f32 %v32967_v11, %v36346_v13 }
 0x172   : > { %6867 = vmatprep.mubr.f32.mxu0 %v36351_v0  ;;  %7082 = vmatpush1.msra.mxu1 %v7081_v36  ;;  %v36355_v29 = vand.u32 4294901760, %v32986_v17  ;;  %v411_v36 = vrot.slane %v33004_v60, %v32997_v1  ;;  %v7559_v13 = vsub.f32 %v32981_v10, %v36350_v2  ;;  %v33051_v1 = vsub.s32 0, %v32971_v61 }
 0x173   : > { %6869 = vmatmul.mubr.f32.vlgmr.msra.gmra.mxu0 %v31917_v12  ;;  %6980 = vmatprep.subr.mxu0 %v32836_v33  ;;  %v32988_v63 = vpop.f32.mrf.mxu0  ;;  %v36401_v2 = vand.u32 4294901760, %v32994_v20 }
 0x174   : > { %36395 = vst [vmem:[#allocation18_spill] sm:$0xff] %v32988_v63  ;;  %7115 = vmatprep.mubr.f32.mxu1 %v36351_v0  ;;  %7233 = vmatprep.subr.mxu1 %v32836_v33  ;;  %v7565_v55 = vsub.f32 %v32986_v17, %v36355_v29  ;;  %36402 = vst [vmem:[#allocation24_spill] sm:$0xff] %v33051_v1  ;;  %v374_v29 = vld [vmem:[%s31883_s1 + $0x1f0] sm:$0xff] }
 0x175   : > { %6982 = vmatpush1.msra.mxu0 %v32846_v40  ;;  %7117 = vmatmul.mubr.f32.vlgmr.msra.gmra.mxu1 %v31917_v12  ;;  %v33006_v23 = vpop.f32.mrf.mxu0  ;;  %v33008_v25 = vpop.f32.mrf.mxu1 }
 0x176   : > { %36397 = vst [vmem:[#allocation20_spill] sm:$0xff] %v33008_v25  ;;  %7235 = vmatpush1.msra.mxu1 %v32846_v40  ;;  %6984 = vmatprep.subr.mxu0 %v32853_v42  ;;  %v646_v25 = vadd.f32 %v32772_v8, %v411_v36  ;;  %v7566_v8 = vand.u32 4294901760, %v7565_v55  ;;  %v33067_v36 = vand.u32 4294901760, %v374_v29 }
 0x177   : > { %7237 = vmatprep.subr.mxu1 %v32853_v42  ;;  %6986 = vmatpush1.msra.mxu0 %v32860_v44  ;;  %v33016_v31 = vpop.f32.mrf.mxu1 }
 0x178   : > { %36398 = vst [vmem:[#allocation21_spill] sm:$0xff] %v33016_v31  ;;  %7019 = vmatprep.mubr.f32.mxu0 %v36351_v0  ;;  %7239 = vmatpush1.msra.mxu1 %v32860_v44  ;;  %v36406_v31 = vand.u32 4294901760, %v32870_v45 }
 0x179   : > { %7025 = vmatmul.mubr.f32.vlgmr.msra.gmra.mxu0 %v31943_v38  ;;  %7153 = vmatprep.subr.mxu0 %v32858_v43  ;;  %v33028_v58 = vpop.f32.mrf.mxu0 }
 0x17a   : > { %36399 = vst [vmem:[#allocation22_spill] sm:$0xff] %v33028_v58  ;;  %7272 = vmatprep.mubr.f32.mxu1 %v36351_v0  ;;  %7395 = vmatprep.subr.mxu1 %v32836_v33  ;;  %v7554_v33 = vand.u32 4294901760, %v7553_v3  ;;  %v7571_v0 = vsub.f32 %v32994_v20, %v36401_v2  ;;  %v7560_v3 = vand.u32 4294901760, %v7559_v13  ;;  %v33061_v58 = vand.u32 4294901760, %v375_v54  ;;  %v343_v2 = vld [vmem:[%s31883_s1 + $0xf8] sm:$0xff] }
 0x17b   : > { %7156 = vmatpush1.msra.mxu0 %v32870_v45  ;;  %7276 = vmatmul.mubr.f32.vlgmr.msra.gmra.mxu1 %v31934_v26  ;;  %v33041_v48 = vpop.f32.mrf.mxu0  ;;  %v33043_v32 = vpop.f32.mrf.mxu1  ;;  %v738_v13 = vadd.f32 %v32789_v15, %v646_v25  ;;  %v33079_v43 = vand.u32 4294901760, %v343_v2  ;;  %v36408_v15 = vand.u32 4294901760, %v32885_v52  ;;  %v33095_v45 = vsub.f32 %v374_v29, %v33067_v36 }
 0x17c   : > { %36400 = vst [vmem:[#allocation23_spill] sm:$0xff] %v33043_v32  ;;  %7397 = vmatpush1.msra.mxu1 %v32846_v40  ;;  %7159 = vmatprep.subr.mxu0 %v32877_v49  ;;  %v36404_v40 = vmov 0.0  }
 0x17d   : > { %7399 = vmatprep.subr.mxu1 %v32853_v42  ;;  %7162 = vmatpush1.msra.mxu0 %v32885_v52  ;;  %v33057_v32 = vpop.f32.mrf.mxu1  ;;  %v342_v42 = vld [vmem:[%s31883_s1 + $0xf0] sm:$0xff] }
 0x17e   : > { %36403 = vst [vmem:[#allocation25_spill] sm:$0xff] %v33057_v32  ;;  %7195 = vmatprep.mubr.f32.mxu0 %v36404_v40  ;;  %7401 = vmatpush1.msra.mxu1 %v32860_v44  ;;  %v7572_v32 = vand.u32 4294901760, %v7571_v0  ;;  %v407_v44 = vrot.slane %v33004_v60, %v33051_v1  ;;  %v33088_v0 = vsub.f32 %v375_v54, %v33061_v58  ;;  %v33090_v1 = vand.u32 4294901760, %v342_v42 }
 0x17f   : > { %7198 = vmatmul.mubr.f32.vlgmr.msra.gmra.mxu0 %v31926_v18  ;;  %7313 = vmatprep.subr.mxu0 %v36405_v4  ;;  %v33070_v63 = vpop.f32.mrf.mxu0  ;;  %v33105_v54 = vsub.f32 %v343_v2, %v33079_v43 }
 0x180   : > { %7434 = vmatprep.mubr.f32.mxu1 %v36404_v40  ;;  %7555 = vmatprep.subr.mxu1 %v7554_v33  ;;  %v36407_v33 = vand.u32 4294901760, %v32877_v49  ;;  %v644_v49 = vadd.f32 %v32764_v6, %v407_v44  ;;  %v36359_v29 = vand.u32 4294901760, %v33088_v0  ;;  %v36358_v6 = vand.u32 4294901760, %v33095_v45 }
 0x181   : > { %7317 = vmatpush1.msra.mxu0 %v36406_v31  ;;  %7436 = vmatmul.mubr.f32.vlgmr.msra.gmra.mxu1 %v31917_v12  ;;  %v33081_v55 = vpop.f32.mrf.mxu0  ;;  %v33083_v4 = vpop.f32.mrf.mxu1  ;;  %v819_v31 = vadd.f32 %v32805_v21, %v738_v13 }
 0x182   : > { %7561 = vmatpush1.msra.mxu1 %v7560_v3  ;;  %7321 = vmatprep.subr.mxu0 %v36407_v33  ;;  %v736_v2 = vadd.f32 %v32774_v9, %v644_v49  ;;  %v8044_v13 = vsub.f32 %v33088_v0, %v36359_v29  ;;  %v31339_v29 = vld [vmem:[%s31895_s10 + $0x8] sm:$0xff] }
 0x183   : > { %7567 = vmatprep.subr.mxu1 %v7566_v8  ;;  %7325 = vmatpush1.msra.mxu0 %v36408_v15  ;;  %v33097_v25 = vpop.f32.mrf.mxu1  ;;  %v897_v8 = vadd.f32 %v32816_v24, %v819_v31  ;;  %v8050_v24 = vsub.f32 %v33095_v45, %v36358_v6  ;;  %v33149_v31 = vsub.s32 3, %v32971_v61 }
 0x184   : > { %7358 = vmatprep.mubr.f32.mxu0 %v36404_v40  ;;  %7573 = vmatpush1.msra.mxu1 %v7572_v32  ;;  %v33113_v32 = vsub.f32 %v342_v42, %v33090_v1  ;;  %v36360_v42 = vand.u32 4294901760, %v33105_v54  ;;  %v817_v15 = vadd.f32 %v32787_v14, %v736_v2  ;;  %v8045_v14 = vand.u32 4294901760, %v8044_v13 }
 0x185   : > { %7360 = vmatmul.mubr.f32.vlgmr.msra.gmra.mxu0 %v31917_v12  ;;  %7471 = vmatprep.subr.mxu0 %v32937_v28  ;;  %v33107_v52 = vpop.f32.mrf.mxu0  ;;  %v981_v49 = vadd.f32 %v32848_v41, %v897_v8  ;;  %v8051_v2 = vand.u32 4294901760, %v8050_v24 }
 0x186   : > { %7606 = vmatprep.mubr.f32.mxu1 %v36404_v40  ;;  %7724 = vmatprep.subr.mxu1 %v32937_v28  ;;  %v8056_v6 = vsub.f32 %v33105_v54, %v36360_v42  ;;  %v36411_v41 = vand.u32 4294901760, %v33113_v32  ;;  %v33173_v42 = vand.u32 4294901760, %v31339_v29 }
 0x187   : > { %7473 = vmatpush1.msra.mxu0 %v32953_v37  ;;  %7608 = vmatmul.mubr.f32.vlgmr.msra.gmra.mxu1 %v31917_v12  ;;  %v33118_v21 = vpop.f32.mrf.mxu0  ;;  %v33120_v3 = vpop.f32.mrf.mxu1  ;;  %v1057_v13 = vadd.f32 %v32862_v47, %v981_v49  ;;  %v9480_v47 = vld [vmem:[%s31895_s10] sm:$0xff] }
 0x188   : > { %36409 = vst [vmem:[#allocation26_spill] sm:$0xff] %v33120_v3  ;;  %7726 = vmatpush1.msra.mxu1 %v32953_v37  ;;  %7475 = vmatprep.subr.mxu0 %v32958_v39  ;;  %v8057_v24 = vand.u32 4294901760, %v8056_v6 }
 0x189   : > { %7728 = vmatprep.subr.mxu1 %v32958_v39  ;;  %7477 = vmatpush1.msra.mxu0 %v32969_v57  ;;  %v33129_v44 = vpop.f32.mrf.mxu1 }
 0x18a   : > { %7510 = vmatprep.mubr.f32.mxu0 %v36404_v40  ;;  %7730 = vmatpush1.msra.mxu1 %v32969_v57 }
 0x18b   : > { %7516 = vmatmul.mubr.f32.vlgmr.msra.gmra.mxu0 %v31943_v38  ;;  %7644 = vmatprep.subr.mxu0 %v32967_v11  ;;  %v33142_v33 = vpop.f32.mrf.mxu0 }
 0x18c   : > { %7763 = vmatprep.mubr.f32.mxu1 %v36404_v40  ;;  %7886 = vmatprep.subr.mxu1 %v32937_v28  ;;  %v8062_v28 = vsub.f32 %v33113_v32, %v36411_v41  ;;  %v419_v41 = vrot.slane %v33004_v60, %v33149_v31 }
 0x18d   : > { %7647 = vmatpush1.msra.mxu0 %v32981_v10  ;;  %7767 = vmatmul.mubr.f32.vlgmr.msra.gmra.mxu1 %v31934_v26  ;;  %v33157_v9 = vpop.f32.mrf.mxu0  ;;  %v33159_v3 = vpop.f32.mrf.mxu1 }
 0x18e   : > { %36410 = vst [vmem:[#allocation27_spill] sm:$0xff] %v33159_v3  ;;  %7888 = vmatpush1.msra.mxu1 %v32953_v37  ;;  %7650 = vmatprep.subr.mxu0 %v32986_v17  ;;  %v895_v37 = vadd.f32 %v32807_v22, %v817_v15  ;;  %v36413_v22 = vand.u32 4294901760, %v32981_v10  ;;  %v1137_v10 = vadd.f32 %v32879_v50, %v419_v41 }
 0x18f   : > { %7890 = vmatprep.subr.mxu1 %v32958_v39  ;;  %7653 = vmatpush1.msra.mxu0 %v32994_v20  ;;  %v33168_v8 = vpop.f32.mrf.mxu1  ;;  %v36412_v39 = vand.u32 4294901760, %v32967_v11  ;;  %v36414_v11 = vand.u32 4294901760, %v32986_v17 }
 0x190   : > { %7686 = vmatprep.mubr.f32.mxu0 %v36404_v40  ;;  %7892 = vmatpush1.msra.mxu1 %v32969_v57  ;;  %v8063_v57 = vand.u32 4294901760, %v8062_v28  ;;  %v979_v6 = vadd.f32 %v32829_v30, %v895_v37  ;;  %v36415_v28 = vand.u32 4294901760, %v32994_v20 }
 0x191   : > { %7689 = vmatmul.mubr.f32.vlgmr.msra.gmra.mxu0 %v31926_v18  ;;  %7804 = vmatprep.subr.mxu0 %v36412_v39  ;;  %v33181_v3 = vpop.f32.mrf.mxu0  ;;  %v33196_v39 = vsub.f32 %v31339_v29, %v33173_v42  ;;  %v1229_v29 = vadd.f32 %v32887_v53, %v1137_v10  ;;  %v33231_v53 = vsub.s32 2, %v32971_v61 }
 0x192   : > { %7925 = vmatprep.mubr.f32.mxu1 %v36404_v40  ;;  %8046 = vmatprep.subr.mxu1 %v8045_v14  ;;  %v8425_v14 = vmax.f32 %v1057_v13, 0.0  ;;  %v1055_v50 = vadd.f32 %v32839_v35, %v979_v6 }
 0x193   : > { %7808 = vmatpush1.msra.mxu0 %v36413_v22  ;;  %7927 = vmatmul.mubr.f32.vlgmr.msra.gmra.mxu1 %v31917_v12  ;;  %v33188_v15 = vpop.f32.mrf.mxu0  ;;  %v33190_v49 = vpop.f32.mrf.mxu1  ;;  %v36361_v17 = vand.u32 4294901760, %v33196_v39 }
 0x194   : > { %8052 = vmatpush1.msra.mxu1 %v8051_v2  ;;  %7812 = vmatprep.subr.mxu0 %v36414_v11  ;;  %v33204_v2 = vand.u32 4294901760, %v9480_v47  ;;  %v33214_v20 = vand.u32 4294901760, %v8425_v14  ;;  %v1310_v11 = vadd.f32 %v32923_v19, %v1229_v29 }
 0x195   : > { %8058 = vmatprep.subr.mxu1 %v8057_v24  ;;  %7816 = vmatpush1.msra.mxu0 %v36415_v28  ;;  %v33201_v22 = vpop.f32.mrf.mxu1  ;;  %v8424_v24 = vmax.f32 %v1055_v50, 0.0 }
 0x196   : > { %7849 = vmatprep.mubr.f32.mxu0 %v36404_v40  ;;  %8064 = vmatpush1.msra.mxu1 %v8063_v57  ;;  %v33226_v35 = vsub.f32 %v9480_v47, %v33204_v2  ;;  %v10931_v57 = vsub.f32 %v33196_v39, %v36361_v17  ;;  %v33241_v47 = vsub.f32 %v8425_v14, %v33214_v20  ;;  %v31341_v17 = vld [vmem:[%s31895_s10 + $0x18] sm:$0xff] }
 0x197   : > { %7851 = vmatmul.mubr.f32.vlgmr.msra.gmra.mxu0 %v31917_v12  ;;  %7962 = vmatprep.subr.mxu0 %v33061_v58  ;;  %v33208_v30 = vpop.f32.mrf.mxu0  ;;  %v415_v14 = vrot.slane %v33004_v60, %v33231_v53  ;;  %v33261_v28 = vand.u32 4294901760, %v8424_v24  ;;  %v1388_v29 = vadd.f32 %v32914_v62, %v1310_v11 }
 0x198   : > { %8097 = vmatprep.mubr.f32.mxu1 %v36404_v40  ;;  %8215 = vmatprep.subr.mxu1 %v33061_v58  ;;  %v36362_v10 = vand.u32 4294901760, %v33226_v35  ;;  %v10745_v50 = vand.u32 4294901760, %v33241_v47 }
 0x199   : > { %7964 = vmatpush1.msra.mxu0 %v33067_v36  ;;  %8099 = vmatmul.mubr.f32.vlgmr.msra.gmra.mxu1 %v31917_v12  ;;  %v33219_v37 = vpop.f32.mrf.mxu0  ;;  %v33221_v13 = vpop.f32.mrf.mxu1  ;;  %v1135_v62 = vadd.f32 %v32864_v51, %v415_v14  ;;  %v33281_v11 = vsub.f32 %v8424_v24, %v33261_v28  ;;  %v36418_v24 = vand.u32 4294901760, %v33105_v54 }
 0x19a   : > { %8217 = vmatpush1.msra.mxu1 %v33067_v36  ;;  %7966 = vmatprep.subr.mxu0 %v33079_v43 }
 0x19b   : > { %8219 = vmatprep.subr.mxu1 %v33079_v43  ;;  %7968 = vmatpush1.msra.mxu0 %v33090_v1  ;;  %v33233_v41 = vpop.f32.mrf.mxu1 }
 0x19c   : > { %8001 = vmatprep.mubr.f32.mxu0 %v36404_v40  ;;  %8221 = vmatpush1.msra.mxu1 %v33090_v1 }
 0x19d   : > { %8007 = vmatmul.mubr.f32.vlgmr.msra.gmra.mxu0 %v31943_v38  ;;  %8135 = vmatprep.subr.mxu0 %v33088_v0  ;;  %v33246_v6 = vpop.f32.mrf.mxu0 }
 0x19e   : > { %8254 = vmatprep.mubr.f32.mxu1 %v36404_v40  ;;  %8377 = vmatprep.subr.mxu1 %v33061_v58  ;;  %v10932_v58 = vand.u32 4294901760, %v10931_v57  ;;  %v36416_v57 = vand.u32 4294901760, %v33088_v0 }
 0x19f   : > { %8138 = vmatpush1.msra.mxu0 %v33095_v45  ;;  %8258 = vmatmul.mubr.f32.vlgmr.msra.gmra.mxu1 %v31934_v26  ;;  %v33255_v19 = vpop.f32.mrf.mxu0  ;;  %v33257_v38 = vpop.f32.mrf.mxu1 }
 0x1a0   : > { %8379 = vmatpush1.msra.mxu1 %v33067_v36  ;;  %8141 = vmatprep.subr.mxu0 %v33105_v54  ;;  %v10949_v36 = vsub.f32 %v33226_v35, %v36362_v10  ;;  %v1472_v10 = vadd.f32 %v32975_v7, %v1388_v29  ;;  %v33300_v7 = vand.u32 4294901760, %v31341_v17  ;;  %v10751_v29 = vand.u32 4294901760, %v33281_v11 }
 0x1a1   : > { %8381 = vmatprep.subr.mxu1 %v33079_v43  ;;  %8144 = vmatpush1.msra.mxu0 %v33113_v32  ;;  %v33267_v26 = vpop.f32.mrf.mxu1  ;;  %v1227_v54 = vadd.f32 %v32872_v46, %v1135_v62 }
 0x1a2   : > { %8177 = vmatprep.mubr.f32.mxu0 %v36404_v40  ;;  %8383 = vmatpush1.msra.mxu1 %v33090_v1  ;;  %v10746_v1 = vsub.f32 %v33241_v47, %v10745_v50  ;;  %v10950_v14 = vand.u32 4294901760, %v10949_v36  ;;  %v1548_v36 = vadd.f32 %v32950_v5, %v1472_v10  ;;  %v10752_v10 = vsub.f32 %v33281_v11, %v10751_v29 }
 0x1a3   : > { %8180 = vmatmul.mubr.f32.vlgmr.msra.gmra.mxu0 %v31926_v18  ;;  %8295 = vmatprep.subr.mxu0 %v36416_v57  ;;  %v33278_v43 = vpop.f32.mrf.mxu0  ;;  %v36417_v18 = vand.u32 4294901760, %v33095_v45  ;;  %v1308_v62 = vadd.f32 %v32897_v56, %v1227_v54 }
 0x1a4   : > { %8416 = vmatprep.mubr.f32.mxu1 %v36404_v40  ;;  %10933 = vmatprep.subr.mxu1 %v10932_v58  ;;  %v36419_v58 = vand.u32 4294901760, %v33113_v32  ;;  %v10747_v57 = vand.u32 4294901760, %v10746_v1  ;;  %v31340_v1 = vld [vmem:[%s31895_s10 + $0x10] sm:$0xff]  ;;  %v10753_v56 = vand.u32 4294901760, %v10752_v10 }
 0x1a5   : > { %8299 = vmatpush1.msra.mxu0 %v36417_v18  ;;  %8418 = vmatmul.mubr.f32.vlgmr.msra.gmra.mxu1 %v31917_v12  ;;  %v33290_v0 = vpop.f32.mrf.mxu0  ;;  %v33292_v51 = vpop.f32.mrf.mxu1  ;;  %v8427_v18 = vmax.f32 %v1548_v36, 0.0 }
 0x1a6   : > { %10939 = vmatpush1.xpose.msra.mxu1 %v36404_v40  ;;  %8303 = vmatprep.subr.mxu0 %v36418_v24 }
 0x1a7   : > { %8307 = vmatpush1.msra.mxu0 %v36419_v58  ;;  %8340 = vmatprep.mubr.f32.mxu0 %v36404_v40  ;;  %v33302_v45 = vpop.f32.mrf.mxu1  ;;  %v33339_v54 = vand.u32 4294901760, %v8427_v18 }
 0x1a8   : > { %8342 = vmatmul.mubr.f32.vlgmr.msra.gmra.mxu0 %v31917_v12  ;;  %10945 = vmatprep.subr.mxu1 %v36404_v40  ;;  %v33317_v12 = vsub.f32 %v31341_v17, %v33300_v7  ;;  %v33330_v17 = vand.u32 4294901760, %v31340_v1 }
 0x1a9   : > { %10672 = vmatprep.subr.mxu0 %v33173_v42  ;;  %11145 = vmatprep.mubr.f32.mxu1 %v33214_v20  ;;  %v33311_v32 = vpop.f32.mrf.mxu0 }
 0x1aa   : > { %10951 = vmatpush1.xpose.msra.mxu1 %v10950_v14  ;;  %10674 = vmatpush1.xpose.msra.mxu0 %v36404_v40  ;;  %v36363_v14 = vand.u32 4294901760, %v33317_v12 }
 0x1ab   : > { %11413 = vmatprep.subr.mxu1 %v33173_v42  ;;  %10676 = vmatprep.subr.mxu0 %v36404_v40  ;;  %v33320_v46 = vpop.f32.mrf.mxu0  ;;  %v33322_v5 = vpop.f32.mrf.mxu1 }
 0x1ac   : > { %36420 = vst [vmem:[#allocation28_spill] sm:$0xff] %v33322_v5  ;;  %10748 = vmatprep.mubr.f32.mxu0 %v10747_v57  ;;  %v1386_v57 = vadd.f32 %v32905_v59, %v1308_v62  ;;  %v33347_v5 = vsub.f32 %v31340_v1, %v33330_v17  ;;  %v12191_v59 = vsub.f32 %v33317_v12, %v36363_v14 }
 0x1ad   : > { %11147 = vmatmul.mubr.f32.vlgmr.msra.gmra.mxu1 %v33261_v28  ;;  %v33327_v24 = vpop.f32.mrf.mxu1 }
 0x1ae   : > { %11415 = vmatpush1.xpose.msra.mxu1 %v36404_v40  ;;  %11487 = vmatprep.mubr.f32.mxu1 %v10745_v50  ;;  %v1470_v62 = vadd.f32 %v32948_v34, %v1386_v57 }
 0x1af   : > { %11417 = vmatprep.subr.mxu1 %v36404_v40  ;;  %10678 = vmatpush1.xpose.msra.mxu0 %v33204_v2  ;;  %v33335_v58 = vpop.f32.mrf.mxu0 }
 0x1b0   : > { %11239 = vmatprep.subr.mxu0 %v33196_v39 }
 0x1b1   : > { %v33341_v36 = vpop.f32.mrf.mxu0  ;;  %v33343_v50 = vpop.f32.mrf.mxu1 }
 0x1b2   : > { %36421 = vst [vmem:[#allocation29_spill] sm:$0xff] %v33343_v50  ;;  %11419 = vmatpush1.xpose.msra.mxu1 %v33204_v2  ;;  %10754 = vmatmul.mubr.f32.vlgmr.msra.gmra.mxu0 %v10753_v56  ;;  %v33360_v56 = vsub.f32 %v8427_v18, %v33339_v54  ;;  %v36423_v18 = vand.u32 4294901760, %v33196_v39 }
 0x1b3   : > { %11819 = vmatprep.subr.mxu1 %v33173_v42  ;;  %11242 = vmatpush1.xpose.msra.mxu0 %v36404_v40  ;;  %v33354_v10 = vpop.f32.mrf.mxu1  ;;  %v36364_v42 = vand.u32 4294901760, %v33347_v5 }
 0x1b4   : > { %11347 = vmatprep.mubr.f32.mxu0 %v33241_v47  ;;  %11245 = vmatprep.subr.mxu0 %v36404_v40  ;;  %v12192_v47 = vand.u32 4294901760, %v12191_v59  ;;  %v12029_v57 = vand.u32 4294901760, %v33360_v56 }
 0x1b5   : > { %11491 = vmatmul.mubr.f32.vlgmr.msra.gmra.mxu1 %v10751_v29  ;;  %v33362_v1 = vpop.f32.mrf.mxu0  ;;  %v1546_v29 = vadd.f32 %v32933_v27, %v1470_v62  ;;  %v12209_v59 = vsub.f32 %v33347_v5, %v36364_v42 }
 0x1b6   : > { %11821 = vmatpush1.xpose.msra.mxu1 %v36404_v40  ;;  %11891 = vmatprep.mubr.f32.mxu1 %v33214_v20  ;;  %v12030_v39 = vsub.f32 %v33360_v56, %v12029_v57 }
 0x1b7   : > { %11823 = vmatprep.subr.mxu1 %v36404_v40  ;;  %11248 = vmatpush1.xpose.msra.mxu0 %v33226_v35  ;;  %v33369_v14 = vpop.f32.mrf.mxu0  ;;  %v33371_v34 = vpop.f32.mrf.mxu1  ;;  %v8426_v27 = vmax.f32 %v1546_v29, 0.0  ;;  %v12210_v62 = vand.u32 4294901760, %v12209_v59 }
 0x1b8   : > { %36422 = vst [vmem:[#allocation30_spill] sm:$0xff] %v33371_v34  ;;  %11612 = vmatprep.subr.mxu0 %v36423_v18  ;;  %v12031_v42 = vand.u32 4294901760, %v12030_v39 }
 0x1b9   : > { %v33377_v50 = vpop.f32.mrf.mxu1  ;;  %v33405_v29 = vand.u32 4294901760, %v8426_v27 }
 0x1ba   : > { %36424 = vst [vmem:[#allocation31_spill] sm:$0xff] %v33377_v50  ;;  %11825 = vmatpush1.xpose.msra.mxu1 %v33204_v2  ;;  %11350 = vmatmul.mubr.f32.vlgmr.msra.gmra.mxu0 %v33281_v11 }
 0x1bb   : > { %12193 = vmatprep.subr.mxu1 %v12192_v47  ;;  %11616 = vmatpush1.xpose.msra.mxu0 %v36404_v40  ;;  %v33385_v34 = vpop.f32.mrf.mxu0  ;;  %v33397_v47 = vsub.s32 5, %v32971_v61 }
 0x1bc   : > { %36425 = vst [vmem:[#allocation32_spill] sm:$0xff] %v33385_v34  ;;  %11754 = vmatprep.mubr.f32.mxu0 %v33214_v20  ;;  %11620 = vmatprep.subr.mxu0 %v36404_v40  ;;  %v36429_v20 = vand.u32 4294901760, %v33226_v35  ;;  %v33420_v34 = vsub.f32 %v8426_v27, %v33405_v29  ;;  %v33434_v27 = vsub.s32 6, %v32971_v61 }
 0x1bd   : > { %11893 = vmatmul.mubr.f32.vlgmr.msra.gmra.mxu1 %v33261_v28  ;;  %v33391_v2 = vpop.f32.mrf.mxu0  ;;  %v33393_v11 = vpop.f32.mrf.mxu1  ;;  %36428 = vst [vmem:[#allocation35_spill] sm:$0xff] %v33397_v47  ;;  %v427_v59 = vrot.slane %v33004_v60, %v33397_v47  ;;  %v36441_v47 = vld [vmem:[#allocation21_spill] sm:$0xff] }
 0x1be   : > { %36426 = vst [vmem:[#allocation33_spill] sm:$0xff] %v33391_v2  ;;  %36427 = vst [vmem:[#allocation34_spill] sm:$0xff] %v33393_v11  ;;  %12199 = vmatpush1.xpose.msra.mxu1 %v36404_v40  ;;  %12429 = vmatprep.mubr.f32.mxu1 %v33339_v54 }
 0x1bf   : > { %12205 = vmatprep.subr.mxu1 %v36404_v40  ;;  %11624 = vmatpush1.xpose.msra.mxu0 %v36429_v20  ;;  %v33403_v18 = vpop.f32.mrf.mxu1 }
 0x1c0   : > { %36430 = vst [vmem:[#allocation36_spill] sm:$0xff] %v33403_v18  ;;  %11948 = vmatprep.subr.mxu0 %v33300_v7 }
 0x1c1   : > { %v33408_v11 = vpop.f32.mrf.mxu0 }
 0x1c2   : > { %36431 = vst [vmem:[#allocation37_spill] sm:$0xff] %v33408_v11  ;;  %12211 = vmatpush1.xpose.msra.mxu1 %v12210_v62  ;;  %11756 = vmatmul.mubr.f32.vlgmr.msra.gmra.mxu0 %v33261_v28  ;;  %v1628_v28 = vadd.f32 %v33006_v23, %v427_v59 }
 0x1c3   : > { %12217 = vmatprep.subr.mxu1 %v36404_v40  ;;  %11950 = vmatpush1.xpose.msra.mxu0 %v36404_v40  ;;  %v33415_v35 = vpop.f32.mrf.mxu0  ;;  %v33417_v20 = vpop.f32.mrf.mxu1 }
 0x1c4   : > { %36432 = vst [vmem:[#allocation38_spill] sm:$0xff] %v33415_v35  ;;  %36433 = vst [vmem:[#allocation39_spill] sm:$0xff] %v33417_v20  ;;  %11952 = vmatprep.subr.mxu0 %v36404_v40  ;;  %12032 = vmatprep.mubr.f32.mxu0 %v12031_v42  ;;  %v33437_v42 = vld [vmem:[%s33001_s9 + $0x10] ss:$2 sm:$0xff]  ;;  %v1720_v23 = vadd.f32 %v32977_v16, %v1628_v28 }
 0x1c5   : > { %v33423_v39 = vpop.f32.mrf.mxu1  ;;  %v463_v59 = vrot.slane %v33437_v42, %v33434_v27 }
 0x1c6   : > { %36434 = vst [vmem:[#allocation40_spill] sm:$0xff] %v33423_v39  ;;  %12223 = vmatpush1.xpose.msra.mxu1 %v36404_v40  ;;  %v1801_v28 = vadd.f32 %v33041_v48, %v1720_v23  ;;  %v33468_v23 = vsub.s32 4, %v32971_v61 }
 0x1c7   : > { %12229 = vmatprep.subr.mxu1 %v36404_v40  ;;  %11954 = vmatpush1.xpose.msra.mxu0 %v33330_v17  ;;  %v33429_v62 = vpop.f32.mrf.mxu0 }
 0x1c8   : > { %36435 = vst [vmem:[#allocation41_spill] sm:$0xff] %v33429_v62  ;;  %11956 = vmatprep.subr.mxu0 %v36404_v40  ;;  %v36438_v62 = vand.u32 4294901760, %v33420_v34  ;;  %v1879_v48 = vadd.f32 %v36441_v47, %v1801_v28 }
 0x1c9   : > { %v33439_v11 = vpop.f32.mrf.mxu0  ;;  %v4172_v39 = vpop.f32.mrf.mxu1 }
 0x1ca   : > { %36436 = vst [vmem:[#allocation42_spill] sm:$0xff] %v33439_v11  ;;  %12235 = vmatpush1.xpose.msra.mxu1 %v36404_v40  ;;  %v12036_v18 = vsub.f32 %v33420_v34, %v36438_v62 }
 0x1cb   : > { %12689 = vmatprep.subr.mxu1 %v33300_v7  ;;  %11958 = vmatpush1.xpose.msra.mxu0 %v36404_v40  ;;  %v33447_v20 = vpop.f32.mrf.mxu1 }
 0x1cc   : > { %36437 = vst [vmem:[#allocation43_spill] sm:$0xff] %v33447_v20  ;;  %11960 = vmatprep.subr.mxu0 %v36404_v40  ;;  %v12037_v62 = vand.u32 4294901760, %v12036_v18 }
 0x1cd   : > { %12431 = vmatmul.mubr.f32.vlgmr.msra.gmra.mxu1 %v33405_v29  ;;  %v4080_v16 = vpop.f32.mrf.mxu0 }
 0x1ce   : > { %12691 = vmatpush1.xpose.msra.mxu1 %v36404_v40  ;;  %12771 = vmatprep.mubr.f32.mxu1 %v12029_v57  ;;  %v4081_v11 = vadd.f32 %v4080_v16, %v463_v59  ;;  %v1963_v59 = vadd.f32 %v33081_v55, %v1879_v48 }
 0x1cf   : > { %12693 = vmatprep.subr.mxu1 %v36404_v40  ;;  %11962 = vmatpush1.xpose.msra.mxu0 %v36404_v40  ;;  %v33458_v20 = vpop.f32.mrf.mxu0  ;;  %v4331_v35 = vpop.f32.mrf.mxu1 }
 0x1d0   : > { %36439 = vst [vmem:[#allocation44_spill] sm:$0xff] %v33458_v20  ;;  %12511 = vmatprep.subr.mxu0 %v33317_v12  ;;  %v4173_v50 = vadd.f32 %v4172_v39, %v4081_v11  ;;  %v31343_v11 = vld [vmem:[%s31895_s10 + $0x28] sm:$0xff] }
 0x1d1   : > { %v33461_v2 = vpop.f32.mrf.mxu1  ;;  %v33479_v28 = vand.u32 4294901760, %v31343_v11 }
 0x1d2   : > { %36440 = vst [vmem:[#allocation45_spill] sm:$0xff] %v33461_v2  ;;  %12695 = vmatpush1.xpose.msra.mxu1 %v33330_v17  ;;  %12038 = vmatmul.mubr.f32.vlgmr.msra.gmra.mxu0 %v12037_v62 }
 0x1d3   : > { %12697 = vmatprep.subr.mxu1 %v36404_v40  ;;  %12514 = vmatpush1.xpose.msra.mxu0 %v36404_v40  ;;  %v4253_v57 = vpop.f32.mrf.mxu0 }
 0x1d4   : > { %12631 = vmatprep.mubr.f32.mxu0 %v33360_v56  ;;  %12517 = vmatprep.subr.mxu0 %v36404_v40  ;;  %v4254_v18 = vadd.f32 %v4253_v57, %v4173_v50  ;;  %v423_v50 = vrot.slane %v33004_v60, %v33468_v23  ;;  %v36444_v57 = vld [vmem:[#allocation25_spill] sm:$0xff] }
 0x1d5   : > { %v33473_v39 = vpop.f32.mrf.mxu0  ;;  %v4491_v47 = vpop.f32.mrf.mxu1  ;;  %v2039_v55 = vadd.f32 %v36444_v57, %v1963_v59 }
 0x1d6   : > { %36442 = vst [vmem:[#allocation21_spill] sm:$0xff] %v33473_v39  ;;  %12699 = vmatpush1.xpose.msra.mxu1 %v36404_v40  ;;  %v4332_v16 = vadd.f32 %v4331_v35, %v4254_v18  ;;  %v33491_v35 = vsub.f32 %v31343_v11, %v33479_v28  ;;  %v31342_v18 = vld [vmem:[%s31895_s10 + $0x20] sm:$0xff]  ;;  %v36446_v39 = vld [vmem:[#allocation18_spill] sm:$0xff] }
 0x1d7   : > { %12701 = vmatprep.subr.mxu1 %v36404_v40  ;;  %12520 = vmatpush1.xpose.msra.mxu0 %v33347_v5  ;;  %v33481_v56 = vpop.f32.mrf.mxu1  ;;  %v1626_v20 = vadd.f32 %v36446_v39, %v423_v50  ;;  %v33508_v11 = vand.u32 4294901760, %v31342_v18  ;;  %v36449_v50 = vld [vmem:[#allocation17_spill] sm:$0xff] }
 0x1d8   : > { %36443 = vst [vmem:[#allocation46_spill] sm:$0xff] %v33481_v56  ;;  %12523 = vmatprep.subr.mxu0 %v36404_v40  ;;  %v36367_v39 = vand.u32 4294901760, %v33491_v35 }
 0x1d9   : > { %v4415_v62 = vpop.f32.mrf.mxu0  ;;  %v1718_v57 = vadd.f32 %v36449_v50, %v1626_v20  ;;  %v36453_v50 = vld [vmem:[#allocation22_spill] sm:$0xff] }
 0x1da   : > { %12703 = vmatpush1.xpose.msra.mxu1 %v36404_v40  ;;  %v4416_v48 = vadd.f32 %v4415_v62, %v4332_v16  ;;  %v36447_v16 = vand.u32 4294901760, %v33420_v34  ;;  %v8429_v62 = vmax.f32 %v2039_v55, 0.0 }
 0x1db   : > { %13095 = vmatprep.subr.mxu1 %v33300_v7  ;;  %12526 = vmatpush1.xpose.msra.mxu0 %v36404_v40  ;;  %v33494_v56 = vpop.f32.mrf.mxu0  ;;  %v33496_v2 = vpop.f32.mrf.mxu1 }
 0x1dc   : > { %36445 = vst [vmem:[#allocation25_spill] sm:$0xff] %v33496_v2  ;;  %12529 = vmatprep.subr.mxu0 %v36404_v40  ;;  %v33500_v59 = vadd.f32 %v4491_v47, %v4416_v48  ;;  %v36450_v48 = vand.u32 4294901760, %v33317_v12  ;;  %v33522_v2 = vand.u32 4294901760, %v8429_v62  ;;  %v13451_v12 = vsub.f32 %v33491_v35, %v36367_v39 }
 0x1dd   : > { %12775 = vmatmul.mubr.f32.vlgmr.msra.gmra.mxu1 %v36447_v16  ;;  %v33504_v7 = vpop.f32.mrf.mxu1  ;;  %v36455_v39 = vand.u32 4294901760, %v33347_v5 }
 0x1de   : > { %36448 = vst [vmem:[#allocation18_spill] sm:$0xff] %v33504_v7  ;;  %13097 = vmatpush1.xpose.msra.mxu1 %v36404_v40  ;;  %13175 = vmatprep.mubr.f32.mxu1 %v33339_v54  ;;  %v33527_v7 = vsub.f32 %v31342_v18, %v33508_v11 }
 0x1df   : > { %13099 = vmatprep.subr.mxu1 %v36404_v40  ;;  %12532 = vmatpush1.xpose.msra.mxu0 %v36404_v40  ;;  %v33513_v47 = vpop.f32.mrf.mxu0 }
 0x1e0   : > { %12880 = vmatprep.subr.mxu0 %v36450_v48  ;;  %v1799_v48 = vadd.f32 %v36453_v50, %v1718_v57  ;;  %v36368_v18 = vand.u32 4294901760, %v33527_v7  ;;  %v36457_v50 = vld [vmem:[#allocation20_spill] sm:$0xff] }
 0x1e1   : > { %v33518_v55 = vpop.f32.mrf.mxu0  ;;  %v33520_v16 = vpop.f32.mrf.mxu1 }
 0x1e2   : > { %36451 = vst [vmem:[#allocation17_spill] sm:$0xff] %v33520_v16  ;;  %13101 = vmatpush1.xpose.msra.mxu1 %v33330_v17  ;;  %12634 = vmatmul.mubr.f32.vlgmr.msra.gmra.mxu0 %v33420_v34  ;;  %v33542_v34 = vsub.f32 %v8429_v62, %v33522_v2  ;;  %v13452_v16 = vand.u32 4294901760, %v13451_v12 }
 0x1e3   : > { %13103 = vmatprep.subr.mxu1 %v36404_v40  ;;  %12884 = vmatpush1.xpose.msra.mxu0 %v36404_v40  ;;  %v33534_v20 = vpop.f32.mrf.mxu1 }
 0x1e4   : > { %36452 = vst [vmem:[#allocation47_spill] sm:$0xff] %v33534_v20  ;;  %13038 = vmatprep.mubr.f32.mxu0 %v33339_v54  ;;  %12888 = vmatprep.subr.mxu0 %v36404_v40  ;;  %v1877_v20 = vadd.f32 %v36457_v50, %v1799_v48  ;;  %v36369_v5 = vand.u32 4294901760, %v33542_v34 }
 0x1e5   : > { %v33539_v17 = vpop.f32.mrf.mxu0 }
 0x1e6   : > { %36454 = vst [vmem:[#allocation22_spill] sm:$0xff] %v33539_v17  ;;  %13105 = vmatpush1.xpose.msra.mxu1 %v36404_v40  ;;  %v13469_v17 = vsub.f32 %v33527_v7, %v36368_v18  ;;  %v1961_v12 = vadd.f32 %v33070_v63, %v1877_v20  ;;  %v36461_v20 = vld [vmem:[#allocation23_spill] sm:$0xff] }
 0x1e7   : > { %13107 = vmatprep.subr.mxu1 %v36404_v40  ;;  %12892 = vmatpush1.xpose.msra.mxu0 %v36455_v39  ;;  %v33549_v57 = vpop.f32.mrf.mxu0  ;;  %v33551_v54 = vpop.f32.mrf.mxu1 }
 0x1e8   : > { %36456 = vst [vmem:[#allocation48_spill] sm:$0xff] %v33551_v54  ;;  %12896 = vmatprep.subr.mxu0 %v36404_v40  ;;  %v13470_v18 = vand.u32 4294901760, %v13469_v17  ;;  %v2037_v54 = vadd.f32 %v36461_v20, %v1961_v12 }
 0x1e9   : > { %v33555_v62 = vpop.f32.mrf.mxu1 }
 0x1ea   : > { %36458 = vst [vmem:[#allocation20_spill] sm:$0xff] %v33555_v62  ;;  %13109 = vmatpush1.xpose.msra.mxu1 %v36404_v40  ;;  %v8428_v62 = vmax.f32 %v2037_v54, 0.0 }
 0x1eb   : > { %13453 = vmatprep.subr.mxu1 %v13452_v16  ;;  %12900 = vmatpush1.xpose.msra.mxu0 %v36404_v40  ;;  %v33563_v39 = vpop.f32.mrf.mxu0  ;;  %v13314_v16 = vsub.f32 %v33542_v34, %v36369_v5 }
 0x1ec   : > { %36459 = vst [vmem:[#allocation49_spill] sm:$0xff] %v33563_v39  ;;  %12904 = vmatprep.subr.mxu0 %v36404_v40 }
 0x1ed   : > { %13177 = vmatmul.mubr.f32.vlgmr.msra.gmra.mxu1 %v33405_v29  ;;  %v33568_v48 = vpop.f32.mrf.mxu0  ;;  %v33570_v50 = vpop.f32.mrf.mxu1  ;;  %v13315_v17 = vand.u32 4294901760, %v13314_v16 }
 0x1ee   : > { %36460 = vst [vmem:[#allocation50_spill] sm:$0xff] %v33570_v50  ;;  %13459 = vmatpush1.xpose.msra.mxu1 %v36404_v40  ;;  %13713 = vmatprep.mubr.f32.mxu1 %v33522_v2 }
 0x1ef   : > { %13465 = vmatprep.subr.mxu1 %v36404_v40  ;;  %12908 = vmatpush1.xpose.msra.mxu0 %v36404_v40  ;;  %v33579_v63 = vpop.f32.mrf.mxu1 }
 0x1f0   : > { %13224 = vmatprep.subr.mxu0 %v33479_v28 }
 0x1f1   : > { %v33583_v50 = vpop.f32.mrf.mxu0 }
 0x1f2   : > { %36462 = vst [vmem:[#allocation23_spill] sm:$0xff] %v33583_v50  ;;  %13471 = vmatpush1.xpose.msra.mxu1 %v13470_v18  ;;  %13040 = vmatmul.mubr.f32.vlgmr.msra.gmra.mxu0 %v33405_v29  ;;  %v33600_v18 = vand.u32 4294901760, %v8428_v62 }
 0x1f3   : > { %13477 = vmatprep.subr.mxu1 %v36404_v40  ;;  %13226 = vmatpush1.xpose.msra.mxu0 %v36404_v40  ;;  %v33588_v5 = vpop.f32.mrf.mxu0  ;;  %v33590_v39 = vpop.f32.mrf.mxu1 }
 0x1f4   : > { %36463 = vst [vmem:[#allocation51_spill] sm:$0xff] %v33590_v39  ;;  %13316 = vmatprep.mubr.f32.mxu0 %v13315_v17  ;;  %13228 = vmatprep.subr.mxu0 %v36404_v40  ;;  %v33613_v17 = vsub.f32 %v8428_v62, %v33600_v18 }
 0x1f5   : > { %v33593_v12 = vpop.f32.mrf.mxu1 }
 0x1f6   : > { %36464 = vst [vmem:[#allocation52_spill] sm:$0xff] %v33593_v12  ;;  %13483 = vmatpush1.xpose.msra.mxu1 %v36404_v40  ;;  %v13319_v50 = vand.u32 4294901760, %v33613_v17  ;;  %v36476_v12 = vand.u32 4294901760, %v33542_v34 }
 0x1f7   : > { %13489 = vmatprep.subr.mxu1 %v36404_v40  ;;  %13230 = vmatpush1.xpose.msra.mxu0 %v33508_v11  ;;  %v33598_v29 = vpop.f32.mrf.mxu0 }
 0x1f8   : > { %36465 = vst [vmem:[#allocation53_spill] sm:$0xff] %v33598_v29  ;;  %13232 = vmatprep.subr.mxu0 %v36404_v40 }
 0x1f9   : > { %v33603_v16 = vpop.f32.mrf.mxu0  ;;  %v33605_v54 = vpop.f32.mrf.mxu1 }
 0x1fa   : > { %36466 = vst [vmem:[#allocation54_spill] sm:$0xff] %v33603_v16  ;;  %36467 = vst [vmem:[#allocation55_spill] sm:$0xff] %v33605_v54  ;;  %13495 = vmatpush1.xpose.msra.mxu1 %v36404_v40 }
 0x1fb   : > { %13501 = vmatprep.subr.mxu1 %v36404_v40  ;;  %13234 = vmatpush1.xpose.msra.mxu0 %v36404_v40  ;;  %v33610_v20 = vpop.f32.mrf.mxu1 }
 0x1fc   : > { %36468 = vst [vmem:[#allocation56_spill] sm:$0xff] %v33610_v20  ;;  %13236 = vmatprep.subr.mxu0 %v36404_v40  ;;  %v13320_v20 = vsub.f32 %v33613_v17, %v13319_v50 }
 0x1fd   : > { %v33616_v39 = vpop.f32.mrf.mxu0 }
 0x1fe   : > { %36469 = vst [vmem:[#allocation57_spill] sm:$0xff] %v33616_v39  ;;  %13507 = vmatpush1.xpose.msra.mxu1 %v36404_v40  ;;  %v13321_v16 = vand.u32 4294901760, %v13320_v20 }
 0x1ff   : > { %13513 = vmatprep.subr.mxu1 %v36404_v40  ;;  %13238 = vmatpush1.xpose.msra.mxu0 %v36404_v40  ;;  %v33621_v54 = vpop.f32.mrf.mxu0  ;;  %v33623_v29 = vpop.f32.mrf.mxu1 }
 0x200   : > { %36470 = vst [vmem:[#allocation58_spill] sm:$0xff] %v33621_v54  ;;  %36471 = vst [vmem:[#allocation59_spill] sm:$0xff] %v33623_v29  ;;  %13240 = vmatprep.subr.mxu0 %v36404_v40 }
 0x201   : > { %v33627_v62 = vpop.f32.mrf.mxu1 }
 0x202   : > { %36472 = vst [vmem:[#allocation60_spill] sm:$0xff] %v33627_v62  ;;  %13519 = vmatpush1.xpose.msra.mxu1 %v36404_v40  ;;  %v33642_v62 = vsub.s32 7, %v32971_v61 }
 0x203   : > { %13965 = vmatprep.subr.mxu1 %v33479_v28  ;;  %13242 = vmatpush1.xpose.msra.mxu0 %v36404_v40  ;;  %v33632_v39 = vpop.f32.mrf.mxu0 }
 0x204   : > { %36473 = vst [vmem:[#allocation61_spill] sm:$0xff] %v33632_v39  ;;  %13244 = vmatprep.subr.mxu0 %v36404_v40  ;;  %v435_v61 = vrot.slane %v33004_v60, %v33642_v62 }
 0x205   : > { %13715 = vmatmul.mubr.f32.vlgmr.msra.gmra.mxu1 %v33600_v18  ;;  %v33637_v29 = vpop.f32.mrf.mxu0  ;;  %v33639_v54 = vpop.f32.mrf.mxu1 }
 0x206   : > { %36474 = vst [vmem:[#allocation62_spill] sm:$0xff] %v33637_v29  ;;  %36475 = vst [vmem:[#allocation63_spill] sm:$0xff] %v33639_v54  ;;  %13967 = vmatpush1.xpose.msra.mxu1 %v36404_v40  ;;  %14055 = vmatprep.mubr.f32.mxu1 %v36476_v12 }
 0x207   : > { %13969 = vmatprep.subr.mxu1 %v36404_v40  ;;  %13246 = vmatpush1.xpose.msra.mxu0 %v36404_v40  ;;  %v33649_v39 = vpop.f32.mrf.mxu1 }
 0x208   : > { %13783 = vmatprep.subr.mxu0 %v33491_v35 }
 0x209   : > { %v33652_v29 = vpop.f32.mrf.mxu0 }
 0x20a   : > { %36477 = vst [vmem:[#allocation64_spill] sm:$0xff] %v33652_v29  ;;  %13971 = vmatpush1.xpose.msra.mxu1 %v33508_v11  ;;  %13322 = vmatmul.mubr.f32.vlgmr.msra.gmra.mxu0 %v13321_v16  ;;  %v2119_v29 = vadd.f32 %v33118_v21, %v435_v61 }
 0x20b   : > { %13973 = vmatprep.subr.mxu1 %v36404_v40  ;;  %13786 = vmatpush1.xpose.msra.mxu0 %v36404_v40  ;;  %v33659_v12 = vpop.f32.mrf.mxu0  ;;  %v33661_v54 = vpop.f32.mrf.mxu1 }
 0x20c   : > { %36478 = vst [vmem:[#allocation65_spill] sm:$0xff] %v33661_v54  ;;  %13915 = vmatprep.mubr.f32.mxu0 %v33542_v34  ;;  %13789 = vmatprep.subr.mxu0 %v36404_v40  ;;  %v2211_v34 = vadd.f32 %v33097_v25, %v2119_v29 }
 0x20d   : > { %v33665_v20 = vpop.f32.mrf.mxu1 }
 0x20e   : > { %13975 = vmatpush1.xpose.msra.mxu1 %v36404_v40 }
 0x20f   : > { %13977 = vmatprep.subr.mxu1 %v36404_v40  ;;  %13792 = vmatpush1.xpose.msra.mxu0 %v33527_v7  ;;  %v33671_v60 = vpop.f32.mrf.mxu0 }
 0x210   : > { %36479 = vst [vmem:[#allocation66_spill] sm:$0xff] %v33671_v60  ;;  %13795 = vmatprep.subr.mxu0 %v36404_v40  ;;  %v2292_v60 = vadd.f32 %v33157_v9, %v2211_v34  ;;  %v31345_v34 = vld [vmem:[%s31895_s10 + $0x38] sm:$0xff] }
 0x211   : > { %v33674_v16 = vpop.f32.mrf.mxu0  ;;  %v33676_v54 = vpop.f32.mrf.mxu1 }
 0x212   : > { %36480 = vst [vmem:[#allocation67_spill] sm:$0xff] %v33676_v54  ;;  %13979 = vmatpush1.xpose.msra.mxu1 %v36404_v40 }
 0x213   : > { %13981 = vmatprep.subr.mxu1 %v36404_v40  ;;  %13798 = vmatpush1.xpose.msra.mxu0 %v36404_v40  ;;  %v33682_v21 = vpop.f32.mrf.mxu1 }
 0x214   : > { %36481 = vst [vmem:[#allocation68_spill] sm:$0xff] %v33682_v21  ;;  %13801 = vmatprep.subr.mxu0 %v36404_v40  ;;  %v2370_v21 = vadd.f32 %v33129_v44, %v2292_v60  ;;  %v33715_v44 = vand.u32 4294901760, %v31345_v34 }
 0x215   : > { %v33685_v61 = vpop.f32.mrf.mxu0 }
 0x216   : > { %36482 = vst [vmem:[#allocation69_spill] sm:$0xff] %v33685_v61  ;;  %13983 = vmatpush1.xpose.msra.mxu1 %v36404_v40 }
 0x217   : > { %13985 = vmatprep.subr.mxu1 %v36404_v40  ;;  %13804 = vmatpush1.xpose.msra.mxu0 %v36404_v40  ;;  %v33691_v25 = vpop.f32.mrf.mxu0  ;;  %v33693_v29 = vpop.f32.mrf.mxu1 }
 0x218   : > { %36483 = vst [vmem:[#allocation70_spill] sm:$0xff] %v33693_v29  ;;  %13807 = vmatprep.subr.mxu0 %v36404_v40 }
 0x219   : > { %v33696_v54 = vpop.f32.mrf.mxu1 }
 0x21a   : > { %36484 = vst [vmem:[#allocation71_spill] sm:$0xff] %v33696_v54  ;;  %13987 = vmatpush1.xpose.msra.mxu1 %v36404_v40  ;;  %v2454_v54 = vadd.f32 %v33188_v15, %v2370_v21  ;;  %v33729_v15 = vsub.f32 %v31345_v34, %v33715_v44  ;;  %v31344_v21 = vld [vmem:[%s31895_s10 + $0x30] sm:$0xff] }
 0x21b   : > { %14371 = vmatprep.subr.mxu1 %v33479_v28  ;;  %13810 = vmatpush1.xpose.msra.mxu0 %v36404_v40  ;;  %v33702_v9 = vpop.f32.mrf.mxu0 }
 0x21c   : > { %36485 = vst [vmem:[#allocation72_spill] sm:$0xff] %v33702_v9  ;;  %13813 = vmatprep.subr.mxu0 %v36404_v40  ;;  %v36370_v34 = vand.u32 4294901760, %v33729_v15 }
 0x21d   : > { %14059 = vmatmul.mubr.f32.vlgmr.msra.gmra.mxu1 %v13319_v50  ;;  %v33706_v61 = vpop.f32.mrf.mxu0  ;;  %v33708_v29 = vpop.f32.mrf.mxu1  ;;  %v36488_v50 = vand.u32 4294901760, %v33491_v35 }
 0x21e   : > { %36486 = vst [vmem:[#allocation73_spill] sm:$0xff] %v33708_v29  ;;  %14373 = vmatpush1.xpose.msra.mxu1 %v36404_v40  ;;  %14459 = vmatprep.mubr.f32.mxu1 %v33522_v2  ;;  %v2530_v29 = vadd.f32 %v33168_v8, %v2454_v54  ;;  %v33741_v54 = vand.u32 4294901760, %v31344_v21 }
 0x21f   : > { %14375 = vmatprep.subr.mxu1 %v36404_v40  ;;  %13816 = vmatpush1.xpose.msra.mxu0 %v36404_v40  ;;  %v33717_v28 = vpop.f32.mrf.mxu1 }
 0x220   : > { %36487 = vst [vmem:[#allocation74_spill] sm:$0xff] %v33717_v28  ;;  %14148 = vmatprep.subr.mxu0 %v36488_v50 }
 0x221   : > { %v33721_v60 = vpop.f32.mrf.mxu0 }
 0x222   : > { %36489 = vst [vmem:[#allocation75_spill] sm:$0xff] %v33721_v60  ;;  %14377 = vmatpush1.xpose.msra.mxu1 %v33508_v11  ;;  %13918 = vmatmul.mubr.f32.vlgmr.msra.gmra.mxu0 %v33613_v17  ;;  %v8431_v11 = vmax.f32 %v2530_v29, 0.0  ;;  %v36492_v17 = vand.u32 4294901760, %v33527_v7  ;;  %v33760_v7 = vsub.f32 %v31344_v21, %v33741_v54 }
 0x223   : > { %14379 = vmatprep.subr.mxu1 %v36404_v40  ;;  %14152 = vmatpush1.xpose.msra.mxu0 %v36404_v40  ;;  %v33732_v9 = vpop.f32.mrf.mxu0  ;;  %v33734_v35 = vpop.f32.mrf.mxu1 }
 0x224   : > { %36490 = vst [vmem:[#allocation76_spill] sm:$0xff] %v33734_v35  ;;  %14322 = vmatprep.mubr.f32.mxu0 %v33522_v2  ;;  %14156 = vmatprep.subr.mxu0 %v36404_v40  ;;  %v31463_v35 = vld [vmem:[%s33001_s9] ss:$2 sm:$0xff]  ;;  %v33756_v60 = vand.u32 4294901760, %v8431_v11  ;;  %v36371_v21 = vand.u32 4294901760, %v33760_v7 }
 0x225   : > { %v33738_v8 = vpop.f32.mrf.mxu1  ;;  %v431_v2 = vrot.slane %v31463_v35, %v33434_v27  ;;  %v14711_v35 = vsub.f32 %v33729_v15, %v36370_v34 }
 0x226   : > { %36491 = vst [vmem:[#allocation77_spill] sm:$0xff] %v33738_v8  ;;  %14381 = vmatpush1.xpose.msra.mxu1 %v36404_v40 }
 0x227   : > { %14383 = vmatprep.subr.mxu1 %v36404_v40  ;;  %14160 = vmatpush1.xpose.msra.mxu0 %v36492_v17  ;;  %v33747_v50 = vpop.f32.mrf.mxu0  ;;  %v14712_v34 = vand.u32 4294901760, %v14711_v35 }
 0x228   : > { %36493 = vst [vmem:[#allocation78_spill] sm:$0xff] %v33747_v50  ;;  %14164 = vmatprep.subr.mxu0 %v36404_v40  ;;  %v2117_v50 = vadd.f32 %v33107_v52, %v431_v2 }
 0x229   : > { %v33752_v8 = vpop.f32.mrf.mxu0  ;;  %v33754_v29 = vpop.f32.mrf.mxu1 }
 0x22a   : > { %36494 = vst [vmem:[#allocation79_spill] sm:$0xff] %v33752_v8  ;;  %36495 = vst [vmem:[#allocation80_spill] sm:$0xff] %v33754_v29  ;;  %14385 = vmatpush1.xpose.msra.mxu1 %v36404_v40  ;;  %v33774_v8 = vsub.f32 %v8431_v11, %v33756_v60  ;;  %v2209_v52 = vadd.f32 %v33083_v4, %v2117_v50  ;;  %v14729_v11 = vsub.f32 %v33760_v7, %v36371_v21 }
 0x22b   : > { %14387 = vmatprep.subr.mxu1 %v36404_v40  ;;  %14168 = vmatpush1.xpose.msra.mxu0 %v36404_v40  ;;  %v33767_v17 = vpop.f32.mrf.mxu1 }
 0x22c   : > { %36496 = vst [vmem:[#allocation81_spill] sm:$0xff] %v33767_v17  ;;  %14172 = vmatprep.subr.mxu0 %v36404_v40  ;;  %v14730_v21 = vand.u32 4294901760, %v14729_v11 }
 0x22d   : > { %v33771_v29 = vpop.f32.mrf.mxu0 }
 0x22e   : > { %36497 = vst [vmem:[#allocation82_spill] sm:$0xff] %v33771_v29  ;;  %14389 = vmatpush1.xpose.msra.mxu1 %v36404_v40  ;;  %v36372_v29 = vand.u32 4294901760, %v33774_v8 }
 0x22f   : > { %14391 = vmatprep.subr.mxu1 %v36404_v40  ;;  %14176 = vmatpush1.xpose.msra.mxu0 %v36404_v40  ;;  %v33780_v28 = vpop.f32.mrf.mxu0  ;;  %v33782_v17 = vpop.f32.mrf.mxu1 }
 0x230   : > { %36498 = vst [vmem:[#allocation83_spill] sm:$0xff] %v33782_v17  ;;  %14180 = vmatprep.subr.mxu0 %v36404_v40  ;;  %v2290_v17 = vadd.f32 %v33142_v33, %v2209_v52  ;;  %v36503_v52 = vld [vmem:[#allocation26_spill] sm:$0xff] }
 0x231   : > { %v33786_v2 = vpop.f32.mrf.mxu1 }
 0x232   : > { %36499 = vst [vmem:[#allocation84_spill] sm:$0xff] %v33786_v2  ;;  %14393 = vmatpush1.xpose.msra.mxu1 %v36404_v40 }
 0x233   : > { %14713 = vmatprep.subr.mxu1 %v14712_v34  ;;  %14184 = vmatpush1.xpose.msra.mxu0 %v36404_v40  ;;  %v33794_v35 = vpop.f32.mrf.mxu0  ;;  %v14598_v34 = vsub.f32 %v33774_v8, %v36372_v29 }
 0x234   : > { %36500 = vst [vmem:[#allocation85_spill] sm:$0xff] %v33794_v35  ;;  %14188 = vmatprep.subr.mxu0 %v36404_v40  ;;  %v2368_v35 = vadd.f32 %v36503_v52, %v2290_v17 }
 0x235   : > { %14461 = vmatmul.mubr.f32.vlgmr.msra.gmra.mxu1 %v33600_v18  ;;  %v33799_v4 = vpop.f32.mrf.mxu0  ;;  %v33801_v50 = vpop.f32.mrf.mxu1  ;;  %v14599_v11 = vand.u32 4294901760, %v14598_v34 }
 0x236   : > { %36501 = vst [vmem:[#allocation86_spill] sm:$0xff] %v33801_v50  ;;  %14719 = vmatpush1.xpose.msra.mxu1 %v36404_v40  ;;  %14997 = vmatprep.mubr.f32.mxu1 %v33756_v60 }
 0x237   : > { %14725 = vmatprep.subr.mxu1 %v36404_v40  ;;  %14192 = vmatpush1.xpose.msra.mxu0 %v36404_v40  ;;  %v33810_v33 = vpop.f32.mrf.mxu1 }
 0x238   : > { %36502 = vst [vmem:[#allocation87_spill] sm:$0xff] %v33810_v33  ;;  %14500 = vmatprep.subr.mxu0 %v33715_v44  ;;  %v2452_v33 = vadd.f32 %v33181_v3, %v2368_v35 }
 0x239   : > { %v33814_v50 = vpop.f32.mrf.mxu0 }
 0x23a   : > { %36504 = vst [vmem:[#allocation26_spill] sm:$0xff] %v33814_v50  ;;  %14731 = vmatpush1.xpose.msra.mxu1 %v14730_v21  ;;  %14324 = vmatmul.mubr.f32.vlgmr.msra.gmra.mxu0 %v33600_v18  ;;  %v36508_v21 = vld [vmem:[#allocation27_spill] sm:$0xff] }
 0x23b   : > { %14737 = vmatprep.subr.mxu1 %v36404_v40  ;;  %14502 = vmatpush1.xpose.msra.mxu0 %v36404_v40  ;;  %v33819_v29 = vpop.f32.mrf.mxu0  ;;  %v33821_v2 = vpop.f32.mrf.mxu1  ;;  %v2528_v34 = vadd.f32 %v36508_v21, %v2452_v33 }
 0x23c   : > { %36505 = vst [vmem:[#allocation88_spill] sm:$0xff] %v33821_v2  ;;  %14600 = vmatprep.mubr.f32.mxu0 %v14599_v11  ;;  %14504 = vmatprep.subr.mxu0 %v36404_v40 }
 0x23d   : > { %v33825_v17 = vpop.f32.mrf.mxu1  ;;  %v8430_v11 = vmax.f32 %v2528_v34, 0.0 }
 0x23e   : > { %36506 = vst [vmem:[#allocation89_spill] sm:$0xff] %v33825_v17  ;;  %14743 = vmatpush1.xpose.msra.mxu1 %v36404_v40 }
 0x23f   : > { %14749 = vmatprep.subr.mxu1 %v36404_v40  ;;  %14506 = vmatpush1.xpose.msra.mxu0 %v33741_v54  ;;  %v33830_v18 = vpop.f32.mrf.mxu0 }
 0x240   : > { %36507 = vst [vmem:[#allocation90_spill] sm:$0xff] %v33830_v18  ;;  %14508 = vmatprep.subr.mxu0 %v36404_v40 }
 0x241   : > { %v33834_v52 = vpop.f32.mrf.mxu0  ;;  %v33836_v3 = vpop.f32.mrf.mxu1 }
 0x242   : > { %36509 = vst [vmem:[#allocation27_spill] sm:$0xff] %v33834_v52  ;;  %36510 = vst [vmem:[#allocation91_spill] sm:$0xff] %v33836_v3  ;;  %14755 = vmatpush1.xpose.msra.mxu1 %v36404_v40  ;;  %v33853_v3 = vand.u32 4294901760, %v8430_v11  ;;  %v36530_v52 = vld [vmem:[#allocation19_spill] sm:$0xff] }
 0x243   : > { %14761 = vmatprep.subr.mxu1 %v36404_v40  ;;  %14510 = vmatpush1.xpose.msra.mxu0 %v36404_v40  ;;  %v33841_v35 = vpop.f32.mrf.mxu1 }
 0x244   : > { %36511 = vst [vmem:[#allocation92_spill] sm:$0xff] %v33841_v35  ;;  %14512 = vmatprep.subr.mxu0 %v36404_v40 }
 0x245   : > { %v33844_v2 = vpop.f32.mrf.mxu0 }
 0x246   : > { %36512 = vst [vmem:[#allocation93_spill] sm:$0xff] %v33844_v2  ;;  %14767 = vmatpush1.xpose.msra.mxu1 %v36404_v40  ;;  %v33864_v2 = vsub.f32 %v8430_v11, %v33853_v3 }
 0x247   : > { %14773 = vmatprep.subr.mxu1 %v36404_v40  ;;  %14514 = vmatpush1.xpose.msra.mxu0 %v36404_v40  ;;  %v33849_v33 = vpop.f32.mrf.mxu0  ;;  %v33851_v21 = vpop.f32.mrf.mxu1 }
 0x248   : > { %36513 = vst [vmem:[#allocation94_spill] sm:$0xff] %v33849_v33  ;;  %36514 = vst [vmem:[#allocation95_spill] sm:$0xff] %v33851_v21  ;;  %14516 = vmatprep.subr.mxu0 %v36404_v40  ;;  %v36373_v35 = vand.u32 4294901760, %v33864_v2 }
 0x249   : > { %v33856_v18 = vpop.f32.mrf.mxu1 }
 0x24a   : > { %36515 = vst [vmem:[#allocation96_spill] sm:$0xff] %v33856_v18  ;;  %14779 = vmatpush1.xpose.msra.mxu1 %v36404_v40 }
 0x24b   : > { %14785 = vmatprep.subr.mxu1 %v36404_v40  ;;  %14518 = vmatpush1.xpose.msra.mxu0 %v36404_v40  ;;  %v33861_v34 = vpop.f32.mrf.mxu0 }
 0x24c   : > { %36516 = vst [vmem:[#allocation97_spill] sm:$0xff] %v33861_v34  ;;  %14520 = vmatprep.subr.mxu0 %v36404_v40 }
 0x24d   : > { %v33867_v21 = vpop.f32.mrf.mxu0  ;;  %v33869_v50 = vpop.f32.mrf.mxu1 }
 0x24e   : > { %36517 = vst [vmem:[#allocation98_spill] sm:$0xff] %v33867_v21  ;;  %36518 = vst [vmem:[#allocation99_spill] sm:$0xff] %v33869_v50  ;;  %14791 = vmatpush1.xpose.msra.mxu1 %v36404_v40 }
 0x24f   : > { %14797 = vmatprep.subr.mxu1 %v36404_v40  ;;  %14522 = vmatpush1.xpose.msra.mxu0 %v36404_v40  ;;  %v33874_v18 = vpop.f32.mrf.mxu1 }
 0x250   : > { %36519 = vst [vmem:[#allocation100_spill] sm:$0xff] %v33874_v18  ;;  %14524 = vmatprep.subr.mxu0 %v36404_v40  ;;  %v14604_v18 = vsub.f32 %v33864_v2, %v36373_v35  ;;  %v31338_v35 = vld [vmem:[%s33001_s9 + $0x30] ss:$2 sm:$0xff] }
 0x251   : > { %v33878_v11 = vpop.f32.mrf.mxu0  ;;  %v527_v17 = vrot.slane %v31338_v35, %v33434_v27 }
 0x252   : > { %36520 = vst [vmem:[#allocation101_spill] sm:$0xff] %v33878_v11  ;;  %14803 = vmatpush1.xpose.msra.mxu1 %v36404_v40  ;;  %v36523_v11 = vand.u32 4294901760, %v33774_v8 }
 0x253   : > { %15241 = vmatprep.subr.mxu1 %v33715_v44  ;;  %14526 = vmatpush1.xpose.msra.mxu0 %v36404_v40  ;;  %v33883_v50 = vpop.f32.mrf.mxu0  ;;  %v33885_v34 = vpop.f32.mrf.mxu1 }
 0x254   : > { %36521 = vst [vmem:[#allocation102_spill] sm:$0xff] %v33883_v50  ;;  %36522 = vst [vmem:[#allocation103_spill] sm:$0xff] %v33885_v34  ;;  %14528 = vmatprep.subr.mxu0 %v36404_v40  ;;  %v14605_v50 = vand.u32 4294901760, %v14604_v18 }
 0x255   : > { %14999 = vmatmul.mubr.f32.vlgmr.msra.gmra.mxu1 %v33853_v3  ;;  %v33895_v21 = vpop.f32.mrf.mxu1 }
 0x256   : > { %15243 = vmatpush1.xpose.msra.mxu1 %v36404_v40  ;;  %15339 = vmatprep.mubr.f32.mxu1 %v36523_v11  ;;  %36524 = vst [vmem:[#allocation104_spill] sm:$0xff] %v33895_v21 }
 0x257   : > { %15245 = vmatprep.subr.mxu1 %v36404_v40  ;;  %14530 = vmatpush1.xpose.msra.mxu0 %v36404_v40  ;;  %v33899_v34 = vpop.f32.mrf.mxu0 }
 0x258   : > { %36525 = vst [vmem:[#allocation105_spill] sm:$0xff] %v33899_v34  ;;  %15055 = vmatprep.subr.mxu0 %v33729_v15 }
 0x259   : > { %v33903_v33 = vpop.f32.mrf.mxu0  ;;  %v8100_v11 = vpop.f32.mrf.mxu1 }
 0x25a   : > { %36526 = vst [vmem:[#allocation106_spill] sm:$0xff] %v33903_v33  ;;  %15247 = vmatpush1.xpose.msra.mxu1 %v33741_v54  ;;  %14606 = vmatmul.mubr.f32.vlgmr.msra.gmra.mxu0 %v14605_v50 }
 0x25b   : > { %15249 = vmatprep.subr.mxu1 %v36404_v40  ;;  %15058 = vmatpush1.xpose.msra.mxu0 %v36404_v40  ;;  %v33912_v21 = vpop.f32.mrf.mxu1 }
 0x25c   : > { %15199 = vmatprep.mubr.f32.mxu0 %v33774_v8  ;;  %15061 = vmatprep.subr.mxu0 %v36404_v40  ;;  %36527 = vst [vmem:[#allocation107_spill] sm:$0xff] %v33912_v21 }
 0x25d   : > { %v8008_v18 = vpop.f32.mrf.mxu0 }
 0x25e   : > { %15251 = vmatpush1.xpose.msra.mxu1 %v36404_v40  ;;  %v8009_v34 = vadd.f32 %v8008_v18, %v527_v17 }
 0x25f   : > { %15253 = vmatprep.subr.mxu1 %v36404_v40  ;;  %15064 = vmatpush1.xpose.msra.mxu0 %v33760_v7  ;;  %v33916_v50 = vpop.f32.mrf.mxu0  ;;  %v8259_v8 = vpop.f32.mrf.mxu1 }
 0x260   : > { %36528 = vst [vmem:[#allocation108_spill] sm:$0xff] %v33916_v50  ;;  %v8101_v35 = vadd.f32 %v8100_v11, %v8009_v34  ;;  %15067 = vmatprep.subr.mxu0 %v36404_v40 }
 0x261   : > { %v33926_v50 = vpop.f32.mrf.mxu1 }
 0x262   : > { %15255 = vmatpush1.xpose.msra.mxu1 %v36404_v40 }
 0x263   : > { %v8181_v33 = vpop.f32.mrf.mxu0  ;;  %15257 = vmatprep.subr.mxu1 %v36404_v40  ;;  %15070 = vmatpush1.xpose.msra.mxu0 %v36404_v40 }
 0x264   : > { %v8182_v17 = vadd.f32 %v8181_v33, %v8101_v35  ;;  %15073 = vmatprep.subr.mxu0 %v36404_v40  ;;  %v443_v33 = vrot.slane %v33437_v42, %v36530_v52 }
 0x265   : > { %v33923_v18 = vpop.f32.mrf.mxu0  ;;  %v8419_v35 = vpop.f32.mrf.mxu1 }
 0x266   : > { %36529 = vst [vmem:[#allocation109_spill] sm:$0xff] %v33923_v18  ;;  %v8260_v21 = vadd.f32 %v8259_v8, %v8182_v17  ;;  %15259 = vmatpush1.xpose.msra.mxu1 %v36404_v40  ;;  %v2610_v8 = vadd.f32 %v33219_v37, %v443_v33  ;;  %v36531_v37 = vand.u32 4294901760, %v33864_v2 }
 0x267   : > { %15261 = vmatprep.subr.mxu1 %v36404_v40  ;;  %15076 = vmatpush1.xpose.msra.mxu0 %v36404_v40 }
 0x268   : > { %v8343_v34 = vpop.f32.mrf.mxu0  ;;  %15079 = vmatprep.subr.mxu0 %v36404_v40 }
 0x269   : > { %v8344_v11 = vadd.f32 %v8343_v34, %v8260_v21  ;;  %v2702_v21 = vadd.f32 %v33201_v22, %v2610_v8  ;;  %v36532_v22 = vand.u32 4294901760, %v33729_v15 }
 0x26a   : > { %15263 = vmatpush1.xpose.msra.mxu1 %v36404_v40 }
 0x26b   : > { %v33934_v18 = vadd.f32 %v8419_v35, %v8344_v11  ;;  %15265 = vmatprep.subr.mxu1 %v36404_v40  ;;  %15082 = vmatpush1.xpose.msra.mxu0 %v36404_v40  ;;  %v2783_v17 = vadd.f32 %v33255_v19, %v2702_v21  ;;  %v31347_v19 = vld [vmem:[%s31895_s10 + $0x48] sm:$0xff] }
 0x26c   : > { %15085 = vmatprep.subr.mxu0 %v36404_v40  ;;  %v33971_v15 = vand.u32 4294901760, %v31347_v19 }
 0x26e   : > { %15267 = vmatpush1.xpose.msra.mxu1 %v36404_v40 }
 0x26f   : > { %15269 = vmatprep.subr.mxu1 %v36404_v40  ;;  %15088 = vmatpush1.xpose.msra.mxu0 %v36404_v40 }
 0x270   : > { %15091 = vmatprep.subr.mxu0 %v36404_v40 }
 0x272   : > { %15271 = vmatpush1.xpose.msra.mxu1 %v36404_v40 }
 0x273   : > { %15647 = vmatprep.subr.mxu1 %v33715_v44  ;;  %15094 = vmatpush1.xpose.msra.mxu0 %v36404_v40  ;;  %v2861_v44 = vadd.f32 %v33233_v41, %v2783_v17  ;;  %v36533_v41 = vand.u32 4294901760, %v33760_v7  ;;  %v36534_v17 = vld [vmem:[#allocation24_spill] sm:$0xff] }
 0x274   : > { %15097 = vmatprep.subr.mxu0 %v36404_v40 }
 0x275   : > { %15343 = vmatmul.mubr.f32.vlgmr.msra.gmra.mxu1 %v36531_v37  ;;  %v2945_v34 = vadd.f32 %v33290_v0, %v2861_v44  ;;  %v33979_v0 = vsub.f32 %v31347_v19, %v33971_v15 }
 0x276   : > { %15649 = vmatpush1.xpose.msra.mxu1 %v36404_v40  ;;  %15743 = vmatprep.mubr.f32.mxu1 %v33756_v60 }
 0x277   : > { %15651 = vmatprep.subr.mxu1 %v36404_v40  ;;  %15100 = vmatpush1.xpose.msra.mxu0 %v36404_v40 }
 0x278   : > { %15416 = vmatprep.subr.mxu0 %v36532_v22  ;;  %v439_v22 = vrot.slane %v33437_v42, %v36534_v17 }
 0x27a   : > { %15653 = vmatpush1.xpose.msra.mxu1 %v33741_v54  ;;  %15202 = vmatmul.mubr.f32.vlgmr.msra.gmra.mxu0 %v33864_v2  ;;  %v3021_v54 = vadd.f32 %v33267_v26, %v2945_v34  ;;  %v15970_v26 = vand.u32 4294901760, %v33979_v0  ;;  %v2608_v34 = vadd.f32 %v33208_v30, %v439_v22 }
 0x27b   : > { %15655 = vmatprep.subr.mxu1 %v36404_v40  ;;  %15420 = vmatpush1.xpose.msra.mxu0 %v36404_v40 }
 0x27c   : > { %15606 = vmatprep.mubr.f32.mxu0 %v33756_v60  ;;  %15424 = vmatprep.subr.mxu0 %v36404_v40  ;;  %v31346_v60 = vld [vmem:[%s31895_s10 + $0x40] sm:$0xff]  ;;  %v8433_v7 = vmax.f32 %v3021_v54, 0.0  ;;  %v15971_v35 = vsub.f32 %v33979_v0, %v15970_v26  ;;  %v2700_v54 = vadd.f32 %v33190_v49, %v2608_v34 }
 0x27d   : > { %v33984_v2 = vand.u32 4294901760, %v31346_v60 }
 0x27e   : > { %15657 = vmatpush1.xpose.msra.mxu1 %v36404_v40  ;;  %v33990_v11 = vand.u32 4294901760, %v8433_v7  ;;  %v15972_v37 = vand.u32 4294901760, %v15971_v35 }
 0x27f   : > { %15659 = vmatprep.subr.mxu1 %v36404_v40  ;;  %15428 = vmatpush1.xpose.msra.mxu0 %v36533_v41  ;;  %v33994_v33 = vsub.f32 %v31346_v60, %v33984_v2  ;;  %v2781_v60 = vadd.f32 %v33246_v6, %v2700_v54 }
 0x280   : > { %15432 = vmatprep.subr.mxu0 %v36404_v40  ;;  %v34003_v8 = vsub.f32 %v8433_v7, %v33990_v11 }
 0x281   : > { %v15988_v21 = vand.u32 4294901760, %v33994_v33  ;;  %v2859_v49 = vadd.f32 %v33221_v13, %v2781_v60 }
 0x282   : > { %15661 = vmatpush1.xpose.msra.mxu1 %v36404_v40  ;;  %v15881_v19 = vand.u32 4294901760, %v34003_v8 }
 0x283   : > { %15663 = vmatprep.subr.mxu1 %v36404_v40  ;;  %15436 = vmatpush1.xpose.msra.mxu0 %v36404_v40  ;;  %v15989_v44 = vsub.f32 %v33994_v33, %v15988_v21  ;;  %v2943_v6 = vadd.f32 %v33278_v43, %v2859_v49 }
 0x284   : > { %15440 = vmatprep.subr.mxu0 %v36404_v40  ;;  %v15882_v41 = vsub.f32 %v34003_v8, %v15881_v19 }
 0x285   : > { %v15990_v42 = vand.u32 4294901760, %v15989_v44  ;;  %v3019_v13 = vadd.f32 %v33257_v38, %v2943_v6 }
 0x286   : > { %15665 = vmatpush1.xpose.msra.mxu1 %v36404_v40  ;;  %v15883_v30 = vand.u32 4294901760, %v15882_v41 }
 0x287   : > { %15667 = vmatprep.subr.mxu1 %v36404_v40  ;;  %15444 = vmatpush1.xpose.msra.mxu0 %v36404_v40 }
 0x288   : > { %15448 = vmatprep.subr.mxu0 %v36404_v40 }
 0x28a   : > { %15669 = vmatpush1.xpose.msra.mxu1 %v36404_v40 }
 0x28b   : > { %15671 = vmatprep.subr.mxu1 %v36404_v40  ;;  %15452 = vmatpush1.xpose.msra.mxu0 %v36404_v40 }
 0x28c   : > { %15456 = vmatprep.subr.mxu0 %v36404_v40 }
 0x28e   : > { %15673 = vmatpush1.xpose.msra.mxu1 %v36404_v40 }
 0x28f   : > { %15675 = vmatprep.subr.mxu1 %v36404_v40  ;;  %15460 = vmatpush1.xpose.msra.mxu0 %v36404_v40 }
 0x290   : > { %15464 = vmatprep.subr.mxu0 %v36404_v40 }
 0x292   : > { %15677 = vmatpush1.xpose.msra.mxu1 %v36404_v40 }
 0x293   : > { %15973 = vmatprep.subr.mxu1 %v15972_v37  ;;  %15468 = vmatpush1.xpose.msra.mxu0 %v36404_v40 }
 0x294   : > { %15472 = vmatprep.subr.mxu0 %v36404_v40 }
 0x295   : > { %15745 = vmatmul.mubr.f32.vlgmr.msra.gmra.mxu1 %v33853_v3 }
 0x296   : > { %15979 = vmatpush1.xpose.msra.mxu1 %v36404_v40  ;;  %16281 = vmatprep.mubr.f32.mxu1 %v33990_v11 }
 0x297   : > { %15985 = vmatprep.subr.mxu1 %v36404_v40  ;;  %15476 = vmatpush1.xpose.msra.mxu0 %v36404_v40 }
 0x298   : > { %15776 = vmatprep.subr.mxu0 %v33971_v15 }
 0x29a   : > { %15991 = vmatpush1.xpose.msra.mxu1 %v15990_v42  ;;  %15608 = vmatmul.mubr.f32.vlgmr.msra.gmra.mxu0 %v33853_v3  ;;  %v8432_v3 = vmax.f32 %v3019_v13, 0.0 }
 0x29b   : > { %15997 = vmatprep.subr.mxu1 %v36404_v40  ;;  %15778 = vmatpush1.xpose.msra.mxu0 %v36404_v40 }
 0x29c   : > { %15884 = vmatprep.mubr.f32.mxu0 %v15883_v30  ;;  %15780 = vmatprep.subr.mxu0 %v36404_v40  ;;  %v34057_v43 = vand.u32 4294901760, %v8432_v3 }
 0x29e   : > { %16003 = vmatpush1.xpose.msra.mxu1 %v36404_v40  ;;  %v34064_v38 = vsub.f32 %v8432_v3, %v34057_v43 }
 0x29f   : > { %16009 = vmatprep.subr.mxu1 %v36404_v40  ;;  %15782 = vmatpush1.xpose.msra.mxu0 %v33984_v2 }
 0x2a0   : > { %15784 = vmatprep.subr.mxu0 %v36404_v40  ;;  %v15887_v7 = vand.u32 4294901760, %v34064_v38 }
 0x2a2   : > { %16015 = vmatpush1.xpose.msra.mxu1 %v36404_v40  ;;  %v15888_v35 = vsub.f32 %v34064_v38, %v15887_v7 }
 0x2a3   : > { %16021 = vmatprep.subr.mxu1 %v36404_v40  ;;  %15786 = vmatpush1.xpose.msra.mxu0 %v36404_v40 }
 0x2a4   : > { %15788 = vmatprep.subr.mxu0 %v36404_v40  ;;  %v15889_v37 = vand.u32 4294901760, %v15888_v35  ;;  %v36536_v35 = vld [vmem:[#allocation29_spill] sm:$0xff] }
 0x2a6   : > { %16027 = vmatpush1.xpose.msra.mxu1 %v36404_v40 }
 0x2a7   : > { %16033 = vmatprep.subr.mxu1 %v36404_v40  ;;  %15790 = vmatpush1.xpose.msra.mxu0 %v36404_v40 }
 0x2a8   : > { %15792 = vmatprep.subr.mxu0 %v36404_v40 }
 0x2aa   : > { %16039 = vmatpush1.xpose.msra.mxu1 %v36404_v40 }
 0x2ab   : > { %16045 = vmatprep.subr.mxu1 %v36404_v40  ;;  %15794 = vmatpush1.xpose.msra.mxu0 %v36404_v40 }
 0x2ac   : > { %15796 = vmatprep.subr.mxu0 %v36404_v40 }
 0x2ae   : > { %16051 = vmatpush1.xpose.msra.mxu1 %v36404_v40 }
 0x2af   : > { %16057 = vmatprep.subr.mxu1 %v36404_v40  ;;  %15798 = vmatpush1.xpose.msra.mxu0 %v36404_v40 }
 0x2b0   : > { %15800 = vmatprep.subr.mxu0 %v36404_v40 }
 0x2b2   : > { %16063 = vmatpush1.xpose.msra.mxu1 %v36404_v40 }
 0x2b3   : > { %16069 = vmatprep.subr.mxu1 %v36404_v40  ;;  %15802 = vmatpush1.xpose.msra.mxu0 %v36404_v40 }
 0x2b4   : > { %15804 = vmatprep.subr.mxu0 %v36404_v40 }
 0x2b6   : > { %16075 = vmatpush1.xpose.msra.mxu1 %v36404_v40 }
 0x2b7   : > { %16081 = vmatprep.subr.mxu1 %v36404_v40  ;;  %15806 = vmatpush1.xpose.msra.mxu0 %v36404_v40 }
 0x2b8   : > { %15808 = vmatprep.subr.mxu0 %v36404_v40 }
 0x2ba   : > { %16087 = vmatpush1.xpose.msra.mxu1 %v36404_v40 }
 0x2bb   : > { %16517 = vmatprep.subr.mxu1 %v33971_v15  ;;  %15810 = vmatpush1.xpose.msra.mxu0 %v36404_v40 }
 0x2bc   : > { %15812 = vmatprep.subr.mxu0 %v36404_v40 }
 0x2bd   : > { %16283 = vmatmul.mubr.f32.vlgmr.msra.gmra.mxu1 %v34057_v43 }
 0x2be   : > { %16519 = vmatpush1.xpose.msra.mxu1 %v36404_v40  ;;  %16623 = vmatprep.mubr.f32.mxu1 %v15881_v19 }
 0x2bf   : > { %16521 = vmatprep.subr.mxu1 %v36404_v40  ;;  %15814 = vmatpush1.xpose.msra.mxu0 %v36404_v40 }
 0x2c0   : > { %16327 = vmatprep.subr.mxu0 %v33979_v0 }
 0x2c2   : > { %16523 = vmatpush1.xpose.msra.mxu1 %v33984_v2  ;;  %15890 = vmatmul.mubr.f32.vlgmr.msra.gmra.mxu0 %v15889_v37 }
 0x2c3   : > { %16525 = vmatprep.subr.mxu1 %v36404_v40  ;;  %16330 = vmatpush1.xpose.msra.mxu0 %v36404_v40 }
 0x2c4   : > { %16483 = vmatprep.mubr.f32.mxu0 %v34003_v8  ;;  %16333 = vmatprep.subr.mxu0 %v36404_v40  ;;  %v34118_v8 = vld [vmem:[%s33001_s9 + $0x10] ss:$2 sm:$0xff] }
 0x2c5   : > { %v451_v22 = vrot.slane %v34118_v8, %v33149_v31  ;;  %v447_v13 = vrot.slane %v34118_v8, %v33231_v53 }
 0x2c6   : > { %16527 = vmatpush1.xpose.msra.mxu1 %v36404_v40 }
 0x2c7   : > { %16529 = vmatprep.subr.mxu1 %v36404_v40  ;;  %16336 = vmatpush1.xpose.msra.mxu0 %v33994_v33  ;;  %v3101_v44 = vadd.f32 %v33320_v46, %v451_v22 }
 0x2c8   : > { %16339 = vmatprep.subr.mxu0 %v36404_v40 }
 0x2ca   : > { %16531 = vmatpush1.xpose.msra.mxu1 %v36404_v40 }
 0x2cb   : > { %16533 = vmatprep.subr.mxu1 %v36404_v40  ;;  %16342 = vmatpush1.xpose.msra.mxu0 %v36404_v40 }
 0x2cc   : > { %16345 = vmatprep.subr.mxu0 %v36404_v40 }
 0x2ce   : > { %16535 = vmatpush1.xpose.msra.mxu1 %v36404_v40 }
 0x2cf   : > { %16537 = vmatprep.subr.mxu1 %v36404_v40  ;;  %16348 = vmatpush1.xpose.msra.mxu0 %v36404_v40 }
 0x2d0   : > { %16351 = vmatprep.subr.mxu0 %v36404_v40 }
 0x2d2   : > { %16539 = vmatpush1.xpose.msra.mxu1 %v36404_v40 }
 0x2d3   : > { %16541 = vmatprep.subr.mxu1 %v36404_v40  ;;  %16354 = vmatpush1.xpose.msra.mxu0 %v36404_v40 }
 0x2d4   : > { %16357 = vmatprep.subr.mxu0 %v36404_v40 }
 0x2d6   : > { %16543 = vmatpush1.xpose.msra.mxu1 %v36404_v40 }
 0x2d7   : > { %16545 = vmatprep.subr.mxu1 %v36404_v40  ;;  %16360 = vmatpush1.xpose.msra.mxu0 %v36404_v40 }
 0x2d8   : > { %16363 = vmatprep.subr.mxu0 %v36404_v40 }
 0x2da   : > { %16547 = vmatpush1.xpose.msra.mxu1 %v36404_v40 }
 0x2db   : > { %16549 = vmatprep.subr.mxu1 %v36404_v40  ;;  %16366 = vmatpush1.xpose.msra.mxu0 %v36404_v40 }
 0x2dc   : > { %16369 = vmatprep.subr.mxu0 %v36404_v40 }
 0x2de   : > { %16551 = vmatpush1.xpose.msra.mxu1 %v36404_v40 }
 0x2df   : > { %16553 = vmatprep.subr.mxu1 %v36404_v40  ;;  %16372 = vmatpush1.xpose.msra.mxu0 %v36404_v40 }
 0x2e0   : > { %16375 = vmatprep.subr.mxu0 %v36404_v40 }
 0x2e2   : > { %16555 = vmatpush1.xpose.msra.mxu1 %v36404_v40 }
 0x2e3   : > { %16923 = vmatprep.subr.mxu1 %v33971_v15  ;;  %16378 = vmatpush1.xpose.msra.mxu0 %v36404_v40  ;;  %v3193_v15 = vadd.f32 %v33302_v45, %v3101_v44 }
 0x2e4   : > { %16381 = vmatprep.subr.mxu0 %v36404_v40 }
 0x2e5   : > { %16627 = vmatmul.mubr.f32.vlgmr.msra.gmra.mxu1 %v15887_v7  ;;  %v3274_v46 = vadd.f32 %v33341_v36, %v3193_v15  ;;  %v31349_v36 = vld [vmem:[%s31895_s10 + $0x58] sm:$0xff] }
 0x2e6   : > { %16925 = vmatpush1.xpose.msra.mxu1 %v36404_v40  ;;  %17027 = vmatprep.mubr.f32.mxu1 %v33990_v11 }
 0x2e7   : > { %16927 = vmatprep.subr.mxu1 %v36404_v40  ;;  %16384 = vmatpush1.xpose.msra.mxu0 %v36404_v40  ;;  %v3352_v45 = vadd.f32 %v33327_v24, %v3274_v46 }
 0x2e8   : > { %16684 = vmatprep.subr.mxu0 %v15970_v26  ;;  %v31348_v26 = vld [vmem:[%s31895_s10 + $0x50] sm:$0xff] }
 0x2e9   : > { %v3436_v0 = vadd.f32 %v33369_v14, %v3352_v45  ;;  %v34169_v33 = vand.u32 4294901760, %v31348_v26 }
 0x2ea   : > { %16929 = vmatpush1.xpose.msra.mxu1 %v33984_v2  ;;  %16486 = vmatmul.mubr.f32.vlgmr.msra.gmra.mxu0 %v34064_v38  ;;  %v34156_v2 = vand.u32 4294901760, %v31349_v36  ;;  %v3099_v38 = vadd.f32 %v33311_v32, %v447_v13 }
 0x2eb   : > { %16931 = vmatprep.subr.mxu1 %v36404_v40  ;;  %16688 = vmatpush1.xpose.msra.mxu0 %v36404_v40  ;;  %v3512_v24 = vadd.f32 %v33354_v10, %v3436_v0  ;;  %v34179_v19 = vsub.f32 %v31348_v26, %v34169_v33 }
 0x2ec   : > { %16890 = vmatprep.mubr.f32.mxu0 %v33990_v11  ;;  %16692 = vmatprep.subr.mxu0 %v36404_v40  ;;  %v34164_v14 = vsub.f32 %v31349_v36, %v34156_v2  ;;  %v3191_v7 = vadd.f32 %v33292_v51, %v3099_v38  ;;  %v36537_v36 = vld [vmem:[#allocation35_spill] sm:$0xff] }
 0x2ed   : > { %v8435_v11 = vmax.f32 %v3512_v24, 0.0  ;;  %v17248_v41 = vand.u32 4294901760, %v34179_v19  ;;  %v459_v0 = vrot.slane %v34118_v8, %v36537_v36 }
 0x2ee   : > { %16933 = vmatpush1.xpose.msra.mxu1 %v36404_v40  ;;  %v17230_v10 = vand.u32 4294901760, %v34164_v14  ;;  %v3272_v32 = vadd.f32 %v33335_v58, %v3191_v7 }
 0x2ef   : > { %16935 = vmatprep.subr.mxu1 %v36404_v40  ;;  %16696 = vmatpush1.xpose.msra.mxu0 %v15988_v21  ;;  %v34175_v21 = vand.u32 4294901760, %v8435_v11  ;;  %v17249_v30 = vsub.f32 %v34179_v19, %v17248_v41 }
 0x2f0   : > { %16700 = vmatprep.subr.mxu0 %v36404_v40  ;;  %v17231_v34 = vsub.f32 %v34164_v14, %v17230_v10 }
 0x2f1   : > { %v34188_v42 = vsub.f32 %v8435_v11, %v34175_v21  ;;  %v17250_v49 = vand.u32 4294901760, %v17249_v30  ;;  %v36540_v11 = vld [vmem:[#allocation38_spill] sm:$0xff] }
 0x2f2   : > { %16937 = vmatpush1.xpose.msra.mxu1 %v36404_v40  ;;  %v17232_v54 = vand.u32 4294901760, %v17231_v34  ;;  %v36542_v34 = vld [vmem:[#allocation42_spill] sm:$0xff] }
 0x2f3   : > { %16939 = vmatprep.subr.mxu1 %v36404_v40  ;;  %16704 = vmatpush1.xpose.msra.mxu0 %v36404_v40  ;;  %v17165_v60 = vand.u32 4294901760, %v34188_v42 }
 0x2f4   : > { %16708 = vmatprep.subr.mxu0 %v36404_v40 }
 0x2f5   : > { %v17166_v6 = vsub.f32 %v34188_v42, %v17165_v60 }
 0x2f6   : > { %16941 = vmatpush1.xpose.msra.mxu1 %v36404_v40 }
 0x2f7   : > { %16943 = vmatprep.subr.mxu1 %v36404_v40  ;;  %16712 = vmatpush1.xpose.msra.mxu0 %v36404_v40  ;;  %v17167_v3 = vand.u32 4294901760, %v17166_v6 }
 0x2f8   : > { %16716 = vmatprep.subr.mxu0 %v36404_v40 }
 0x2fa   : > { %16945 = vmatpush1.xpose.msra.mxu1 %v36404_v40 }
 0x2fb   : > { %16947 = vmatprep.subr.mxu1 %v36404_v40  ;;  %16720 = vmatpush1.xpose.msra.mxu0 %v36404_v40 }
 0x2fc   : > { %16724 = vmatprep.subr.mxu0 %v36404_v40 }
 0x2fe   : > { %16949 = vmatpush1.xpose.msra.mxu1 %v36404_v40 }
 0x2ff   : > { %16951 = vmatprep.subr.mxu1 %v36404_v40  ;;  %16728 = vmatpush1.xpose.msra.mxu0 %v36404_v40 }
 0x300   : > { %16732 = vmatprep.subr.mxu0 %v36404_v40 }
 0x302   : > { %16953 = vmatpush1.xpose.msra.mxu1 %v36404_v40 }
 0x303   : > { %16955 = vmatprep.subr.mxu1 %v36404_v40  ;;  %16736 = vmatpush1.xpose.msra.mxu0 %v36404_v40 }
 0x304   : > { %16740 = vmatprep.subr.mxu0 %v36404_v40 }
 0x306   : > { %16957 = vmatpush1.xpose.msra.mxu1 %v36404_v40 }
 0x307   : > { %16959 = vmatprep.subr.mxu1 %v36404_v40  ;;  %16744 = vmatpush1.xpose.msra.mxu0 %v36404_v40 }
 0x308   : > { %16748 = vmatprep.subr.mxu0 %v36404_v40 }
 0x30a   : > { %16961 = vmatpush1.xpose.msra.mxu1 %v36404_v40 }
 0x30b   : > { %17233 = vmatprep.subr.mxu1 %v17232_v54  ;;  %16752 = vmatpush1.xpose.msra.mxu0 %v36404_v40  ;;  %v36543_v54 = vld [vmem:[#allocation40_spill] sm:$0xff] }
 0x30c   : > { %16756 = vmatprep.subr.mxu0 %v36404_v40 }
 0x30d   : > { %17029 = vmatmul.mubr.f32.vlgmr.msra.gmra.mxu1 %v34057_v43 }
 0x30e   : > { %17239 = vmatpush1.xpose.msra.mxu1 %v36404_v40  ;;  %17565 = vmatprep.mubr.f32.mxu1 %v34175_v21 }
 0x30f   : > { %17245 = vmatprep.subr.mxu1 %v36404_v40  ;;  %16760 = vmatpush1.xpose.msra.mxu0 %v36404_v40 }
 0x310   : > { %17052 = vmatprep.subr.mxu0 %v34156_v2 }
 0x312   : > { %17251 = vmatpush1.xpose.msra.mxu1 %v17250_v49  ;;  %16892 = vmatmul.mubr.f32.vlgmr.msra.gmra.mxu0 %v34057_v43  ;;  %v36535_v43 = vld [vmem:[#allocation28_spill] sm:$0xff]  ;;  %v31350_v49 = vld [vmem:[%s31895_s10 + $0x60] sm:$0xff] }
 0x313   : > { %17257 = vmatprep.subr.mxu1 %v36404_v40  ;;  %17054 = vmatpush1.xpose.msra.mxu0 %v36404_v40  ;;  %v3350_v51 = vadd.f32 %v36535_v43, %v3272_v32  ;;  %v34375_v13 = vand.u32 4294901760, %v31350_v49 }
 0x314   : > { %17168 = vmatprep.mubr.f32.mxu0 %v17167_v3  ;;  %17056 = vmatprep.subr.mxu0 %v36404_v40 }
 0x315   : > { %v3434_v58 = vadd.f32 %v33362_v1, %v3350_v51  ;;  %v34385_v7 = vsub.f32 %v31350_v49, %v34375_v13 }
 0x316   : > { %17263 = vmatpush1.xpose.msra.mxu1 %v36404_v40 }
 0x317   : > { %17269 = vmatprep.subr.mxu1 %v36404_v40  ;;  %17058 = vmatpush1.xpose.msra.mxu0 %v34169_v33  ;;  %v3510_v37 = vadd.f32 %v36536_v35, %v3434_v58  ;;  %v18508_v51 = vand.u32 4294901760, %v34385_v7 }
 0x318   : > { %17060 = vmatprep.subr.mxu0 %v36404_v40 }
 0x319   : > { %v8434_v22 = vmax.f32 %v3510_v37, 0.0  ;;  %v18509_v35 = vsub.f32 %v34385_v7, %v18508_v51 }
 0x31a   : > { %17275 = vmatpush1.xpose.msra.mxu1 %v36404_v40 }
 0x31b   : > { %17281 = vmatprep.subr.mxu1 %v36404_v40  ;;  %17062 = vmatpush1.xpose.msra.mxu0 %v36404_v40  ;;  %v34250_v1 = vand.u32 4294901760, %v8434_v22 }
 0x31c   : > { %17064 = vmatprep.subr.mxu0 %v36404_v40 }
 0x31d   : > { %v34257_v44 = vsub.f32 %v8434_v22, %v34250_v1  ;;  %v18510_v22 = vand.u32 4294901760, %v18509_v35 }
 0x31e   : > { %17287 = vmatpush1.xpose.msra.mxu1 %v36404_v40 }
 0x31f   : > { %17293 = vmatprep.subr.mxu1 %v36404_v40  ;;  %17066 = vmatpush1.xpose.msra.mxu0 %v36404_v40  ;;  %v17171_v15 = vand.u32 4294901760, %v34257_v44 }
 0x320   : > { %17068 = vmatprep.subr.mxu0 %v36404_v40 }
 0x321   : > { %v17172_v46 = vsub.f32 %v34257_v44, %v17171_v15 }
 0x322   : > { %17299 = vmatpush1.xpose.msra.mxu1 %v36404_v40 }
 0x323   : > { %17305 = vmatprep.subr.mxu1 %v36404_v40  ;;  %17070 = vmatpush1.xpose.msra.mxu0 %v36404_v40  ;;  %v17173_v45 = vand.u32 4294901760, %v17172_v46  ;;  %v455_v46 = vrot.slane %v34118_v8, %v33468_v23 }
 0x324   : > { %17072 = vmatprep.subr.mxu0 %v36404_v40 }
 0x326   : > { %17311 = vmatpush1.xpose.msra.mxu1 %v36404_v40 }
 0x327   : > { %17317 = vmatprep.subr.mxu1 %v36404_v40  ;;  %17074 = vmatpush1.xpose.msra.mxu0 %v36404_v40 }
 0x328   : > { %17076 = vmatprep.subr.mxu0 %v36404_v40 }
 0x32a   : > { %17323 = vmatpush1.xpose.msra.mxu1 %v36404_v40 }
 0x32b   : > { %17329 = vmatprep.subr.mxu1 %v36404_v40  ;;  %17078 = vmatpush1.xpose.msra.mxu0 %v36404_v40 }
 0x32c   : > { %17080 = vmatprep.subr.mxu0 %v36404_v40 }
 0x32e   : > { %17335 = vmatpush1.xpose.msra.mxu1 %v36404_v40 }
 0x32f   : > { %17341 = vmatprep.subr.mxu1 %v36404_v40  ;;  %17082 = vmatpush1.xpose.msra.mxu0 %v36404_v40 }
 0x330   : > { %17084 = vmatprep.subr.mxu0 %v36404_v40 }
 0x332   : > { %17347 = vmatpush1.xpose.msra.mxu1 %v36404_v40 }
 0x333   : > { %17353 = vmatprep.subr.mxu1 %v36404_v40  ;;  %17086 = vmatpush1.xpose.msra.mxu0 %v36404_v40 }
 0x334   : > { %17088 = vmatprep.subr.mxu0 %v36404_v40 }
 0x336   : > { %17359 = vmatpush1.xpose.msra.mxu1 %v36404_v40 }
 0x337   : > { %17365 = vmatprep.subr.mxu1 %v36404_v40  ;;  %17090 = vmatpush1.xpose.msra.mxu0 %v36404_v40 }
 0x338   : > { %17092 = vmatprep.subr.mxu0 %v36404_v40 }
 0x33a   : > { %17371 = vmatpush1.xpose.msra.mxu1 %v36404_v40 }
 0x33b   : > { %17793 = vmatprep.subr.mxu1 %v34156_v2  ;;  %17094 = vmatpush1.xpose.msra.mxu0 %v36404_v40 }
 0x33c   : > { %17096 = vmatprep.subr.mxu0 %v36404_v40 }
 0x33d   : > { %17567 = vmatmul.mubr.f32.vlgmr.msra.gmra.mxu1 %v34250_v1 }
 0x33e   : > { %17795 = vmatpush1.xpose.msra.mxu1 %v36404_v40  ;;  %17907 = vmatprep.mubr.f32.mxu1 %v17165_v60 }
 0x33f   : > { %17797 = vmatprep.subr.mxu1 %v36404_v40  ;;  %17098 = vmatpush1.xpose.msra.mxu0 %v36404_v40 }
 0x340   : > { %17599 = vmatprep.subr.mxu0 %v34164_v14  ;;  %v36539_v14 = vld [vmem:[#allocation31_spill] sm:$0xff] }
 0x342   : > { %17799 = vmatpush1.xpose.msra.mxu1 %v34169_v33  ;;  %17174 = vmatmul.mubr.f32.vlgmr.msra.gmra.mxu0 %v17173_v45 }
 0x343   : > { %17801 = vmatprep.subr.mxu1 %v36404_v40  ;;  %17602 = vmatpush1.xpose.msra.mxu0 %v36404_v40 }
 0x344   : > { %17767 = vmatprep.mubr.f32.mxu0 %v34188_v42  ;;  %17605 = vmatprep.subr.mxu0 %v36404_v40 }
 0x346   : > { %17803 = vmatpush1.xpose.msra.mxu1 %v36404_v40 }
 0x347   : > { %17805 = vmatprep.subr.mxu1 %v36404_v40  ;;  %17608 = vmatpush1.xpose.msra.mxu0 %v34179_v19  ;;  %v31351_v19 = vld [vmem:[%s31895_s10 + $0x68] sm:$0xff] }
 0x348   : > { %17611 = vmatprep.subr.mxu0 %v36404_v40 }
 0x34a   : > { %17807 = vmatpush1.xpose.msra.mxu1 %v36404_v40 }
 0x34b   : > { %17809 = vmatprep.subr.mxu1 %v36404_v40  ;;  %17614 = vmatpush1.xpose.msra.mxu0 %v36404_v40 }
 0x34c   : > { %17617 = vmatprep.subr.mxu0 %v36404_v40 }
 0x34e   : > { %17811 = vmatpush1.xpose.msra.mxu1 %v36404_v40 }
 0x34f   : > { %17813 = vmatprep.subr.mxu1 %v36404_v40  ;;  %17620 = vmatpush1.xpose.msra.mxu0 %v36404_v40 }
 0x350   : > { %17623 = vmatprep.subr.mxu0 %v36404_v40 }
 0x352   : > { %17815 = vmatpush1.xpose.msra.mxu1 %v36404_v40 }
 0x353   : > { %17817 = vmatprep.subr.mxu1 %v36404_v40  ;;  %17626 = vmatpush1.xpose.msra.mxu0 %v36404_v40 }
 0x354   : > { %17629 = vmatprep.subr.mxu0 %v36404_v40 }
 0x356   : > { %17819 = vmatpush1.xpose.msra.mxu1 %v36404_v40 }
 0x357   : > { %17821 = vmatprep.subr.mxu1 %v36404_v40  ;;  %17632 = vmatpush1.xpose.msra.mxu0 %v36404_v40 }
 0x358   : > { %17635 = vmatprep.subr.mxu0 %v36404_v40 }
 0x35a   : > { %17823 = vmatpush1.xpose.msra.mxu1 %v36404_v40 }
 0x35b   : > { %17825 = vmatprep.subr.mxu1 %v36404_v40  ;;  %17638 = vmatpush1.xpose.msra.mxu0 %v36404_v40 }
 0x35c   : > { %17641 = vmatprep.subr.mxu0 %v36404_v40 }
 0x35e   : > { %17827 = vmatpush1.xpose.msra.mxu1 %v36404_v40 }
 0x35f   : > { %17829 = vmatprep.subr.mxu1 %v36404_v40  ;;  %17644 = vmatpush1.xpose.msra.mxu0 %v36404_v40 }
 0x360   : > { %17647 = vmatprep.subr.mxu0 %v36404_v40 }
 0x362   : > { %17831 = vmatpush1.xpose.msra.mxu1 %v36404_v40 }
 0x363   : > { %17833 = vmatprep.subr.mxu1 %v36404_v40  ;;  %17650 = vmatpush1.xpose.msra.mxu0 %v36404_v40 }
 0x364   : > { %17653 = vmatprep.subr.mxu0 %v36404_v40 }
 0x366   : > { %17835 = vmatpush1.xpose.msra.mxu1 %v36404_v40 }
 0x367   : > { %17837 = vmatprep.subr.mxu1 %v36404_v40  ;;  %17656 = vmatpush1.xpose.msra.mxu0 %v36404_v40 }
 0x368   : > { %17659 = vmatprep.subr.mxu0 %v36404_v40 }
 0x36a   : > { %17839 = vmatpush1.xpose.msra.mxu1 %v36404_v40 }
 0x36b   : > { %18199 = vmatprep.subr.mxu1 %v34156_v2  ;;  %17662 = vmatpush1.xpose.msra.mxu0 %v36404_v40  ;;  %v36538_v2 = vld [vmem:[#allocation33_spill] sm:$0xff] }
 0x36c   : > { %17665 = vmatprep.subr.mxu0 %v36404_v40  ;;  %v3592_v24 = vadd.f32 %v36538_v2, %v459_v0  ;;  %v36545_v0 = vld [vmem:[#allocation30_spill] sm:$0xff] }
 0x36d   : > { %17911 = vmatmul.mubr.f32.vlgmr.msra.gmra.mxu1 %v17171_v15 }
 0x36e   : > { %18201 = vmatpush1.xpose.msra.mxu1 %v36404_v40  ;;  %18311 = vmatprep.mubr.f32.mxu1 %v34175_v21  ;;  %v3684_v26 = vadd.f32 %v36539_v14, %v3592_v24  ;;  %v36546_v24 = vld [vmem:[#allocation37_spill] sm:$0xff] }
 0x36f   : > { %18203 = vmatprep.subr.mxu1 %v36404_v40  ;;  %17668 = vmatpush1.xpose.msra.mxu0 %v36404_v40 }
 0x370   : > { %17952 = vmatprep.subr.mxu0 %v17230_v10  ;;  %v36541_v10 = vld [vmem:[#allocation36_spill] sm:$0xff] }
 0x372   : > { %18205 = vmatpush1.xpose.msra.mxu1 %v34169_v33  ;;  %17770 = vmatmul.mubr.f32.vlgmr.msra.gmra.mxu0 %v34257_v44  ;;  %v3765_v33 = vadd.f32 %v36540_v11, %v3684_v26  ;;  %v36547_v26 = vld [vmem:[#allocation34_spill] sm:$0xff] }
 0x373   : > { %18207 = vmatprep.subr.mxu1 %v36404_v40  ;;  %17956 = vmatpush1.xpose.msra.mxu0 %v36404_v40 }
 0x374   : > { %18174 = vmatprep.mubr.f32.mxu0 %v34175_v21  ;;  %17960 = vmatprep.subr.mxu0 %v36404_v40  ;;  %v3843_v21 = vadd.f32 %v36541_v10, %v3765_v33  ;;  %v36548_v33 = vld [vmem:[#allocation41_spill] sm:$0xff] }
 0x376   : > { %18209 = vmatpush1.xpose.msra.mxu1 %v36404_v40  ;;  %v3927_v42 = vadd.f32 %v36542_v34, %v3843_v21  ;;  %v36549_v21 = vld [vmem:[#allocation39_spill] sm:$0xff] }
 0x377   : > { %18211 = vmatprep.subr.mxu1 %v36404_v40  ;;  %17964 = vmatpush1.xpose.msra.mxu0 %v17248_v41  ;;  %v34362_v41 = vand.u32 4294901760, %v31351_v19 }
 0x378   : > { %17968 = vmatprep.subr.mxu0 %v36404_v40  ;;  %v4003_v30 = vadd.f32 %v36543_v54, %v3927_v42 }
 0x379   : > { %v34370_v60 = vsub.f32 %v31351_v19, %v34362_v41 }
 0x37a   : > { %18213 = vmatpush1.xpose.msra.mxu1 %v36404_v40  ;;  %v8437_v6 = vmax.f32 %v4003_v30, 0.0 }
 0x37b   : > { %18215 = vmatprep.subr.mxu1 %v36404_v40  ;;  %17972 = vmatpush1.xpose.msra.mxu0 %v36404_v40  ;;  %v18490_v3 = vand.u32 4294901760, %v34370_v60 }
 0x37c   : > { %17976 = vmatprep.subr.mxu0 %v36404_v40  ;;  %v34381_v38 = vand.u32 4294901760, %v8437_v6 }
 0x37d   : > { %v18491_v32 = vsub.f32 %v34370_v60, %v18490_v3 }
 0x37e   : > { %18217 = vmatpush1.xpose.msra.mxu1 %v36404_v40  ;;  %v34394_v43 = vsub.f32 %v8437_v6, %v34381_v38 }
 0x37f   : > { %18219 = vmatprep.subr.mxu1 %v36404_v40  ;;  %17980 = vmatpush1.xpose.msra.mxu0 %v36404_v40  ;;  %v18492_v58 = vand.u32 4294901760, %v18491_v32  ;;  %v36553_v32 = vld [vmem:[#allocation45_spill] sm:$0xff] }
 0x380   : > { %17984 = vmatprep.subr.mxu0 %v36404_v40  ;;  %v18449_v37 = vand.u32 4294901760, %v34394_v43 }
 0x382   : > { %18221 = vmatpush1.xpose.msra.mxu1 %v36404_v40  ;;  %v18450_v44 = vsub.f32 %v34394_v43, %v18449_v37 }
 0x383   : > { %18223 = vmatprep.subr.mxu1 %v36404_v40  ;;  %17988 = vmatpush1.xpose.msra.mxu0 %v36404_v40 }
 0x384   : > { %17992 = vmatprep.subr.mxu0 %v36404_v40  ;;  %v18451_v15 = vand.u32 4294901760, %v18450_v44  ;;  %v31352_v44 = vld [vmem:[%s31895_s10 + $0x70] sm:$0xff] }
 0x386   : > { %18225 = vmatpush1.xpose.msra.mxu1 %v36404_v40 }
 0x387   : > { %18227 = vmatprep.subr.mxu1 %v36404_v40  ;;  %17996 = vmatpush1.xpose.msra.mxu0 %v36404_v40 }
 0x388   : > { %18000 = vmatprep.subr.mxu0 %v36404_v40 }
 0x38a   : > { %18229 = vmatpush1.xpose.msra.mxu1 %v36404_v40 }
 0x38b   : > { %18231 = vmatprep.subr.mxu1 %v36404_v40  ;;  %18004 = vmatpush1.xpose.msra.mxu0 %v36404_v40 }
 0x38c   : > { %18008 = vmatprep.subr.mxu0 %v36404_v40 }
 0x38e   : > { %18233 = vmatpush1.xpose.msra.mxu1 %v36404_v40 }
 0x38f   : > { %18235 = vmatprep.subr.mxu1 %v36404_v40  ;;  %18012 = vmatpush1.xpose.msra.mxu0 %v36404_v40 }
 0x390   : > { %18016 = vmatprep.subr.mxu0 %v36404_v40 }
 0x392   : > { %18237 = vmatpush1.xpose.msra.mxu1 %v36404_v40 }
 0x393   : > { %18239 = vmatprep.subr.mxu1 %v36404_v40  ;;  %18020 = vmatpush1.xpose.msra.mxu0 %v36404_v40 }
 0x394   : > { %18024 = vmatprep.subr.mxu0 %v36404_v40 }
 0x396   : > { %18241 = vmatpush1.xpose.msra.mxu1 %v36404_v40 }
 0x397   : > { %18243 = vmatprep.subr.mxu1 %v36404_v40  ;;  %18028 = vmatpush1.xpose.msra.mxu0 %v36404_v40 }
 0x398   : > { %18032 = vmatprep.subr.mxu0 %v36404_v40 }
 0x39a   : > { %18245 = vmatpush1.xpose.msra.mxu1 %v36404_v40 }
 0x39b   : > { %18493 = vmatprep.subr.mxu1 %v18492_v58  ;;  %18036 = vmatpush1.xpose.msra.mxu0 %v36404_v40 }
 0x39c   : > { %18040 = vmatprep.subr.mxu0 %v36404_v40 }
 0x39d   : > { %18313 = vmatmul.mubr.f32.vlgmr.msra.gmra.mxu1 %v34250_v1 }
 0x39e   : > { %18499 = vmatpush1.xpose.msra.mxu1 %v36404_v40  ;;  %18849 = vmatprep.mubr.f32.mxu1 %v34381_v38 }
 0x39f   : > { %18505 = vmatprep.subr.mxu1 %v36404_v40  ;;  %18044 = vmatpush1.xpose.msra.mxu0 %v36404_v40 }
 0x3a0   : > { %18328 = vmatprep.subr.mxu0 %v34362_v41 }
 0x3a2   : > { %18511 = vmatpush1.xpose.msra.mxu1 %v18510_v22  ;;  %18176 = vmatmul.mubr.f32.vlgmr.msra.gmra.mxu0 %v34250_v1  ;;  %v36544_v1 = vld [vmem:[#allocation32_spill] sm:$0xff] }
 0x3a3   : > { %18517 = vmatprep.subr.mxu1 %v36404_v40  ;;  %18330 = vmatpush1.xpose.msra.mxu0 %v36404_v40  ;;  %v3590_v45 = vadd.f32 %v36544_v1, %v455_v46  ;;  %v34609_v46 = vand.u32 4294901760, %v31352_v44 }
 0x3a4   : > { %18452 = vmatprep.mubr.f32.mxu0 %v18451_v15  ;;  %18332 = vmatprep.subr.mxu0 %v36404_v40 }
 0x3a5   : > { %v3682_v2 = vadd.f32 %v36545_v0, %v3590_v45  ;;  %v34619_v0 = vsub.f32 %v31352_v44, %v34609_v46 }
 0x3a6   : > { %18523 = vmatpush1.xpose.msra.mxu1 %v36404_v40 }
 0x3a7   : > { %18529 = vmatprep.subr.mxu1 %v36404_v40  ;;  %18334 = vmatpush1.xpose.msra.mxu0 %v34375_v13  ;;  %v3763_v14 = vadd.f32 %v36546_v24, %v3682_v2 }
 0x3a8   : > { %18336 = vmatprep.subr.mxu0 %v36404_v40 }
 0x3a9   : > { %v3841_v11 = vadd.f32 %v36547_v26, %v3763_v14  ;;  %v19768_v14 = vand.u32 4294901760, %v34619_v0 }
 0x3aa   : > { %18535 = vmatpush1.xpose.msra.mxu1 %v36404_v40 }
 0x3ab   : > { %18541 = vmatprep.subr.mxu1 %v36404_v40  ;;  %18338 = vmatpush1.xpose.msra.mxu0 %v36404_v40  ;;  %v3925_v10 = vadd.f32 %v36548_v33, %v3841_v11  ;;  %v19769_v11 = vsub.f32 %v34619_v0, %v19768_v14 }
 0x3ac   : > { %18340 = vmatprep.subr.mxu0 %v36404_v40 }
 0x3ad   : > { %v4001_v19 = vadd.f32 %v36549_v21, %v3925_v10  ;;  %v19770_v10 = vand.u32 4294901760, %v19769_v11 }
 0x3ae   : > { %18547 = vmatpush1.xpose.msra.mxu1 %v36404_v40 }
 0x3af   : > { %18553 = vmatprep.subr.mxu1 %v36404_v40  ;;  %18342 = vmatpush1.xpose.msra.mxu0 %v36404_v40  ;;  %v8436_v34 = vmax.f32 %v4001_v19, 0.0 }
 0x3b0   : > { %18344 = vmatprep.subr.mxu0 %v36404_v40 }
 0x3b1   : > { %v34464_v42 = vand.u32 4294901760, %v8436_v34 }
 0x3b2   : > { %18559 = vmatpush1.xpose.msra.mxu1 %v36404_v40 }
 0x3b3   : > { %18565 = vmatprep.subr.mxu1 %v36404_v40  ;;  %18346 = vmatpush1.xpose.msra.mxu0 %v36404_v40  ;;  %v34471_v54 = vsub.f32 %v8436_v34, %v34464_v42  ;;  %v8438_v34 = vmax.f32 %v33500_v59, 0.0 }
 0x3b4   : > { %18348 = vmatprep.subr.mxu0 %v36404_v40 }
 0x3b5   : > { %v18455_v30 = vand.u32 4294901760, %v34471_v54 }
 0x3b6   : > { %18571 = vmatpush1.xpose.msra.mxu1 %v36404_v40 }
 0x3b7   : > { %18577 = vmatprep.subr.mxu1 %v36404_v40  ;;  %18350 = vmatpush1.xpose.msra.mxu0 %v36404_v40  ;;  %v18456_v49 = vsub.f32 %v34471_v54, %v18455_v30 }
 0x3b8   : > { %18352 = vmatprep.subr.mxu0 %v36404_v40 }
 0x3b9   : > { %v18457_v6 = vand.u32 4294901760, %v18456_v49 }
 0x3ba   : > { %18583 = vmatpush1.xpose.msra.mxu1 %v36404_v40 }
 0x3bb   : > { %18589 = vmatprep.subr.mxu1 %v36404_v40  ;;  %18354 = vmatpush1.xpose.msra.mxu0 %v36404_v40 }
 0x3bc   : > { %18356 = vmatprep.subr.mxu0 %v36404_v40 }
 0x3be   : > { %18595 = vmatpush1.xpose.msra.mxu1 %v36404_v40 }
 0x3bf   : > { %18601 = vmatprep.subr.mxu1 %v36404_v40  ;;  %18358 = vmatpush1.xpose.msra.mxu0 %v36404_v40 }
 0x3c0   : > { %18360 = vmatprep.subr.mxu0 %v36404_v40 }
 0x3c2   : > { %18607 = vmatpush1.xpose.msra.mxu1 %v36404_v40 }
 0x3c3   : > { %18613 = vmatprep.subr.mxu1 %v36404_v40  ;;  %18362 = vmatpush1.xpose.msra.mxu0 %v36404_v40 }
 0x3c4   : > { %18364 = vmatprep.subr.mxu0 %v36404_v40 }
 0x3c6   : > { %18619 = vmatpush1.xpose.msra.mxu1 %v36404_v40 }
 0x3c7   : > { %18625 = vmatprep.subr.mxu1 %v36404_v40  ;;  %18366 = vmatpush1.xpose.msra.mxu0 %v36404_v40 }
 0x3c8   : > { %18368 = vmatprep.subr.mxu0 %v36404_v40 }
 0x3ca   : > { %18631 = vmatpush1.xpose.msra.mxu1 %v36404_v40 }
 0x3cb   : > { %18637 = vmatprep.subr.mxu1 %v36404_v40  ;;  %18370 = vmatpush1.xpose.msra.mxu0 %v36404_v40 }
 0x3cc   : > { %18372 = vmatprep.subr.mxu0 %v36404_v40 }
 0x3ce   : > { %18643 = vmatpush1.xpose.msra.mxu1 %v36404_v40 }
 0x3cf   : > { %18649 = vmatprep.subr.mxu1 %v36404_v40  ;;  %18374 = vmatpush1.xpose.msra.mxu0 %v36404_v40 }
 0x3d0   : > { %18376 = vmatprep.subr.mxu0 %v36404_v40 }
 0x3d2   : > { %18655 = vmatpush1.xpose.msra.mxu1 %v36404_v40 }
 0x3d3   : > { %19069 = vmatprep.subr.mxu1 %v34362_v41  ;;  %18378 = vmatpush1.xpose.msra.mxu0 %v36404_v40 }
 0x3d4   : > { %18380 = vmatprep.subr.mxu0 %v36404_v40 }
 0x3d5   : > { %18851 = vmatmul.mubr.f32.vlgmr.msra.gmra.mxu1 %v34464_v42 }
 0x3d6   : > { %19071 = vmatpush1.xpose.msra.mxu1 %v36404_v40  ;;  %19191 = vmatprep.mubr.f32.mxu1 %v18449_v37  ;;  %v36554_v37 = vld [vmem:[#allocation46_spill] sm:$0xff] }
 0x3d7   : > { %19073 = vmatprep.subr.mxu1 %v36404_v40  ;;  %18382 = vmatpush1.xpose.msra.mxu0 %v36404_v40 }
 0x3d8   : > { %18871 = vmatprep.subr.mxu0 %v34370_v60  ;;  %v36550_v60 = vld [vmem:[#allocation44_spill] sm:$0xff] }
 0x3da   : > { %19075 = vmatpush1.xpose.msra.mxu1 %v34375_v13  ;;  %18458 = vmatmul.mubr.f32.vlgmr.msra.gmra.mxu0 %v18457_v6  ;;  %v34814_v6 = vld [vmem:[%s33001_s9 + $0x20] ss:$2 sm:$0xff] }
 0x3db   : > { %19077 = vmatprep.subr.mxu1 %v36404_v40  ;;  %18874 = vmatpush1.xpose.msra.mxu0 %v36404_v40 }
 0x3dc   : > { %19051 = vmatprep.mubr.f32.mxu0 %v34394_v43  ;;  %18877 = vmatprep.subr.mxu0 %v36404_v40 }
 0x3de   : > { %19079 = vmatpush1.xpose.msra.mxu1 %v36404_v40 }
 0x3df   : > { %19081 = vmatprep.subr.mxu1 %v36404_v40  ;;  %18880 = vmatpush1.xpose.msra.mxu0 %v34385_v7 }
 0x3e0   : > { %18883 = vmatprep.subr.mxu0 %v36404_v40 }
 0x3e2   : > { %19083 = vmatpush1.xpose.msra.mxu1 %v36404_v40 }
 0x3e3   : > { %19085 = vmatprep.subr.mxu1 %v36404_v40  ;;  %18886 = vmatpush1.xpose.msra.mxu0 %v36404_v40 }
 0x3e4   : > { %18889 = vmatprep.subr.mxu0 %v36404_v40 }
 0x3e6   : > { %19087 = vmatpush1.xpose.msra.mxu1 %v36404_v40 }
 0x3e7   : > { %19089 = vmatprep.subr.mxu1 %v36404_v40  ;;  %18892 = vmatpush1.xpose.msra.mxu0 %v36404_v40 }
 0x3e8   : > { %18895 = vmatprep.subr.mxu0 %v36404_v40 }
 0x3ea   : > { %19091 = vmatpush1.xpose.msra.mxu1 %v36404_v40 }
 0x3eb   : > { %19093 = vmatprep.subr.mxu1 %v36404_v40  ;;  %18898 = vmatpush1.xpose.msra.mxu0 %v36404_v40 }
 0x3ec   : > { %18901 = vmatprep.subr.mxu0 %v36404_v40 }
 0x3ee   : > { %19095 = vmatpush1.xpose.msra.mxu1 %v36404_v40 }
 0x3ef   : > { %19097 = vmatprep.subr.mxu1 %v36404_v40  ;;  %18904 = vmatpush1.xpose.msra.mxu0 %v36404_v40 }
 0x3f0   : > { %18907 = vmatprep.subr.mxu0 %v36404_v40 }
 0x3f2   : > { %19099 = vmatpush1.xpose.msra.mxu1 %v36404_v40 }
 0x3f3   : > { %19101 = vmatprep.subr.mxu1 %v36404_v40  ;;  %18910 = vmatpush1.xpose.msra.mxu0 %v36404_v40 }
 0x3f4   : > { %18913 = vmatprep.subr.mxu0 %v36404_v40 }
 0x3f6   : > { %19103 = vmatpush1.xpose.msra.mxu1 %v36404_v40 }
 0x3f7   : > { %19105 = vmatprep.subr.mxu1 %v36404_v40  ;;  %18916 = vmatpush1.xpose.msra.mxu0 %v36404_v40 }
 0x3f8   : > { %18919 = vmatprep.subr.mxu0 %v36404_v40 }
 0x3fa   : > { %19107 = vmatpush1.xpose.msra.mxu1 %v36404_v40 }
 0x3fb   : > { %19109 = vmatprep.subr.mxu1 %v36404_v40  ;;  %18922 = vmatpush1.xpose.msra.mxu0 %v36404_v40 }
 0x3fc   : > { %18925 = vmatprep.subr.mxu0 %v36404_v40 }
 0x3fe   : > { %19111 = vmatpush1.xpose.msra.mxu1 %v36404_v40 }
 0x3ff   : > { %19113 = vmatprep.subr.mxu1 %v36404_v40  ;;  %18928 = vmatpush1.xpose.msra.mxu0 %v36404_v40 }
 0x400   : > { %18931 = vmatprep.subr.mxu0 %v36404_v40 }
 0x402   : > { %19115 = vmatpush1.xpose.msra.mxu1 %v36404_v40 }
 0x403   : > { %19117 = vmatprep.subr.mxu1 %v36404_v40  ;;  %18934 = vmatpush1.xpose.msra.mxu0 %v36404_v40 }
 0x404   : > { %18937 = vmatprep.subr.mxu0 %v36404_v40 }
 0x406   : > { %19119 = vmatpush1.xpose.msra.mxu1 %v36404_v40 }
 0x407   : > { %19121 = vmatprep.subr.mxu1 %v36404_v40  ;;  %18940 = vmatpush1.xpose.msra.mxu0 %v36404_v40 }
 0x408   : > { %18943 = vmatprep.subr.mxu0 %v36404_v40 }
 0x40a   : > { %19123 = vmatpush1.xpose.msra.mxu1 %v36404_v40 }
 0x40b   : > { %19475 = vmatprep.subr.mxu1 %v34362_v41  ;;  %18946 = vmatpush1.xpose.msra.mxu0 %v36404_v40  ;;  %v467_v41 = vrot.slane %v34118_v8, %v33642_v62 }
 0x40c   : > { %18949 = vmatprep.subr.mxu0 %v36404_v40 }
 0x40d   : > { %19195 = vmatmul.mubr.f32.vlgmr.msra.gmra.mxu1 %v18455_v30 }
 0x40e   : > { %19477 = vmatpush1.xpose.msra.mxu1 %v36404_v40  ;;  %19595 = vmatprep.mubr.f32.mxu1 %v34381_v38 }
 0x40f   : > { %19479 = vmatprep.subr.mxu1 %v36404_v40  ;;  %18952 = vmatpush1.xpose.msra.mxu0 %v36404_v40 }
 0x410   : > { %19220 = vmatprep.subr.mxu0 %v18490_v3  ;;  %v36551_v3 = vld [vmem:[#allocation43_spill] sm:$0xff] }
 0x412   : > { %19481 = vmatpush1.xpose.msra.mxu1 %v34375_v13  ;;  %19054 = vmatmul.mubr.f32.vlgmr.msra.gmra.mxu0 %v34471_v54  ;;  %v4083_v13 = vadd.f32 %v36550_v60, %v467_v41  ;;  %v475_v41 = vrot.slane %v34814_v6, %v36530_v52 }
 0x413   : > { %19483 = vmatprep.subr.mxu1 %v36404_v40  ;;  %19224 = vmatpush1.xpose.msra.mxu0 %v36404_v40 }
 0x414   : > { %19458 = vmatprep.mubr.f32.mxu0 %v34381_v38  ;;  %19228 = vmatprep.subr.mxu0 %v36404_v40  ;;  %v4175_v8 = vadd.f32 %v36551_v3, %v4083_v13  ;;  %v36552_v38 = vld [vmem:[#allocation21_spill] sm:$0xff]  ;;  %v4574_v60 = vadd.f32 %v33518_v55, %v475_v41  ;;  %v36555_v13 = vld [vmem:[#allocation18_spill] sm:$0xff] }
 0x416   : > { %19485 = vmatpush1.xpose.msra.mxu1 %v36404_v40  ;;  %v4256_v7 = vadd.f32 %v36552_v38, %v4175_v8  ;;  %v4666_v3 = vadd.f32 %v36555_v13, %v4574_v60  ;;  %v471_v8 = vrot.slane %v34814_v6, %v36534_v17 }
 0x417   : > { %19487 = vmatprep.subr.mxu1 %v36404_v40  ;;  %19232 = vmatpush1.xpose.msra.mxu0 %v18508_v51  ;;  %v31353_v51 = vld [vmem:[%s31895_s10 + $0x78] sm:$0xff] }
 0x418   : > { %19236 = vmatprep.subr.mxu0 %v36404_v40  ;;  %v4334_v43 = vadd.f32 %v36553_v32, %v4256_v7  ;;  %v34596_v35 = vand.u32 4294901760, %v31353_v51  ;;  %v4747_v55 = vadd.f32 %v33549_v57, %v4666_v3  ;;  %v4572_v38 = vadd.f32 %v33513_v47, %v471_v8  ;;  %v36556_v7 = vld [vmem:[#allocation47_spill] sm:$0xff]  ;;  %v36557_v57 = vld [vmem:[#allocation25_spill] sm:$0xff]  ;;  %v36558_v47 = vld [vmem:[#allocation22_spill] sm:$0xff] }
 0x419   : > { %v36563_v8 = vld [vmem:[#allocation54_spill] sm:$0xff] }
 0x41a   : > { %19489 = vmatpush1.xpose.msra.mxu1 %v36404_v40  ;;  %v4418_v58 = vadd.f32 %v33494_v56, %v4334_v43  ;;  %v34604_v56 = vsub.f32 %v31353_v51, %v34596_v35  ;;  %v4825_v32 = vadd.f32 %v36556_v7, %v4747_v55  ;;  %v4664_v43 = vadd.f32 %v36557_v57, %v4572_v38 }
 0x41b   : > { %19491 = vmatprep.subr.mxu1 %v36404_v40  ;;  %19240 = vmatpush1.xpose.msra.mxu0 %v36404_v40 }
 0x41c   : > { %19244 = vmatprep.subr.mxu0 %v36404_v40  ;;  %v4494_v22 = vadd.f32 %v36554_v37, %v4418_v58  ;;  %v19750_v1 = vand.u32 4294901760, %v34604_v56  ;;  %v4909_v51 = vadd.f32 %v33568_v48, %v4825_v32  ;;  %v4745_v58 = vadd.f32 %v36558_v47, %v4664_v43  ;;  %v36559_v37 = vld [vmem:[#allocation20_spill] sm:$0xff] }
 0x41d   : > { %v36564_v32 = vld [vmem:[#allocation52_spill] sm:$0xff] }
 0x41e   : > { %19493 = vmatpush1.xpose.msra.mxu1 %v36404_v40  ;;  %v8439_v15 = vmax.f32 %v4494_v22, 0.0  ;;  %v19751_v2 = vsub.f32 %v34604_v56, %v19750_v1  ;;  %v4985_v22 = vadd.f32 %v36559_v37, %v4909_v51  ;;  %v36565_v51 = vld [vmem:[#allocation58_spill] sm:$0xff] }
 0x41f   : > { %19495 = vmatprep.subr.mxu1 %v36404_v40  ;;  %19248 = vmatpush1.xpose.msra.mxu0 %v36404_v40 }
 0x420   : > { %19252 = vmatprep.subr.mxu0 %v36404_v40  ;;  %v34615_v45 = vand.u32 4294901760, %v8439_v15  ;;  %v19752_v26 = vand.u32 4294901760, %v19751_v2 }
 0x422   : > { %19497 = vmatpush1.xpose.msra.mxu1 %v36404_v40  ;;  %v34628_v24 = vsub.f32 %v8439_v15, %v34615_v45  ;;  %v8441_v15 = vmax.f32 %v4985_v22, 0.0  ;;  %v31357_v22 = vld [vmem:[%s31895_s10 + $0x98] sm:$0xff] }
 0x423   : > { %19499 = vmatprep.subr.mxu1 %v36404_v40  ;;  %19256 = vmatpush1.xpose.msra.mxu0 %v36404_v40 }
 0x424   : > { %19260 = vmatprep.subr.mxu0 %v36404_v40  ;;  %v19733_v33 = vand.u32 4294901760, %v34628_v24  ;;  %v34873_v2 = vand.u32 4294901760, %v8441_v15 }
 0x426   : > { %19501 = vmatpush1.xpose.msra.mxu1 %v36404_v40  ;;  %v19734_v21 = vsub.f32 %v34628_v24, %v19733_v33 }
 0x427   : > { %19503 = vmatprep.subr.mxu1 %v36404_v40  ;;  %19264 = vmatpush1.xpose.msra.mxu0 %v36404_v40 }
 0x428   : > { %19268 = vmatprep.subr.mxu0 %v36404_v40  ;;  %v19735_v19 = vand.u32 4294901760, %v19734_v21 }
 0x42a   : > { %19505 = vmatpush1.xpose.msra.mxu1 %v36404_v40 }
 0x42b   : > { %19507 = vmatprep.subr.mxu1 %v36404_v40  ;;  %19272 = vmatpush1.xpose.msra.mxu0 %v36404_v40 }
 0x42c   : > { %19276 = vmatprep.subr.mxu0 %v36404_v40 }
 0x42e   : > { %19509 = vmatpush1.xpose.msra.mxu1 %v36404_v40 }
 0x42f   : > { %19511 = vmatprep.subr.mxu1 %v36404_v40  ;;  %19280 = vmatpush1.xpose.msra.mxu0 %v36404_v40 }
 0x430   : > { %19284 = vmatprep.subr.mxu0 %v36404_v40 }
 0x432   : > { %19513 = vmatpush1.xpose.msra.mxu1 %v36404_v40 }
 0x433   : > { %19515 = vmatprep.subr.mxu1 %v36404_v40  ;;  %19288 = vmatpush1.xpose.msra.mxu0 %v36404_v40 }
 0x434   : > { %19292 = vmatprep.subr.mxu0 %v36404_v40 }
 0x436   : > { %19517 = vmatpush1.xpose.msra.mxu1 %v36404_v40 }
 0x437   : > { %19519 = vmatprep.subr.mxu1 %v36404_v40  ;;  %19296 = vmatpush1.xpose.msra.mxu0 %v36404_v40 }
 0x438   : > { %19300 = vmatprep.subr.mxu0 %v36404_v40 }
 0x43a   : > { %19521 = vmatpush1.xpose.msra.mxu1 %v36404_v40 }
 0x43b   : > { %19523 = vmatprep.subr.mxu1 %v36404_v40  ;;  %19304 = vmatpush1.xpose.msra.mxu0 %v36404_v40 }
 0x43c   : > { %19308 = vmatprep.subr.mxu0 %v36404_v40 }
 0x43e   : > { %19525 = vmatpush1.xpose.msra.mxu1 %v36404_v40 }
 0x43f   : > { %19527 = vmatprep.subr.mxu1 %v36404_v40  ;;  %19312 = vmatpush1.xpose.msra.mxu0 %v36404_v40 }
 0x440   : > { %19316 = vmatprep.subr.mxu0 %v36404_v40 }
 0x442   : > { %19529 = vmatpush1.xpose.msra.mxu1 %v36404_v40 }
 0x443   : > { %19753 = vmatprep.subr.mxu1 %v19752_v26  ;;  %19320 = vmatpush1.xpose.msra.mxu0 %v36404_v40  ;;  %v36562_v26 = vld [vmem:[#allocation48_spill] sm:$0xff] }
 0x444   : > { %19324 = vmatprep.subr.mxu0 %v36404_v40 }
 0x445   : > { %19597 = vmatmul.mubr.f32.vlgmr.msra.gmra.mxu1 %v34464_v42 }
 0x446   : > { %19759 = vmatpush1.xpose.msra.mxu1 %v36404_v40  ;;  %20133 = vmatprep.mubr.f32.mxu1 %v34615_v45 }
 0x447   : > { %19765 = vmatprep.subr.mxu1 %v36404_v40  ;;  %19328 = vmatpush1.xpose.msra.mxu0 %v36404_v40 }
 0x448   : > { %19604 = vmatprep.subr.mxu0 %v34596_v35 }
 0x44a   : > { %19771 = vmatpush1.xpose.msra.mxu1 %v19770_v10  ;;  %19460 = vmatmul.mubr.f32.vlgmr.msra.gmra.mxu0 %v34464_v42  ;;  %v34699_v42 = vand.u32 4294901760, %v8438_v34  ;;  %v483_v10 = vrot.slane %v34814_v6, %v33149_v31 }
 0x44b   : > { %19777 = vmatprep.subr.mxu1 %v36404_v40  ;;  %19606 = vmatpush1.xpose.msra.mxu0 %v36404_v40 }
 0x44c   : > { %19736 = vmatprep.mubr.f32.mxu0 %v19735_v19  ;;  %19608 = vmatprep.subr.mxu0 %v36404_v40  ;;  %v34706_v59 = vsub.f32 %v8438_v34, %v34699_v42 }
 0x44e   : > { %19783 = vmatpush1.xpose.msra.mxu1 %v36404_v40  ;;  %v19739_v54 = vand.u32 4294901760, %v34706_v59 }
 0x44f   : > { %19789 = vmatprep.subr.mxu1 %v36404_v40  ;;  %19610 = vmatpush1.xpose.msra.mxu0 %v34609_v46 }
 0x450   : > { %19612 = vmatprep.subr.mxu0 %v36404_v40  ;;  %v19740_v30 = vsub.f32 %v34706_v59, %v19739_v54 }
 0x452   : > { %19795 = vmatpush1.xpose.msra.mxu1 %v36404_v40  ;;  %v19741_v49 = vand.u32 4294901760, %v19740_v30 }
 0x453   : > { %19801 = vmatprep.subr.mxu1 %v36404_v40  ;;  %19614 = vmatpush1.xpose.msra.mxu0 %v36404_v40 }
 0x454   : > { %19616 = vmatprep.subr.mxu0 %v36404_v40 }
 0x456   : > { %19807 = vmatpush1.xpose.msra.mxu1 %v36404_v40 }
 0x457   : > { %19813 = vmatprep.subr.mxu1 %v36404_v40  ;;  %19618 = vmatpush1.xpose.msra.mxu0 %v36404_v40 }
 0x458   : > { %19620 = vmatprep.subr.mxu0 %v36404_v40 }
 0x45a   : > { %19819 = vmatpush1.xpose.msra.mxu1 %v36404_v40 }
 0x45b   : > { %19825 = vmatprep.subr.mxu1 %v36404_v40  ;;  %19622 = vmatpush1.xpose.msra.mxu0 %v36404_v40 }
 0x45c   : > { %19624 = vmatprep.subr.mxu0 %v36404_v40 }
 0x45e   : > { %19831 = vmatpush1.xpose.msra.mxu1 %v36404_v40 }
 0x45f   : > { %19837 = vmatprep.subr.mxu1 %v36404_v40  ;;  %19626 = vmatpush1.xpose.msra.mxu0 %v36404_v40 }
 0x460   : > { %19628 = vmatprep.subr.mxu0 %v36404_v40 }
 0x462   : > { %19843 = vmatpush1.xpose.msra.mxu1 %v36404_v40 }
 0x463   : > { %19849 = vmatprep.subr.mxu1 %v36404_v40  ;;  %19630 = vmatpush1.xpose.msra.mxu0 %v36404_v40 }
 0x464   : > { %19632 = vmatprep.subr.mxu0 %v36404_v40 }
 0x466   : > { %19855 = vmatpush1.xpose.msra.mxu1 %v36404_v40 }
 0x467   : > { %19861 = vmatprep.subr.mxu1 %v36404_v40  ;;  %19634 = vmatpush1.xpose.msra.mxu0 %v36404_v40 }
 0x468   : > { %19636 = vmatprep.subr.mxu0 %v36404_v40 }
 0x46a   : > { %19867 = vmatpush1.xpose.msra.mxu1 %v36404_v40 }
 0x46b   : > { %19873 = vmatprep.subr.mxu1 %v36404_v40  ;;  %19638 = vmatpush1.xpose.msra.mxu0 %v36404_v40 }
 0x46c   : > { %19640 = vmatprep.subr.mxu0 %v36404_v40 }
 0x46e   : > { %19879 = vmatpush1.xpose.msra.mxu1 %v36404_v40 }
 0x46f   : > { %19885 = vmatprep.subr.mxu1 %v36404_v40  ;;  %19642 = vmatpush1.xpose.msra.mxu0 %v36404_v40 }
 0x470   : > { %19644 = vmatprep.subr.mxu0 %v36404_v40 }
 0x472   : > { %19891 = vmatpush1.xpose.msra.mxu1 %v36404_v40 }
 0x473   : > { %19897 = vmatprep.subr.mxu1 %v36404_v40  ;;  %19646 = vmatpush1.xpose.msra.mxu0 %v36404_v40 }
 0x474   : > { %19648 = vmatprep.subr.mxu0 %v36404_v40 }
 0x476   : > { %19903 = vmatpush1.xpose.msra.mxu1 %v36404_v40 }
 0x477   : > { %19909 = vmatprep.subr.mxu1 %v36404_v40  ;;  %19650 = vmatpush1.xpose.msra.mxu0 %v36404_v40 }
 0x478   : > { %19652 = vmatprep.subr.mxu0 %v36404_v40 }
 0x47a   : > { %19915 = vmatpush1.xpose.msra.mxu1 %v36404_v40 }
 0x47b   : > { %19921 = vmatprep.subr.mxu1 %v36404_v40  ;;  %19654 = vmatpush1.xpose.msra.mxu0 %v36404_v40 }
 0x47c   : > { %19656 = vmatprep.subr.mxu0 %v36404_v40 }
 0x47e   : > { %19927 = vmatpush1.xpose.msra.mxu1 %v36404_v40 }
 0x47f   : > { %19933 = vmatprep.subr.mxu1 %v36404_v40  ;;  %19658 = vmatpush1.xpose.msra.mxu0 %v36404_v40 }
 0x480   : > { %19660 = vmatprep.subr.mxu0 %v36404_v40 }
 0x482   : > { %19939 = vmatpush1.xpose.msra.mxu1 %v36404_v40 }
 0x483   : > { %20345 = vmatprep.subr.mxu1 %v34596_v35  ;;  %19662 = vmatpush1.xpose.msra.mxu0 %v36404_v40 }
 0x484   : > { %19664 = vmatprep.subr.mxu0 %v36404_v40 }
 0x485   : > { %20135 = vmatmul.mubr.f32.vlgmr.msra.gmra.mxu1 %v34699_v42 }
 0x486   : > { %20347 = vmatpush1.xpose.msra.mxu1 %v36404_v40  ;;  %20475 = vmatprep.mubr.f32.mxu1 %v19733_v33  ;;  %v21016_v33 = vsub.f32 %v8441_v15, %v34873_v2  ;;  %v34938_v15 = vand.u32 4294901760, %v31357_v22 }
 0x487   : > { %20349 = vmatprep.subr.mxu1 %v36404_v40  ;;  %19666 = vmatpush1.xpose.msra.mxu0 %v36404_v40 }
 0x488   : > { %20143 = vmatprep.subr.mxu0 %v34604_v56  ;;  %v36560_v56 = vld [vmem:[#allocation17_spill] sm:$0xff] }
 0x489   : > { %v4823_v44 = vadd.f32 %v36560_v56, %v4745_v58  ;;  %v36567_v56 = vld [vmem:[#allocation56_spill] sm:$0xff] }
 0x48a   : > { %20351 = vmatpush1.xpose.msra.mxu1 %v34609_v46  ;;  %19742 = vmatmul.mubr.f32.vlgmr.msra.gmra.mxu0 %v19741_v49 }
 0x48b   : > { %20353 = vmatprep.subr.mxu1 %v36404_v40  ;;  %20146 = vmatpush1.xpose.msra.mxu0 %v36404_v40 }
 0x48c   : > { %20335 = vmatprep.mubr.f32.mxu0 %v34628_v24  ;;  %20149 = vmatprep.subr.mxu0 %v36404_v40 }
 0x48e   : > { %20355 = vmatpush1.xpose.msra.mxu1 %v36404_v40 }
 0x48f   : > { %20357 = vmatprep.subr.mxu1 %v36404_v40  ;;  %20152 = vmatpush1.xpose.msra.mxu0 %v34619_v0 }
 0x490   : > { %20155 = vmatprep.subr.mxu0 %v36404_v40 }
 0x492   : > { %20359 = vmatpush1.xpose.msra.mxu1 %v36404_v40 }
 0x493   : > { %20361 = vmatprep.subr.mxu1 %v36404_v40  ;;  %20158 = vmatpush1.xpose.msra.mxu0 %v36404_v40 }
 0x494   : > { %20161 = vmatprep.subr.mxu0 %v36404_v40 }
 0x496   : > { %20363 = vmatpush1.xpose.msra.mxu1 %v36404_v40 }
 0x497   : > { %20365 = vmatprep.subr.mxu1 %v36404_v40  ;;  %20164 = vmatpush1.xpose.msra.mxu0 %v36404_v40 }
 0x498   : > { %20167 = vmatprep.subr.mxu0 %v36404_v40 }
 0x49a   : > { %20367 = vmatpush1.xpose.msra.mxu1 %v36404_v40 }
 0x49b   : > { %20369 = vmatprep.subr.mxu1 %v36404_v40  ;;  %20170 = vmatpush1.xpose.msra.mxu0 %v36404_v40 }
 0x49c   : > { %20173 = vmatprep.subr.mxu0 %v36404_v40 }
 0x49e   : > { %20371 = vmatpush1.xpose.msra.mxu1 %v36404_v40 }
 0x49f   : > { %20373 = vmatprep.subr.mxu1 %v36404_v40  ;;  %20176 = vmatpush1.xpose.msra.mxu0 %v36404_v40 }
 0x4a0   : > { %20179 = vmatprep.subr.mxu0 %v36404_v40 }
 0x4a2   : > { %20375 = vmatpush1.xpose.msra.mxu1 %v36404_v40 }
 0x4a3   : > { %20377 = vmatprep.subr.mxu1 %v36404_v40  ;;  %20182 = vmatpush1.xpose.msra.mxu0 %v36404_v40 }
 0x4a4   : > { %20185 = vmatprep.subr.mxu0 %v36404_v40 }
 0x4a6   : > { %20379 = vmatpush1.xpose.msra.mxu1 %v36404_v40 }
 0x4a7   : > { %20381 = vmatprep.subr.mxu1 %v36404_v40  ;;  %20188 = vmatpush1.xpose.msra.mxu0 %v36404_v40 }
 0x4a8   : > { %20191 = vmatprep.subr.mxu0 %v36404_v40 }
 0x4aa   : > { %20383 = vmatpush1.xpose.msra.mxu1 %v36404_v40 }
 0x4ab   : > { %20385 = vmatprep.subr.mxu1 %v36404_v40  ;;  %20194 = vmatpush1.xpose.msra.mxu0 %v36404_v40 }
 0x4ac   : > { %20197 = vmatprep.subr.mxu0 %v36404_v40 }
 0x4ae   : > { %20387 = vmatpush1.xpose.msra.mxu1 %v36404_v40 }
 0x4af   : > { %20389 = vmatprep.subr.mxu1 %v36404_v40  ;;  %20200 = vmatpush1.xpose.msra.mxu0 %v36404_v40 }
 0x4b0   : > { %20203 = vmatprep.subr.mxu0 %v36404_v40 }
 0x4b2   : > { %20391 = vmatpush1.xpose.msra.mxu1 %v36404_v40 }
 0x4b3   : > { %20393 = vmatprep.subr.mxu1 %v36404_v40  ;;  %20206 = vmatpush1.xpose.msra.mxu0 %v36404_v40 }
 0x4b4   : > { %20209 = vmatprep.subr.mxu0 %v36404_v40 }
 0x4b6   : > { %20395 = vmatpush1.xpose.msra.mxu1 %v36404_v40 }
 0x4b7   : > { %20397 = vmatprep.subr.mxu1 %v36404_v40  ;;  %20212 = vmatpush1.xpose.msra.mxu0 %v36404_v40 }
 0x4b8   : > { %20215 = vmatprep.subr.mxu0 %v36404_v40 }
 0x4ba   : > { %20399 = vmatpush1.xpose.msra.mxu1 %v36404_v40 }
 0x4bb   : > { %20401 = vmatprep.subr.mxu1 %v36404_v40  ;;  %20218 = vmatpush1.xpose.msra.mxu0 %v36404_v40 }
 0x4bc   : > { %20221 = vmatprep.subr.mxu0 %v36404_v40 }
 0x4be   : > { %20403 = vmatpush1.xpose.msra.mxu1 %v36404_v40 }
 0x4bf   : > { %20405 = vmatprep.subr.mxu1 %v36404_v40  ;;  %20224 = vmatpush1.xpose.msra.mxu0 %v36404_v40 }
 0x4c0   : > { %20227 = vmatprep.subr.mxu0 %v36404_v40 }
 0x4c2   : > { %20407 = vmatpush1.xpose.msra.mxu1 %v36404_v40 }
 0x4c3   : > { %20751 = vmatprep.subr.mxu1 %v34596_v35  ;;  %20230 = vmatpush1.xpose.msra.mxu0 %v36404_v40  ;;  %v31355_v35 = vld [vmem:[%s31895_s10 + $0x88] sm:$0xff] }
 0x4c4   : > { %20233 = vmatprep.subr.mxu0 %v36404_v40  ;;  %v34860_v48 = vand.u32 4294901760, %v31355_v35 }
 0x4c5   : > { %20479 = vmatmul.mubr.f32.vlgmr.msra.gmra.mxu1 %v19739_v54  ;;  %v21017_v54 = vand.u32 4294901760, %v21016_v33 }
 0x4c6   : > { %20753 = vmatpush1.xpose.msra.mxu1 %v36404_v40  ;;  %20879 = vmatprep.mubr.f32.mxu1 %v34615_v45 }
 0x4c7   : > { %20755 = vmatprep.subr.mxu1 %v36404_v40  ;;  %20236 = vmatpush1.xpose.msra.mxu0 %v36404_v40 }
 0x4c8   : > { %20488 = vmatprep.subr.mxu0 %v19750_v1  ;;  %v31354_v1 = vld [vmem:[%s31895_s10 + $0x80] sm:$0xff] }
 0x4c9   : > { %v34876_v24 = vand.u32 4294901760, %v31354_v1 }
 0x4ca   : > { %20757 = vmatpush1.xpose.msra.mxu1 %v34609_v46  ;;  %20338 = vmatmul.mubr.f32.vlgmr.msra.gmra.mxu0 %v34706_v59  ;;  %v34868_v46 = vsub.f32 %v31355_v35, %v34860_v48  ;;  %v5065_v59 = vadd.f32 %v33588_v5, %v483_v10  ;;  %v21018_v5 = vsub.f32 %v21016_v33, %v21017_v54  ;;  %v36566_v35 = vld [vmem:[#allocation23_spill] sm:$0xff]  ;;  %v36569_v10 = vld [vmem:[#allocation53_spill] sm:$0xff] }
 0x4cb   : > { %20759 = vmatprep.subr.mxu1 %v36404_v40  ;;  %20492 = vmatpush1.xpose.msra.mxu0 %v36404_v40  ;;  %v34888_v21 = vsub.f32 %v31354_v1, %v34876_v24  ;;  %v36568_v1 = vld [vmem:[#allocation50_spill] sm:$0xff] }
 0x4cc   : > { %20742 = vmatprep.mubr.f32.mxu0 %v34615_v45  ;;  %20496 = vmatprep.subr.mxu0 %v36404_v40  ;;  %v36561_v45 = vld [vmem:[#allocation49_spill] sm:$0xff]  ;;  %v5157_v60 = vadd.f32 %v33579_v63, %v5065_v59  ;;  %v21019_v63 = vand.u32 4294901760, %v21018_v5 }
 0x4cd   : > { %v4907_v0 = vadd.f32 %v36561_v45, %v4823_v44  ;;  %v21412_v30 = vand.u32 4294901760, %v34888_v21 }
 0x4ce   : > { %20761 = vmatpush1.xpose.msra.mxu1 %v36404_v40  ;;  %v5238_v55 = vadd.f32 %v36563_v8, %v5157_v60 }
 0x4cf   : > { %20763 = vmatprep.subr.mxu1 %v36404_v40  ;;  %20500 = vmatpush1.xpose.msra.mxu0 %v19768_v14  ;;  %v21394_v14 = vand.u32 4294901760, %v34868_v46  ;;  %v4983_v11 = vadd.f32 %v36562_v26, %v4907_v0  ;;  %v21413_v13 = vsub.f32 %v34888_v21, %v21412_v30  ;;  %v34946_v26 = vsub.f32 %v31357_v22, %v34938_v15 }
 0x4d0   : > { %20504 = vmatprep.subr.mxu0 %v36404_v40  ;;  %v5316_v57 = vadd.f32 %v36564_v32, %v5238_v55 }
 0x4d1   : > { %v21395_v19 = vsub.f32 %v34868_v46, %v21394_v14  ;;  %v8440_v34 = vmax.f32 %v4983_v11, 0.0  ;;  %v21414_v38 = vand.u32 4294901760, %v21413_v13  ;;  %v31356_v11 = vld [vmem:[%s31895_s10 + $0x90] sm:$0xff]  ;;  %v22654_v59 = vand.u32 4294901760, %v34946_v26  ;;  %v36571_v13 = vld [vmem:[#allocation57_spill] sm:$0xff] }
 0x4d2   : > { %20765 = vmatpush1.xpose.msra.mxu1 %v36404_v40  ;;  %v5400_v47 = vadd.f32 %v36565_v51, %v5316_v57 }
 0x4d3   : > { %20767 = vmatprep.subr.mxu1 %v36404_v40  ;;  %20508 = vmatpush1.xpose.msra.mxu0 %v36404_v40  ;;  %v21396_v49 = vand.u32 4294901760, %v21395_v19  ;;  %v34901_v41 = vand.u32 4294901760, %v8440_v34 }
 0x4d4   : > { %20512 = vmatprep.subr.mxu0 %v36404_v40  ;;  %v5476_v44 = vadd.f32 %v36567_v56, %v5400_v47  ;;  %v31359_v56 = vld [vmem:[%s31895_s10 + $0xa8] sm:$0xff] }
 0x4d5   : > { %v21022_v3 = vsub.f32 %v8440_v34, %v34901_v41 }
 0x4d6   : > { %20769 = vmatpush1.xpose.msra.mxu1 %v36404_v40  ;;  %v8443_v0 = vmax.f32 %v5476_v44, 0.0  ;;  %v487_v44 = vrot.slane %v34814_v6, %v33468_v23 }
 0x4d7   : > { %20771 = vmatprep.subr.mxu1 %v36404_v40  ;;  %20516 = vmatpush1.xpose.msra.mxu0 %v36404_v40  ;;  %v21023_v7 = vand.u32 4294901760, %v21022_v3 }
 0x4d8   : > { %20520 = vmatprep.subr.mxu0 %v36404_v40  ;;  %v34951_v34 = vand.u32 4294901760, %v8443_v0 }
 0x4d9   : > { %v21024_v43 = vsub.f32 %v21022_v3, %v21023_v7 }
 0x4da   : > { %20773 = vmatpush1.xpose.msra.mxu1 %v36404_v40  ;;  %v34963_v60 = vsub.f32 %v8443_v0, %v34951_v34 }
 0x4db   : > { %20775 = vmatprep.subr.mxu1 %v36404_v40  ;;  %20524 = vmatpush1.xpose.msra.mxu0 %v36404_v40  ;;  %v21025_v58 = vand.u32 4294901760, %v21024_v43 }
 0x4dc   : > { %20528 = vmatprep.subr.mxu0 %v36404_v40 }
 0x4de   : > { %20777 = vmatpush1.xpose.msra.mxu1 %v36404_v40 }
 0x4df   : > { %20779 = vmatprep.subr.mxu1 %v36404_v40  ;;  %20532 = vmatpush1.xpose.msra.mxu0 %v36404_v40 }
 0x4e0   : > { %20536 = vmatprep.subr.mxu0 %v36404_v40 }
 0x4e2   : > { %20781 = vmatpush1.xpose.msra.mxu1 %v36404_v40 }
 0x4e3   : > { %20783 = vmatprep.subr.mxu1 %v36404_v40  ;;  %20540 = vmatpush1.xpose.msra.mxu0 %v36404_v40 }
 0x4e4   : > { %20544 = vmatprep.subr.mxu0 %v36404_v40 }
 0x4e6   : > { %20785 = vmatpush1.xpose.msra.mxu1 %v36404_v40 }
 0x4e7   : > { %20787 = vmatprep.subr.mxu1 %v36404_v40  ;;  %20548 = vmatpush1.xpose.msra.mxu0 %v36404_v40 }
 0x4e8   : > { %20552 = vmatprep.subr.mxu0 %v36404_v40 }
 0x4ea   : > { %20789 = vmatpush1.xpose.msra.mxu1 %v36404_v40 }
 0x4eb   : > { %20791 = vmatprep.subr.mxu1 %v36404_v40  ;;  %20556 = vmatpush1.xpose.msra.mxu0 %v36404_v40 }
 0x4ec   : > { %20560 = vmatprep.subr.mxu0 %v36404_v40 }
 0x4ee   : > { %20793 = vmatpush1.xpose.msra.mxu1 %v36404_v40 }
 0x4ef   : > { %20795 = vmatprep.subr.mxu1 %v36404_v40  ;;  %20564 = vmatpush1.xpose.msra.mxu0 %v36404_v40 }
 0x4f0   : > { %20568 = vmatprep.subr.mxu0 %v36404_v40 }
 0x4f2   : > { %20797 = vmatpush1.xpose.msra.mxu1 %v36404_v40 }
 0x4f3   : > { %20799 = vmatprep.subr.mxu1 %v36404_v40  ;;  %20572 = vmatpush1.xpose.msra.mxu0 %v36404_v40 }
 0x4f4   : > { %20576 = vmatprep.subr.mxu0 %v36404_v40 }
 0x4f6   : > { %20801 = vmatpush1.xpose.msra.mxu1 %v36404_v40 }
 0x4f7   : > { %20803 = vmatprep.subr.mxu1 %v36404_v40  ;;  %20580 = vmatpush1.xpose.msra.mxu0 %v36404_v40 }
 0x4f8   : > { %20584 = vmatprep.subr.mxu0 %v36404_v40 }
 0x4fa   : > { %20805 = vmatpush1.xpose.msra.mxu1 %v36404_v40 }
 0x4fb   : > { %20807 = vmatprep.subr.mxu1 %v36404_v40  ;;  %20588 = vmatpush1.xpose.msra.mxu0 %v36404_v40 }
 0x4fc   : > { %20592 = vmatprep.subr.mxu0 %v36404_v40 }
 0x4fe   : > { %20809 = vmatpush1.xpose.msra.mxu1 %v36404_v40 }
 0x4ff   : > { %20811 = vmatprep.subr.mxu1 %v36404_v40  ;;  %20596 = vmatpush1.xpose.msra.mxu0 %v36404_v40 }
 0x500   : > { %20600 = vmatprep.subr.mxu0 %v36404_v40 }
 0x502   : > { %20813 = vmatpush1.xpose.msra.mxu1 %v36404_v40 }
 0x503   : > { %21217 = vmatprep.subr.mxu1 %v36404_v40  ;;  %20604 = vmatpush1.xpose.msra.mxu0 %v36404_v40 }
 0x504   : > { %20608 = vmatprep.subr.mxu0 %v36404_v40 }
 0x505   : > { %20881 = vmatmul.mubr.f32.vlgmr.msra.gmra.mxu1 %v34699_v42 }
 0x506   : > { %21223 = vmatpush1.xpose.msra.mxu1 %v36404_v40  ;;  %21417 = vmatprep.mubr.f32.mxu1 %v34873_v2 }
 0x507   : > { %21397 = vmatprep.subr.mxu1 %v21396_v49  ;;  %20612 = vmatpush1.xpose.msra.mxu0 %v36404_v40 }
 0x508   : > { %20948 = vmatprep.subr.mxu0 %v36404_v40 }
 0x50a   : > { %21403 = vmatpush2.xpose.msra.mxu1 %v36404_v40  ;;  %20744 = vmatmul.mubr.f32.vlgmr.msra.gmra.mxu0 %v34699_v42  ;;  %v479_v42 = vrot.slane %v34814_v6, %v33231_v53 }
 0x50b   : > { %21409 = vmatprep.subr.mxu1 %v36404_v40  ;;  %20950 = vmatpush1.xpose.msra.mxu0 %v36404_v40 }
 0x50c   : > { %21020 = vmatprep.mubr.f32.mxu0 %v21019_v63  ;;  %21008 = vmatprep.subr.mxu0 %v34860_v48  ;;  %v5063_v37 = vadd.f32 %v36566_v35, %v479_v42  ;;  %v36573_v42 = vld [vmem:[#allocation62_spill] sm:$0xff] }
 0x50e   : > { %21415 = vmatpush2.xpose.msra.mxu1 %v21414_v38  ;;  %v5155_v45 = vadd.f32 %v36568_v1, %v5063_v37  ;;  %v36572_v38 = vld [vmem:[#allocation55_spill] sm:$0xff] }
 0x50f   : > { %21689 = vmatprep.subr.mxu1 %v36404_v40  ;;  %21010 = vmatpush2.xpose.msra.mxu0 %v36404_v40 }
 0x510   : > { %21012 = vmatprep.subr.mxu0 %v36404_v40  ;;  %v5236_v19 = vadd.f32 %v36569_v10, %v5155_v45  ;;  %v36575_v45 = vld [vmem:[#allocation61_spill] sm:$0xff] }
 0x511   : > { %21419 = vmatmul.mubr.f32.vlgmr.msra.gmra.mxu1 %v34901_v41  ;;  %v5554_v0 = vadd.f32 %v36575_v45, %v487_v44  ;;  %v31360_v44 = vld [vmem:[%s31895_s10 + $0xb0] sm:$0xff]  ;;  %v495_v45 = vrot.slane %v34814_v6, %v33434_v27 }
 0x512   : > { %21691 = vmatpush1.xpose.msra.mxu1 %v36404_v40  ;;  %21759 = vmatprep.mubr.f32.mxu1 %v21017_v54  ;;  %v36570_v54 = vld [vmem:[#allocation51_spill] sm:$0xff] }
 0x513   : > { %21749 = vmatprep.subr.mxu1 %v34860_v48  ;;  %21014 = vmatpush2.xpose.msra.mxu0 %v34876_v24  ;;  %v5314_v49 = vadd.f32 %v36570_v54, %v5236_v19  ;;  %v36576_v54 = vld [vmem:[#allocation59_spill] sm:$0xff] }
 0x514   : > { %21517 = vmatprep.subr.mxu0 %v36404_v40 }
 0x515   : > { %v5398_v8 = vadd.f32 %v36571_v13, %v5314_v49  ;;  %v5646_v49 = vadd.f32 %v36576_v54, %v5554_v0 }
 0x516   : > { %21751 = vmatpush2.xpose.msra.mxu1 %v36404_v40  ;;  %21026 = vmatmul.mubr.f32.vlgmr.msra.gmra.mxu0 %v21025_v58  ;;  %v36574_v58 = vld [vmem:[#allocation60_spill] sm:$0xff] }
 0x517   : > { %21753 = vmatprep.subr.mxu1 %v36404_v40  ;;  %21520 = vmatpush1.xpose.msra.mxu0 %v36404_v40 }
 0x518   : > { %21619 = vmatprep.mubr.f32.mxu0 %v21016_v33  ;;  %21607 = vmatprep.subr.mxu0 %v34868_v46  ;;  %v34955_v33 = vand.u32 4294901760, %v31356_v11 }
 0x51a   : > { %21755 = vmatpush2.xpose.msra.mxu1 %v34876_v24  ;;  %v34967_v5 = vsub.f32 %v31356_v11, %v34955_v33 }
 0x51b   : > { %22095 = vmatprep.subr.mxu1 %v36404_v40  ;;  %21610 = vmatpush2.xpose.msra.mxu0 %v36404_v40 }
 0x51c   : > { %21613 = vmatprep.subr.mxu0 %v36404_v40  ;;  %v22672_v55 = vand.u32 4294901760, %v34967_v5 }
 0x51d   : > { %21763 = vmatmul.mubr.f32.vlgmr.msra.gmra.mxu1 %v21023_v7  ;;  %v5474_v7 = vadd.f32 %v36572_v38, %v5398_v8  ;;  %v36578_v8 = vld [vmem:[#allocation63_spill] sm:$0xff]  ;;  %v36579_v38 = vld [vmem:[#allocation66_spill] sm:$0xff] }
 0x51e   : > { %22097 = vmatpush1.xpose.msra.mxu1 %v36404_v40  ;;  %22163 = vmatprep.mubr.f32.mxu1 %v34873_v2 }
 0x51f   : > { %22155 = vmatprep.subr.mxu1 %v34860_v48  ;;  %21616 = vmatpush2.xpose.msra.mxu0 %v34888_v21  ;;  %v22655_v48 = vsub.f32 %v34946_v26, %v22654_v59 }
 0x520   : > { %21892 = vmatprep.subr.mxu0 %v36404_v40 }
 0x521   : > { %v22656_v63 = vand.u32 4294901760, %v22655_v48 }
 0x522   : > { %22157 = vmatpush2.xpose.msra.mxu1 %v36404_v40  ;;  %21622 = vmatmul.mubr.f32.vlgmr.msra.gmra.mxu0 %v21022_v3  ;;  %v22301_v3 = vand.u32 4294901760, %v34963_v60 }
 0x523   : > { %22159 = vmatprep.subr.mxu1 %v36404_v40  ;;  %21896 = vmatpush1.xpose.msra.mxu0 %v36404_v40 }
 0x524   : > { %22026 = vmatprep.mubr.f32.mxu0 %v34873_v2  ;;  %22012 = vmatprep.subr.mxu0 %v21394_v14  ;;  %v22302_v46 = vsub.f32 %v34963_v60, %v22301_v3  ;;  %v22673_v2 = vsub.f32 %v34967_v5, %v22672_v55 }
 0x526   : > { %22161 = vmatpush2.xpose.msra.mxu1 %v34876_v24  ;;  %v8442_v24 = vmax.f32 %v5474_v7, 0.0  ;;  %v22303_v14 = vand.u32 4294901760, %v22302_v46  ;;  %v22674_v32 = vand.u32 4294901760, %v22673_v2 }
 0x527   : > { %22501 = vmatprep.subr.mxu1 %v36404_v40  ;;  %22016 = vmatpush2.xpose.msra.mxu0 %v36404_v40 }
 0x528   : > { %22020 = vmatprep.subr.mxu0 %v36404_v40  ;;  %v34999_v57 = vand.u32 4294901760, %v8442_v24 }
 0x529   : > { %22165 = vmatmul.mubr.f32.vlgmr.msra.gmra.mxu1 %v34901_v41 }
 0x52a   : > { %22507 = vmatpush1.xpose.msra.mxu1 %v36404_v40  ;;  %22701 = vmatprep.mubr.f32.mxu1 %v34951_v34  ;;  %v22306_v21 = vsub.f32 %v8442_v24, %v34999_v57  ;;  %v36580_v24 = vld [vmem:[#allocation65_spill] sm:$0xff] }
 0x52b   : > { %22657 = vmatprep.subr.mxu1 %v22656_v63  ;;  %22024 = vmatpush2.xpose.msra.mxu0 %v21412_v30 }
 0x52c   : > { %22232 = vmatprep.subr.mxu0 %v36404_v40  ;;  %v22307_v30 = vand.u32 4294901760, %v22306_v21 }
 0x52e   : > { %22663 = vmatpush2.xpose.msra.mxu1 %v36404_v40  ;;  %22028 = vmatmul.mubr.f32.vlgmr.msra.gmra.mxu0 %v34901_v41  ;;  %v491_v41 = vrot.slane %v34814_v6, %v36537_v36  ;;  %v22308_v43 = vsub.f32 %v22306_v21, %v22307_v30 }
 0x52f   : > { %22669 = vmatprep.subr.mxu1 %v36404_v40  ;;  %22234 = vmatpush1.xpose.msra.mxu0 %v36404_v40 }
 0x530   : > { %22304 = vmatprep.mubr.f32.mxu0 %v22303_v14  ;;  %22284 = vmatprep.subr.mxu0 %v34938_v15  ;;  %v5556_v51 = vadd.f32 %v36573_v42, %v491_v41  ;;  %v22309_v47 = vand.u32 4294901760, %v22308_v43  ;;  %v499_v42 = vrot.slane %v34814_v6, %v33642_v62 }
 0x532   : > { %22675 = vmatpush2.xpose.msra.mxu1 %v22674_v32  ;;  %v5648_v35 = vadd.f32 %v36574_v58, %v5556_v51  ;;  %v6047_v51 = vadd.f32 %v33691_v25, %v499_v42  ;;  %v36591_v42 = vld [vmem:[#allocation77_spill] sm:$0xff] }
 0x533   : > { %22681 = vmatprep.subr.mxu1 %v36404_v40  ;;  %22286 = vmatpush2.xpose.msra.mxu0 %v36404_v40 }
 0x534   : > { %22288 = vmatprep.subr.mxu0 %v36404_v40  ;;  %v5729_v37 = vadd.f32 %v33659_v12, %v5648_v35  ;;  %v36582_v35 = vld [vmem:[#allocation71_spill] sm:$0xff] }
 0x536   : > { %22687 = vmatpush2.xpose.msra.mxu1 %v36404_v40  ;;  %v5807_v22 = vadd.f32 %v33649_v39, %v5729_v37 }
 0x537   : > { %22693 = vmatprep.subr.mxu1 %v36404_v40  ;;  %22290 = vmatpush2.xpose.msra.mxu0 %v34955_v33 }
 0x538   : > { %22292 = vmatprep.subr.mxu0 %v36404_v40  ;;  %v5891_v12 = vadd.f32 %v33674_v16, %v5807_v22  ;;  %v35049_v16 = vand.u32 4294901760, %v31359_v56  ;;  %v31361_v22 = vld [vmem:[%s31895_s10 + $0xb8] sm:$0xff] }
 0x53a   : > { %22699 = vmatpush2.xpose.msra.mxu1 %v36404_v40  ;;  %v5967_v39 = vadd.f32 %v33665_v20, %v5891_v12  ;;  %v35058_v20 = vsub.f32 %v31359_v56, %v35049_v16  ;;  %v36583_v12 = vld [vmem:[#allocation74_spill] sm:$0xff] }
 0x53b   : > { %22973 = vmatprep.subr.mxu1 %v36404_v40  ;;  %22294 = vmatpush2.xpose.msra.mxu0 %v36404_v40 }
 0x53c   : > { %22296 = vmatprep.subr.mxu0 %v36404_v40  ;;  %v8445_v1 = vmax.f32 %v5967_v39, 0.0  ;;  %v23914_v19 = vand.u32 4294901760, %v35058_v20 }
 0x53d   : > { %22703 = vmatmul.mubr.f32.vlgmr.msra.gmra.mxu1 %v34999_v57 }
 0x53e   : > { %22975 = vmatpush1.xpose.msra.mxu1 %v36404_v40  ;;  %23043 = vmatprep.mubr.f32.mxu1 %v22301_v3  ;;  %v35065_v11 = vand.u32 4294901760, %v8445_v1 }
 0x53f   : > { %23025 = vmatprep.subr.mxu1 %v34938_v15  ;;  %22298 = vmatpush2.xpose.msra.mxu0 %v36404_v40 }
 0x540   : > { %22801 = vmatprep.subr.mxu0 %v36404_v40 }
 0x542   : > { %23027 = vmatpush2.xpose.msra.mxu1 %v36404_v40  ;;  %22310 = vmatmul.mubr.f32.vlgmr.msra.gmra.mxu0 %v22309_v47  ;;  %v36581_v47 = vld [vmem:[#allocation68_spill] sm:$0xff] }
 0x543   : > { %23029 = vmatprep.subr.mxu1 %v36404_v40  ;;  %22804 = vmatpush1.xpose.msra.mxu0 %v36404_v40  ;;  %v6139_v58 = vadd.f32 %v36581_v47, %v6047_v51 }
 0x544   : > { %22903 = vmatprep.mubr.f32.mxu0 %v34963_v60  ;;  %22879 = vmatprep.subr.mxu0 %v34946_v26 }
 0x545   : > { %v6220_v25 = vadd.f32 %v33706_v61, %v6139_v58  ;;  %v36592_v58 = vld [vmem:[#allocation81_spill] sm:$0xff] }
 0x546   : > { %23031 = vmatpush2.xpose.msra.mxu1 %v34955_v33 }
 0x547   : > { %23033 = vmatprep.subr.mxu1 %v36404_v40  ;;  %22882 = vmatpush2.xpose.msra.mxu0 %v36404_v40  ;;  %v6298_v37 = vadd.f32 %v36582_v35, %v6220_v25  ;;  %v31363_v35 = vld [vmem:[%s31895_s10 + $0xc8] sm:$0xff] }
 0x548   : > { %22885 = vmatprep.subr.mxu0 %v36404_v40 }
 0x549   : > { %v6382_v61 = vadd.f32 %v33732_v9, %v6298_v37  ;;  %v35188_v9 = vand.u32 4294901760, %v31361_v22  ;;  %v36593_v37 = vld [vmem:[#allocation84_spill] sm:$0xff] }
 0x54a   : > { %23035 = vmatpush2.xpose.msra.mxu1 %v36404_v40 }
 0x54b   : > { %23037 = vmatprep.subr.mxu1 %v36404_v40  ;;  %22888 = vmatpush2.xpose.msra.mxu0 %v34967_v5  ;;  %v6458_v56 = vadd.f32 %v36583_v12, %v6382_v61 }
 0x54c   : > { %22891 = vmatprep.subr.mxu0 %v36404_v40 }
 0x54d   : > { %v8447_v39 = vmax.f32 %v6458_v56, 0.0  ;;  %v31362_v56 = vld [vmem:[%s31895_s10 + $0xc0] sm:$0xff] }
 0x54e   : > { %23039 = vmatpush2.xpose.msra.mxu1 %v36404_v40 }
 0x54f   : > { %23379 = vmatprep.subr.mxu1 %v36404_v40  ;;  %22894 = vmatpush2.xpose.msra.mxu0 %v36404_v40 }
 0x550   : > { %22897 = vmatprep.subr.mxu0 %v36404_v40 }
 0x551   : > { %23047 = vmatmul.mubr.f32.vlgmr.msra.gmra.mxu1 %v22307_v30 }
 0x552   : > { %23381 = vmatpush1.xpose.msra.mxu1 %v36404_v40  ;;  %23447 = vmatprep.mubr.f32.mxu1 %v34951_v34 }
 0x553   : > { %23431 = vmatprep.subr.mxu1 %v34938_v15  ;;  %22900 = vmatpush2.xpose.msra.mxu0 %v36404_v40  ;;  %v31358_v15 = vld [vmem:[%s31895_s10 + $0xa0] sm:$0xff] }
 0x554   : > { %23176 = vmatprep.subr.mxu0 %v36404_v40  ;;  %v35068_v10 = vand.u32 4294901760, %v31358_v15 }
 0x556   : > { %23433 = vmatpush2.xpose.msra.mxu1 %v36404_v40  ;;  %22906 = vmatmul.mubr.f32.vlgmr.msra.gmra.mxu0 %v22306_v21  ;;  %v35080_v26 = vsub.f32 %v31358_v15, %v35068_v10 }
 0x557   : > { %23435 = vmatprep.subr.mxu1 %v36404_v40  ;;  %23180 = vmatpush1.xpose.msra.mxu0 %v36404_v40 }
 0x558   : > { %23310 = vmatprep.mubr.f32.mxu0 %v34951_v34  ;;  %23280 = vmatprep.subr.mxu0 %v22654_v59  ;;  %v35076_v34 = vsub.f32 %v8445_v1, %v35065_v11  ;;  %v36577_v59 = vld [vmem:[#allocation64_spill] sm:$0xff]  ;;  %v23932_v13 = vand.u32 4294901760, %v35080_v26  ;;  %v35200_v1 = vand.u32 4294901760, %v8447_v39 }
 0x559   : > { %v5727_v60 = vadd.f32 %v36577_v59, %v5646_v49 }
 0x55a   : > { %23437 = vmatpush2.xpose.msra.mxu1 %v34955_v33  ;;  %v23915_v33 = vsub.f32 %v35058_v20, %v23914_v19  ;;  %v23585_v48 = vand.u32 4294901760, %v35076_v34  ;;  %v23933_v63 = vsub.f32 %v35080_v26, %v23932_v13  ;;  %v35212_v0 = vsub.f32 %v8447_v39, %v35200_v1 }
 0x55b   : > { %23439 = vmatprep.subr.mxu1 %v36404_v40  ;;  %23284 = vmatpush2.xpose.msra.mxu0 %v36404_v40  ;;  %v5805_v3 = vadd.f32 %v36578_v8, %v5727_v60  ;;  %v36586_v60 = vld [vmem:[#allocation72_spill] sm:$0xff]  ;;  %v36587_v8 = vld [vmem:[#allocation70_spill] sm:$0xff]  ;;  %v35372_v39 = vand.u32 4294901760, %v31362_v56 }
 0x55c   : > { %23288 = vmatprep.subr.mxu0 %v36404_v40  ;;  %v23916_v5 = vand.u32 4294901760, %v23915_v33  ;;  %v23934_v2 = vand.u32 4294901760, %v23933_v63  ;;  %v24869_v6 = vand.u32 4294901760, %v35212_v0 }
 0x55d   : > { %v5889_v7 = vadd.f32 %v36579_v38, %v5805_v3  ;;  %v36589_v38 = vld [vmem:[#allocation73_spill] sm:$0xff] }
 0x55e   : > { %23441 = vmatpush2.xpose.msra.mxu1 %v36404_v40  ;;  %v24870_v33 = vsub.f32 %v35212_v0, %v24869_v6 }
 0x55f   : > { %23443 = vmatprep.subr.mxu1 %v36404_v40  ;;  %23292 = vmatpush2.xpose.msra.mxu0 %v22672_v55  ;;  %v23586_v55 = vsub.f32 %v35076_v34, %v23585_v48  ;;  %v5965_v14 = vadd.f32 %v36580_v24, %v5889_v7 }
 0x560   : > { %23296 = vmatprep.subr.mxu0 %v36404_v40 }
 0x561   : > { %v23587_v46 = vand.u32 4294901760, %v23586_v55  ;;  %v8444_v32 = vmax.f32 %v5965_v14, 0.0  ;;  %v36588_v55 = vld [vmem:[#allocation75_spill] sm:$0xff] }
 0x562   : > { %23445 = vmatpush2.xpose.msra.mxu1 %v36404_v40 }
 0x563   : > { %23785 = vmatprep.subr.mxu1 %v36404_v40  ;;  %23300 = vmatpush2.xpose.msra.mxu0 %v36404_v40 }
 0x564   : > { %23304 = vmatprep.subr.mxu0 %v36404_v40 }
 0x565   : > { %23449 = vmatmul.mubr.f32.vlgmr.msra.gmra.mxu1 %v34999_v57 }
 0x566   : > { %23791 = vmatpush1.xpose.msra.mxu1 %v36404_v40  ;;  %23985 = vmatprep.mubr.f32.mxu1 %v35065_v11 }
 0x567   : > { %23917 = vmatprep.subr.mxu1 %v23916_v5  ;;  %23308 = vmatpush2.xpose.msra.mxu0 %v36404_v40 }
 0x568   : > { %23516 = vmatprep.subr.mxu0 %v36404_v40 }
 0x56a   : > { %23923 = vmatpush2.xpose.msra.mxu1 %v36404_v40  ;;  %23312 = vmatmul.mubr.f32.vlgmr.msra.gmra.mxu0 %v34999_v57  ;;  %v35119_v57 = vand.u32 4294901760, %v8444_v32 }
 0x56b   : > { %23929 = vmatprep.subr.mxu1 %v36404_v40  ;;  %23518 = vmatpush1.xpose.msra.mxu0 %v36404_v40 }
 0x56c   : > { %23588 = vmatprep.mubr.f32.mxu0 %v23587_v46  ;;  %23560 = vmatprep.subr.mxu0 %v35049_v16  ;;  %v23590_v21 = vsub.f32 %v8444_v32, %v35119_v57 }
 0x56e   : > { %23935 = vmatpush2.xpose.msra.mxu1 %v23934_v2  ;;  %v23591_v30 = vand.u32 4294901760, %v23590_v21 }
 0x56f   : > { %23941 = vmatprep.subr.mxu1 %v36404_v40  ;;  %23562 = vmatpush2.xpose.msra.mxu0 %v36404_v40 }
 0x570   : > { %23564 = vmatprep.subr.mxu0 %v36404_v40  ;;  %v23592_v41 = vsub.f32 %v23590_v21, %v23591_v30 }
 0x572   : > { %23947 = vmatpush2.xpose.msra.mxu1 %v36404_v40  ;;  %v23593_v43 = vand.u32 4294901760, %v23592_v41  ;;  %v36590_v41 = vld [vmem:[#allocation79_spill] sm:$0xff] }
 0x573   : > { %23953 = vmatprep.subr.mxu1 %v36404_v40  ;;  %23566 = vmatpush2.xpose.msra.mxu0 %v35068_v10 }
 0x574   : > { %23568 = vmatprep.subr.mxu0 %v36404_v40 }
 0x576   : > { %23959 = vmatpush2.xpose.msra.mxu1 %v36404_v40 }
 0x577   : > { %23965 = vmatprep.subr.mxu1 %v36404_v40  ;;  %23570 = vmatpush2.xpose.msra.mxu0 %v36404_v40 }
 0x578   : > { %23572 = vmatprep.subr.mxu0 %v36404_v40 }
 0x57a   : > { %23971 = vmatpush2.xpose.msra.mxu1 %v36404_v40 }
 0x57b   : > { %23977 = vmatprep.subr.mxu1 %v36404_v40  ;;  %23574 = vmatpush2.xpose.msra.mxu0 %v36404_v40 }
 0x57c   : > { %23576 = vmatprep.subr.mxu0 %v36404_v40 }
 0x57e   : > { %23983 = vmatpush2.xpose.msra.mxu1 %v36404_v40 }
 0x57f   : > { %24257 = vmatprep.subr.mxu1 %v36404_v40  ;;  %23578 = vmatpush2.xpose.msra.mxu0 %v36404_v40 }
 0x580   : > { %23580 = vmatprep.subr.mxu0 %v36404_v40 }
 0x581   : > { %23987 = vmatmul.mubr.f32.vlgmr.msra.gmra.mxu1 %v35119_v57 }
 0x582   : > { %24259 = vmatpush1.xpose.msra.mxu1 %v36404_v40  ;;  %24327 = vmatprep.mubr.f32.mxu1 %v23585_v48 }
 0x583   : > { %24301 = vmatprep.subr.mxu1 %v35049_v16  ;;  %23582 = vmatpush2.xpose.msra.mxu0 %v36404_v40 }
 0x584   : > { %24085 = vmatprep.subr.mxu0 %v36404_v40 }
 0x586   : > { %24303 = vmatpush2.xpose.msra.mxu1 %v36404_v40  ;;  %23594 = vmatmul.mubr.f32.vlgmr.msra.gmra.mxu0 %v23593_v43 }
 0x587   : > { %24305 = vmatprep.subr.mxu1 %v36404_v40  ;;  %24088 = vmatpush1.xpose.msra.mxu0 %v36404_v40 }
 0x588   : > { %24187 = vmatprep.mubr.f32.mxu0 %v35076_v34  ;;  %24151 = vmatprep.subr.mxu0 %v35058_v20  ;;  %v35203_v20 = vand.u32 4294901760, %v31360_v44  ;;  %v36585_v34 = vld [vmem:[#allocation67_spill] sm:$0xff] }
 0x58a   : > { %24307 = vmatpush2.xpose.msra.mxu1 %v35068_v10 }
 0x58b   : > { %24309 = vmatprep.subr.mxu1 %v36404_v40  ;;  %24154 = vmatpush2.xpose.msra.mxu0 %v36404_v40 }
 0x58c   : > { %24157 = vmatprep.subr.mxu0 %v36404_v40 }
 0x58e   : > { %24311 = vmatpush2.xpose.msra.mxu1 %v36404_v40 }
 0x58f   : > { %24313 = vmatprep.subr.mxu1 %v36404_v40  ;;  %24160 = vmatpush2.xpose.msra.mxu0 %v35080_v26 }
 0x590   : > { %24163 = vmatprep.subr.mxu0 %v36404_v40 }
 0x592   : > { %24315 = vmatpush2.xpose.msra.mxu1 %v36404_v40 }
 0x593   : > { %24317 = vmatprep.subr.mxu1 %v36404_v40  ;;  %24166 = vmatpush2.xpose.msra.mxu0 %v36404_v40 }
 0x594   : > { %24169 = vmatprep.subr.mxu0 %v36404_v40 }
 0x596   : > { %24319 = vmatpush2.xpose.msra.mxu1 %v36404_v40 }
 0x597   : > { %24321 = vmatprep.subr.mxu1 %v36404_v40  ;;  %24172 = vmatpush2.xpose.msra.mxu0 %v36404_v40 }
 0x598   : > { %24175 = vmatprep.subr.mxu0 %v36404_v40 }
 0x59a   : > { %24323 = vmatpush2.xpose.msra.mxu1 %v36404_v40 }
 0x59b   : > { %24663 = vmatprep.subr.mxu1 %v36404_v40  ;;  %24178 = vmatpush2.xpose.msra.mxu0 %v36404_v40 }
 0x59c   : > { %24181 = vmatprep.subr.mxu0 %v36404_v40 }
 0x59d   : > { %24331 = vmatmul.mubr.f32.vlgmr.msra.gmra.mxu1 %v23591_v30 }
 0x59e   : > { %24665 = vmatpush1.xpose.msra.mxu1 %v36404_v40  ;;  %24731 = vmatprep.mubr.f32.mxu1 %v35065_v11 }
 0x59f   : > { %24707 = vmatprep.subr.mxu1 %v35049_v16  ;;  %24184 = vmatpush2.xpose.msra.mxu0 %v36404_v40  ;;  %v35196_v16 = vsub.f32 %v31361_v22, %v35188_v9 }
 0x5a0   : > { %24460 = vmatprep.subr.mxu0 %v36404_v40 }
 0x5a1   : > { %v25174_v15 = vand.u32 4294901760, %v35196_v16 }
 0x5a2   : > { %24709 = vmatpush2.xpose.msra.mxu1 %v36404_v40  ;;  %24190 = vmatmul.mubr.f32.vlgmr.msra.gmra.mxu0 %v23590_v21  ;;  %v35315_v21 = vld [vmem:[%s33001_s9 + $0x30] ss:$2 sm:$0xff] }
 0x5a3   : > { %24711 = vmatprep.subr.mxu1 %v36404_v40  ;;  %24464 = vmatpush1.xpose.msra.mxu0 %v36404_v40  ;;  %v507_v30 = vrot.slane %v35315_v21, %v36530_v52 }
 0x5a4   : > { %24594 = vmatprep.mubr.f32.mxu0 %v35065_v11  ;;  %24548 = vmatprep.subr.mxu0 %v23914_v19  ;;  %v35216_v11 = vsub.f32 %v31360_v44, %v35203_v20  ;;  %v36584_v19 = vld [vmem:[#allocation69_spill] sm:$0xff] }
 0x5a5   : > { %v6045_v27 = vadd.f32 %v36584_v19, %v495_v45  ;;  %v6538_v43 = vadd.f32 %v36590_v41, %v507_v30  ;;  %v36602_v30 = vld [vmem:[#allocation89_spill] sm:$0xff] }
 0x5a6   : > { %24713 = vmatpush2.xpose.msra.mxu1 %v35068_v10  ;;  %v25175_v10 = vsub.f32 %v35196_v16, %v25174_v15  ;;  %v25192_v54 = vand.u32 4294901760, %v35216_v11 }
 0x5a7   : > { %24715 = vmatprep.subr.mxu1 %v36404_v40  ;;  %24552 = vmatpush2.xpose.msra.mxu0 %v36404_v40  ;;  %v6137_v26 = vadd.f32 %v36585_v34, %v6045_v27  ;;  %v6630_v51 = vadd.f32 %v36591_v42, %v6538_v43  ;;  %v36594_v27 = vld [vmem:[#allocation78_spill] sm:$0xff]  ;;  %v36595_v34 = vld [vmem:[#allocation76_spill] sm:$0xff] }
 0x5a8   : > { %24556 = vmatprep.subr.mxu0 %v36404_v40  ;;  %v25176_v49 = vand.u32 4294901760, %v25175_v10  ;;  %v25193_v59 = vsub.f32 %v35216_v11, %v25192_v54  ;;  %v36603_v43 = vld [vmem:[#allocation94_spill] sm:$0xff] }
 0x5a9   : > { %v6218_v48 = vadd.f32 %v36586_v60, %v6137_v26  ;;  %v6711_v47 = vadd.f32 %v33780_v28, %v6630_v51  ;;  %v36597_v60 = vld [vmem:[#allocation80_spill] sm:$0xff] }
 0x5aa   : > { %24717 = vmatpush2.xpose.msra.mxu1 %v36404_v40  ;;  %v25194_v5 = vand.u32 4294901760, %v25193_v59  ;;  %v31365_v51 = vld [vmem:[%s31895_s10 + $0xd8] sm:$0xff] }
 0x5ab   : > { %24719 = vmatprep.subr.mxu1 %v36404_v40  ;;  %24560 = vmatpush2.xpose.msra.mxu0 %v23932_v13  ;;  %v24871_v13 = vand.u32 4294901760, %v24870_v33  ;;  %v6296_v3 = vadd.f32 %v36587_v8, %v6218_v48  ;;  %v6789_v25 = vadd.f32 %v36592_v58, %v6711_v47  ;;  %v36596_v33 = vld [vmem:[#allocation82_spill] sm:$0xff]  ;;  %v36599_v8 = vld [vmem:[#allocation83_spill] sm:$0xff]  ;;  %v36604_v47 = vld [vmem:[#allocation92_spill] sm:$0xff] }
 0x5ac   : > { %24564 = vmatprep.subr.mxu0 %v36404_v40 }
 0x5ad   : > { %v6380_v63 = vadd.f32 %v36588_v55, %v6296_v3  ;;  %v6873_v28 = vadd.f32 %v33799_v4, %v6789_v25  ;;  %v35358_v4 = vand.u32 4294901760, %v31363_v35  ;;  %v35552_v25 = vand.u32 4294901760, %v31365_v51 }
 0x5ae   : > { %24721 = vmatpush2.xpose.msra.mxu1 %v36404_v40 }
 0x5af   : > { %24723 = vmatprep.subr.mxu1 %v36404_v40  ;;  %24568 = vmatpush2.xpose.msra.mxu0 %v36404_v40  ;;  %v6456_v7 = vadd.f32 %v36589_v38, %v6380_v63  ;;  %v6949_v61 = vadd.f32 %v36593_v37, %v6873_v28  ;;  %v35365_v12 = vsub.f32 %v31363_v35, %v35358_v4  ;;  %v31364_v37 = vld [vmem:[%s31895_s10 + $0xd0] sm:$0xff] }
 0x5b0   : > { %24572 = vmatprep.subr.mxu0 %v36404_v40  ;;  %v35559_v35 = vsub.f32 %v31365_v51, %v35552_v25  ;;  %v31366_v51 = vld [vmem:[%s31895_s10 + $0xe0] sm:$0xff] }
 0x5b1   : > { %v8446_v46 = vmax.f32 %v6456_v7, 0.0  ;;  %v8449_v22 = vmax.f32 %v6949_v61, 0.0 }
 0x5b2   : > { %24725 = vmatpush2.xpose.msra.mxu1 %v36404_v40 }
 0x5b3   : > { %24727 = vmatprep.subr.mxu1 %v36404_v40  ;;  %24576 = vmatpush2.xpose.msra.mxu0 %v36404_v40  ;;  %v35264_v2 = vand.u32 4294901760, %v8446_v46 }
 0x5b4   : > { %24580 = vmatprep.subr.mxu0 %v36404_v40 }
 0x5b5   : > { %v35271_v24 = vsub.f32 %v8446_v46, %v35264_v2 }
 0x5b6   : > { %24729 = vmatpush2.xpose.msra.mxu1 %v36404_v40 }
 0x5b7   : > { %25069 = vmatprep.subr.mxu1 %v36404_v40  ;;  %24584 = vmatpush2.xpose.msra.mxu0 %v36404_v40  ;;  %v24875_v14 = vand.u32 4294901760, %v35271_v24 }
 0x5b8   : > { %24588 = vmatprep.subr.mxu0 %v36404_v40 }
 0x5b9   : > { %24733 = vmatmul.mubr.f32.vlgmr.msra.gmra.mxu1 %v35119_v57  ;;  %v24876_v32 = vsub.f32 %v35271_v24, %v24875_v14 }
 0x5ba   : > { %25075 = vmatpush1.xpose.msra.mxu1 %v36404_v40  ;;  %25269 = vmatprep.mubr.f32.mxu1 %v35200_v1 }
 0x5bb   : > { %25177 = vmatprep.subr.mxu1 %v25176_v49  ;;  %24592 = vmatpush2.xpose.msra.mxu0 %v36404_v40 }
 0x5bc   : > { %24800 = vmatprep.subr.mxu0 %v36404_v40 }
 0x5be   : > { %25183 = vmatpush2.xpose.msra.mxu1 %v36404_v40  ;;  %24596 = vmatmul.mubr.f32.vlgmr.msra.gmra.mxu0 %v35119_v57  ;;  %v24877_v57 = vand.u32 4294901760, %v24876_v32 }
 0x5bf   : > { %25189 = vmatprep.subr.mxu1 %v36404_v40  ;;  %24802 = vmatpush1.xpose.msra.mxu0 %v36404_v40 }
 0x5c0   : > { %24872 = vmatprep.mubr.f32.mxu0 %v24871_v13  ;;  %24836 = vmatprep.subr.mxu0 %v35188_v9  ;;  %v36598_v13 = vld [vmem:[#allocation85_spill] sm:$0xff] }
 0x5c2   : > { %25195 = vmatpush2.xpose.msra.mxu1 %v25194_v5 }
 0x5c3   : > { %25201 = vmatprep.subr.mxu1 %v36404_v40  ;;  %24838 = vmatpush2.xpose.msra.mxu0 %v36404_v40 }
 0x5c4   : > { %24840 = vmatprep.subr.mxu0 %v36404_v40 }
 0x5c6   : > { %25207 = vmatpush2.xpose.msra.mxu1 %v36404_v40 }
 0x5c7   : > { %25213 = vmatprep.subr.mxu1 %v36404_v40  ;;  %24842 = vmatpush2.xpose.msra.mxu0 %v35203_v20 }
 0x5c8   : > { %24844 = vmatprep.subr.mxu0 %v36404_v40 }
 0x5ca   : > { %25219 = vmatpush2.xpose.msra.mxu1 %v36404_v40 }
 0x5cb   : > { %25225 = vmatprep.subr.mxu1 %v36404_v40  ;;  %24846 = vmatpush2.xpose.msra.mxu0 %v36404_v40 }
 0x5cc   : > { %24848 = vmatprep.subr.mxu0 %v36404_v40 }
 0x5ce   : > { %25231 = vmatpush2.xpose.msra.mxu1 %v36404_v40 }
 0x5cf   : > { %25237 = vmatprep.subr.mxu1 %v36404_v40  ;;  %24850 = vmatpush2.xpose.msra.mxu0 %v36404_v40 }
 0x5d0   : > { %24852 = vmatprep.subr.mxu0 %v36404_v40 }
 0x5d2   : > { %25243 = vmatpush2.xpose.msra.mxu1 %v36404_v40 }
 0x5d3   : > { %25249 = vmatprep.subr.mxu1 %v36404_v40  ;;  %24854 = vmatpush2.xpose.msra.mxu0 %v36404_v40 }
 0x5d4   : > { %24856 = vmatprep.subr.mxu0 %v36404_v40 }
 0x5d6   : > { %25255 = vmatpush2.xpose.msra.mxu1 %v36404_v40 }
 0x5d7   : > { %25261 = vmatprep.subr.mxu1 %v36404_v40  ;;  %24858 = vmatpush2.xpose.msra.mxu0 %v36404_v40 }
 0x5d8   : > { %24860 = vmatprep.subr.mxu0 %v36404_v40 }
 0x5da   : > { %25267 = vmatpush2.xpose.msra.mxu1 %v36404_v40 }
 0x5db   : > { %25541 = vmatprep.subr.mxu1 %v36404_v40  ;;  %24862 = vmatpush2.xpose.msra.mxu0 %v36404_v40 }
 0x5dc   : > { %24864 = vmatprep.subr.mxu0 %v36404_v40 }
 0x5dd   : > { %25271 = vmatmul.mubr.f32.vlgmr.msra.gmra.mxu1 %v35264_v2 }
 0x5de   : > { %25543 = vmatpush1.xpose.msra.mxu1 %v36404_v40  ;;  %25611 = vmatprep.mubr.f32.mxu1 %v24869_v6 }
 0x5df   : > { %25577 = vmatprep.subr.mxu1 %v35188_v9  ;;  %24866 = vmatpush2.xpose.msra.mxu0 %v36404_v40 }
 0x5e0   : > { %25369 = vmatprep.subr.mxu0 %v36404_v40 }
 0x5e2   : > { %25579 = vmatpush2.xpose.msra.mxu1 %v36404_v40  ;;  %24878 = vmatmul.mubr.f32.vlgmr.msra.gmra.mxu0 %v24877_v57 }
 0x5e3   : > { %25581 = vmatprep.subr.mxu1 %v36404_v40  ;;  %25372 = vmatpush1.xpose.msra.mxu0 %v36404_v40 }
 0x5e4   : > { %25471 = vmatprep.mubr.f32.mxu0 %v35212_v0  ;;  %25423 = vmatprep.subr.mxu0 %v35196_v16  ;;  %v26434_v16 = vand.u32 4294901760, %v35365_v12 }
 0x5e6   : > { %25583 = vmatpush2.xpose.msra.mxu1 %v35203_v20 }
 0x5e7   : > { %25585 = vmatprep.subr.mxu1 %v36404_v40  ;;  %25426 = vmatpush2.xpose.msra.mxu0 %v36404_v40 }
 0x5e8   : > { %25429 = vmatprep.subr.mxu0 %v36404_v40 }
 0x5ea   : > { %25587 = vmatpush2.xpose.msra.mxu1 %v36404_v40 }
 0x5eb   : > { %25589 = vmatprep.subr.mxu1 %v36404_v40  ;;  %25432 = vmatpush2.xpose.msra.mxu0 %v35216_v11  ;;  %v503_v11 = vrot.slane %v35315_v21, %v36534_v17 }
 0x5ec   : > { %25435 = vmatprep.subr.mxu0 %v36404_v40 }
 0x5ed   : > { %v6536_v6 = vadd.f32 %v36594_v27, %v503_v11  ;;  %v36605_v11 = vld [vmem:[#allocation26_spill] sm:$0xff] }
 0x5ee   : > { %25591 = vmatpush2.xpose.msra.mxu1 %v36404_v40  ;;  %v36607_v27 = vld [vmem:[#allocation90_spill] sm:$0xff] }
 0x5ef   : > { %25593 = vmatprep.subr.mxu1 %v36404_v40  ;;  %25438 = vmatpush2.xpose.msra.mxu0 %v36404_v40  ;;  %v6628_v26 = vadd.f32 %v36595_v34, %v6536_v6  ;;  %v36609_v34 = vld [vmem:[#allocation93_spill] sm:$0xff] }
 0x5f0   : > { %25441 = vmatprep.subr.mxu0 %v36404_v40 }
 0x5f1   : > { %v6709_v59 = vadd.f32 %v36596_v33, %v6628_v26  ;;  %v36610_v33 = vld [vmem:[#allocation91_spill] sm:$0xff] }
 0x5f2   : > { %25595 = vmatpush2.xpose.msra.mxu1 %v36404_v40 }
 0x5f3   : > { %25597 = vmatprep.subr.mxu1 %v36404_v40  ;;  %25444 = vmatpush2.xpose.msra.mxu0 %v36404_v40  ;;  %v6787_v48 = vadd.f32 %v36597_v60, %v6709_v59 }
 0x5f4   : > { %25447 = vmatprep.subr.mxu0 %v36404_v40 }
 0x5f5   : > { %v6871_v5 = vadd.f32 %v36598_v13, %v6787_v48 }
 0x5f6   : > { %25599 = vmatpush2.xpose.msra.mxu1 %v36404_v40 }
 0x5f7   : > { %25601 = vmatprep.subr.mxu1 %v36404_v40  ;;  %25450 = vmatpush2.xpose.msra.mxu0 %v36404_v40  ;;  %v6947_v3 = vadd.f32 %v36599_v8, %v6871_v5 }
 0x5f8   : > { %25453 = vmatprep.subr.mxu0 %v36404_v40 }
 0x5f9   : > { %v8448_v55 = vmax.f32 %v6947_v3, 0.0 }
 0x5fa   : > { %25603 = vmatpush2.xpose.msra.mxu1 %v36404_v40 }
 0x5fb   : > { %25605 = vmatprep.subr.mxu1 %v36404_v40  ;;  %25456 = vmatpush2.xpose.msra.mxu0 %v36404_v40  ;;  %v35443_v63 = vand.u32 4294901760, %v8448_v55 }
 0x5fc   : > { %25459 = vmatprep.subr.mxu0 %v36404_v40 }
 0x5fd   : > { %v35450_v38 = vsub.f32 %v8448_v55, %v35443_v63  ;;  %v523_v55 = vrot.slane %v35315_v21, %v36537_v36  ;;  %v36612_v36 = vld [vmem:[#allocation96_spill] sm:$0xff] }
 0x5fe   : > { %25607 = vmatpush2.xpose.msra.mxu1 %v36404_v40 }
 0x5ff   : > { %25947 = vmatprep.subr.mxu1 %v36404_v40  ;;  %25462 = vmatpush2.xpose.msra.mxu0 %v36404_v40  ;;  %v26159_v7 = vand.u32 4294901760, %v35450_v38 }
 0x600   : > { %25465 = vmatprep.subr.mxu0 %v36404_v40 }
 0x601   : > { %25615 = vmatmul.mubr.f32.vlgmr.msra.gmra.mxu1 %v24875_v14  ;;  %v26160_v46 = vsub.f32 %v35450_v38, %v26159_v7 }
 0x602   : > { %25949 = vmatpush1.xpose.msra.mxu1 %v36404_v40  ;;  %26015 = vmatprep.mubr.f32.mxu1 %v35200_v1 }
 0x603   : > { %25983 = vmatprep.subr.mxu1 %v35188_v9  ;;  %25468 = vmatpush2.xpose.msra.mxu0 %v36404_v40  ;;  %v35369_v9 = vand.u32 4294901760, %v8449_v22 }
 0x604   : > { %25744 = vmatprep.subr.mxu0 %v36404_v40 }
 0x605   : > { %v35379_v44 = vsub.f32 %v8449_v22, %v35369_v9  ;;  %v27694_v22 = vand.u32 4294901760, %v35559_v35 }
 0x606   : > { %25985 = vmatpush2.xpose.msra.mxu1 %v36404_v40  ;;  %25474 = vmatmul.mubr.f32.vlgmr.msra.gmra.mxu0 %v35271_v24  ;;  %v515_v24 = vrot.slane %v35315_v21, %v33149_v31  ;;  %v36600_v31 = vld [vmem:[#allocation87_spill] sm:$0xff] }
 0x607   : > { %25987 = vmatprep.subr.mxu1 %v36404_v40  ;;  %25748 = vmatpush1.xpose.msra.mxu0 %v36404_v40 }
 0x608   : > { %25878 = vmatprep.mubr.f32.mxu0 %v35200_v1  ;;  %25816 = vmatprep.subr.mxu0 %v25174_v15  ;;  %v35383_v1 = vsub.f32 %v31362_v56, %v35372_v39  ;;  %v26153_v15 = vand.u32 4294901760, %v35379_v44  ;;  %v7029_v14 = vadd.f32 %v33819_v29, %v515_v24  ;;  %v36601_v29 = vld [vmem:[#allocation27_spill] sm:$0xff]  ;;  %v36614_v24 = vld [vmem:[#allocation100_spill] sm:$0xff] }
 0x60a   : > { %25989 = vmatpush2.xpose.msra.mxu1 %v35203_v20  ;;  %v26435_v20 = vsub.f32 %v35365_v12, %v26434_v16  ;;  %v26452_v45 = vand.u32 4294901760, %v35383_v1  ;;  %v26154_v10 = vsub.f32 %v35379_v44, %v26153_v15  ;;  %v7121_v32 = vadd.f32 %v36600_v31, %v7029_v14  ;;  %v36615_v31 = vld [vmem:[#allocation106_spill] sm:$0xff] }
 0x60b   : > { %25991 = vmatprep.subr.mxu1 %v36404_v40  ;;  %25820 = vmatpush2.xpose.msra.mxu0 %v36404_v40 }
 0x60c   : > { %25824 = vmatprep.subr.mxu0 %v36404_v40  ;;  %v26436_v0 = vand.u32 4294901760, %v26435_v20  ;;  %v26453_v19 = vsub.f32 %v35383_v1, %v26452_v45  ;;  %v7202_v57 = vadd.f32 %v36601_v29, %v7121_v32  ;;  %v31367_v29 = vld [vmem:[%s31895_s10 + $0xe8] sm:$0xff] }
 0x60e   : > { %25993 = vmatpush2.xpose.msra.mxu1 %v36404_v40  ;;  %v26454_v49 = vand.u32 4294901760, %v26453_v19  ;;  %v7280_v41 = vadd.f32 %v36602_v30, %v7202_v57  ;;  %v36606_v19 = vld [vmem:[#allocation86_spill] sm:$0xff]  ;;  %v36616_v57 = vld [vmem:[#allocation104_spill] sm:$0xff] }
 0x60f   : > { %25995 = vmatprep.subr.mxu1 %v36404_v40  ;;  %25828 = vmatpush2.xpose.msra.mxu0 %v25192_v54  ;;  %v26155_v54 = vand.u32 4294901760, %v26154_v10 }
 0x610   : > { %25832 = vmatprep.subr.mxu0 %v36404_v40  ;;  %v7364_v42 = vadd.f32 %v36603_v43, %v7280_v41  ;;  %v35774_v41 = vand.u32 4294901760, %v31367_v29 }
 0x612   : > { %25997 = vmatpush2.xpose.msra.mxu1 %v36404_v40  ;;  %v7440_v58 = vadd.f32 %v36604_v47, %v7364_v42  ;;  %v35781_v42 = vsub.f32 %v31367_v29, %v35774_v41 }
 0x613   : > { %25999 = vmatprep.subr.mxu1 %v36404_v40  ;;  %25836 = vmatpush2.xpose.msra.mxu0 %v36404_v40 }
 0x614   : > { %25840 = vmatprep.subr.mxu0 %v36404_v40  ;;  %v8451_v28 = vmax.f32 %v7440_v58, 0.0  ;;  %v35788_v58 = vand.u32 4294901760, %v31366_v51 }
 0x616   : > { %26001 = vmatpush2.xpose.msra.mxu1 %v36404_v40  ;;  %v35563_v61 = vand.u32 4294901760, %v8451_v28 }
 0x617   : > { %26003 = vmatprep.subr.mxu1 %v36404_v40  ;;  %25844 = vmatpush2.xpose.msra.mxu0 %v36404_v40 }
 0x618   : > { %25848 = vmatprep.subr.mxu0 %v36404_v40 }
 0x61a   : > { %26005 = vmatpush2.xpose.msra.mxu1 %v36404_v40 }
 0x61b   : > { %26007 = vmatprep.subr.mxu1 %v36404_v40  ;;  %25852 = vmatpush2.xpose.msra.mxu0 %v36404_v40 }
 0x61c   : > { %25856 = vmatprep.subr.mxu0 %v36404_v40 }
 0x61e   : > { %26009 = vmatpush2.xpose.msra.mxu1 %v36404_v40 }
 0x61f   : > { %26011 = vmatprep.subr.mxu1 %v36404_v40  ;;  %25860 = vmatpush2.xpose.msra.mxu0 %v36404_v40 }
 0x620   : > { %25864 = vmatprep.subr.mxu0 %v36404_v40 }
 0x622   : > { %26013 = vmatpush2.xpose.msra.mxu1 %v36404_v40 }
 0x623   : > { %26353 = vmatprep.subr.mxu1 %v36404_v40  ;;  %25868 = vmatpush2.xpose.msra.mxu0 %v36404_v40 }
 0x624   : > { %25872 = vmatprep.subr.mxu0 %v36404_v40 }
 0x625   : > { %26017 = vmatmul.mubr.f32.vlgmr.msra.gmra.mxu1 %v35264_v2 }
 0x626   : > { %26359 = vmatpush1.xpose.msra.mxu1 %v36404_v40  ;;  %26553 = vmatprep.mubr.f32.mxu1 %v35369_v9 }
 0x627   : > { %26437 = vmatprep.subr.mxu1 %v26436_v0  ;;  %25876 = vmatpush2.xpose.msra.mxu0 %v36404_v40  ;;  %v511_v0 = vrot.slane %v35315_v21, %v33231_v53 }
 0x628   : > { %26084 = vmatprep.subr.mxu0 %v36404_v40 }
 0x629   : > { %v7027_v10 = vadd.f32 %v36605_v11, %v511_v0  ;;  %v36621_v11 = vld [vmem:[#allocation105_spill] sm:$0xff] }
 0x62a   : > { %26443 = vmatpush2.xpose.msra.mxu1 %v36404_v40  ;;  %25880 = vmatmul.mubr.f32.vlgmr.msra.gmra.mxu0 %v35264_v2  ;;  %v26161_v2 = vand.u32 4294901760, %v26160_v46  ;;  %v36613_v46 = vld [vmem:[#allocation102_spill] sm:$0xff] }
 0x62b   : > { %26449 = vmatprep.subr.mxu1 %v36404_v40  ;;  %26086 = vmatpush1.xpose.msra.mxu0 %v36404_v40  ;;  %v7119_v53 = vadd.f32 %v36606_v19, %v7027_v10  ;;  %v36622_v19 = vld [vmem:[#allocation103_spill] sm:$0xff] }
 0x62c   : > { %26156 = vmatprep.mubr.f32.mxu0 %v26155_v54  ;;  %26112 = vmatprep.subr.mxu0 %v35358_v4  ;;  %v36608_v54 = vld [vmem:[#allocation88_spill] sm:$0xff] }
 0x62d   : > { %v7200_v6 = vadd.f32 %v36607_v27, %v7119_v53 }
 0x62e   : > { %26455 = vmatpush2.xpose.msra.mxu1 %v26454_v49 }
 0x62f   : > { %26461 = vmatprep.subr.mxu1 %v36404_v40  ;;  %26114 = vmatpush2.xpose.msra.mxu0 %v36404_v40  ;;  %v7278_v49 = vadd.f32 %v36608_v54, %v7200_v6 }
 0x630   : > { %26116 = vmatprep.subr.mxu0 %v36404_v40 }
 0x631   : > { %v7362_v26 = vadd.f32 %v36609_v34, %v7278_v49 }
 0x632   : > { %26467 = vmatpush2.xpose.msra.mxu1 %v36404_v40 }
 0x633   : > { %26473 = vmatprep.subr.mxu1 %v36404_v40  ;;  %26118 = vmatpush2.xpose.msra.mxu0 %v35372_v39  ;;  %v7438_v59 = vadd.f32 %v36610_v33, %v7362_v26  ;;  %v31466_v33 = vld [vmem:[%s33001_s9 + $0x30] ss:$2 sm:$0xff] }
 0x634   : > { %26120 = vmatprep.subr.mxu0 %v36404_v40 }
 0x635   : > { %v8450_v60 = vmax.f32 %v7438_v59, 0.0  ;;  %v531_v59 = vrot.slane %v31466_v33, %v33642_v62 }
 0x636   : > { %26479 = vmatpush2.xpose.msra.mxu1 %v36404_v40 }
 0x637   : > { %26485 = vmatprep.subr.mxu1 %v36404_v40  ;;  %26122 = vmatpush2.xpose.msra.mxu0 %v36404_v40  ;;  %v35645_v48 = vand.u32 4294901760, %v8450_v60 }
 0x638   : > { %26124 = vmatprep.subr.mxu0 %v36404_v40 }
 0x639   : > { %v35652_v13 = vsub.f32 %v8450_v60, %v35645_v48  ;;  %v36623_v60 = vld [vmem:[#allocation108_spill] sm:$0xff] }
 0x63a   : > { %26491 = vmatpush2.xpose.msra.mxu1 %v36404_v40 }
 0x63b   : > { %26497 = vmatprep.subr.mxu1 %v36404_v40  ;;  %26126 = vmatpush2.xpose.msra.mxu0 %v36404_v40  ;;  %v27443_v5 = vand.u32 4294901760, %v35652_v13 }
 0x63c   : > { %26128 = vmatprep.subr.mxu0 %v36404_v40 }
 0x63d   : > { %v27444_v8 = vsub.f32 %v35652_v13, %v27443_v5 }
 0x63e   : > { %26503 = vmatpush2.xpose.msra.mxu1 %v36404_v40 }
 0x63f   : > { %26509 = vmatprep.subr.mxu1 %v36404_v40  ;;  %26130 = vmatpush2.xpose.msra.mxu0 %v36404_v40  ;;  %v27445_v3 = vand.u32 4294901760, %v27444_v8 }
 0x640   : > { %26132 = vmatprep.subr.mxu0 %v36404_v40 }
 0x642   : > { %26515 = vmatpush2.xpose.msra.mxu1 %v36404_v40 }
 0x643   : > { %26521 = vmatprep.subr.mxu1 %v36404_v40  ;;  %26134 = vmatpush2.xpose.msra.mxu0 %v36404_v40 }
 0x644   : > { %26136 = vmatprep.subr.mxu0 %v36404_v40 }
 0x646   : > { %26527 = vmatpush2.xpose.msra.mxu1 %v36404_v40 }
 0x647   : > { %26533 = vmatprep.subr.mxu1 %v36404_v40  ;;  %26138 = vmatpush2.xpose.msra.mxu0 %v36404_v40 }
 0x648   : > { %26140 = vmatprep.subr.mxu0 %v36404_v40 }
 0x64a   : > { %26539 = vmatpush2.xpose.msra.mxu1 %v36404_v40 }
 0x64b   : > { %26545 = vmatprep.subr.mxu1 %v36404_v40  ;;  %26142 = vmatpush2.xpose.msra.mxu0 %v36404_v40 }
 0x64c   : > { %26144 = vmatprep.subr.mxu0 %v36404_v40 }
 0x64e   : > { %26551 = vmatpush2.xpose.msra.mxu1 %v36404_v40 }
 0x64f   : > { %26825 = vmatprep.subr.mxu1 %v36404_v40  ;;  %26146 = vmatpush2.xpose.msra.mxu0 %v36404_v40 }
 0x650   : > { %26148 = vmatprep.subr.mxu0 %v36404_v40 }
 0x651   : > { %26555 = vmatmul.mubr.f32.vlgmr.msra.gmra.mxu1 %v35443_v63 }
 0x652   : > { %26827 = vmatpush1.xpose.msra.mxu1 %v36404_v40  ;;  %26895 = vmatprep.mubr.f32.mxu1 %v26153_v15 }
 0x653   : > { %26853 = vmatprep.subr.mxu1 %v35358_v4  ;;  %26150 = vmatpush2.xpose.msra.mxu0 %v36404_v40 }
 0x654   : > { %26653 = vmatprep.subr.mxu0 %v36404_v40 }
 0x656   : > { %26855 = vmatpush2.xpose.msra.mxu1 %v36404_v40  ;;  %26162 = vmatmul.mubr.f32.vlgmr.msra.gmra.mxu0 %v26161_v2 }
 0x657   : > { %26857 = vmatprep.subr.mxu1 %v36404_v40  ;;  %26656 = vmatpush1.xpose.msra.mxu0 %v36404_v40 }
 0x658   : > { %26755 = vmatprep.mubr.f32.mxu0 %v35379_v44  ;;  %26695 = vmatprep.subr.mxu0 %v35365_v12  ;;  %v35573_v12 = vsub.f32 %v8451_v28, %v35563_v61 }
 0x65a   : > { %26859 = vmatpush2.xpose.msra.mxu1 %v35372_v39 }
 0x65b   : > { %26861 = vmatprep.subr.mxu1 %v36404_v40  ;;  %26698 = vmatpush2.xpose.msra.mxu0 %v36404_v40 }
 0x65c   : > { %26701 = vmatprep.subr.mxu0 %v36404_v40 }
 0x65e   : > { %26863 = vmatpush2.xpose.msra.mxu1 %v36404_v40 }
 0x65f   : > { %26865 = vmatprep.subr.mxu1 %v36404_v40  ;;  %26704 = vmatpush2.xpose.msra.mxu0 %v35383_v1 }
 0x660   : > { %26707 = vmatprep.subr.mxu0 %v36404_v40 }
 0x662   : > { %26867 = vmatpush2.xpose.msra.mxu1 %v36404_v40 }
 0x663   : > { %26869 = vmatprep.subr.mxu1 %v36404_v40  ;;  %26710 = vmatpush2.xpose.msra.mxu0 %v36404_v40 }
 0x664   : > { %26713 = vmatprep.subr.mxu0 %v36404_v40 }
 0x666   : > { %26871 = vmatpush2.xpose.msra.mxu1 %v36404_v40 }
 0x667   : > { %26873 = vmatprep.subr.mxu1 %v36404_v40  ;;  %26716 = vmatpush2.xpose.msra.mxu0 %v36404_v40 }
 0x668   : > { %26719 = vmatprep.subr.mxu0 %v36404_v40 }
 0x66a   : > { %26875 = vmatpush2.xpose.msra.mxu1 %v36404_v40 }
 0x66b   : > { %26877 = vmatprep.subr.mxu1 %v36404_v40  ;;  %26722 = vmatpush2.xpose.msra.mxu0 %v36404_v40 }
 0x66c   : > { %26725 = vmatprep.subr.mxu0 %v36404_v40 }
 0x66e   : > { %26879 = vmatpush2.xpose.msra.mxu1 %v36404_v40 }
 0x66f   : > { %26881 = vmatprep.subr.mxu1 %v36404_v40  ;;  %26728 = vmatpush2.xpose.msra.mxu0 %v36404_v40 }
 0x670   : > { %26731 = vmatprep.subr.mxu0 %v36404_v40 }
 0x672   : > { %26883 = vmatpush2.xpose.msra.mxu1 %v36404_v40 }
 0x673   : > { %26885 = vmatprep.subr.mxu1 %v36404_v40  ;;  %26734 = vmatpush2.xpose.msra.mxu0 %v36404_v40 }
 0x674   : > { %26737 = vmatprep.subr.mxu0 %v36404_v40 }
 0x676   : > { %26887 = vmatpush2.xpose.msra.mxu1 %v36404_v40 }
 0x677   : > { %26889 = vmatprep.subr.mxu1 %v36404_v40  ;;  %26740 = vmatpush2.xpose.msra.mxu0 %v36404_v40 }
 0x678   : > { %26743 = vmatprep.subr.mxu0 %v36404_v40 }
 0x67a   : > { %26891 = vmatpush2.xpose.msra.mxu1 %v36404_v40 }
 0x67b   : > { %27231 = vmatprep.subr.mxu1 %v36404_v40  ;;  %26746 = vmatpush2.xpose.msra.mxu0 %v36404_v40 }
 0x67c   : > { %26749 = vmatprep.subr.mxu0 %v36404_v40 }
 0x67d   : > { %26899 = vmatmul.mubr.f32.vlgmr.msra.gmra.mxu1 %v26159_v7 }
 0x67e   : > { %27233 = vmatpush1.xpose.msra.mxu1 %v36404_v40  ;;  %27299 = vmatprep.mubr.f32.mxu1 %v35369_v9 }
 0x67f   : > { %27259 = vmatprep.subr.mxu1 %v35358_v4  ;;  %26752 = vmatpush2.xpose.msra.mxu0 %v36404_v40  ;;  %v35566_v4 = vand.u32 4294901760, %v31364_v37 }
 0x680   : > { %27028 = vmatprep.subr.mxu0 %v36404_v40 }
 0x681   : > { %v35577_v56 = vsub.f32 %v31364_v37, %v35566_v4 }
 0x682   : > { %27261 = vmatpush2.xpose.msra.mxu1 %v36404_v40  ;;  %26758 = vmatmul.mubr.f32.vlgmr.msra.gmra.mxu0 %v35450_v38 }
 0x683   : > { %27263 = vmatprep.subr.mxu1 %v36404_v40  ;;  %27032 = vmatpush1.xpose.msra.mxu0 %v36404_v40 }
 0x684   : > { %27162 = vmatprep.mubr.f32.mxu0 %v35369_v9  ;;  %27084 = vmatprep.subr.mxu0 %v26434_v16  ;;  %v27695_v9 = vsub.f32 %v35559_v35, %v27694_v22  ;;  %v27712_v16 = vand.u32 4294901760, %v35577_v56 }
 0x686   : > { %27265 = vmatpush2.xpose.msra.mxu1 %v35372_v39  ;;  %v27437_v39 = vand.u32 4294901760, %v35573_v12  ;;  %v27696_v44 = vand.u32 4294901760, %v27695_v9  ;;  %v27713_v20 = vsub.f32 %v35577_v56, %v27712_v16 }
 0x687   : > { %27267 = vmatprep.subr.mxu1 %v36404_v40  ;;  %27088 = vmatpush2.xpose.msra.mxu0 %v36404_v40 }
 0x688   : > { %27092 = vmatprep.subr.mxu0 %v36404_v40  ;;  %v27438_v1 = vsub.f32 %v35573_v12, %v27437_v39 }
 0x68a   : > { %27269 = vmatpush2.xpose.msra.mxu1 %v36404_v40  ;;  %v27439_v15 = vand.u32 4294901760, %v27438_v1 }
 0x68b   : > { %27271 = vmatprep.subr.mxu1 %v36404_v40  ;;  %27096 = vmatpush2.xpose.msra.mxu0 %v26452_v45  ;;  %v27714_v45 = vand.u32 4294901760, %v27713_v20  ;;  %v36618_v20 = vld [vmem:[#allocation95_spill] sm:$0xff] }
 0x68c   : > { %27100 = vmatprep.subr.mxu0 %v36404_v40 }
 0x68e   : > { %27273 = vmatpush2.xpose.msra.mxu1 %v36404_v40 }
 0x68f   : > { %27275 = vmatprep.subr.mxu1 %v36404_v40  ;;  %27104 = vmatpush2.xpose.msra.mxu0 %v36404_v40 }
 0x690   : > { %27108 = vmatprep.subr.mxu0 %v36404_v40 }
 0x692   : > { %27277 = vmatpush2.xpose.msra.mxu1 %v36404_v40 }
 0x693   : > { %27279 = vmatprep.subr.mxu1 %v36404_v40  ;;  %27112 = vmatpush2.xpose.msra.mxu0 %v36404_v40 }
 0x694   : > { %27116 = vmatprep.subr.mxu0 %v36404_v40 }
 0x696   : > { %27281 = vmatpush2.xpose.msra.mxu1 %v36404_v40 }
 0x697   : > { %27283 = vmatprep.subr.mxu1 %v36404_v40  ;;  %27120 = vmatpush2.xpose.msra.mxu0 %v36404_v40 }
 0x698   : > { %27124 = vmatprep.subr.mxu0 %v36404_v40 }
 0x69a   : > { %27285 = vmatpush2.xpose.msra.mxu1 %v36404_v40 }
 0x69b   : > { %27287 = vmatprep.subr.mxu1 %v36404_v40  ;;  %27128 = vmatpush2.xpose.msra.mxu0 %v36404_v40 }
 0x69c   : > { %27132 = vmatprep.subr.mxu0 %v36404_v40 }
 0x69e   : > { %27289 = vmatpush2.xpose.msra.mxu1 %v36404_v40 }
 0x69f   : > { %27291 = vmatprep.subr.mxu1 %v36404_v40  ;;  %27136 = vmatpush2.xpose.msra.mxu0 %v36404_v40 }
 0x6a0   : > { %27140 = vmatprep.subr.mxu0 %v36404_v40 }
 0x6a2   : > { %27293 = vmatpush2.xpose.msra.mxu1 %v36404_v40 }
 0x6a3   : > { %27295 = vmatprep.subr.mxu1 %v36404_v40  ;;  %27144 = vmatpush2.xpose.msra.mxu0 %v36404_v40 }
 0x6a4   : > { %27148 = vmatprep.subr.mxu0 %v36404_v40 }
 0x6a6   : > { %27297 = vmatpush2.xpose.msra.mxu1 %v36404_v40 }
 0x6a7   : > { %27637 = vmatprep.subr.mxu1 %v36404_v40  ;;  %27152 = vmatpush2.xpose.msra.mxu0 %v36404_v40 }
 0x6a8   : > { %27156 = vmatprep.subr.mxu0 %v36404_v40 }
 0x6a9   : > { %27301 = vmatmul.mubr.f32.vlgmr.msra.gmra.mxu1 %v35443_v63 }
 0x6aa   : > { %27643 = vmatpush1.xpose.msra.mxu1 %v36404_v40  ;;  %27837 = vmatprep.mubr.f32.mxu1 %v35563_v61 }
 0x6ab   : > { %27697 = vmatprep.subr.mxu1 %v27696_v44  ;;  %27160 = vmatpush2.xpose.msra.mxu0 %v36404_v40  ;;  %v36617_v44 = vld [vmem:[#allocation97_spill] sm:$0xff] }
 0x6ac   : > { %27368 = vmatprep.subr.mxu0 %v36404_v40 }
 0x6ae   : > { %27703 = vmatpush2.xpose.msra.mxu1 %v36404_v40  ;;  %27164 = vmatmul.mubr.f32.vlgmr.msra.gmra.mxu0 %v35443_v63  ;;  %v36611_v63 = vld [vmem:[#allocation98_spill] sm:$0xff] }
 0x6af   : > { %27709 = vmatprep.subr.mxu1 %v36404_v40  ;;  %27370 = vmatpush1.xpose.msra.mxu0 %v36404_v40  ;;  %v7520_v38 = vadd.f32 %v36611_v63, %v523_v55  ;;  %v8345_v55 = vpop.f32.mrf.mxu0 }
 0x6b0   : > { %27440 = vmatprep.mubr.f32.mxu0 %v27439_v15  ;;  %27388 = vmatprep.subr.mxu0 %v35552_v25 }
 0x6b1   : > { %v7612_v7 = vadd.f32 %v36612_v36, %v7520_v38  ;;  %v8421_v38 = vpop.f32.mrf.mxu1 }
 0x6b2   : > { %27715 = vmatpush2.xpose.msra.mxu1 %v27714_v45  ;;  %v36620_v45 = vld [vmem:[#allocation99_spill] sm:$0xff] }
 0x6b3   : > { %27721 = vmatprep.subr.mxu1 %v36404_v40  ;;  %27390 = vmatpush2.xpose.msra.mxu0 %v36404_v40  ;;  %v7693_v2 = vadd.f32 %v36613_v46, %v7612_v7 }
 0x6b4   : > { %27392 = vmatprep.subr.mxu0 %v36404_v40 }
 0x6b5   : > { %v7771_v14 = vadd.f32 %v36614_v24, %v7693_v2  ;;  %v31368_v24 = vld [vmem:[%s31895_s10 + $0xf0] sm:$0xff] }
 0x6b6   : > { %27727 = vmatpush2.xpose.msra.mxu1 %v36404_v40 }
 0x6b7   : > { %27733 = vmatprep.subr.mxu1 %v36404_v40  ;;  %27394 = vmatpush2.xpose.msra.mxu0 %v35566_v4  ;;  %v7855_v32 = vadd.f32 %v36615_v31, %v7771_v14  ;;  %v36032_v31 = vand.u32 4294901760, %v31368_v24 }
 0x6b8   : > { %27396 = vmatprep.subr.mxu0 %v36404_v40 }
 0x6b9   : > { %v7931_v30 = vadd.f32 %v36616_v57, %v7855_v32  ;;  %v36043_v57 = vsub.f32 %v31368_v24, %v36032_v31 }
 0x6ba   : > { %27739 = vmatpush2.xpose.msra.mxu1 %v36404_v40 }
 0x6bb   : > { %27745 = vmatprep.subr.mxu1 %v36404_v40  ;;  %27398 = vmatpush2.xpose.msra.mxu0 %v36404_v40  ;;  %v8453_v43 = vmax.f32 %v7931_v30, 0.0 }
 0x6bc   : > { %27400 = vmatprep.subr.mxu0 %v36404_v40 }
 0x6bd   : > { %v35785_v47 = vand.u32 4294901760, %v8453_v43 }
 0x6be   : > { %27751 = vmatpush2.xpose.msra.mxu1 %v36404_v40 }
 0x6bf   : > { %27757 = vmatprep.subr.mxu1 %v36404_v40  ;;  %27402 = vmatpush2.xpose.msra.mxu0 %v36404_v40  ;;  %v35795_v28 = vsub.f32 %v8453_v43, %v35785_v47  ;;  %v30232_v43 = vand.u32 4294901760, %v36043_v57 }
 0x6c0   : > { %27404 = vmatprep.subr.mxu0 %v36404_v40 }
 0x6c2   : > { %27763 = vmatpush2.xpose.msra.mxu1 %v36404_v40 }
 0x6c3   : > { %27769 = vmatprep.subr.mxu1 %v36404_v40  ;;  %27406 = vmatpush2.xpose.msra.mxu0 %v36404_v40 }
 0x6c4   : > { %27408 = vmatprep.subr.mxu0 %v36404_v40 }
 0x6c6   : > { %27775 = vmatpush2.xpose.msra.mxu1 %v36404_v40 }
 0x6c7   : > { %27781 = vmatprep.subr.mxu1 %v36404_v40  ;;  %27410 = vmatpush2.xpose.msra.mxu0 %v36404_v40 }
 0x6c8   : > { %27412 = vmatprep.subr.mxu0 %v36404_v40 }
 0x6ca   : > { %27787 = vmatpush2.xpose.msra.mxu1 %v36404_v40 }
 0x6cb   : > { %27793 = vmatprep.subr.mxu1 %v36404_v40  ;;  %27414 = vmatpush2.xpose.msra.mxu0 %v36404_v40 }
 0x6cc   : > { %27416 = vmatprep.subr.mxu0 %v36404_v40 }
 0x6ce   : > { %27799 = vmatpush2.xpose.msra.mxu1 %v36404_v40 }
 0x6cf   : > { %27805 = vmatprep.subr.mxu1 %v36404_v40  ;;  %27418 = vmatpush2.xpose.msra.mxu0 %v36404_v40 }
 0x6d0   : > { %27420 = vmatprep.subr.mxu0 %v36404_v40 }
 0x6d2   : > { %27811 = vmatpush2.xpose.msra.mxu1 %v36404_v40 }
 0x6d3   : > { %27817 = vmatprep.subr.mxu1 %v36404_v40  ;;  %27422 = vmatpush2.xpose.msra.mxu0 %v36404_v40 }
 0x6d4   : > { %27424 = vmatprep.subr.mxu0 %v36404_v40 }
 0x6d6   : > { %27823 = vmatpush2.xpose.msra.mxu1 %v36404_v40 }
 0x6d7   : > { %27829 = vmatprep.subr.mxu1 %v36404_v40  ;;  %27426 = vmatpush2.xpose.msra.mxu0 %v36404_v40 }
 0x6d8   : > { %27428 = vmatprep.subr.mxu0 %v36404_v40 }
 0x6da   : > { %27835 = vmatpush2.xpose.msra.mxu1 %v36404_v40 }
 0x6db   : > { %28109 = vmatprep.subr.mxu1 %v36404_v40  ;;  %27430 = vmatpush2.xpose.msra.mxu0 %v36404_v40 }
 0x6dc   : > { %27432 = vmatprep.subr.mxu0 %v36404_v40 }
 0x6dd   : > { %27839 = vmatmul.mubr.f32.vlgmr.msra.gmra.mxu1 %v35645_v48 }
 0x6de   : > { %28111 = vmatpush1.xpose.msra.mxu1 %v36404_v40  ;;  %28179 = vmatprep.mubr.f32.mxu1 %v27437_v39 }
 0x6df   : > { %28129 = vmatprep.subr.mxu1 %v35552_v25  ;;  %27434 = vmatpush2.xpose.msra.mxu0 %v36404_v40 }
 0x6e0   : > { %27937 = vmatprep.subr.mxu0 %v36404_v40 }
 0x6e2   : > { %28131 = vmatpush2.xpose.msra.mxu1 %v36404_v40  ;;  %27446 = vmatmul.mubr.f32.vlgmr.msra.gmra.mxu0 %v27445_v3 }
 0x6e3   : > { %28133 = vmatprep.subr.mxu1 %v36404_v40  ;;  %27940 = vmatpush1.xpose.msra.mxu0 %v36404_v40 }
 0x6e4   : > { %28039 = vmatprep.mubr.f32.mxu0 %v35573_v12  ;;  %27967 = vmatprep.subr.mxu0 %v35559_v35  ;;  %v35799_v35 = vsub.f32 %v31366_v51, %v35788_v58 }
 0x6e6   : > { %28135 = vmatpush2.xpose.msra.mxu1 %v35566_v4 }
 0x6e7   : > { %28137 = vmatprep.subr.mxu1 %v36404_v40  ;;  %27970 = vmatpush2.xpose.msra.mxu0 %v36404_v40 }
 0x6e8   : > { %27973 = vmatprep.subr.mxu0 %v36404_v40 }
 0x6ea   : > { %28139 = vmatpush2.xpose.msra.mxu1 %v36404_v40 }
 0x6eb   : > { %28141 = vmatprep.subr.mxu1 %v36404_v40  ;;  %27976 = vmatpush2.xpose.msra.mxu0 %v35577_v56 }
 0x6ec   : > { %27979 = vmatprep.subr.mxu0 %v36404_v40 }
 0x6ee   : > { %28143 = vmatpush2.xpose.msra.mxu1 %v36404_v40 }
 0x6ef   : > { %28145 = vmatprep.subr.mxu1 %v36404_v40  ;;  %27982 = vmatpush2.xpose.msra.mxu0 %v36404_v40 }
 0x6f0   : > { %27985 = vmatprep.subr.mxu0 %v36404_v40 }
 0x6f2   : > { %28147 = vmatpush2.xpose.msra.mxu1 %v36404_v40 }
 0x6f3   : > { %28149 = vmatprep.subr.mxu1 %v36404_v40  ;;  %27988 = vmatpush2.xpose.msra.mxu0 %v36404_v40 }
 0x6f4   : > { %27991 = vmatprep.subr.mxu0 %v36404_v40 }
 0x6f6   : > { %28151 = vmatpush2.xpose.msra.mxu1 %v36404_v40 }
 0x6f7   : > { %28153 = vmatprep.subr.mxu1 %v36404_v40  ;;  %27994 = vmatpush2.xpose.msra.mxu0 %v36404_v40 }
 0x6f8   : > { %27997 = vmatprep.subr.mxu0 %v36404_v40 }
 0x6fa   : > { %28155 = vmatpush2.xpose.msra.mxu1 %v36404_v40 }
 0x6fb   : > { %28157 = vmatprep.subr.mxu1 %v36404_v40  ;;  %28000 = vmatpush2.xpose.msra.mxu0 %v36404_v40 }
 0x6fc   : > { %28003 = vmatprep.subr.mxu0 %v36404_v40 }
 0x6fe   : > { %28159 = vmatpush2.xpose.msra.mxu1 %v36404_v40 }
 0x6ff   : > { %28161 = vmatprep.subr.mxu1 %v36404_v40  ;;  %28006 = vmatpush2.xpose.msra.mxu0 %v36404_v40 }
 0x700   : > { %28009 = vmatprep.subr.mxu0 %v36404_v40 }
 0x702   : > { %28163 = vmatpush2.xpose.msra.mxu1 %v36404_v40 }
 0x703   : > { %28165 = vmatprep.subr.mxu1 %v36404_v40  ;;  %28012 = vmatpush2.xpose.msra.mxu0 %v36404_v40 }
 0x704   : > { %28015 = vmatprep.subr.mxu0 %v36404_v40 }
 0x706   : > { %28167 = vmatpush2.xpose.msra.mxu1 %v36404_v40 }
 0x707   : > { %28169 = vmatprep.subr.mxu1 %v36404_v40  ;;  %28018 = vmatpush2.xpose.msra.mxu0 %v36404_v40 }
 0x708   : > { %28021 = vmatprep.subr.mxu0 %v36404_v40 }
 0x70a   : > { %28171 = vmatpush2.xpose.msra.mxu1 %v36404_v40 }
 0x70b   : > { %28173 = vmatprep.subr.mxu1 %v36404_v40  ;;  %28024 = vmatpush2.xpose.msra.mxu0 %v36404_v40 }
 0x70c   : > { %28027 = vmatprep.subr.mxu0 %v36404_v40 }
 0x70e   : > { %28175 = vmatpush2.xpose.msra.mxu1 %v36404_v40 }
 0x70f   : > { %28515 = vmatprep.subr.mxu1 %v36404_v40  ;;  %28030 = vmatpush2.xpose.msra.mxu0 %v36404_v40 }
 0x710   : > { %28033 = vmatprep.subr.mxu0 %v36404_v40 }
 0x711   : > { %28183 = vmatmul.mubr.f32.vlgmr.msra.gmra.mxu1 %v27443_v5  ;;  %v36625_v5 = vld [vmem:[#allocation109_spill] sm:$0xff] }
 0x712   : > { %28517 = vmatpush1.xpose.msra.mxu1 %v36404_v40  ;;  %28583 = vmatprep.mubr.f32.mxu1 %v35563_v61 }
 0x713   : > { %28535 = vmatprep.subr.mxu1 %v35552_v25  ;;  %28036 = vmatpush2.xpose.msra.mxu0 %v36404_v40  ;;  %v28954_v25 = vand.u32 4294901760, %v35781_v42 }
 0x714   : > { %28312 = vmatprep.subr.mxu0 %v36404_v40 }
 0x715   : > { %v28955_v37 = vsub.f32 %v35781_v42, %v28954_v25 }
 0x716   : > { %28537 = vmatpush2.xpose.msra.mxu1 %v36404_v40  ;;  %28042 = vmatmul.mubr.f32.vlgmr.msra.gmra.mxu0 %v35652_v13  ;;  %v36624_v13 = vld [vmem:[#allocation107_spill] sm:$0xff] }
 0x717   : > { %28539 = vmatprep.subr.mxu1 %v36404_v40  ;;  %28316 = vmatpush1.xpose.msra.mxu0 %v36404_v40 }
 0x718   : > { %28446 = vmatprep.mubr.f32.mxu0 %v35563_v61  ;;  %28352 = vmatprep.subr.mxu0 %v27694_v22  ;;  %v28721_v61 = vand.u32 4294901760, %v35795_v28  ;;  %v28956_v22 = vand.u32 4294901760, %v28955_v37 }
 0x71a   : > { %28541 = vmatpush2.xpose.msra.mxu1 %v35566_v4  ;;  %v28972_v4 = vand.u32 4294901760, %v35799_v35  ;;  %v28722_v12 = vsub.f32 %v35795_v28, %v28721_v61 }
 0x71b   : > { %28543 = vmatprep.subr.mxu1 %v36404_v40  ;;  %28356 = vmatpush2.xpose.msra.mxu0 %v36404_v40 }
 0x71c   : > { %28360 = vmatprep.subr.mxu0 %v36404_v40  ;;  %v28973_v56 = vsub.f32 %v35799_v35, %v28972_v4  ;;  %v28723_v9 = vand.u32 4294901760, %v28722_v12  ;;  %v10755_v12 = vpop.f32.mrf.mxu0 }
 0x71e   : > { %28545 = vmatpush2.xpose.msra.mxu1 %v36404_v40  ;;  %v28974_v39 = vand.u32 4294901760, %v28973_v56 }
 0x71f   : > { %28547 = vmatprep.subr.mxu1 %v36404_v40  ;;  %28364 = vmatpush2.xpose.msra.mxu0 %v27712_v16  ;;  %v519_v16 = vrot.slane %v35315_v21, %v33468_v23  ;;  %v36619_v21 = vld [vmem:[#allocation101_spill] sm:$0xff] }
 0x720   : > { %28368 = vmatprep.subr.mxu0 %v36404_v40 }
 0x721   : > { %v7518_v1 = vadd.f32 %v36617_v44, %v519_v16  ;;  %v10757_v16 = vpop.f32.mrf.mxu0 }
 0x722   : > { %28549 = vmatpush2.xpose.msra.mxu1 %v36404_v40 }
 0x723   : > { %28551 = vmatprep.subr.mxu1 %v36404_v40  ;;  %28372 = vmatpush2.xpose.msra.mxu0 %v36404_v40  ;;  %v7610_v23 = vadd.f32 %v36618_v20, %v7518_v1  ;;  %v11351_v1 = vpop.f32.mrf.mxu0 }
 0x724   : > { %28376 = vmatprep.subr.mxu0 %v36404_v40 }
 0x725   : > { %v7691_v15 = vadd.f32 %v36619_v21, %v7610_v23  ;;  %v11353_v21 = vpop.f32.mrf.mxu0 }
 0x726   : > { %28553 = vmatpush2.xpose.msra.mxu1 %v36404_v40 }
 0x727   : > { %28555 = vmatprep.subr.mxu1 %v36404_v40  ;;  %28380 = vmatpush2.xpose.msra.mxu0 %v36404_v40  ;;  %v7769_v0 = vadd.f32 %v36620_v45, %v7691_v15 }
 0x728   : > { %28384 = vmatprep.subr.mxu0 %v36404_v40 }
 0x729   : > { %v7853_v10 = vadd.f32 %v36621_v11, %v7769_v0  ;;  %v11757_v0 = vpop.f32.mrf.mxu0 }
 0x72a   : > { %28557 = vmatpush2.xpose.msra.mxu1 %v36404_v40 }
 0x72b   : > { %28559 = vmatprep.subr.mxu1 %v36404_v40  ;;  %28388 = vmatpush2.xpose.msra.mxu0 %v36404_v40  ;;  %v7929_v53 = vadd.f32 %v36622_v19, %v7853_v10 }
 0x72c   : > { %28392 = vmatprep.subr.mxu0 %v36404_v40 }
 0x72d   : > { %v8452_v27 = vmax.f32 %v7929_v53, 0.0 }
 0x72e   : > { %28561 = vmatpush2.xpose.msra.mxu1 %v36404_v40 }
 0x72f   : > { %28563 = vmatprep.subr.mxu1 %v36404_v40  ;;  %28396 = vmatpush2.xpose.msra.mxu0 %v36404_v40  ;;  %v35875_v6 = vand.u32 4294901760, %v8452_v27 }
 0x730   : > { %28400 = vmatprep.subr.mxu0 %v36404_v40 }
 0x731   : > { %v35882_v54 = vsub.f32 %v8452_v27, %v35875_v6  ;;  %v11759_v27 = vpop.f32.mrf.mxu0 }
 0x732   : > { %28565 = vmatpush2.xpose.msra.mxu1 %v36404_v40 }
 0x733   : > { %28567 = vmatprep.subr.mxu1 %v36404_v40  ;;  %28404 = vmatpush2.xpose.msra.mxu0 %v36404_v40  ;;  %v28727_v49 = vand.u32 4294901760, %v35882_v54 }
 0x734   : > { %28408 = vmatprep.subr.mxu0 %v36404_v40 }
 0x735   : > { %v28728_v34 = vsub.f32 %v35882_v54, %v28727_v49 }
 0x736   : > { %28569 = vmatpush2.xpose.msra.mxu1 %v36404_v40 }
 0x737   : > { %28571 = vmatprep.subr.mxu1 %v36404_v40  ;;  %28412 = vmatpush2.xpose.msra.mxu0 %v36404_v40  ;;  %v28729_v26 = vand.u32 4294901760, %v28728_v34 }
 0x738   : > { %28416 = vmatprep.subr.mxu0 %v36404_v40 }
 0x73a   : > { %28573 = vmatpush2.xpose.msra.mxu1 %v36404_v40 }
 0x73b   : > { %28575 = vmatprep.subr.mxu1 %v36404_v40  ;;  %28420 = vmatpush2.xpose.msra.mxu0 %v36404_v40 }
 0x73c   : > { %28424 = vmatprep.subr.mxu0 %v36404_v40 }
 0x73e   : > { %28577 = vmatpush2.xpose.msra.mxu1 %v36404_v40 }
 0x73f   : > { %28579 = vmatprep.subr.mxu1 %v36404_v40  ;;  %28428 = vmatpush2.xpose.msra.mxu0 %v36404_v40 }
 0x740   : > { %28432 = vmatprep.subr.mxu0 %v36404_v40 }
 0x742   : > { %28581 = vmatpush2.xpose.msra.mxu1 %v36404_v40 }
 0x743   : > { %28921 = vmatprep.subr.mxu1 %v36404_v40  ;;  %28436 = vmatpush2.xpose.msra.mxu0 %v36404_v40 }
 0x744   : > { %28440 = vmatprep.subr.mxu0 %v36404_v40 }
 0x745   : > { %28585 = vmatmul.mubr.f32.vlgmr.msra.gmra.mxu1 %v35645_v48 }
 0x746   : > { %28927 = vmatpush1.xpose.msra.mxu1 %v36404_v40  ;;  %29121 = vmatprep.mubr.f32.mxu1 %v35785_v47 }
 0x747   : > { %28957 = vmatprep.subr.mxu1 %v28956_v22  ;;  %28444 = vmatpush2.xpose.msra.mxu0 %v36404_v40  ;;  %v10603_v22 = vld [vmem:[%s10602_s8] ss:$2 sm:$0x3] }
 0x748   : > { %28652 = vmatprep.subr.mxu0 %v36404_v40  ;;  %v10608_v56 = vrot.slane %v10603_v22, %v36534_v17 }
 0x74a   : > { %28963 = vmatpush2.xpose.msra.mxu1 %v36404_v40  ;;  %28448 = vmatmul.mubr.f32.vlgmr.msra.gmra.mxu0 %v35645_v48  ;;  %v8011_v48 = vadd.f32 %v36623_v60, %v531_v59  ;;  %v10756_v44 = vadd.f32 %v10755_v12, %v10608_v56 }
 0x74b   : > { %28969 = vmatprep.subr.mxu1 %v36404_v40  ;;  %28654 = vmatpush1.xpose.msra.mxu0 %v36404_v40 }
 0x74c   : > { %28724 = vmatprep.mubr.f32.mxu0 %v28723_v9  ;;  %28664 = vmatprep.subr.mxu0 %v35774_v41  ;;  %v8103_v62 = vadd.f32 %v36624_v13, %v8011_v48  ;;  %v10612_v9 = vrot.slane %v10603_v22, %v36530_v52 }
 0x74e   : > { %28975 = vmatpush2.xpose.msra.mxu1 %v28974_v39  ;;  %v8184_v8 = vadd.f32 %v36625_v5, %v8103_v62  ;;  %v11148_v39 = vpop.f32.mrf.mxu1  ;;  %v10758_v20 = vadd.f32 %v10757_v16, %v10612_v9 }
 0x74f   : > { %28981 = vmatprep.subr.mxu1 %v36404_v40  ;;  %28666 = vmatpush2.xpose.msra.mxu0 %v36404_v40  ;;  %v11149_v52 = vadd.f32 %v11148_v39, %v10756_v44 }
 0x750   : > { %28668 = vmatprep.subr.mxu0 %v36404_v40  ;;  %v8262_v3 = vadd.f32 %v33926_v50, %v8184_v8  ;;  %v31369_v50 = vld [vmem:[%s31895_s10 + $0xf8] sm:$0xff]  ;;  %v11150_v17 = vpop.f32.mrf.mxu1  ;;  %s31575_s10 = scalar_lea.vmem %s31177_s11, 256 }
 0x751   : > { %v36018_v7 = vand.u32 4294901760, %v31369_v50  ;;  %v11151_v15 = vadd.f32 %v11150_v17, %v10758_v20  ;;  %v11352_v45 = vadd.f32 %v11351_v1, %v11149_v52  ;;  %p31576_p10 = scmp.ne.s32.totalorder %s31177_s11, %s31575_s10  ;;  %p31583_p2 = scmp.lt.s32.totalorder %s31581_s16, %s31575_s10 }
 0x752   : > { %28987 = vmatpush2.xpose.msra.mxu1 %v36404_v40  ;;  %v8346_v63 = vadd.f32 %v8345_v55, %v8262_v3  ;;  %v11492_v23 = vpop.f32.mrf.mxu1 }
 0x753   : > { %28993 = vmatprep.subr.mxu1 %v36404_v40  ;;  %28670 = vmatpush2.xpose.msra.mxu0 %v35788_v58  ;;  %v36025_v2 = vsub.f32 %v31369_v50, %v36018_v7  ;;  %v11354_v11 = vadd.f32 %v11353_v21, %v11151_v15  ;;  %v11493_v19 = vadd.f32 %v11492_v23, %v11352_v45  ;;  %p31577_p12 = pnand %p31576_p10, %p36626_p1  ;;  %p31584_p8 = por %p31583_p2, %p31582_p7 }
 0x754   : > { %28672 = vmatprep.subr.mxu0 %v36404_v40  ;;  %v8422_v36 = vadd.f32 %v8421_v38, %v8346_v63  ;;  %v11494_v10 = vpop.f32.mrf.mxu1 }
 0x755   : > { %v30214_v32 = vand.u32 4294901760, %v36025_v2  ;;  %p31578_p6 = pneg %p31577_p12 }
 0x756   : > { %28999 = vmatpush2.xpose.msra.mxu1 %v36404_v40  ;;  %v8455_v46 = vmax.f32 %v8422_v36, 0.0  ;;  %v11894_v53 = vpop.f32.mrf.mxu1 }
 0x757   : > { %29005 = vmatprep.subr.mxu1 %v36404_v40  ;;  %28674 = vmatpush2.xpose.msra.mxu0 %v36404_v40  ;;  %v30215_v30 = vsub.f32 %v36025_v2, %v30214_v32  ;;  %p31585_p0 = pnand %p31584_p8, %p31578_p6 }
 0x758   : > { %28676 = vmatprep.subr.mxu0 %v36404_v40  ;;  %v36029_v14 = vand.u32 4294901760, %v8455_v46 }
 0x75a   : > { %29011 = vmatpush2.xpose.msra.mxu1 %v36404_v40  ;;  %v36039_v29 = vsub.f32 %v8455_v46, %v36029_v14 }
 0x75b   : > { %29017 = vmatprep.subr.mxu1 %v36404_v40  ;;  %28678 = vmatpush2.xpose.msra.mxu0 %v36404_v40 }
 0x75c   : > { %28680 = vmatprep.subr.mxu0 %v36404_v40 }
 0x75e   : > { %29023 = vmatpush2.xpose.msra.mxu1 %v36404_v40 }
 0x75f   : > { %29029 = vmatprep.subr.mxu1 %v36404_v40  ;;  %28682 = vmatpush2.xpose.msra.mxu0 %v36404_v40 }
 0x760   : > { %28684 = vmatprep.subr.mxu0 %v36404_v40 }
 0x762   : > { %29035 = vmatpush2.xpose.msra.mxu1 %v36404_v40 }
 0x763   : > { %29041 = vmatprep.subr.mxu1 %v36404_v40  ;;  %28686 = vmatpush2.xpose.msra.mxu0 %v36404_v40 }
 0x764   : > { %28688 = vmatprep.subr.mxu0 %v36404_v40 }
 0x766   : > { %29047 = vmatpush2.xpose.msra.mxu1 %v36404_v40 }
 0x767   : > { %29053 = vmatprep.subr.mxu1 %v36404_v40  ;;  %28690 = vmatpush2.xpose.msra.mxu0 %v36404_v40 }
 0x768   : > { %28692 = vmatprep.subr.mxu0 %v36404_v40 }
 0x76a   : > { %29059 = vmatpush2.xpose.msra.mxu1 %v36404_v40 }
 0x76b   : > { %29065 = vmatprep.subr.mxu1 %v36404_v40  ;;  %28694 = vmatpush2.xpose.msra.mxu0 %v36404_v40 }
 0x76c   : > { %28696 = vmatprep.subr.mxu0 %v36404_v40 }
 0x76e   : > { %29071 = vmatpush2.xpose.msra.mxu1 %v36404_v40 }
 0x76f   : > { %29077 = vmatprep.subr.mxu1 %v36404_v40  ;;  %28698 = vmatpush2.xpose.msra.mxu0 %v36404_v40 }
 0x770   : > { %28700 = vmatprep.subr.mxu0 %v36404_v40 }
 0x772   : > { %29083 = vmatpush2.xpose.msra.mxu1 %v36404_v40 }
 0x773   : > { %29089 = vmatprep.subr.mxu1 %v36404_v40  ;;  %28702 = vmatpush2.xpose.msra.mxu0 %v36404_v40 }
 0x774   : > { %28704 = vmatprep.subr.mxu0 %v36404_v40 }
 0x776   : > { %29095 = vmatpush2.xpose.msra.mxu1 %v36404_v40 }
 0x777   : > { %29101 = vmatprep.subr.mxu1 %v36404_v40  ;;  %28706 = vmatpush2.xpose.msra.mxu0 %v36404_v40 }
 0x778   : > { %28708 = vmatprep.subr.mxu0 %v36404_v40 }
 0x77a   : > { %29107 = vmatpush2.xpose.msra.mxu1 %v36404_v40 }
 0x77b   : > { %29113 = vmatprep.subr.mxu1 %v36404_v40  ;;  %28710 = vmatpush2.xpose.msra.mxu0 %v36404_v40 }
 0x77c   : > { %28712 = vmatprep.subr.mxu0 %v36404_v40 }
 0x77e   : > { %29119 = vmatpush2.xpose.msra.mxu1 %v36404_v40 }
 0x77f   : > { %29393 = vmatprep.subr.mxu1 %v36404_v40  ;;  %28714 = vmatpush2.xpose.msra.mxu0 %v36404_v40 }
 0x780   : > { %28716 = vmatprep.subr.mxu0 %v36404_v40 }
 0x781   : > { %29123 = vmatmul.mubr.f32.vlgmr.msra.gmra.mxu1 %v35875_v6 }
 0x782   : > { %29395 = vmatpush1.xpose.msra.mxu1 %v36404_v40  ;;  %29463 = vmatprep.mubr.f32.mxu1 %v28721_v61 }
 0x783   : > { %29405 = vmatprep.subr.mxu1 %v35774_v41  ;;  %28718 = vmatpush2.xpose.msra.mxu0 %v36404_v40 }
 0x784   : > { %29221 = vmatprep.subr.mxu0 %v36404_v40 }
 0x786   : > { %29407 = vmatpush2.xpose.msra.mxu1 %v36404_v40  ;;  %28730 = vmatmul.mubr.f32.vlgmr.msra.gmra.mxu0 %v28729_v26  ;;  %v11896_v26 = vpop.f32.mrf.mxu1 }
 0x787   : > { %29409 = vmatprep.subr.mxu1 %v36404_v40  ;;  %29224 = vmatpush1.xpose.msra.mxu0 %v36404_v40 }
 0x788   : > { %29323 = vmatprep.mubr.f32.mxu0 %v35795_v28  ;;  %29239 = vmatprep.subr.mxu0 %v35781_v42  ;;  %v30216_v42 = vand.u32 4294901760, %v30215_v30  ;;  %v8454_v28 = vmax.f32 %v33934_v18, 0.0  ;;  %v12432_v59 = vpop.f32.mrf.mxu1 }
 0x78a   : > { %29411 = vmatpush2.xpose.msra.mxu1 %v35788_v58  ;;  %v12434_v8 = vpop.f32.mrf.mxu1 }
 0x78b   : > { %29413 = vmatprep.subr.mxu1 %v36404_v40  ;;  %29242 = vmatpush2.xpose.msra.mxu0 %v36404_v40 }
 0x78c   : > { %29245 = vmatprep.subr.mxu0 %v36404_v40  ;;  %v12776_v55 = vpop.f32.mrf.mxu1 }
 0x78e   : > { %29415 = vmatpush2.xpose.msra.mxu1 %v36404_v40  ;;  %v12778_v46 = vpop.f32.mrf.mxu1 }
 0x78f   : > { %29417 = vmatprep.subr.mxu1 %v36404_v40  ;;  %29248 = vmatpush2.xpose.msra.mxu0 %v35799_v35  ;;  %v36120_v35 = vand.u32 4294901760, %v8454_v28 }
 0x790   : > { %29251 = vmatprep.subr.mxu0 %v36404_v40 }
 0x791   : > { %v36127_v18 = vsub.f32 %v8454_v28, %v36120_v35 }
 0x792   : > { %29419 = vmatpush2.xpose.msra.mxu1 %v36404_v40 }
 0x793   : > { %29421 = vmatprep.subr.mxu1 %v36404_v40  ;;  %29254 = vmatpush2.xpose.msra.mxu0 %v36404_v40  ;;  %v30011_v37 = vand.u32 4294901760, %v36127_v18 }
 0x794   : > { %29257 = vmatprep.subr.mxu0 %v36404_v40 }
 0x795   : > { %v30012_v61 = vsub.f32 %v36127_v18, %v30011_v37 }
 0x796   : > { %29423 = vmatpush2.xpose.msra.mxu1 %v36404_v40 }
 0x797   : > { %29425 = vmatprep.subr.mxu1 %v36404_v40  ;;  %29260 = vmatpush2.xpose.msra.mxu0 %v36404_v40 }
 0x798   : > { %29263 = vmatprep.subr.mxu0 %v36404_v40 }
 0x79a   : > { %29427 = vmatpush2.xpose.msra.mxu1 %v36404_v40 }
 0x79b   : > { %29429 = vmatprep.subr.mxu1 %v36404_v40  ;;  %29266 = vmatpush2.xpose.msra.mxu0 %v36404_v40 }
 0x79c   : > { %29269 = vmatprep.subr.mxu0 %v36404_v40 }
 0x79e   : > { %29431 = vmatpush2.xpose.msra.mxu1 %v36404_v40 }
 0x79f   : > { %29433 = vmatprep.subr.mxu1 %v36404_v40  ;;  %29272 = vmatpush2.xpose.msra.mxu0 %v36404_v40 }
 0x7a0   : > { %29275 = vmatprep.subr.mxu0 %v36404_v40 }
 0x7a2   : > { %29435 = vmatpush2.xpose.msra.mxu1 %v36404_v40 }
 0x7a3   : > { %29437 = vmatprep.subr.mxu1 %v36404_v40  ;;  %29278 = vmatpush2.xpose.msra.mxu0 %v36404_v40 }
 0x7a4   : > { %29281 = vmatprep.subr.mxu0 %v36404_v40 }
 0x7a6   : > { %29439 = vmatpush2.xpose.msra.mxu1 %v36404_v40 }
 0x7a7   : > { %29441 = vmatprep.subr.mxu1 %v36404_v40  ;;  %29284 = vmatpush2.xpose.msra.mxu0 %v36404_v40 }
 0x7a8   : > { %29287 = vmatprep.subr.mxu0 %v36404_v40 }
 0x7aa   : > { %29443 = vmatpush2.xpose.msra.mxu1 %v36404_v40 }
 0x7ab   : > { %29445 = vmatprep.subr.mxu1 %v36404_v40  ;;  %29290 = vmatpush2.xpose.msra.mxu0 %v36404_v40 }
 0x7ac   : > { %29293 = vmatprep.subr.mxu0 %v36404_v40 }
 0x7ae   : > { %29447 = vmatpush2.xpose.msra.mxu1 %v36404_v40 }
 0x7af   : > { %29449 = vmatprep.subr.mxu1 %v36404_v40  ;;  %29296 = vmatpush2.xpose.msra.mxu0 %v36404_v40 }
 0x7b0   : > { %29299 = vmatprep.subr.mxu0 %v36404_v40 }
 0x7b2   : > { %29451 = vmatpush2.xpose.msra.mxu1 %v36404_v40 }
 0x7b3   : > { %29453 = vmatprep.subr.mxu1 %v36404_v40  ;;  %29302 = vmatpush2.xpose.msra.mxu0 %v36404_v40 }
 0x7b4   : > { %29305 = vmatprep.subr.mxu0 %v36404_v40 }
 0x7b6   : > { %29455 = vmatpush2.xpose.msra.mxu1 %v36404_v40 }
 0x7b7   : > { %29457 = vmatprep.subr.mxu1 %v36404_v40  ;;  %29308 = vmatpush2.xpose.msra.mxu0 %v36404_v40 }
 0x7b8   : > { %29311 = vmatprep.subr.mxu0 %v36404_v40 }
 0x7ba   : > { %29459 = vmatpush2.xpose.msra.mxu1 %v36404_v40 }
 0x7bb   : > { %29799 = vmatprep.subr.mxu1 %v36404_v40  ;;  %29314 = vmatpush2.xpose.msra.mxu0 %v36404_v40 }
 0x7bc   : > { %29317 = vmatprep.subr.mxu0 %v36404_v40 }
 0x7bd   : > { %29467 = vmatmul.mubr.f32.vlgmr.msra.gmra.mxu1 %v28727_v49  ;;  %v12039_v49 = vpop.f32.mrf.mxu0 }
 0x7be   : > { %29801 = vmatpush1.xpose.msra.mxu1 %v36404_v40  ;;  %29867 = vmatprep.mubr.f32.mxu1 %v35785_v47 }
 0x7bf   : > { %29811 = vmatprep.subr.mxu1 %v35774_v41  ;;  %29320 = vmatpush2.xpose.msra.mxu0 %v36404_v40  ;;  %v30005_v41 = vand.u32 4294901760, %v36039_v29  ;;  %v12041_v60 = vpop.f32.mrf.mxu0 }
 0x7c0   : > { %29596 = vmatprep.subr.mxu0 %v36404_v40 }
 0x7c1   : > { %v30006_v51 = vsub.f32 %v36039_v29, %v30005_v41  ;;  %v12635_v62 = vpop.f32.mrf.mxu0 }
 0x7c2   : > { %29813 = vmatpush2.xpose.msra.mxu1 %v36404_v40  ;;  %29326 = vmatmul.mubr.f32.vlgmr.msra.gmra.mxu0 %v35882_v54  ;;  %v11758_v54 = vadd.f32 %v11757_v0, %v11493_v19 }
 0x7c3   : > { %29815 = vmatprep.subr.mxu1 %v36404_v40  ;;  %29600 = vmatpush1.xpose.msra.mxu0 %v36404_v40  ;;  %v12637_v63 = vpop.f32.mrf.mxu0 }
 0x7c4   : > { %29730 = vmatprep.mubr.f32.mxu0 %v35785_v47  ;;  %29620 = vmatprep.subr.mxu0 %v28954_v25  ;;  %v30233_v47 = vsub.f32 %v36043_v57, %v30232_v43  ;;  %v11895_v33 = vadd.f32 %v11894_v53, %v11758_v54 }
 0x7c5   : > { %v13041_v36 = vpop.f32.mrf.mxu0 }
 0x7c6   : > { %29817 = vmatpush2.xpose.msra.mxu1 %v35788_v58  ;;  %v30007_v58 = vand.u32 4294901760, %v30006_v51  ;;  %v30234_v25 = vand.u32 4294901760, %v30233_v47  ;;  %v12040_v13 = vadd.f32 %v12039_v49, %v11895_v33 }
 0x7c7   : > { %29819 = vmatprep.subr.mxu1 %v36404_v40  ;;  %29624 = vmatpush2.xpose.msra.mxu0 %v36404_v40  ;;  %v13043_v30 = vpop.f32.mrf.mxu0 }
 0x7c8   : > { %29628 = vmatprep.subr.mxu0 %v36404_v40  ;;  %v12433_v3 = vadd.f32 %v12432_v59, %v12040_v13 }
 0x7ca   : > { %29821 = vmatpush2.xpose.msra.mxu1 %v36404_v40  ;;  %v12636_v50 = vadd.f32 %v12635_v62, %v12433_v3 }
 0x7cb   : > { %29823 = vmatprep.subr.mxu1 %v36404_v40  ;;  %29632 = vmatpush2.xpose.msra.mxu0 %v28972_v4  ;;  %v30013_v4 = vand.u32 4294901760, %v30012_v61 }
 0x7cc   : > { %29636 = vmatprep.subr.mxu0 %v36404_v40  ;;  %v12777_v24 = vadd.f32 %v12776_v55, %v12636_v50 }
 0x7ce   : > { %29825 = vmatpush2.xpose.msra.mxu1 %v36404_v40 }
 0x7cf   : > { %29827 = vmatprep.subr.mxu1 %v36404_v40  ;;  %29640 = vmatpush2.xpose.msra.mxu0 %v36404_v40 }
 0x7d0   : > { %29644 = vmatprep.subr.mxu0 %v36404_v40 }
 0x7d2   : > { %29829 = vmatpush2.xpose.msra.mxu1 %v36404_v40 }
 0x7d3   : > { %29831 = vmatprep.subr.mxu1 %v36404_v40  ;;  %29648 = vmatpush2.xpose.msra.mxu0 %v36404_v40 }
 0x7d4   : > { %29652 = vmatprep.subr.mxu0 %v36404_v40 }
 0x7d6   : > { %29833 = vmatpush2.xpose.msra.mxu1 %v36404_v40 }
 0x7d7   : > { %29835 = vmatprep.subr.mxu1 %v36404_v40  ;;  %29656 = vmatpush2.xpose.msra.mxu0 %v36404_v40 }
 0x7d8   : > { %29660 = vmatprep.subr.mxu0 %v36404_v40 }
 0x7da   : > { %29837 = vmatpush2.xpose.msra.mxu1 %v36404_v40 }
 0x7db   : > { %29839 = vmatprep.subr.mxu1 %v36404_v40  ;;  %29664 = vmatpush2.xpose.msra.mxu0 %v36404_v40 }
 0x7dc   : > { %29668 = vmatprep.subr.mxu0 %v36404_v40 }
 0x7de   : > { %29841 = vmatpush2.xpose.msra.mxu1 %v36404_v40 }
 0x7df   : > { %29843 = vmatprep.subr.mxu1 %v36404_v40  ;;  %29672 = vmatpush2.xpose.msra.mxu0 %v36404_v40 }
 0x7e0   : > { %29676 = vmatprep.subr.mxu0 %v36404_v40 }
 0x7e2   : > { %29845 = vmatpush2.xpose.msra.mxu1 %v36404_v40 }
 0x7e3   : > { %29847 = vmatprep.subr.mxu1 %v36404_v40  ;;  %29680 = vmatpush2.xpose.msra.mxu0 %v36404_v40 }
 0x7e4   : > { %29684 = vmatprep.subr.mxu0 %v36404_v40 }
 0x7e6   : > { %29849 = vmatpush2.xpose.msra.mxu1 %v36404_v40 }
 0x7e7   : > { %29851 = vmatprep.subr.mxu1 %v36404_v40  ;;  %29688 = vmatpush2.xpose.msra.mxu0 %v36404_v40 }
 0x7e8   : > { %29692 = vmatprep.subr.mxu0 %v36404_v40 }
 0x7ea   : > { %29853 = vmatpush2.xpose.msra.mxu1 %v36404_v40 }
 0x7eb   : > { %29855 = vmatprep.subr.mxu1 %v36404_v40  ;;  %29696 = vmatpush2.xpose.msra.mxu0 %v36404_v40 }
 0x7ec   : > { %29700 = vmatprep.subr.mxu0 %v36404_v40 }
 0x7ee   : > { %29857 = vmatpush2.xpose.msra.mxu1 %v36404_v40 }
 0x7ef   : > { %29859 = vmatprep.subr.mxu1 %v36404_v40  ;;  %29704 = vmatpush2.xpose.msra.mxu0 %v36404_v40 }
 0x7f0   : > { %29708 = vmatprep.subr.mxu0 %v36404_v40 }
 0x7f2   : > { %29861 = vmatpush2.xpose.msra.mxu1 %v36404_v40 }
 0x7f3   : > { %29863 = vmatprep.subr.mxu1 %v36404_v40  ;;  %29712 = vmatpush2.xpose.msra.mxu0 %v36404_v40 }
 0x7f4   : > { %29716 = vmatprep.subr.mxu0 %v36404_v40 }
 0x7f6   : > { %29865 = vmatpush2.xpose.msra.mxu1 %v36404_v40 }
 0x7f7   : > { %30205 = vmatprep.subr.mxu1 %v36404_v40  ;;  %29720 = vmatpush2.xpose.msra.mxu0 %v36404_v40 }
 0x7f8   : > { %29724 = vmatprep.subr.mxu0 %v36404_v40 }
 0x7f9   : > { %29869 = vmatmul.mubr.f32.vlgmr.msra.gmra.mxu1 %v35875_v6 }
 0x7fa   : > { %30211 = vmatpush1.xpose.msra.mxu1 %v36404_v40  ;;  %30405 = vmatprep.mubr.f32.mxu1 %v36029_v14 }
 0x7fb   : > { %30217 = vmatprep.subr.mxu1 %v30216_v42  ;;  %29728 = vmatpush2.xpose.msra.mxu0 %v36404_v40 }
 0x7fc   : > { %29936 = vmatprep.subr.mxu0 %v36404_v40 }
 0x7fe   : > { %30223 = vmatpush2.xpose.msra.mxu1 %v36404_v40  ;;  %29732 = vmatmul.mubr.f32.vlgmr.msra.gmra.mxu0 %v35875_v6  ;;  %v11495_v6 = vadd.f32 %v11494_v10, %v11354_v11 }
 0x7ff   : > { %30229 = vmatprep.subr.mxu1 %v36404_v40  ;;  %29938 = vmatpush1.xpose.msra.mxu0 %v36404_v40 }
 0x800   : > { %30008 = vmatprep.mubr.f32.mxu0 %v30007_v58  ;;  %29940 = vmatprep.subr.mxu0 %v36018_v7  ;;  %v11760_v34 = vadd.f32 %v11759_v27, %v11495_v6 }
 0x802   : > { %30235 = vmatpush2.xpose.msra.mxu1 %v30234_v25  ;;  %v11897_v48 = vadd.f32 %v11896_v26, %v11760_v34 }
 0x803   : > { %30241 = vmatprep.subr.mxu1 %v36404_v40  ;;  %29942 = vmatpush2.xpose.msra.mxu0 %v36404_v40 }
 0x804   : > { %29944 = vmatprep.subr.mxu0 %v36404_v40  ;;  %v12042_v5 = vadd.f32 %v12041_v60, %v11897_v48 }
 0x806   : > { %30247 = vmatpush2.xpose.msra.mxu1 %v36404_v40  ;;  %v12435_v38 = vadd.f32 %v12434_v8, %v12042_v5 }
 0x807   : > { %30253 = vmatprep.subr.mxu1 %v36404_v40  ;;  %29946 = vmatpush2.xpose.msra.mxu0 %v36032_v31 }
 0x808   : > { %29948 = vmatprep.subr.mxu0 %v36404_v40 }
 0x80a   : > { %30259 = vmatpush2.xpose.msra.mxu1 %v36404_v40 }
 0x80b   : > { %30265 = vmatprep.subr.mxu1 %v36404_v40  ;;  %29950 = vmatpush2.xpose.msra.mxu0 %v36404_v40 }
 0x80c   : > { %29952 = vmatprep.subr.mxu0 %v36404_v40 }
 0x80e   : > { %30271 = vmatpush2.xpose.msra.mxu1 %v36404_v40 }
 0x80f   : > { %30277 = vmatprep.subr.mxu1 %v36404_v40  ;;  %29954 = vmatpush2.xpose.msra.mxu0 %v36404_v40 }
 0x810   : > { %29956 = vmatprep.subr.mxu0 %v36404_v40 }
 0x812   : > { %30283 = vmatpush2.xpose.msra.mxu1 %v36404_v40 }
 0x813   : > { %30289 = vmatprep.subr.mxu1 %v36404_v40  ;;  %29958 = vmatpush2.xpose.msra.mxu0 %v36404_v40 }
 0x814   : > { %29960 = vmatprep.subr.mxu0 %v36404_v40 }
 0x816   : > { %30295 = vmatpush2.xpose.msra.mxu1 %v36404_v40 }
 0x817   : > { %30301 = vmatprep.subr.mxu1 %v36404_v40  ;;  %29962 = vmatpush2.xpose.msra.mxu0 %v36404_v40 }
 0x818   : > { %29964 = vmatprep.subr.mxu0 %v36404_v40 }
 0x81a   : > { %30307 = vmatpush2.xpose.msra.mxu1 %v36404_v40 }
 0x81b   : > { %30313 = vmatprep.subr.mxu1 %v36404_v40  ;;  %29966 = vmatpush2.xpose.msra.mxu0 %v36404_v40 }
 0x81c   : > { %29968 = vmatprep.subr.mxu0 %v36404_v40 }
 0x81e   : > { %30319 = vmatpush2.xpose.msra.mxu1 %v36404_v40 }
 0x81f   : > { %30325 = vmatprep.subr.mxu1 %v36404_v40  ;;  %29970 = vmatpush2.xpose.msra.mxu0 %v36404_v40 }
 0x820   : > { %29972 = vmatprep.subr.mxu0 %v36404_v40 }
 0x822   : > { %30331 = vmatpush2.xpose.msra.mxu1 %v36404_v40 }
 0x823   : > { %30337 = vmatprep.subr.mxu1 %v36404_v40  ;;  %29974 = vmatpush2.xpose.msra.mxu0 %v36404_v40 }
 0x824   : > { %29976 = vmatprep.subr.mxu0 %v36404_v40 }
 0x826   : > { %30343 = vmatpush2.xpose.msra.mxu1 %v36404_v40 }
 0x827   : > { %30349 = vmatprep.subr.mxu1 %v36404_v40  ;;  %29978 = vmatpush2.xpose.msra.mxu0 %v36404_v40 }
 0x828   : > { %29980 = vmatprep.subr.mxu0 %v36404_v40 }
 0x82a   : > { %30355 = vmatpush2.xpose.msra.mxu1 %v36404_v40 }
 0x82b   : > { %30361 = vmatprep.subr.mxu1 %v36404_v40  ;;  %29982 = vmatpush2.xpose.msra.mxu0 %v36404_v40 }
 0x82c   : > { %29984 = vmatprep.subr.mxu0 %v36404_v40 }
 0x82e   : > { %30367 = vmatpush2.xpose.msra.mxu1 %v36404_v40 }
 0x82f   : > { %30373 = vmatprep.subr.mxu1 %v36404_v40  ;;  %29986 = vmatpush2.xpose.msra.mxu0 %v36404_v40 }
 0x830   : > { %29988 = vmatprep.subr.mxu0 %v36404_v40 }
 0x832   : > { %30379 = vmatpush2.xpose.msra.mxu1 %v36404_v40 }
 0x833   : > { %30385 = vmatprep.subr.mxu1 %v36404_v40  ;;  %29990 = vmatpush2.xpose.msra.mxu0 %v36404_v40 }
 0x834   : > { %29992 = vmatprep.subr.mxu0 %v36404_v40 }
 0x836   : > { %30391 = vmatpush2.xpose.msra.mxu1 %v36404_v40 }
 0x837   : > { %30397 = vmatprep.subr.mxu1 %v36404_v40  ;;  %29994 = vmatpush2.xpose.msra.mxu0 %v36404_v40 }
 0x838   : > { %29996 = vmatprep.subr.mxu0 %v36404_v40 }
 0x83a   : > { %30403 = vmatpush2.xpose.msra.mxu1 %v36404_v40 }
 0x83b   : > { %30677 = vmatprep.subr.mxu1 %v36404_v40  ;;  %29998 = vmatpush2.xpose.msra.mxu0 %v36404_v40 }
 0x83c   : > { %30000 = vmatprep.subr.mxu0 %v36404_v40 }
 0x83d   : > { %30407 = vmatmul.mubr.f32.vlgmr.msra.gmra.mxu1 %v36120_v35 }
 0x83e   : > { %30679 = vmatpush1.xpose.msra.mxu1 %v36404_v40  ;;  %30747 = vmatprep.mubr.f32.mxu1 %v30005_v41 }
 0x83f   : > { %30681 = vmatprep.subr.mxu1 %v36018_v7  ;;  %30002 = vmatpush2.xpose.msra.mxu0 %v36404_v40 }
 0x840   : > { %30505 = vmatprep.subr.mxu0 %v36404_v40 }
 0x842   : > { %30683 = vmatpush2.xpose.msra.mxu1 %v36404_v40  ;;  %30014 = vmatmul.mubr.f32.vlgmr.msra.gmra.mxu0 %v30013_v4 }
 0x843   : > { %30685 = vmatprep.subr.mxu1 %v36404_v40  ;;  %30508 = vmatpush1.xpose.msra.mxu0 %v36404_v40 }
 0x844   : > { %30607 = vmatprep.mubr.f32.mxu0 %v36039_v29  ;;  %30511 = vmatprep.subr.mxu0 %v36025_v2  ;;  %v13178_v29 = vpop.f32.mrf.mxu1 }
 0x846   : > { %30687 = vmatpush2.xpose.msra.mxu1 %v36032_v31  ;;  %v13180_v41 = vpop.f32.mrf.mxu1 }
 0x847   : > { %30689 = vmatprep.subr.mxu1 %v36404_v40  ;;  %30514 = vmatpush2.xpose.msra.mxu0 %v36404_v40 }
 0x848   : > { %30517 = vmatprep.subr.mxu0 %v36404_v40  ;;  %v13716_v51 = vpop.f32.mrf.mxu1 }
 0x84a   : > { %30691 = vmatpush2.xpose.msra.mxu1 %v36404_v40  ;;  %v13718_v28 = vpop.f32.mrf.mxu1 }
 0x84b   : > { %30693 = vmatprep.subr.mxu1 %v36404_v40  ;;  %30520 = vmatpush2.xpose.msra.mxu0 %v36043_v57 }
 0x84c   : > { %30523 = vmatprep.subr.mxu0 %v36404_v40 }
 0x84e   : > { %30695 = vmatpush2.xpose.msra.mxu1 %v36404_v40 }
 0x84f   : > { %30697 = vmatprep.subr.mxu1 %v36404_v40  ;;  %30526 = vmatpush2.xpose.msra.mxu0 %v36404_v40 }
 0x850   : > { %30529 = vmatprep.subr.mxu0 %v36404_v40 }
 0x852   : > { %30699 = vmatpush2.xpose.msra.mxu1 %v36404_v40 }
 0x853   : > { %30701 = vmatprep.subr.mxu1 %v36404_v40  ;;  %30532 = vmatpush2.xpose.msra.mxu0 %v36404_v40 }
 0x854   : > { %30535 = vmatprep.subr.mxu0 %v36404_v40 }
 0x856   : > { %30703 = vmatpush2.xpose.msra.mxu1 %v36404_v40 }
 0x857   : > { %30705 = vmatprep.subr.mxu1 %v36404_v40  ;;  %30538 = vmatpush2.xpose.msra.mxu0 %v36404_v40 }
 0x858   : > { %30541 = vmatprep.subr.mxu0 %v36404_v40 }
 0x85a   : > { %30707 = vmatpush2.xpose.msra.mxu1 %v36404_v40 }
 0x85b   : > { %30709 = vmatprep.subr.mxu1 %v36404_v40  ;;  %30544 = vmatpush2.xpose.msra.mxu0 %v36404_v40 }
 0x85c   : > { %30547 = vmatprep.subr.mxu0 %v36404_v40 }
 0x85e   : > { %30711 = vmatpush2.xpose.msra.mxu1 %v36404_v40 }
 0x85f   : > { %30713 = vmatprep.subr.mxu1 %v36404_v40  ;;  %30550 = vmatpush2.xpose.msra.mxu0 %v36404_v40 }
 0x860   : > { %30553 = vmatprep.subr.mxu0 %v36404_v40 }
 0x862   : > { %30715 = vmatpush2.xpose.msra.mxu1 %v36404_v40 }
 0x863   : > { %30717 = vmatprep.subr.mxu1 %v36404_v40  ;;  %30556 = vmatpush2.xpose.msra.mxu0 %v36404_v40 }
 0x864   : > { %30559 = vmatprep.subr.mxu0 %v36404_v40 }
 0x866   : > { %30719 = vmatpush2.xpose.msra.mxu1 %v36404_v40 }
 0x867   : > { %30721 = vmatprep.subr.mxu1 %v36404_v40  ;;  %30562 = vmatpush2.xpose.msra.mxu0 %v36404_v40 }
 0x868   : > { %30565 = vmatprep.subr.mxu0 %v36404_v40 }
 0x86a   : > { %30723 = vmatpush2.xpose.msra.mxu1 %v36404_v40 }
 0x86b   : > { %30725 = vmatprep.subr.mxu1 %v36404_v40  ;;  %30568 = vmatpush2.xpose.msra.mxu0 %v36404_v40 }
 0x86c   : > { %30571 = vmatprep.subr.mxu0 %v36404_v40 }
 0x86e   : > { %30727 = vmatpush2.xpose.msra.mxu1 %v36404_v40 }
 0x86f   : > { %30729 = vmatprep.subr.mxu1 %v36404_v40  ;;  %30574 = vmatpush2.xpose.msra.mxu0 %v36404_v40 }
 0x870   : > { %30577 = vmatprep.subr.mxu0 %v36404_v40 }
 0x872   : > { %30731 = vmatpush2.xpose.msra.mxu1 %v36404_v40 }
 0x873   : > { %30733 = vmatprep.subr.mxu1 %v36404_v40  ;;  %30580 = vmatpush2.xpose.msra.mxu0 %v36404_v40 }
 0x874   : > { %30583 = vmatprep.subr.mxu0 %v36404_v40 }
 0x876   : > { %30735 = vmatpush2.xpose.msra.mxu1 %v36404_v40 }
 0x877   : > { %30737 = vmatprep.subr.mxu1 %v36404_v40  ;;  %30586 = vmatpush2.xpose.msra.mxu0 %v36404_v40 }
 0x878   : > { %30589 = vmatprep.subr.mxu0 %v36404_v40 }
 0x87a   : > { %30739 = vmatpush2.xpose.msra.mxu1 %v36404_v40 }
 0x87b   : > { %30741 = vmatprep.subr.mxu1 %v36404_v40  ;;  %30592 = vmatpush2.xpose.msra.mxu0 %v36404_v40 }
 0x87c   : > { %30595 = vmatprep.subr.mxu0 %v36404_v40 }
 0x87e   : > { %30743 = vmatpush2.xpose.msra.mxu1 %v36404_v40 }
 0x87f   : > { %31083 = vmatprep.subr.mxu1 %v36404_v40  ;;  %30598 = vmatpush2.xpose.msra.mxu0 %v36404_v40 }
 0x880   : > { %30601 = vmatprep.subr.mxu0 %v36404_v40 }
 0x881   : > { %30751 = vmatmul.mubr.f32.vlgmr.msra.gmra.mxu1 %v30011_v37  ;;  %v14060_v37 = vpop.f32.mrf.mxu1 }
 0x882   : > { %31085 = vmatpush1.xpose.msra.mxu1 %v36404_v40  ;;  %31151 = vmatprep.mubr.f32.mxu1 %v36029_v14 }
 0x883   : > { %31087 = vmatprep.subr.mxu1 %v36018_v7  ;;  %30604 = vmatpush2.xpose.msra.mxu0 %v36404_v40  ;;  %v12638_v7 = vadd.f32 %v12637_v63, %v12435_v38  ;;  %v14062_v9 = vpop.f32.mrf.mxu1 }
 0x884   : > { %30880 = vmatprep.subr.mxu0 %v36404_v40 }
 0x885   : > { %v12779_v2 = vadd.f32 %v12778_v46, %v12638_v7  ;;  %v14462_v16 = vpop.f32.mrf.mxu1 }
 0x886   : > { %31089 = vmatpush2.xpose.msra.mxu1 %v36404_v40  ;;  %30610 = vmatmul.mubr.f32.vlgmr.msra.gmra.mxu0 %v36127_v18 }
 0x887   : > { %31091 = vmatprep.subr.mxu1 %v36404_v40  ;;  %30884 = vmatpush1.xpose.msra.mxu0 %v36404_v40  ;;  %v14464_v23 = vpop.f32.mrf.mxu1 }
 0x888   : > { %31014 = vmatprep.mubr.f32.mxu0 %v36029_v14  ;;  %30888 = vmatprep.subr.mxu0 %v30214_v32  ;;  %v13042_v14 = vadd.f32 %v13041_v36, %v12777_v24  ;;  %v13044_v32 = vadd.f32 %v13043_v30, %v12779_v2 }
 0x889   : > { %v15000_v15 = vpop.f32.mrf.mxu1 }
 0x88a   : > { %31093 = vmatpush2.xpose.msra.mxu1 %v36032_v31  ;;  %v13323_v31 = vpop.f32.mrf.mxu0  ;;  %v13179_v42 = vadd.f32 %v13178_v29, %v13042_v14  ;;  %v13181_v58 = vadd.f32 %v13180_v41, %v13044_v32 }
 0x88b   : > { %31095 = vmatprep.subr.mxu1 %v36404_v40  ;;  %30892 = vmatpush2.xpose.msra.mxu0 %v36404_v40  ;;  %v15002_v53 = vpop.f32.mrf.mxu1 }
 0x88c   : > { %30896 = vmatprep.subr.mxu0 %v36404_v40  ;;  %v13325_v47 = vpop.f32.mrf.mxu0  ;;  %v13324_v25 = vadd.f32 %v13323_v31, %v13179_v42 }
 0x88d   : > { %v15344_v6 = vpop.f32.mrf.mxu1 }
 0x88e   : > { %31097 = vmatpush2.xpose.msra.mxu1 %v36404_v40  ;;  %v13919_v57 = vpop.f32.mrf.mxu0  ;;  %v13717_v18 = vadd.f32 %v13716_v51, %v13324_v25 }
 0x88f   : > { %31099 = vmatprep.subr.mxu1 %v36404_v40  ;;  %30900 = vmatpush2.xpose.msra.mxu0 %v30232_v43  ;;  %v13326_v43 = vadd.f32 %v13325_v47, %v13181_v58  ;;  %v15346_v59 = vpop.f32.mrf.mxu1 }
 0x890   : > { %30904 = vmatprep.subr.mxu0 %v36404_v40  ;;  %v13921_v61 = vpop.f32.mrf.mxu0  ;;  %v13920_v22 = vadd.f32 %v13919_v57, %v13717_v18 }
 0x891   : > { %v13719_v4 = vadd.f32 %v13718_v28, %v13326_v43  ;;  %v15746_v48 = vpop.f32.mrf.mxu1 }
 0x892   : > { %31101 = vmatpush2.xpose.msra.mxu1 %v36404_v40  ;;  %v14325_v12 = vpop.f32.mrf.mxu0  ;;  %v14061_v39 = vadd.f32 %v14060_v37, %v13920_v22 }
 0x893   : > { %31103 = vmatprep.subr.mxu1 %v36404_v40  ;;  %30908 = vmatpush2.xpose.msra.mxu0 %v36404_v40  ;;  %v13922_v56 = vadd.f32 %v13921_v61, %v13719_v4  ;;  %v15748_v55 = vpop.f32.mrf.mxu1 }
 0x894   : > { %30912 = vmatprep.subr.mxu0 %v36404_v40  ;;  %v14327_v44 = vpop.f32.mrf.mxu0  ;;  %v14326_v20 = vadd.f32 %v14325_v12, %v14061_v39 }
 0x895   : > { %v14063_v1 = vadd.f32 %v14062_v9, %v13922_v56  ;;  %v16284_v38 = vpop.f32.mrf.mxu1 }
 0x896   : > { %31105 = vmatpush2.xpose.msra.mxu1 %v36404_v40  ;;  %v14607_v17 = vpop.f32.mrf.mxu0  ;;  %v14463_v21 = vadd.f32 %v14462_v16, %v14326_v20 }
 0x897   : > { %31107 = vmatprep.subr.mxu1 %v36404_v40  ;;  %30916 = vmatpush2.xpose.msra.mxu0 %v36404_v40  ;;  %v14328_v52 = vadd.f32 %v14327_v44, %v14063_v1  ;;  %v16286_v29 = vpop.f32.mrf.mxu1 }
 0x898   : > { %30920 = vmatprep.subr.mxu0 %v36404_v40  ;;  %v14609_v45 = vpop.f32.mrf.mxu0  ;;  %v14608_v11 = vadd.f32 %v14607_v17, %v14463_v21 }
 0x899   : > { %v14465_v0 = vadd.f32 %v14464_v23, %v14328_v52  ;;  %v16628_v2 = vpop.f32.mrf.mxu1 }
 0x89a   : > { %31109 = vmatpush2.xpose.msra.mxu1 %v36404_v40  ;;  %v15203_v10 = vpop.f32.mrf.mxu0  ;;  %v15001_v27 = vadd.f32 %v15000_v15, %v14608_v11 }
 0x89b   : > { %31111 = vmatprep.subr.mxu1 %v36404_v40  ;;  %30924 = vmatpush2.xpose.msra.mxu0 %v36404_v40  ;;  %v14610_v19 = vadd.f32 %v14609_v45, %v14465_v0  ;;  %v16630_v51 = vpop.f32.mrf.mxu1 }
 0x89c   : > { %30928 = vmatprep.subr.mxu0 %v36404_v40  ;;  %v15205_v54 = vpop.f32.mrf.mxu0  ;;  %v15204_v34 = vadd.f32 %v15203_v10, %v15001_v27 }
 0x89d   : > { %v15003_v49 = vadd.f32 %v15002_v53, %v14610_v19  ;;  %v17030_v58 = vpop.f32.mrf.mxu1 }
 0x89e   : > { %31113 = vmatpush2.xpose.msra.mxu1 %v36404_v40  ;;  %v15609_v26 = vpop.f32.mrf.mxu0  ;;  %v15345_v60 = vadd.f32 %v15344_v6, %v15204_v34 }
 0x89f   : > { %31115 = vmatprep.subr.mxu1 %v36404_v40  ;;  %30932 = vmatpush2.xpose.msra.mxu0 %v36404_v40  ;;  %v15206_v33 = vadd.f32 %v15205_v54, %v15003_v49  ;;  %v17032_v37 = vpop.f32.mrf.mxu1 }
 0x8a0   : > { %30936 = vmatprep.subr.mxu0 %v36404_v40  ;;  %v15611_v13 = vpop.f32.mrf.mxu0  ;;  %v15610_v5 = vadd.f32 %v15609_v26, %v15345_v60 }
 0x8a1   : > { %v15347_v62 = vadd.f32 %v15346_v59, %v15206_v33  ;;  %v17568_v4 = vpop.f32.mrf.mxu1 }
 0x8a2   : > { %31117 = vmatpush2.xpose.msra.mxu1 %v36404_v40  ;;  %v15891_v8 = vpop.f32.mrf.mxu0  ;;  %v15747_v63 = vadd.f32 %v15746_v48, %v15610_v5 }
 0x8a3   : > { %31119 = vmatprep.subr.mxu1 %v36404_v40  ;;  %30940 = vmatpush2.xpose.msra.mxu0 %v36404_v40  ;;  %v15612_v3 = vadd.f32 %v15611_v13, %v15347_v62  ;;  %v17570_v16 = vpop.f32.mrf.mxu1 }
 0x8a4   : > { %30944 = vmatprep.subr.mxu0 %v36404_v40  ;;  %v15893_v50 = vpop.f32.mrf.mxu0  ;;  %v15892_v7 = vadd.f32 %v15891_v8, %v15747_v63 }
 0x8a5   : > { %v15749_v36 = vadd.f32 %v15748_v55, %v15612_v3  ;;  %v17912_v1 = vpop.f32.mrf.mxu1 }
 0x8a6   : > { %31121 = vmatpush2.xpose.msra.mxu1 %v36404_v40  ;;  %v16487_v46 = vpop.f32.mrf.mxu0  ;;  %v16285_v30 = vadd.f32 %v16284_v38, %v15892_v7 }
 0x8a7   : > { %31123 = vmatprep.subr.mxu1 %v36404_v40  ;;  %30948 = vmatpush2.xpose.msra.mxu0 %v36404_v40  ;;  %v15894_v24 = vadd.f32 %v15893_v50, %v15749_v36  ;;  %v17914_v15 = vpop.f32.mrf.mxu1 }
 0x8a8   : > { %30952 = vmatprep.subr.mxu0 %v36404_v40  ;;  %v16489_v14 = vpop.f32.mrf.mxu0  ;;  %v16488_v32 = vadd.f32 %v16487_v46, %v16285_v30 }
 0x8a9   : > { %v16287_v31 = vadd.f32 %v16286_v29, %v15894_v24  ;;  %v18314_v45 = vpop.f32.mrf.mxu1 }
 0x8aa   : > { %31125 = vmatpush2.xpose.msra.mxu1 %v36404_v40  ;;  %v16893_v41 = vpop.f32.mrf.mxu0  ;;  %v16629_v47 = vadd.f32 %v16628_v2, %v16488_v32 }
 0x8ab   : > { %31127 = vmatprep.subr.mxu1 %v36404_v40  ;;  %30956 = vmatpush2.xpose.msra.mxu0 %v36404_v40  ;;  %v16490_v42 = vadd.f32 %v16489_v14, %v16287_v31  ;;  %v18316_v53 = vpop.f32.mrf.mxu1 }
 0x8ac   : > { %30960 = vmatprep.subr.mxu0 %v36404_v40  ;;  %v16895_v25 = vpop.f32.mrf.mxu0  ;;  %v16894_v43 = vadd.f32 %v16893_v41, %v16629_v47 }
 0x8ad   : > { %v16631_v57 = vadd.f32 %v16630_v51, %v16490_v42  ;;  %v18852_v6 = vpop.f32.mrf.mxu1 }
 0x8ae   : > { %31129 = vmatpush2.xpose.msra.mxu1 %v36404_v40  ;;  %v17175_v28 = vpop.f32.mrf.mxu0  ;;  %v17031_v61 = vadd.f32 %v17030_v58, %v16894_v43 }
 0x8af   : > { %31131 = vmatprep.subr.mxu1 %v36404_v40  ;;  %30964 = vmatpush2.xpose.msra.mxu0 %v36404_v40  ;;  %v16896_v18 = vadd.f32 %v16895_v25, %v16631_v57  ;;  %v18854_v59 = vpop.f32.mrf.mxu1 }
 0x8b0   : > { %30968 = vmatprep.subr.mxu0 %v36404_v40  ;;  %v17177_v22 = vpop.f32.mrf.mxu0  ;;  %v17176_v56 = vadd.f32 %v17175_v28, %v17031_v61 }
 0x8b1   : > { %v17033_v12 = vadd.f32 %v17032_v37, %v16896_v18  ;;  %v19196_v48 = vpop.f32.mrf.mxu1 }
 0x8b2   : > { %31133 = vmatpush2.xpose.msra.mxu1 %v36404_v40  ;;  %v17771_v9 = vpop.f32.mrf.mxu0  ;;  %v17569_v44 = vadd.f32 %v17568_v4, %v17176_v56 }
 0x8b3   : > { %31135 = vmatprep.subr.mxu1 %v36404_v40  ;;  %30972 = vmatpush2.xpose.msra.mxu0 %v36404_v40  ;;  %v17178_v39 = vadd.f32 %v17177_v22, %v17033_v12  ;;  %v19198_v55 = vpop.f32.mrf.mxu1 }
 0x8b4   : > { %30976 = vmatprep.subr.mxu0 %v36404_v40  ;;  %v17773_v20 = vpop.f32.mrf.mxu0  ;;  %v17772_v52 = vadd.f32 %v17771_v9, %v17569_v44 }
 0x8b5   : > { %v17571_v17 = vadd.f32 %v17570_v16, %v17178_v39  ;;  %v19598_v38 = vpop.f32.mrf.mxu1 }
 0x8b6   : > { %31137 = vmatpush2.xpose.msra.mxu1 %v36404_v40  ;;  %v18177_v23 = vpop.f32.mrf.mxu0 }
 0x8b7   : > { %31139 = vmatprep.subr.mxu1 %v36404_v40  ;;  %30980 = vmatpush2.xpose.msra.mxu0 %v36404_v40  ;;  %v17774_v21 = vadd.f32 %v17773_v20, %v17571_v17  ;;  %v19600_v29 = vpop.f32.mrf.mxu1 }
 0x8b8   : > { %30984 = vmatprep.subr.mxu0 %v36404_v40  ;;  %v18179_v0 = vpop.f32.mrf.mxu0 }
 0x8b9   : > { %v17915_v11 = vadd.f32 %v17914_v15, %v17774_v21  ;;  %v20136_v2 = vpop.f32.mrf.mxu1 }
 0x8ba   : > { %31141 = vmatpush2.xpose.msra.mxu1 %v36404_v40  ;;  %v18459_v19 = vpop.f32.mrf.mxu0 }
 0x8bb   : > { %31143 = vmatprep.subr.mxu1 %v36404_v40  ;;  %30988 = vmatpush2.xpose.msra.mxu0 %v36404_v40  ;;  %v20138_v51 = vpop.f32.mrf.mxu1 }
 0x8bc   : > { %30992 = vmatprep.subr.mxu0 %v36404_v40  ;;  %v18461_v54 = vpop.f32.mrf.mxu0 }
 0x8bd   : > { %v20480_v58 = vpop.f32.mrf.mxu1 }
 0x8be   : > { %31145 = vmatpush2.xpose.msra.mxu1 %v36404_v40  ;;  %v19055_v26 = vpop.f32.mrf.mxu0 }
 0x8bf   : > { %31147 = vmatprep.subr.mxu1 %v36404_v40  ;;  %30996 = vmatpush2.xpose.msra.mxu0 %v36404_v40  ;;  %v20482_v37 = vpop.f32.mrf.mxu1 }
 0x8c0   : > { %31000 = vmatprep.subr.mxu0 %v36404_v40  ;;  %v19057_v13 = vpop.f32.mrf.mxu0 }
 0x8c1   : > { %v20882_v4 = vpop.f32.mrf.mxu1 }
 0x8c2   : > { %31149 = vmatpush2.xpose.msra.mxu1 %v36404_v40  ;;  %v19461_v8 = vpop.f32.mrf.mxu0 }
 0x8c3   : > { %31004 = vmatpush2.xpose.msra.mxu0 %v36404_v40  ;;  %v20884_v16 = vpop.f32.mrf.mxu1 }
 0x8c4   : > { %31008 = vmatprep.subr.mxu0 %v36404_v40  ;;  %v19463_v50 = vpop.f32.mrf.mxu0 }
 0x8c5   : > { %31153 = vmatmul.mubr.f32.vlgmr.msra.gmra.mxu1 %v36120_v35 }
 0x8c6   : > { %v19743_v46 = vpop.f32.mrf.mxu0 }
 0x8c7   : > { %31012 = vmatpush2.xpose.msra.mxu0 %v36404_v40  ;;  %v17913_v40 = vadd.f32 %v17912_v1, %v17772_v52  ;;  %v21420_v1 = vpop.f32.mrf.mxu1 }
 0x8c8   : > { %v19745_v14 = vpop.f32.mrf.mxu0 }
 0x8c9   : > { %v18178_v10 = vadd.f32 %v18177_v23, %v17913_v40  ;;  %v21422_v15 = vpop.f32.mrf.mxu1 }
 0x8ca   : > { %31016 = vmatmul.mubr.f32.vlgmr.msra.gmra.mxu0 %v36120_v35  ;;  %v18180_v35 = vadd.f32 %v18179_v0, %v17915_v11  ;;  %v20339_v41 = vpop.f32.mrf.mxu0 }
 0x8cb   : > { %v18315_v27 = vadd.f32 %v18314_v45, %v18178_v10  ;;  %v21764_v45 = vpop.f32.mrf.mxu1 }
 0x8cc   : > { %v18317_v49 = vadd.f32 %v18316_v53, %v18180_v35  ;;  %v20341_v25 = vpop.f32.mrf.mxu0 }
 0x8cd   : > { %v18460_v34 = vadd.f32 %v18459_v19, %v18315_v27  ;;  %v21766_v53 = vpop.f32.mrf.mxu1 }
 0x8ce   : > { %v18462_v33 = vadd.f32 %v18461_v54, %v18317_v49  ;;  %v20745_v28 = vpop.f32.mrf.mxu0 }
 0x8cf   : > { %v18853_v60 = vadd.f32 %v18852_v6, %v18460_v34  ;;  %v22166_v6 = vpop.f32.mrf.mxu1 }
 0x8d0   : > { %v18855_v5 = vadd.f32 %v18854_v59, %v18462_v33  ;;  %v20747_v22 = vpop.f32.mrf.mxu0 }
 0x8d1   : > { %v19056_v62 = vadd.f32 %v19055_v26, %v18853_v60  ;;  %v22168_v59 = vpop.f32.mrf.mxu1 }
 0x8d2   : > { %v19058_v3 = vadd.f32 %v19057_v13, %v18855_v5  ;;  %v21027_v9 = vpop.f32.mrf.mxu0 }
 0x8d3   : > { %v19197_v63 = vadd.f32 %v19196_v48, %v19056_v62  ;;  %v22704_v48 = vpop.f32.mrf.mxu1 }
 0x8d4   : > { %v19199_v7 = vadd.f32 %v19198_v55, %v19058_v3  ;;  %v21029_v20 = vpop.f32.mrf.mxu0 }
 0x8d5   : > { %v19462_v36 = vadd.f32 %v19461_v8, %v19197_v63  ;;  %v22706_v55 = vpop.f32.mrf.mxu1 }
 0x8d6   : > { %v19464_v24 = vadd.f32 %v19463_v50, %v19199_v7  ;;  %v21623_v23 = vpop.f32.mrf.mxu0 }
 0x8d7   : > { %v19599_v30 = vadd.f32 %v19598_v38, %v19462_v36  ;;  %v23048_v38 = vpop.f32.mrf.mxu1 }
 0x8d8   : > { %v19601_v32 = vadd.f32 %v19600_v29, %v19464_v24  ;;  %v21625_v0 = vpop.f32.mrf.mxu0 }
 0x8d9   : > { %v19744_v31 = vadd.f32 %v19743_v46, %v19599_v30  ;;  %v23050_v29 = vpop.f32.mrf.mxu1 }
 0x8da   : > { %v19746_v42 = vadd.f32 %v19745_v14, %v19601_v32  ;;  %v22029_v19 = vpop.f32.mrf.mxu0 }
 0x8db   : > { %v20137_v47 = vadd.f32 %v20136_v2, %v19744_v31  ;;  %v23450_v2 = vpop.f32.mrf.mxu1 }
 0x8dc   : > { %v20139_v43 = vadd.f32 %v20138_v51, %v19746_v42  ;;  %v22031_v54 = vpop.f32.mrf.mxu0 }
 0x8dd   : > { %v20340_v57 = vadd.f32 %v20339_v41, %v20137_v47  ;;  %v23452_v51 = vpop.f32.mrf.mxu1 }
 0x8de   : > { %v20342_v18 = vadd.f32 %v20341_v25, %v20139_v43  ;;  %v22311_v26 = vpop.f32.mrf.mxu0 }
 0x8df   : > { %v20481_v61 = vadd.f32 %v20480_v58, %v20340_v57  ;;  %v23988_v58 = vpop.f32.mrf.mxu1 }
 0x8e0   : > { %v20483_v56 = vadd.f32 %v20482_v37, %v20342_v18  ;;  %v22313_v13 = vpop.f32.mrf.mxu0 }
 0x8e1   : > { %v20746_v12 = vadd.f32 %v20745_v28, %v20481_v61  ;;  %v23990_v37 = vpop.f32.mrf.mxu1 }
 0x8e2   : > { %v20748_v39 = vadd.f32 %v20747_v22, %v20483_v56  ;;  %v22907_v8 = vpop.f32.mrf.mxu0 }
 0x8e3   : > { %v20883_v44 = vadd.f32 %v20882_v4, %v20746_v12  ;;  %v24332_v4 = vpop.f32.mrf.mxu1 }
 0x8e4   : > { %v20885_v52 = vadd.f32 %v20884_v16, %v20748_v39  ;;  %v22909_v50 = vpop.f32.mrf.mxu0 }
 0x8e5   : > { %v21028_v17 = vadd.f32 %v21027_v9, %v20883_v44  ;;  %v24334_v16 = vpop.f32.mrf.mxu1 }
 0x8e6   : > { %v21030_v21 = vadd.f32 %v21029_v20, %v20885_v52  ;;  %v23313_v46 = vpop.f32.mrf.mxu0 }
 0x8e7   : > { %v21421_v40 = vadd.f32 %v21420_v1, %v21028_v17  ;;  %v24734_v1 = vpop.f32.mrf.mxu1 }
 0x8e8   : > { %v21423_v10 = vadd.f32 %v21422_v15, %v21030_v21  ;;  %v23315_v14 = vpop.f32.mrf.mxu0 }
 0x8e9   : > { %v21624_v11 = vadd.f32 %v21623_v23, %v21421_v40  ;;  %v24736_v15 = vpop.f32.mrf.mxu1 }
 0x8ea   : > { %v21626_v35 = vadd.f32 %v21625_v0, %v21423_v10  ;;  %v23595_v41 = vpop.f32.mrf.mxu0 }
 0x8eb   : > { %v21765_v27 = vadd.f32 %v21764_v45, %v21624_v11  ;;  %v25272_v45 = vpop.f32.mrf.mxu1 }
 0x8ec   : > { %v21767_v34 = vadd.f32 %v21766_v53, %v21626_v35  ;;  %v23597_v25 = vpop.f32.mrf.mxu0 }
 0x8ed   : > { %v22030_v49 = vadd.f32 %v22029_v19, %v21765_v27  ;;  %v25274_v53 = vpop.f32.mrf.mxu1 }
 0x8ee   : > { %v22032_v33 = vadd.f32 %v22031_v54, %v21767_v34  ;;  %v24191_v28 = vpop.f32.mrf.mxu0 }
 0x8ef   : > { %v22167_v60 = vadd.f32 %v22166_v6, %v22030_v49  ;;  %v25616_v6 = vpop.f32.mrf.mxu1 }
 0x8f0   : > { %v22169_v5 = vadd.f32 %v22168_v59, %v22032_v33  ;;  %v24193_v22 = vpop.f32.mrf.mxu0 }
 0x8f1   : > { %v22312_v62 = vadd.f32 %v22311_v26, %v22167_v60  ;;  %v25618_v59 = vpop.f32.mrf.mxu1 }
 0x8f2   : > { %v22314_v3 = vadd.f32 %v22313_v13, %v22169_v5  ;;  %v24597_v9 = vpop.f32.mrf.mxu0 }
 0x8f3   : > { %v22705_v63 = vadd.f32 %v22704_v48, %v22312_v62  ;;  %v26018_v48 = vpop.f32.mrf.mxu1 }
 0x8f4   : > { %v22707_v7 = vadd.f32 %v22706_v55, %v22314_v3  ;;  %v24599_v20 = vpop.f32.mrf.mxu0 }
 0x8f5   : > { %v22908_v36 = vadd.f32 %v22907_v8, %v22705_v63  ;;  %v26020_v55 = vpop.f32.mrf.mxu1 }
 0x8f6   : > { %v22910_v24 = vadd.f32 %v22909_v50, %v22707_v7  ;;  %v24879_v23 = vpop.f32.mrf.mxu0 }
 0x8f7   : > { %v23049_v30 = vadd.f32 %v23048_v38, %v22908_v36  ;;  %v26556_v38 = vpop.f32.mrf.mxu1 }
 0x8f8   : > { %v23051_v32 = vadd.f32 %v23050_v29, %v22910_v24  ;;  %v24881_v0 = vpop.f32.mrf.mxu0 }
 0x8f9   : > { %v23314_v31 = vadd.f32 %v23313_v46, %v23049_v30  ;;  %v26558_v29 = vpop.f32.mrf.mxu1 }
 0x8fa   : > { %v23316_v42 = vadd.f32 %v23315_v14, %v23051_v32  ;;  %v25475_v19 = vpop.f32.mrf.mxu0 }
 0x8fb   : > { %v23451_v47 = vadd.f32 %v23450_v2, %v23314_v31  ;;  %v26900_v2 = vpop.f32.mrf.mxu1 }
 0x8fc   : > { %v23453_v43 = vadd.f32 %v23452_v51, %v23316_v42  ;;  %v25477_v54 = vpop.f32.mrf.mxu0 }
 0x8fd   : > { %v23596_v57 = vadd.f32 %v23595_v41, %v23451_v47  ;;  %v26902_v51 = vpop.f32.mrf.mxu1 }
 0x8fe   : > { %v23598_v18 = vadd.f32 %v23597_v25, %v23453_v43  ;;  %v25881_v26 = vpop.f32.mrf.mxu0 }
 0x8ff   : > { %v23989_v61 = vadd.f32 %v23988_v58, %v23596_v57  ;;  %v27302_v58 = vpop.f32.mrf.mxu1 }
 0x900   : > { %v23991_v56 = vadd.f32 %v23990_v37, %v23598_v18  ;;  %v25883_v13 = vpop.f32.mrf.mxu0 }
 0x901   : > { %v24192_v12 = vadd.f32 %v24191_v28, %v23989_v61  ;;  %v27304_v37 = vpop.f32.mrf.mxu1 }
 0x902   : > { %v24194_v39 = vadd.f32 %v24193_v22, %v23991_v56  ;;  %v26163_v8 = vpop.f32.mrf.mxu0 }
 0x903   : > { %v24333_v44 = vadd.f32 %v24332_v4, %v24192_v12  ;;  %v27840_v4 = vpop.f32.mrf.mxu1 }
 0x904   : > { %v24335_v52 = vadd.f32 %v24334_v16, %v24194_v39  ;;  %v26165_v50 = vpop.f32.mrf.mxu0 }
 0x905   : > { %v24598_v17 = vadd.f32 %v24597_v9, %v24333_v44  ;;  %v27842_v16 = vpop.f32.mrf.mxu1 }
 0x906   : > { %v24600_v21 = vadd.f32 %v24599_v20, %v24335_v52  ;;  %v26759_v46 = vpop.f32.mrf.mxu0 }
 0x907   : > { %v24735_v40 = vadd.f32 %v24734_v1, %v24598_v17  ;;  %v28184_v1 = vpop.f32.mrf.mxu1 }
 0x908   : > { %v24737_v10 = vadd.f32 %v24736_v15, %v24600_v21  ;;  %v26761_v14 = vpop.f32.mrf.mxu0 }
 0x909   : > { %v24880_v11 = vadd.f32 %v24879_v23, %v24735_v40  ;;  %v28186_v15 = vpop.f32.mrf.mxu1 }
 0x90a   : > { %v24882_v35 = vadd.f32 %v24881_v0, %v24737_v10  ;;  %v27165_v41 = vpop.f32.mrf.mxu0 }
 0x90b   : > { %v25273_v27 = vadd.f32 %v25272_v45, %v24880_v11  ;;  %v28586_v45 = vpop.f32.mrf.mxu1 }
 0x90c   : > { %v25275_v34 = vadd.f32 %v25274_v53, %v24882_v35  ;;  %v27167_v25 = vpop.f32.mrf.mxu0 }
 0x90d   : > { %v25476_v49 = vadd.f32 %v25475_v19, %v25273_v27  ;;  %v28588_v53 = vpop.f32.mrf.mxu1 }
 0x90e   : > { %v25478_v33 = vadd.f32 %v25477_v54, %v25275_v34  ;;  %v27447_v28 = vpop.f32.mrf.mxu0 }
 0x90f   : > { %v25617_v60 = vadd.f32 %v25616_v6, %v25476_v49  ;;  %v29124_v6 = vpop.f32.mrf.mxu1 }
 0x910   : > { %v25619_v5 = vadd.f32 %v25618_v59, %v25478_v33  ;;  %v27449_v22 = vpop.f32.mrf.mxu0 }
 0x911   : > { %v25882_v62 = vadd.f32 %v25881_v26, %v25617_v60  ;;  %v29126_v59 = vpop.f32.mrf.mxu1 }
 0x912   : > { %v25884_v3 = vadd.f32 %v25883_v13, %v25619_v5  ;;  %v28043_v9 = vpop.f32.mrf.mxu0 }
 0x913   : > { %v26019_v63 = vadd.f32 %v26018_v48, %v25882_v62  ;;  %v29468_v48 = vpop.f32.mrf.mxu1 }
 0x914   : > { %v26021_v7 = vadd.f32 %v26020_v55, %v25884_v3  ;;  %v28045_v20 = vpop.f32.mrf.mxu0 }
 0x915   : > { %v26164_v36 = vadd.f32 %v26163_v8, %v26019_v63  ;;  %v29470_v55 = vpop.f32.mrf.mxu1 }
 0x916   : > { %v26166_v24 = vadd.f32 %v26165_v50, %v26021_v7  ;;  %v28449_v23 = vpop.f32.mrf.mxu0 }
 0x917   : > { %v26557_v30 = vadd.f32 %v26556_v38, %v26164_v36  ;;  %v29870_v38 = vpop.f32.mrf.mxu1 }
 0x918   : > { %v26559_v32 = vadd.f32 %v26558_v29, %v26166_v24  ;;  %v28451_v0 = vpop.f32.mrf.mxu0 }
 0x919   : > { %v26760_v31 = vadd.f32 %v26759_v46, %v26557_v30  ;;  %v29872_v29 = vpop.f32.mrf.mxu1 }
 0x91a   : > { %v26762_v42 = vadd.f32 %v26761_v14, %v26559_v32  ;;  %v28731_v19 = vpop.f32.mrf.mxu0 }
 0x91b   : > { %v26901_v47 = vadd.f32 %v26900_v2, %v26760_v31  ;;  %v30408_v2 = vpop.f32.mrf.mxu1 }
 0x91c   : > { %v26903_v43 = vadd.f32 %v26902_v51, %v26762_v42  ;;  %v28733_v54 = vpop.f32.mrf.mxu0 }
 0x91d   : > { %v27166_v57 = vadd.f32 %v27165_v41, %v26901_v47  ;;  %v30410_v51 = vpop.f32.mrf.mxu1 }
 0x91e   : > { %v27168_v18 = vadd.f32 %v27167_v25, %v26903_v43  ;;  %v29327_v26 = vpop.f32.mrf.mxu0 }
 0x91f   : > { %v27303_v61 = vadd.f32 %v27302_v58, %v27166_v57 }
 0x920   : > { %v27305_v56 = vadd.f32 %v27304_v37, %v27168_v18  ;;  %v29329_v13 = vpop.f32.mrf.mxu0 }
 0x921   : > { %v27448_v12 = vadd.f32 %v27447_v28, %v27303_v61 }
 0x922   : > { %v27450_v39 = vadd.f32 %v27449_v22, %v27305_v56  ;;  %v29733_v8 = vpop.f32.mrf.mxu0 }
 0x923   : > { %v27841_v44 = vadd.f32 %v27840_v4, %v27448_v12 }
 0x924   : > { %v27843_v52 = vadd.f32 %v27842_v16, %v27450_v39  ;;  %v29735_v50 = vpop.f32.mrf.mxu0 }
 0x925   : > { %v28044_v17 = vadd.f32 %v28043_v9, %v27841_v44 }
 0x926   : > { %v28046_v21 = vadd.f32 %v28045_v20, %v27843_v52  ;;  %v30015_v46 = vpop.f32.mrf.mxu0 }
 0x927   : > { %v28185_v40 = vadd.f32 %v28184_v1, %v28044_v17 }
 0x928   : > { %v28187_v10 = vadd.f32 %v28186_v15, %v28046_v21  ;;  %v30017_v14 = vpop.f32.mrf.mxu0 }
 0x929   : > { %v28450_v11 = vadd.f32 %v28449_v23, %v28185_v40 }
 0x92a   : > { %v28452_v35 = vadd.f32 %v28451_v0, %v28187_v10 }
 0x92b   : > { %v28587_v27 = vadd.f32 %v28586_v45, %v28450_v11 }
 0x92c   : > { %v28589_v34 = vadd.f32 %v28588_v53, %v28452_v35 }
 0x92d   : > { %v28732_v49 = vadd.f32 %v28731_v19, %v28587_v27 }
 0x92e   : > { %v28734_v33 = vadd.f32 %v28733_v54, %v28589_v34 }
 0x92f   : > { %v29125_v60 = vadd.f32 %v29124_v6, %v28732_v49 }
 0x930   : > { %v29127_v5 = vadd.f32 %v29126_v59, %v28734_v33 }
 0x931   : > { %v29328_v62 = vadd.f32 %v29327_v26, %v29125_v60 }
 0x932   : > { %v29330_v3 = vadd.f32 %v29329_v13, %v29127_v5 }
 0x933   : > { %v29469_v63 = vadd.f32 %v29468_v48, %v29328_v62 }
 0x934   : > { %v29471_v7 = vadd.f32 %v29470_v55, %v29330_v3 }
 0x935   : > { %v29734_v36 = vadd.f32 %v29733_v8, %v29469_v63 }
 0x936   : > { %v29736_v24 = vadd.f32 %v29735_v50, %v29471_v7 }
 0x937   : > { %v29871_v30 = vadd.f32 %v29870_v38, %v29734_v36 }
 0x938   : > { %v29873_v32 = vadd.f32 %v29872_v29, %v29736_v24 }
 0x939   : > { %v30016_v31 = vadd.f32 %v30015_v46, %v29871_v30 }
 0x93a   : > { %v30018_v42 = vadd.f32 %v30017_v14, %v29873_v32 }
 0x93b   : > { %v30409_v47 = vadd.f32 %v30408_v2, %v30016_v31 }
 0x93c   : > { %v30411_v43 = vadd.f32 %v30410_v51, %v30018_v42 }
 0x941   : > { %v30752_v58 = vpop.f32.mrf.mxu1 }
 0x943   : > { %v30754_v18 = vpop.f32.mrf.mxu1 }
 0x946   : > { %v30611_v41 = vpop.f32.mrf.mxu0 }
 0x947   : > { %v30612_v57 = vadd.f32 %v30611_v41, %v30409_v47 }
 0x948   : > { %v30613_v25 = vpop.f32.mrf.mxu0 }
 0x949   : > { %v30614_v28 = vadd.f32 %v30613_v25, %v30411_v43  ;;  %v30753_v37 = vadd.f32 %v30752_v58, %v30612_v57 }
 0x94b   : > { %v30755_v12 = vadd.f32 %v30754_v18, %v30614_v28 }
 0x985   : > { %v31154_v61 = vpop.f32.mrf.mxu1 }
 0x987   : > { %v31156_v16 = vpop.f32.mrf.mxu1 }
 0x98a   : > { %v31017_v4 = vpop.f32.mrf.mxu0 }
 0x98b   : > { %v31018_v22 = vadd.f32 %v31017_v4, %v30753_v37 }
 0x98c   : > { %v31019_v56 = vpop.f32.mrf.mxu0 }
 0x98d   : > { %v31155_v9 = vadd.f32 %v31154_v61, %v31018_v22  ;;  %v31020_v39 = vadd.f32 %v31019_v56, %v30755_v12 }
 0x98f   : > { %31159 = vst [vmem:[%s307_s25] sm:$0xff] %v31155_v9  ;;  %v31157_v44 = vadd.f32 %v31156_v16, %v31020_v39 }
 0x991   : > { %31160 = vst [vmem:[%s307_s25 + $0x8] sm:$0xff] %v31157_v44 }
 0x992   : > { %31588 = shalt.err (!%p31585_p0)
}
 0x993   : > { %s31589_s23 = scalar_lea.hbm %s31174_s7, 256  ;;  %s31593_s13 = scalar_lea.hbm %s36340_s5, 512 }
 0x994   : > { %p31590_p5 = scmp.ne.s32.totalorder %s31174_s7, %s31589_s23  ;;  %p31594_p13 = scmp.lt.s32.totalorder %s31174_s7, %s36340_s5 }
 0x995   : > { %p31595_p3 = scmp.lt.s32.totalorder %s31593_s13, %s31589_s23 }
 0x996   : > { %p31591_p11 = pnand %p31590_p5, %p36626_p1 }
 0x997   : > { %p31596_p9 = por %p31595_p3, %p31594_p13 }
 0x998   : > { %p31592_p4 = pneg %p31591_p11 }
 0x99a   : > { %p31597_p10 = pnand %p31596_p9, %p31592_p4 }
 0x99c   : > { %31600 = shalt.err (!%p31597_p10)
}
 0x99d   : > { %31397 = dma.vmem_to_hbm [thread:$0]  (%p36626_p1), %s31177_s11, 256, %s31174_s7, %s31162_s28  }
 0x99e PF: > { %s31188_s14 = sand.u32 1, %s31639_s18   ;;  %p36627_p12 = scmp.ne.s32.totalorder %s36380_s6, 0 }
 0x99f   : > { %p36628_p6 = scmp.ge.s32.totalorder %s31651_s21, 2  ;;  %s31189_s8 = scalar_lea.sflag [#allocation5], %s31188_s14 }
 0x9a1   : > { %p31414_p7 = pnand %p36628_p6, %p36627_p12 }
 0x9a3   : > { %p31415_p2 = pneg %p31414_p7 }
 0x9a5   : > { %31634 = dma.done.wait (%p31415_p2), %s31189_s8, 256  }
 0x9a6   : > { %31636 = vsyncadd (%p31415_p2), %s31189_s8, 4294967040  ;;  %p22_p8 = scmp.ge.s32.totalorder %s31719_s24, 4   ;;  %s36629_s18 = smov %s31643_s19 }
 0x9a7   : > { %s36630_s19 = smov %s31647_s20  ;;  %s36631_s20 = smov %s31731_s27 }
 0x9a8   : > { %s36632_s21 = smov %s31719_s24  ;;  %24 = sbr.rel (!%p22_p8) target bundleno = 12 (0xc), region = 143 }
 0x9ad   :  { %31194 = vsyncpa [#allocation4], 1 }
 0x9ae   :  { %31196 = vsyncpa [#allocation4 + $0x1], 1 }
 0x9af   :  { %31197 = vsyncpa [#allocation7], 1 }
 0x9b0   :  { %31199 = vsyncpa [#allocation7 + $0x1], 1 }
 0x9b1   :  { %31200 = vsyncpa [#allocation10], 1 }
 0x9b2   :  { %31202 = vsyncpa [#allocation10 + $0x1], 1 }
 0x9b3   :  { %31203 = vsyncpa [#allocation5], 1 }
 0x9b4   :  { %31205 = vsyncpa [#allocation5 + $0x1], 1 }

</bundles_post_ra>
